<compile_context>
chip_gen: v7x
topology: tpu7x:2x2x1
jax: 0.10.0
libtpu: 0.0.40
codegen_flags: <defaults>
</compile_context>

<pallas_src>
import math
import numpy as np
import jax
import jax.numpy as jnp
from jax import lax
from jax.experimental import pallas as pl
from jax.experimental.pallas import tpu as pltpu

# ----------------------------- model configuration --------------------------
EMBED_DIM   = 32     # embed_dim
HIDDEN_DIM  = 64     # hidden_dim
NUM_T       = 16     # num_t_pints
NUM_HEADS   = 4
NUM_LAYERS  = 2
NUM_CLASSES = 6
NUM_PATCHES = 4      # == number of input channels
NUM_SCALES  = 2
LN_EPS      = 1e-5   # PyTorch LayerNorm default
HEAD_DIM    = EMBED_DIM // NUM_HEADS
SEQ_LEN     = 1 + NUM_PATCHES * NUM_SCALES          # 9 = cls + C*scales

# ----------------------------- kernel tiling ---------------------------------
B_BLK = 8                              # examples per grid step (72 seq rows)
R     = B_BLK * SEQ_LEN                # 72 sequence rows per grid step
BC    = B_BLK * NUM_PATCHES            # 32 raw-signal rows per grid step
LANE  = 128                            # slab / output lane width
NEG   = -1.0e30                        # additive mask value


# ---------------------------------------------------------------------------
# CWT ('morl', method='conv') expressed as an exact linear operator.
# TODO(synk): pywt is not importable here; pywt.cwt's algorithm (integrated
# Morlet wavelet, convolution, diff, center-trim) is re-derived below as a
# per-scale (N, N) matrix so the CWT becomes a matmul inside the Pallas kernel.
def build_cwt_matrices(n, scales, precision=10):
    lb, ub = -8.0, 8.0
    xw = np.linspace(lb, ub, 2 ** precision)
    psi = np.exp(-xw ** 2 / 2.0) * np.cos(5.0 * xw)      # pywt 'morl'
    step = xw[1] - xw[0]
    int_psi = np.cumsum(psi) * step
    eye = np.eye(n, dtype=np.float64)
    mats = []
    for scale in scales:
        j = np.arange(scale * (xw[-1] - xw[0]) + 1) / (scale * step)
        j = j.astype(np.int64)
        j = j[j < int_psi.size]
        int_psi_scale = int_psi[j][::-1]
        cols = []
        for k in range(n):
            conv = np.convolve(eye[k], int_psi_scale)
            coef = -np.sqrt(scale) * np.diff(conv)
            d = (coef.size - n) / 2.0
            if d > 0:
                coef = coef[int(np.floor(d)): -int(np.ceil(d))]
            cols.append(coef)
        w = np.stack(cols, axis=1)          # coef = w @ signal
        mats.append(w.T)                    # store transposed: coef = signal @ w.T
    return np.stack(mats, axis=0).astype(np.float32)      # (num_scales, N, N)


# ---------------------------------------------------------------------------
# Weight-slab layout: every parameter / derived constant lives in one
# (SLAB_ROWS, 128) f32 array; each entry starts on an 8-row boundary.
def _r8(n):
    return ((n + 7) // 8) * 8


def _make_layout():
    entries = []
    for s in range(NUM_SCALES):
        entries.append((f"cwt{s}", NUM_T, NUM_T))
    entries += [
        ("win",    NUM_T, EMBED_DIM),
        ("pmat",   R, NUM_SCALES * BC),       # token-row scatter (assembly)
        ("poscls", R, EMBED_DIM),             # cls / pos-embedding / input bias
        ("bbias",  R, R),                     # per-example additive block mask
        ("hd4",    NUM_HEADS, EMBED_DIM),     # per-head lane one-hot rows
        ("psel",   B_BLK, R),                 # cls-row selector
    ]
    for l in range(NUM_LAYERS):
        entries += [
            (f"l{l}_ln1",  2, EMBED_DIM),
            (f"l{l}_wqkv", EMBED_DIM, 3 * EMBED_DIM),
            (f"l{l}_bqkv", 1, 3 * EMBED_DIM),
            (f"l{l}_wo",   EMBED_DIM, EMBED_DIM),
            (f"l{l}_bo",   1, EMBED_DIM),
            (f"l{l}_ln2",  2, EMBED_DIM),
            (f"l{l}_w1",   EMBED_DIM, HIDDEN_DIM),
            (f"l{l}_b1",   1, HIDDEN_DIM),
            (f"l{l}_w2",   HIDDEN_DIM, EMBED_DIM),
            (f"l{l}_b2",   1, EMBED_DIM),
        ]
    entries += [
        ("head_ln", 2, EMBED_DIM),
        ("head_w",  EMBED_DIM, LANE),          # class dim padded to 128 lanes
        ("head_b",  1, LANE),
    ]
    layout, off = {}, 0
    for name, rows, cols in entries:
        layout[name] = (off, rows, cols)
        off += _r8(rows)
    return layout, off


LAYOUT, SLAB_ROWS = _make_layout()


# ---------------------------------------------------------------------------
def init_params(key):
    keys = iter(jax.random.split(key, 64))

    def nrm(shape, s=0.02):
        return (s * jax.random.normal(next(keys), shape)).astype(jnp.float32)

    params = {
        "win_t": nrm((NUM_T, EMBED_DIM)),                 # input_layer.weight.T
        "b_in":  nrm((1, EMBED_DIM)),
        "cls_token":     nrm((1, 1, EMBED_DIM), 1.0),
        "pos_embedding": nrm((1, SEQ_LEN, EMBED_DIM), 1.0),
        "layers": [],
    }
    for _ in range(NUM_LAYERS):
        params["layers"].append({
            "ln1_g": jnp.ones((1, EMBED_DIM), jnp.float32),
            "ln1_b": jnp.zeros((1, EMBED_DIM), jnp.float32),
            "wqkv":  nrm((EMBED_DIM, 3 * EMBED_DIM)),     # in_proj_weight.T
            "bqkv":  jnp.zeros((1, 3 * EMBED_DIM), jnp.float32),
            "wo":    nrm((EMBED_DIM, EMBED_DIM)),         # out_proj.weight.T
            "bo":    jnp.zeros((1, EMBED_DIM), jnp.float32),
            "ln2_g": jnp.ones((1, EMBED_DIM), jnp.float32),
            "ln2_b": jnp.zeros((1, EMBED_DIM), jnp.float32),
            "w1":    nrm((EMBED_DIM, HIDDEN_DIM)),
            "b1":    jnp.zeros((1, HIDDEN_DIM), jnp.float32),
            "w2":    nrm((HIDDEN_DIM, EMBED_DIM)),
            "b2":    jnp.zeros((1, EMBED_DIM), jnp.float32),
        })
    params["head"] = {
        "ln_g": jnp.ones((1, EMBED_DIM), jnp.float32),
        "ln_b": jnp.zeros((1, EMBED_DIM), jnp.float32),
        "w":    nrm((EMBED_DIM, NUM_CLASSES)),
        "b":    jnp.zeros((1, NUM_CLASSES), jnp.float32),
    }
    return params


def pack_params(params, cwt_t):
    """One-time host-side parameter preparation (all per-call math hoisted here):
    q-scale folding, pos-embedding row permutation, scatter/selector matrices,
    attention block masks, class-dim lane padding."""
    slab = np.zeros((SLAB_ROWS, LANE), np.float32)

    def put(name, arr):
        off, rows, cols = LAYOUT[name]
        slab[off:off + rows, :cols] = np.asarray(arr, np.float32).reshape(rows, cols)

    cwt_np = np.asarray(cwt_t, np.float32)
    for s in range(NUM_SCALES):
        put(f"cwt{s}", cwt_np[s])
    put("win", params["win_t"])

    # sequence assembly: scatter matrix + (cls / permuted pos / input-bias) rows.
    # Kernel token order within an example is (scale-major, channel); the pos
    # rows are permuted to match (transformer is permutation-equivariant and
    # only the fixed cls row is read out, so results are identical to PyTorch).
    pmat   = np.zeros((R, NUM_SCALES * BC), np.float32)
    poscls = np.zeros((R, EMBED_DIM), np.float32)
    cls_tok = np.asarray(params["cls_token"], np.float32)[0, 0]
    pos     = np.asarray(params["pos_embedding"], np.float32)[0]
    b_in    = np.asarray(params["b_in"], np.float32)[0]
    for b in range(B_BLK):
        poscls[b * SEQ_LEN] = cls_tok + pos[0]
        for s in range(NUM_SCALES):
            for c in range(NUM_PATCHES):
                row = b * SEQ_LEN + 1 + s * NUM_PATCHES + c
                pmat[row, s * BC + b * NUM_PATCHES + c] = 1.0
                # kernel token (s, c) == PyTorch token t = c*num_scales + s
                poscls[row] = b_in + pos[1 + c * NUM_SCALES + s]
    put("pmat", pmat)
    put("poscls", poscls)

    # additive per-example block mask for attention scores
    ex = np.arange(R) // SEQ_LEN
    put("bbias", np.where(ex[:, None] == ex[None, :], 0.0, NEG))

    # per-head lane one-hot rows (head h owns lanes h*HEAD_DIM : (h+1)*HEAD_DIM)
    hd4 = np.zeros((NUM_HEADS, EMBED_DIM), np.float32)
    for h in range(NUM_HEADS):
        hd4[h, h * HEAD_DIM:(h + 1) * HEAD_DIM] = 1.0
    put("hd4", hd4)

    # cls-row selector
    psel = np.zeros((B_BLK, R), np.float32)
    for b in range(B_BLK):
        psel[b, b * SEQ_LEN] = 1.0
    put("psel", psel)

    # transformer layers (1/sqrt(head_dim) folded into the packed Q columns)
    qscale = np.ones((1, 3 * EMBED_DIM), np.float32)
    qscale[0, :EMBED_DIM] = 1.0 / math.sqrt(HEAD_DIM)
    for l, lp in enumerate(params["layers"]):
        put(f"l{l}_ln1",  np.stack([np.asarray(lp["ln1_g"])[0],
                                    np.asarray(lp["ln1_b"])[0]]))
        put(f"l{l}_wqkv", np.asarray(lp["wqkv"]) * qscale)
        put(f"l{l}_bqkv", np.asarray(lp["bqkv"]) * qscale)
        put(f"l{l}_wo",   lp["wo"])
        put(f"l{l}_bo",   lp["bo"])
        put(f"l{l}_ln2",  np.stack([np.asarray(lp["ln2_g"])[0],
                                    np.asarray(lp["ln2_b"])[0]]))
        put(f"l{l}_w1",   lp["w1"])
        put(f"l{l}_b1",   lp["b1"])
        put(f"l{l}_w2",   lp["w2"])
        put(f"l{l}_b2",   lp["b2"])

    hp = params["head"]
    put("head_ln", np.stack([np.asarray(hp["ln_g"])[0], np.asarray(hp["ln_b"])[0]]))
    head_w = np.zeros((EMBED_DIM, LANE), np.float32)
    head_w[:, :NUM_CLASSES] = np.asarray(hp["w"])
    head_b = np.zeros((1, LANE), np.float32)
    head_b[0, :NUM_CLASSES] = np.asarray(hp["b"])[0]
    put("head_w", head_w)
    put("head_b", head_b)
    return jnp.asarray(slab)


# ---------------------------------------------------------------------------
def _ln(x, gb):
    mu = jnp.mean(x, axis=-1, keepdims=True)
    var = jnp.mean((x - mu) ** 2, axis=-1, keepdims=True)
    return (x - mu) * lax.rsqrt(var + LN_EPS) * gb[0:1, :] + gb[1:2, :]


def vit_kernel(x_ref, w_ref, o_ref):
    f32 = jnp.float32
    E, H = EMBED_DIM, NUM_HEADS

    def W(name):
        off, rows, cols = LAYOUT[name]
        return w_ref[off:off + rows, :cols]

    xb = x_ref[...]                                               # (BC, NUM_T)

    # ---- CWT (per-scale exact linear operator) -----------------------------
    coef = jnp.concatenate(
        [jnp.dot(xb, W(f"cwt{s}"), preferred_element_type=f32)
         for s in range(NUM_SCALES)], axis=0)                     # (NS*BC, NUM_T)

    # ---- per-token-row standardization (torch.std: unbiased, no eps) -------
    mu  = jnp.mean(coef, axis=-1, keepdims=True)
    var = jnp.sum((coef - mu) ** 2, axis=-1, keepdims=True) * (1.0 / (NUM_T - 1))
    z   = (coef - mu) * lax.rsqrt(var)

    # ---- input projection + sequence assembly (cls + pos + input bias) -----
    feats = jnp.dot(z, W("win"), preferred_element_type=f32)      # (NS*BC, E)
    x = jnp.dot(W("pmat"), feats, preferred_element_type=f32) + W("poscls")  # (R, E)
    # nn.Dropout(p=0.0) / eval mode -> identity

    # ---- masks for the fused (all heads, all examples) attention -----------
    hd4 = W("hd4")                                                # (H, E)
    mask_hd = jnp.concatenate(
        [jnp.broadcast_to(hd4[h:h + 1, :], (R, E)) for h in range(H)],
        axis=0)                                                   # (H*R, E)
    bbias = jnp.concatenate([W("bbias")] * H, axis=1)             # (R, H*R)

    # ---- transformer encoder (pre-LN MHA + pre-LN MLP, residuals) ----------
    for l in range(NUM_LAYERS):
        p = lambda n, _l=l: W(f"l{_l}_{n}")

        xn  = _ln(x, p("ln1"))
        qkv = jnp.dot(xn, p("wqkv"), preferred_element_type=f32) + p("bqkv")  # (R,3E)
        q  = qkv[:, :E]                                   # Q already / sqrt(head_dim)
        kt = jnp.concatenate([qkv[:, E:2 * E]] * H, axis=0) * mask_hd         # (H*R,E)
        vt = jnp.concatenate([qkv[:, 2 * E:]] * H, axis=0) * mask_hd          # (H*R,E)

        # one MXU push for all heads/examples: block-diagonal keys along lanes
        s = lax.dot_general(q, kt, (((1,), (1,)), ((), ())),
                            preferred_element_type=f32) + bbias               # (R,H*R)
        # per-head numerically-stable softmax (normalization applied after ctx)
        parts = []
        for h in range(H):
            sh = s[:, h * R:(h + 1) * R]
            parts.append(sh - jnp.max(sh, axis=-1, keepdims=True))
        ps  = jnp.exp(jnp.concatenate(parts, axis=1))                         # (R,H*R)
        ctx = jnp.dot(ps, vt, preferred_element_type=f32)                     # (R, E)
        lw  = jnp.dot(ps, mask_hd, preferred_element_type=f32)                # (R, E)
        ctx = ctx * pl.reciprocal(lw, approx=True)
        x   = x + jnp.dot(ctx, p("wo"), preferred_element_type=f32) + p("bo")

        # feed-forward: Linear -> GELU(erf) -> Linear
        xn2 = _ln(x, p("ln2"))
        h1  = jnp.dot(xn2, p("w1"), preferred_element_type=f32) + p("b1")
        h1  = 0.5 * h1 * (1.0 + lax.erf(h1 * (1.0 / math.sqrt(2.0))))
        x   = x + jnp.dot(h1, p("w2"), preferred_element_type=f32) + p("b2")

    # ---- MLP head on the cls rows (lane-dense 128-wide output) -------------
    cls = jnp.dot(W("psel"), x, preferred_element_type=f32)       # (B_BLK, E)
    cls = _ln(cls, W("head_ln"))
    o_ref[...] = (jnp.dot(cls, W("head_w"), preferred_element_type=f32)
                  + W("head_b"))                                  # (B_BLK, 128)


# ---------------------------------------------------------------------------
def vision_transformer_forward(x, slab):
    """x: (B, C, N) float32 raw signals -> (B, NUM_CLASSES) logits."""
    B = x.shape[0]
    b_pad = -(-B // B_BLK) * B_BLK
    if b_pad != B:
        # replicate the last example so padded results stay finite (discarded)
        x = jnp.concatenate([x, jnp.repeat(x[-1:], b_pad - B, axis=0)], axis=0)
    x2d = x.reshape(b_pad * NUM_PATCHES, NUM_T)

    out = pl.pallas_call(
        vit_kernel,
        out_shape=jax.ShapeDtypeStruct((b_pad, LANE), jnp.float32),
        grid=(b_pad // B_BLK,),
        in_specs=[
            pl.BlockSpec((BC, NUM_T), lambda i: (i, 0)),
            pl.BlockSpec((SLAB_ROWS, LANE), lambda i: (0, 0)),   # resident weights
        ],
        out_specs=pl.BlockSpec((B_BLK, LANE), lambda i: (i, 0)),
        compiler_params=pltpu.CompilerParams(
            dimension_semantics=("parallel",)),
    )(x2d, slab)
    return out[:B, :NUM_CLASSES]


# ---------------------------------------------------------------------------
if __name__ == "__main__":
    key = jax.random.PRNGKey(0)
    pkey, xkey = jax.random.split(key)
    params = init_params(pkey)
    cwt_t = build_cwt_matrices(NUM_T, np.arange(1, NUM_SCALES + 1))

    # one-time parameter preparation (hoisted out of the per-call forward)
    slab = pack_params(params, cwt_t)

    x = jax.random.normal(xkey, (2, NUM_PATCHES, NUM_T), jnp.float32)
    fwd = jax.jit(vision_transformer_forward)
    out = jax.block_until_ready(fwd(x, slab))
    assert out.shape == (2, NUM_CLASSES)
    assert bool(jnp.all(jnp.isfinite(out)))
    print("KERNEL_OK")
</pallas_src>

<mosaic_0001>
module attributes {stable_mosaic.version = 11 : i64} {
  func.func @vit_kernel(%arg0: i32, %arg1: memref<32x16xf32, #tpu.memory_space<vmem>>, %arg2: memref<744x128xf32, #tpu.memory_space<vmem>>, %arg3: memref<8x128xf32, #tpu.memory_space<vmem>>) attributes {dimension_semantics = [#tpu.dimension_semantics<parallel>], iteration_bounds = array<i64: 1>, scalar_prefetch = 0 : i64, scratch_operands = 0 : i64, tpu.core_type = #tpu.core_type<tc>, window_params = [{transform_indices = @transform_0, window_bounds = array<i64: 32, 16>}, {pipeline_mode = #tpu.pipeline_mode<synchronous>, transform_indices = @transform_1, window_bounds = array<i64: 744, 128>}, {transform_indices = @transform_2, window_bounds = array<i64: 8, 128>}]} {
    %c0 = arith.constant 0 : index
    %c0_0 = arith.constant 0 : index
    %0 = vector.load %arg1[%c0, %c0_0] : memref<32x16xf32, #tpu.memory_space<vmem>>, vector<32x16xf32>
    %c0_1 = arith.constant 0 : index
    %c0_2 = arith.constant 0 : index
    %1 = vector.load %arg2[%c0_1, %c0_2] : memref<744x128xf32, #tpu.memory_space<vmem>>, vector<16x16xf32>
    %cst = arith.constant dense<0.000000e+00> : vector<32x16xf32>
    %2 = tpu.matmul %0, %1, %cst {dimension_numbers = #tpu.dot_dimension_numbers<[1], [0], [0], [1], [0, 0, 1, 1], [], []>} : vector<32x16xf32>, vector<16x16xf32>, vector<32x16xf32> -> vector<32x16xf32>
    %c16 = arith.constant 16 : index
    %c0_3 = arith.constant 0 : index
    %3 = vector.load %arg2[%c16, %c0_3] : memref<744x128xf32, #tpu.memory_space<vmem>>, vector<16x16xf32>
    %cst_4 = arith.constant dense<0.000000e+00> : vector<32x16xf32>
    %4 = tpu.matmul %0, %3, %cst_4 {dimension_numbers = #tpu.dot_dimension_numbers<[1], [0], [0], [1], [0, 0, 1, 1], [], []>} : vector<32x16xf32>, vector<16x16xf32>, vector<32x16xf32> -> vector<32x16xf32>
    %5 = tpu.concatenate %2, %4 in 0 : vector<32x16xf32>, vector<32x16xf32> -> vector<64x16xf32>
    %cst_5 = arith.constant dense<0.000000e+00> : vector<64xf32>
    %6 = vector.multi_reduction <add>, %5, %cst_5 [1] : vector<64x16xf32> to vector<64xf32>
    %7 = vector.shape_cast %6 : vector<64xf32> to vector<64x1xf32>
    %cst_6 = arith.constant 1.600000e+01 : f32
    %8 = vector.broadcast %cst_6 : f32 to vector<64x1xf32>
    %9 = arith.divf %7, %8 : vector<64x1xf32>
    %10 = vector.broadcast %9 : vector<64x1xf32> to vector<64x16xf32>
    %11 = arith.subf %5, %10 : vector<64x16xf32>
    %12 = arith.mulf %11, %11 : vector<64x16xf32>
    %cst_7 = arith.constant dense<0.000000e+00> : vector<64xf32>
    %13 = vector.multi_reduction <add>, %12, %cst_7 [1] : vector<64x16xf32> to vector<64xf32>
    %14 = vector.shape_cast %13 : vector<64xf32> to vector<64x1xf32>
    %cst_8 = arith.constant 0.0666666701 : f32
    %15 = vector.broadcast %cst_8 : f32 to vector<64x1xf32>
    %16 = arith.mulf %14, %15 : vector<64x1xf32>
    %17 = vector.broadcast %9 : vector<64x1xf32> to vector<64x16xf32>
    %18 = arith.subf %5, %17 : vector<64x16xf32>
    %19 = math.rsqrt %16 : vector<64x1xf32>
    %20 = vector.broadcast %19 : vector<64x1xf32> to vector<64x16xf32>
    %21 = arith.mulf %18, %20 : vector<64x16xf32>
    %c32 = arith.constant 32 : index
    %c0_9 = arith.constant 0 : index
    %22 = vector.load %arg2[%c32, %c0_9] : memref<744x128xf32, #tpu.memory_space<vmem>>, vector<16x32xf32>
    %cst_10 = arith.constant dense<0.000000e+00> : vector<64x32xf32>
    %23 = tpu.matmul %21, %22, %cst_10 {dimension_numbers = #tpu.dot_dimension_numbers<[1], [0], [0], [1], [0, 0, 1, 1], [], []>} : vector<64x16xf32>, vector<16x32xf32>, vector<64x32xf32> -> vector<64x32xf32>
    %c48 = arith.constant 48 : index
    %c0_11 = arith.constant 0 : index
    %24 = vector.load %arg2[%c48, %c0_11] : memref<744x128xf32, #tpu.memory_space<vmem>>, vector<72x64xf32>
    %cst_12 = arith.constant dense<0.000000e+00> : vector<72x32xf32>
    %25 = tpu.matmul %24, %23, %cst_12 {dimension_numbers = #tpu.dot_dimension_numbers<[1], [0], [0], [1], [0, 0, 1, 1], [], []>} : vector<72x64xf32>, vector<64x32xf32>, vector<72x32xf32> -> vector<72x32xf32>
    %c120 = arith.constant 120 : index
    %c0_13 = arith.constant 0 : index
    %26 = vector.load %arg2[%c120, %c0_13] : memref<744x128xf32, #tpu.memory_space<vmem>>, vector<72x32xf32>
    %27 = arith.addf %25, %26 : vector<72x32xf32>
    %c264 = arith.constant 264 : index
    %c0_14 = arith.constant 0 : index
    %28 = vector.load %arg2[%c264, %c0_14] : memref<744x128xf32, #tpu.memory_space<vmem>>, vector<4x32xf32>
    %29 = vector.extract_strided_slice %28 {offsets = [0, 0], sizes = [1, 32], strides = [1, 1]} : vector<4x32xf32> to vector<1x32xf32>
    %30 = vector.shape_cast %29 : vector<1x32xf32> to vector<1x32xf32>
    %31 = vector.broadcast %30 : vector<1x32xf32> to vector<72x32xf32>
    %32 = vector.extract_strided_slice %28 {offsets = [1, 0], sizes = [1, 32], strides = [1, 1]} : vector<4x32xf32> to vector<1x32xf32>
    %33 = vector.shape_cast %32 : vector<1x32xf32> to vector<1x32xf32>
    %34 = vector.broadcast %33 : vector<1x32xf32> to vector<72x32xf32>
    %35 = vector.extract_strided_slice %28 {offsets = [2, 0], sizes = [1, 32], strides = [1, 1]} : vector<4x32xf32> to vector<1x32xf32>
    %36 = vector.shape_cast %35 : vector<1x32xf32> to vector<1x32xf32>
    %37 = vector.broadcast %36 : vector<1x32xf32> to vector<72x32xf32>
    %38 = vector.extract_strided_slice %28 {offsets = [3, 0], sizes = [1, 32], strides = [1, 1]} : vector<4x32xf32> to vector<1x32xf32>
    %39 = vector.shape_cast %38 : vector<1x32xf32> to vector<1x32xf32>
    %40 = vector.broadcast %39 : vector<1x32xf32> to vector<72x32xf32>
    %41 = tpu.concatenate %31, %34, %37, %40 in 0 : vector<72x32xf32>, vector<72x32xf32>, vector<72x32xf32>, vector<72x32xf32> -> vector<288x32xf32>
    %c192 = arith.constant 192 : index
    %c0_15 = arith.constant 0 : index
    %42 = vector.load %arg2[%c192, %c0_15] : memref<744x128xf32, #tpu.memory_space<vmem>>, vector<72x72xf32>
    %43 = tpu.concatenate %42, %42, %42, %42 in 1 : vector<72x72xf32>, vector<72x72xf32>, vector<72x72xf32>, vector<72x72xf32> -> vector<72x288xf32>
    %c280 = arith.constant 280 : index
    %c0_16 = arith.constant 0 : index
    %44 = vector.load %arg2[%c280, %c0_16] : memref<744x128xf32, #tpu.memory_space<vmem>>, vector<2x32xf32>
    %cst_17 = arith.constant dense<0.000000e+00> : vector<72xf32>
    %45 = vector.multi_reduction <add>, %27, %cst_17 [1] : vector<72x32xf32> to vector<72xf32>
    %46 = vector.shape_cast %45 : vector<72xf32> to vector<72x1xf32>
    %cst_18 = arith.constant 3.200000e+01 : f32
    %47 = vector.broadcast %cst_18 : f32 to vector<72x1xf32>
    %48 = arith.divf %46, %47 : vector<72x1xf32>
    %49 = vector.broadcast %48 : vector<72x1xf32> to vector<72x32xf32>
    %50 = arith.subf %27, %49 : vector<72x32xf32>
    %51 = arith.mulf %50, %50 : vector<72x32xf32>
    %cst_19 = arith.constant dense<0.000000e+00> : vector<72xf32>
    %52 = vector.multi_reduction <add>, %51, %cst_19 [1] : vector<72x32xf32> to vector<72xf32>
    %53 = vector.shape_cast %52 : vector<72xf32> to vector<72x1xf32>
    %cst_20 = arith.constant 3.200000e+01 : f32
    %54 = vector.broadcast %cst_20 : f32 to vector<72x1xf32>
    %55 = arith.divf %53, %54 : vector<72x1xf32>
    %56 = vector.broadcast %48 : vector<72x1xf32> to vector<72x32xf32>
    %57 = arith.subf %27, %56 : vector<72x32xf32>
    %cst_21 = arith.constant 9.99999974E-6 : f32
    %58 = vector.broadcast %cst_21 : f32 to vector<72x1xf32>
    %59 = arith.addf %55, %58 : vector<72x1xf32>
    %60 = math.rsqrt %59 : vector<72x1xf32>
    %61 = vector.broadcast %60 : vector<72x1xf32> to vector<72x32xf32>
    %62 = arith.mulf %57, %61 : vector<72x32xf32>
    %63 = vector.extract_strided_slice %44 {offsets = [0, 0], sizes = [1, 32], strides = [1, 1]} : vector<2x32xf32> to vector<1x32xf32>
    %64 = vector.broadcast %63 : vector<1x32xf32> to vector<72x32xf32>
    %65 = arith.mulf %62, %64 : vector<72x32xf32>
    %66 = vector.extract_strided_slice %44 {offsets = [1, 0], sizes = [1, 32], strides = [1, 1]} : vector<2x32xf32> to vector<1x32xf32>
    %67 = vector.broadcast %66 : vector<1x32xf32> to vector<72x32xf32>
    %68 = arith.addf %65, %67 : vector<72x32xf32>
    %c288 = arith.constant 288 : index
    %c0_22 = arith.constant 0 : index
    %69 = vector.load %arg2[%c288, %c0_22] : memref<744x128xf32, #tpu.memory_space<vmem>>, vector<32x96xf32>
    %cst_23 = arith.constant dense<0.000000e+00> : vector<72x96xf32>
    %70 = tpu.matmul %68, %69, %cst_23 {dimension_numbers = #tpu.dot_dimension_numbers<[1], [0], [0], [1], [0, 0, 1, 1], [], []>} : vector<72x32xf32>, vector<32x96xf32>, vector<72x96xf32> -> vector<72x96xf32>
    %c320 = arith.constant 320 : index
    %c0_24 = arith.constant 0 : index
    %71 = vector.load %arg2[%c320, %c0_24] : memref<744x128xf32, #tpu.memory_space<vmem>>, vector<1x96xf32>
    %72 = vector.broadcast %71 : vector<1x96xf32> to vector<72x96xf32>
    %73 = arith.addf %70, %72 : vector<72x96xf32>
    %74 = vector.extract_strided_slice %73 {offsets = [0, 0], sizes = [72, 32], strides = [1, 1]} : vector<72x96xf32> to vector<72x32xf32>
    %75 = vector.extract_strided_slice %73 {offsets = [0, 32], sizes = [72, 32], strides = [1, 1]} : vector<72x96xf32> to vector<72x32xf32>
    %76 = tpu.concatenate %75, %75, %75, %75 in 0 : vector<72x32xf32>, vector<72x32xf32>, vector<72x32xf32>, vector<72x32xf32> -> vector<288x32xf32>
    %77 = arith.mulf %76, %41 : vector<288x32xf32>
    %78 = vector.extract_strided_slice %73 {offsets = [0, 64], sizes = [72, 32], strides = [1, 1]} : vector<72x96xf32> to vector<72x32xf32>
    %79 = tpu.concatenate %78, %78, %78, %78 in 0 : vector<72x32xf32>, vector<72x32xf32>, vector<72x32xf32>, vector<72x32xf32> -> vector<288x32xf32>
    %80 = arith.mulf %79, %41 : vector<288x32xf32>
    %cst_25 = arith.constant dense<0.000000e+00> : vector<72x288xf32>
    %81 = tpu.matmul %74, %77, %cst_25 {dimension_numbers = #tpu.dot_dimension_numbers<[1], [1], [0], [0], [0, 0, 1, 0], [], []>} : vector<72x32xf32>, vector<288x32xf32>, vector<72x288xf32> -> vector<72x288xf32>
    %82 = arith.addf %81, %43 : vector<72x288xf32>
    %83 = vector.extract_strided_slice %82 {offsets = [0, 0], sizes = [72, 72], strides = [1, 1]} : vector<72x288xf32> to vector<72x72xf32>
    %cst_26 = arith.constant dense<0xFF800000> : vector<72xf32>
    %84 = vector.multi_reduction <maximumf>, %83, %cst_26 [1] : vector<72x72xf32> to vector<72xf32>
    %85 = vector.shape_cast %84 : vector<72xf32> to vector<72x1xf32>
    %86 = vector.broadcast %85 : vector<72x1xf32> to vector<72x72xf32>
    %87 = arith.subf %83, %86 : vector<72x72xf32>
    %88 = vector.extract_strided_slice %82 {offsets = [0, 72], sizes = [72, 72], strides = [1, 1]} : vector<72x288xf32> to vector<72x72xf32>
    %cst_27 = arith.constant dense<0xFF800000> : vector<72xf32>
    %89 = vector.multi_reduction <maximumf>, %88, %cst_27 [1] : vector<72x72xf32> to vector<72xf32>
    %90 = vector.shape_cast %89 : vector<72xf32> to vector<72x1xf32>
    %91 = vector.broadcast %90 : vector<72x1xf32> to vector<72x72xf32>
    %92 = arith.subf %88, %91 : vector<72x72xf32>
    %93 = vector.extract_strided_slice %82 {offsets = [0, 144], sizes = [72, 72], strides = [1, 1]} : vector<72x288xf32> to vector<72x72xf32>
    %cst_28 = arith.constant dense<0xFF800000> : vector<72xf32>
    %94 = vector.multi_reduction <maximumf>, %93, %cst_28 [1] : vector<72x72xf32> to vector<72xf32>
    %95 = vector.shape_cast %94 : vector<72xf32> to vector<72x1xf32>
    %96 = vector.broadcast %95 : vector<72x1xf32> to vector<72x72xf32>
    %97 = arith.subf %93, %96 : vector<72x72xf32>
    %98 = vector.extract_strided_slice %82 {offsets = [0, 216], sizes = [72, 72], strides = [1, 1]} : vector<72x288xf32> to vector<72x72xf32>
    %cst_29 = arith.constant dense<0xFF800000> : vector<72xf32>
    %99 = vector.multi_reduction <maximumf>, %98, %cst_29 [1] : vector<72x72xf32> to vector<72xf32>
    %100 = vector.shape_cast %99 : vector<72xf32> to vector<72x1xf32>
    %101 = vector.broadcast %100 : vector<72x1xf32> to vector<72x72xf32>
    %102 = arith.subf %98, %101 : vector<72x72xf32>
    %103 = tpu.concatenate %87, %92, %97, %102 in 1 : vector<72x72xf32>, vector<72x72xf32>, vector<72x72xf32>, vector<72x72xf32> -> vector<72x288xf32>
    %104 = math.exp %103 : vector<72x288xf32>
    %cst_30 = arith.constant dense<0.000000e+00> : vector<72x32xf32>
    %105 = tpu.matmul %104, %80, %cst_30 {dimension_numbers = #tpu.dot_dimension_numbers<[1], [0], [0], [1], [0, 0, 1, 1], [], []>} : vector<72x288xf32>, vector<288x32xf32>, vector<72x32xf32> -> vector<72x32xf32>
    %cst_31 = arith.constant dense<0.000000e+00> : vector<72x32xf32>
    %106 = tpu.matmul %104, %41, %cst_31 {dimension_numbers = #tpu.dot_dimension_numbers<[1], [0], [0], [1], [0, 0, 1, 1], [], []>} : vector<72x288xf32>, vector<288x32xf32>, vector<72x32xf32> -> vector<72x32xf32>
    %107 = tpu.reciprocal %106 {approx = true} : vector<72x32xf32> -> vector<72x32xf32>
    %108 = arith.mulf %105, %107 : vector<72x32xf32>
    %c328 = arith.constant 328 : index
    %c0_32 = arith.constant 0 : index
    %109 = vector.load %arg2[%c328, %c0_32] : memref<744x128xf32, #tpu.memory_space<vmem>>, vector<32x32xf32>
    %cst_33 = arith.constant dense<0.000000e+00> : vector<72x32xf32>
    %110 = tpu.matmul %108, %109, %cst_33 {dimension_numbers = #tpu.dot_dimension_numbers<[1], [0], [0], [1], [0, 0, 1, 1], [], []>} : vector<72x32xf32>, vector<32x32xf32>, vector<72x32xf32> -> vector<72x32xf32>
    %111 = arith.addf %27, %110 : vector<72x32xf32>
    %c360 = arith.constant 360 : index
    %c0_34 = arith.constant 0 : index
    %112 = vector.load %arg2[%c360, %c0_34] : memref<744x128xf32, #tpu.memory_space<vmem>>, vector<1x32xf32>
    %113 = vector.broadcast %112 : vector<1x32xf32> to vector<72x32xf32>
    %114 = arith.addf %111, %113 : vector<72x32xf32>
    %c368 = arith.constant 368 : index
    %c0_35 = arith.constant 0 : index
    %115 = vector.load %arg2[%c368, %c0_35] : memref<744x128xf32, #tpu.memory_space<vmem>>, vector<2x32xf32>
    %cst_36 = arith.constant dense<0.000000e+00> : vector<72xf32>
    %116 = vector.multi_reduction <add>, %114, %cst_36 [1] : vector<72x32xf32> to vector<72xf32>
    %117 = vector.shape_cast %116 : vector<72xf32> to vector<72x1xf32>
    %cst_37 = arith.constant 3.200000e+01 : f32
    %118 = vector.broadcast %cst_37 : f32 to vector<72x1xf32>
    %119 = arith.divf %117, %118 : vector<72x1xf32>
    %120 = vector.broadcast %119 : vector<72x1xf32> to vector<72x32xf32>
    %121 = arith.subf %114, %120 : vector<72x32xf32>
    %122 = arith.mulf %121, %121 : vector<72x32xf32>
    %cst_38 = arith.constant dense<0.000000e+00> : vector<72xf32>
    %123 = vector.multi_reduction <add>, %122, %cst_38 [1] : vector<72x32xf32> to vector<72xf32>
    %124 = vector.shape_cast %123 : vector<72xf32> to vector<72x1xf32>
    %cst_39 = arith.constant 3.200000e+01 : f32
    %125 = vector.broadcast %cst_39 : f32 to vector<72x1xf32>
    %126 = arith.divf %124, %125 : vector<72x1xf32>
    %127 = vector.broadcast %119 : vector<72x1xf32> to vector<72x32xf32>
    %128 = arith.subf %114, %127 : vector<72x32xf32>
    %cst_40 = arith.constant 9.99999974E-6 : f32
    %129 = vector.broadcast %cst_40 : f32 to vector<72x1xf32>
    %130 = arith.addf %126, %129 : vector<72x1xf32>
    %131 = math.rsqrt %130 : vector<72x1xf32>
    %132 = vector.broadcast %131 : vector<72x1xf32> to vector<72x32xf32>
    %133 = arith.mulf %128, %132 : vector<72x32xf32>
    %134 = vector.extract_strided_slice %115 {offsets = [0, 0], sizes = [1, 32], strides = [1, 1]} : vector<2x32xf32> to vector<1x32xf32>
    %135 = vector.broadcast %134 : vector<1x32xf32> to vector<72x32xf32>
    %136 = arith.mulf %133, %135 : vector<72x32xf32>
    %137 = vector.extract_strided_slice %115 {offsets = [1, 0], sizes = [1, 32], strides = [1, 1]} : vector<2x32xf32> to vector<1x32xf32>
    %138 = vector.broadcast %137 : vector<1x32xf32> to vector<72x32xf32>
    %139 = arith.addf %136, %138 : vector<72x32xf32>
    %c376 = arith.constant 376 : index
    %c0_41 = arith.constant 0 : index
    %140 = vector.load %arg2[%c376, %c0_41] : memref<744x128xf32, #tpu.memory_space<vmem>>, vector<32x64xf32>
    %cst_42 = arith.constant dense<0.000000e+00> : vector<72x64xf32>
    %141 = tpu.matmul %139, %140, %cst_42 {dimension_numbers = #tpu.dot_dimension_numbers<[1], [0], [0], [1], [0, 0, 1, 1], [], []>} : vector<72x32xf32>, vector<32x64xf32>, vector<72x64xf32> -> vector<72x64xf32>
    %c408 = arith.constant 408 : index
    %c0_43 = arith.constant 0 : index
    %142 = vector.load %arg2[%c408, %c0_43] : memref<744x128xf32, #tpu.memory_space<vmem>>, vector<1x64xf32>
    %143 = vector.broadcast %142 : vector<1x64xf32> to vector<72x64xf32>
    %144 = arith.addf %141, %143 : vector<72x64xf32>
    %cst_44 = arith.constant 5.000000e-01 : f32
    %145 = vector.broadcast %cst_44 : f32 to vector<72x64xf32>
    %146 = arith.mulf %145, %144 : vector<72x64xf32>
    %cst_45 = arith.constant 0.707106769 : f32
    %147 = vector.broadcast %cst_45 : f32 to vector<72x64xf32>
    %148 = arith.mulf %144, %147 : vector<72x64xf32>
    %149 = math.erf %148 : vector<72x64xf32>
    %cst_46 = arith.constant 1.000000e+00 : f32
    %150 = vector.broadcast %cst_46 : f32 to vector<72x64xf32>
    %151 = arith.addf %150, %149 : vector<72x64xf32>
    %152 = arith.mulf %146, %151 : vector<72x64xf32>
    %c416 = arith.constant 416 : index
    %c0_47 = arith.constant 0 : index
    %153 = vector.load %arg2[%c416, %c0_47] : memref<744x128xf32, #tpu.memory_space<vmem>>, vector<64x32xf32>
    %cst_48 = arith.constant dense<0.000000e+00> : vector<72x32xf32>
    %154 = tpu.matmul %152, %153, %cst_48 {dimension_numbers = #tpu.dot_dimension_numbers<[1], [0], [0], [1], [0, 0, 1, 1], [], []>} : vector<72x64xf32>, vector<64x32xf32>, vector<72x32xf32> -> vector<72x32xf32>
    %155 = arith.addf %114, %154 : vector<72x32xf32>
    %c480 = arith.constant 480 : index
    %c0_49 = arith.constant 0 : index
    %156 = vector.load %arg2[%c480, %c0_49] : memref<744x128xf32, #tpu.memory_space<vmem>>, vector<1x32xf32>
    %157 = vector.broadcast %156 : vector<1x32xf32> to vector<72x32xf32>
    %158 = arith.addf %155, %157 : vector<72x32xf32>
    %c488 = arith.constant 488 : index
    %c0_50 = arith.constant 0 : index
    %159 = vector.load %arg2[%c488, %c0_50] : memref<744x128xf32, #tpu.memory_space<vmem>>, vector<2x32xf32>
    %cst_51 = arith.constant dense<0.000000e+00> : vector<72xf32>
    %160 = vector.multi_reduction <add>, %158, %cst_51 [1] : vector<72x32xf32> to vector<72xf32>
    %161 = vector.shape_cast %160 : vector<72xf32> to vector<72x1xf32>
    %cst_52 = arith.constant 3.200000e+01 : f32
    %162 = vector.broadcast %cst_52 : f32 to vector<72x1xf32>
    %163 = arith.divf %161, %162 : vector<72x1xf32>
    %164 = vector.broadcast %163 : vector<72x1xf32> to vector<72x32xf32>
    %165 = arith.subf %158, %164 : vector<72x32xf32>
    %166 = arith.mulf %165, %165 : vector<72x32xf32>
    %cst_53 = arith.constant dense<0.000000e+00> : vector<72xf32>
    %167 = vector.multi_reduction <add>, %166, %cst_53 [1] : vector<72x32xf32> to vector<72xf32>
    %168 = vector.shape_cast %167 : vector<72xf32> to vector<72x1xf32>
    %cst_54 = arith.constant 3.200000e+01 : f32
    %169 = vector.broadcast %cst_54 : f32 to vector<72x1xf32>
    %170 = arith.divf %168, %169 : vector<72x1xf32>
    %171 = vector.broadcast %163 : vector<72x1xf32> to vector<72x32xf32>
    %172 = arith.subf %158, %171 : vector<72x32xf32>
    %cst_55 = arith.constant 9.99999974E-6 : f32
    %173 = vector.broadcast %cst_55 : f32 to vector<72x1xf32>
    %174 = arith.addf %170, %173 : vector<72x1xf32>
    %175 = math.rsqrt %174 : vector<72x1xf32>
    %176 = vector.broadcast %175 : vector<72x1xf32> to vector<72x32xf32>
    %177 = arith.mulf %172, %176 : vector<72x32xf32>
    %178 = vector.extract_strided_slice %159 {offsets = [0, 0], sizes = [1, 32], strides = [1, 1]} : vector<2x32xf32> to vector<1x32xf32>
    %179 = vector.broadcast %178 : vector<1x32xf32> to vector<72x32xf32>
    %180 = arith.mulf %177, %179 : vector<72x32xf32>
    %181 = vector.extract_strided_slice %159 {offsets = [1, 0], sizes = [1, 32], strides = [1, 1]} : vector<2x32xf32> to vector<1x32xf32>
    %182 = vector.broadcast %181 : vector<1x32xf32> to vector<72x32xf32>
    %183 = arith.addf %180, %182 : vector<72x32xf32>
    %c496 = arith.constant 496 : index
    %c0_56 = arith.constant 0 : index
    %184 = vector.load %arg2[%c496, %c0_56] : memref<744x128xf32, #tpu.memory_space<vmem>>, vector<32x96xf32>
    %cst_57 = arith.constant dense<0.000000e+00> : vector<72x96xf32>
    %185 = tpu.matmul %183, %184, %cst_57 {dimension_numbers = #tpu.dot_dimension_numbers<[1], [0], [0], [1], [0, 0, 1, 1], [], []>} : vector<72x32xf32>, vector<32x96xf32>, vector<72x96xf32> -> vector<72x96xf32>
    %c528 = arith.constant 528 : index
    %c0_58 = arith.constant 0 : index
    %186 = vector.load %arg2[%c528, %c0_58] : memref<744x128xf32, #tpu.memory_space<vmem>>, vector<1x96xf32>
    %187 = vector.broadcast %186 : vector<1x96xf32> to vector<72x96xf32>
    %188 = arith.addf %185, %187 : vector<72x96xf32>
    %189 = vector.extract_strided_slice %188 {offsets = [0, 0], sizes = [72, 32], strides = [1, 1]} : vector<72x96xf32> to vector<72x32xf32>
    %190 = vector.extract_strided_slice %188 {offsets = [0, 32], sizes = [72, 32], strides = [1, 1]} : vector<72x96xf32> to vector<72x32xf32>
    %191 = tpu.concatenate %190, %190, %190, %190 in 0 : vector<72x32xf32>, vector<72x32xf32>, vector<72x32xf32>, vector<72x32xf32> -> vector<288x32xf32>
    %192 = arith.mulf %191, %41 : vector<288x32xf32>
    %193 = vector.extract_strided_slice %188 {offsets = [0, 64], sizes = [72, 32], strides = [1, 1]} : vector<72x96xf32> to vector<72x32xf32>
    %194 = tpu.concatenate %193, %193, %193, %193 in 0 : vector<72x32xf32>, vector<72x32xf32>, vector<72x32xf32>, vector<72x32xf32> -> vector<288x32xf32>
    %195 = arith.mulf %194, %41 : vector<288x32xf32>
    %cst_59 = arith.constant dense<0.000000e+00> : vector<72x288xf32>
    %196 = tpu.matmul %189, %192, %cst_59 {dimension_numbers = #tpu.dot_dimension_numbers<[1], [1], [0], [0], [0, 0, 1, 0], [], []>} : vector<72x32xf32>, vector<288x32xf32>, vector<72x288xf32> -> vector<72x288xf32>
    %197 = arith.addf %196, %43 : vector<72x288xf32>
    %198 = vector.extract_strided_slice %197 {offsets = [0, 0], sizes = [72, 72], strides = [1, 1]} : vector<72x288xf32> to vector<72x72xf32>
    %cst_60 = arith.constant dense<0xFF800000> : vector<72xf32>
    %199 = vector.multi_reduction <maximumf>, %198, %cst_60 [1] : vector<72x72xf32> to vector<72xf32>
    %200 = vector.shape_cast %199 : vector<72xf32> to vector<72x1xf32>
    %201 = vector.broadcast %200 : vector<72x1xf32> to vector<72x72xf32>
    %202 = arith.subf %198, %201 : vector<72x72xf32>
    %203 = vector.extract_strided_slice %197 {offsets = [0, 72], sizes = [72, 72], strides = [1, 1]} : vector<72x288xf32> to vector<72x72xf32>
    %cst_61 = arith.constant dense<0xFF800000> : vector<72xf32>
    %204 = vector.multi_reduction <maximumf>, %203, %cst_61 [1] : vector<72x72xf32> to vector<72xf32>
    %205 = vector.shape_cast %204 : vector<72xf32> to vector<72x1xf32>
    %206 = vector.broadcast %205 : vector<72x1xf32> to vector<72x72xf32>
    %207 = arith.subf %203, %206 : vector<72x72xf32>
    %208 = vector.extract_strided_slice %197 {offsets = [0, 144], sizes = [72, 72], strides = [1, 1]} : vector<72x288xf32> to vector<72x72xf32>
    %cst_62 = arith.constant dense<0xFF800000> : vector<72xf32>
    %209 = vector.multi_reduction <maximumf>, %208, %cst_62 [1] : vector<72x72xf32> to vector<72xf32>
    %210 = vector.shape_cast %209 : vector<72xf32> to vector<72x1xf32>
    %211 = vector.broadcast %210 : vector<72x1xf32> to vector<72x72xf32>
    %212 = arith.subf %208, %211 : vector<72x72xf32>
    %213 = vector.extract_strided_slice %197 {offsets = [0, 216], sizes = [72, 72], strides = [1, 1]} : vector<72x288xf32> to vector<72x72xf32>
    %cst_63 = arith.constant dense<0xFF800000> : vector<72xf32>
    %214 = vector.multi_reduction <maximumf>, %213, %cst_63 [1] : vector<72x72xf32> to vector<72xf32>
    %215 = vector.shape_cast %214 : vector<72xf32> to vector<72x1xf32>
    %216 = vector.broadcast %215 : vector<72x1xf32> to vector<72x72xf32>
    %217 = arith.subf %213, %216 : vector<72x72xf32>
    %218 = tpu.concatenate %202, %207, %212, %217 in 1 : vector<72x72xf32>, vector<72x72xf32>, vector<72x72xf32>, vector<72x72xf32> -> vector<72x288xf32>
    %219 = math.exp %218 : vector<72x288xf32>
    %cst_64 = arith.constant dense<0.000000e+00> : vector<72x32xf32>
    %220 = tpu.matmul %219, %195, %cst_64 {dimension_numbers = #tpu.dot_dimension_numbers<[1], [0], [0], [1], [0, 0, 1, 1], [], []>} : vector<72x288xf32>, vector<288x32xf32>, vector<72x32xf32> -> vector<72x32xf32>
    %cst_65 = arith.constant dense<0.000000e+00> : vector<72x32xf32>
    %221 = tpu.matmul %219, %41, %cst_65 {dimension_numbers = #tpu.dot_dimension_numbers<[1], [0], [0], [1], [0, 0, 1, 1], [], []>} : vector<72x288xf32>, vector<288x32xf32>, vector<72x32xf32> -> vector<72x32xf32>
    %222 = tpu.reciprocal %221 {approx = true} : vector<72x32xf32> -> vector<72x32xf32>
    %223 = arith.mulf %220, %222 : vector<72x32xf32>
    %c536 = arith.constant 536 : index
    %c0_66 = arith.constant 0 : index
    %224 = vector.load %arg2[%c536, %c0_66] : memref<744x128xf32, #tpu.memory_space<vmem>>, vector<32x32xf32>
    %cst_67 = arith.constant dense<0.000000e+00> : vector<72x32xf32>
    %225 = tpu.matmul %223, %224, %cst_67 {dimension_numbers = #tpu.dot_dimension_numbers<[1], [0], [0], [1], [0, 0, 1, 1], [], []>} : vector<72x32xf32>, vector<32x32xf32>, vector<72x32xf32> -> vector<72x32xf32>
    %226 = arith.addf %158, %225 : vector<72x32xf32>
    %c568 = arith.constant 568 : index
    %c0_68 = arith.constant 0 : index
    %227 = vector.load %arg2[%c568, %c0_68] : memref<744x128xf32, #tpu.memory_space<vmem>>, vector<1x32xf32>
    %228 = vector.broadcast %227 : vector<1x32xf32> to vector<72x32xf32>
    %229 = arith.addf %226, %228 : vector<72x32xf32>
    %c576 = arith.constant 576 : index
    %c0_69 = arith.constant 0 : index
    %230 = vector.load %arg2[%c576, %c0_69] : memref<744x128xf32, #tpu.memory_space<vmem>>, vector<2x32xf32>
    %cst_70 = arith.constant dense<0.000000e+00> : vector<72xf32>
    %231 = vector.multi_reduction <add>, %229, %cst_70 [1] : vector<72x32xf32> to vector<72xf32>
    %232 = vector.shape_cast %231 : vector<72xf32> to vector<72x1xf32>
    %cst_71 = arith.constant 3.200000e+01 : f32
    %233 = vector.broadcast %cst_71 : f32 to vector<72x1xf32>
    %234 = arith.divf %232, %233 : vector<72x1xf32>
    %235 = vector.broadcast %234 : vector<72x1xf32> to vector<72x32xf32>
    %236 = arith.subf %229, %235 : vector<72x32xf32>
    %237 = arith.mulf %236, %236 : vector<72x32xf32>
    %cst_72 = arith.constant dense<0.000000e+00> : vector<72xf32>
    %238 = vector.multi_reduction <add>, %237, %cst_72 [1] : vector<72x32xf32> to vector<72xf32>
    %239 = vector.shape_cast %238 : vector<72xf32> to vector<72x1xf32>
    %cst_73 = arith.constant 3.200000e+01 : f32
    %240 = vector.broadcast %cst_73 : f32 to vector<72x1xf32>
    %241 = arith.divf %239, %240 : vector<72x1xf32>
    %242 = vector.broadcast %234 : vector<72x1xf32> to vector<72x32xf32>
    %243 = arith.subf %229, %242 : vector<72x32xf32>
    %cst_74 = arith.constant 9.99999974E-6 : f32
    %244 = vector.broadcast %cst_74 : f32 to vector<72x1xf32>
    %245 = arith.addf %241, %244 : vector<72x1xf32>
    %246 = math.rsqrt %245 : vector<72x1xf32>
    %247 = vector.broadcast %246 : vector<72x1xf32> to vector<72x32xf32>
    %248 = arith.mulf %243, %247 : vector<72x32xf32>
    %249 = vector.extract_strided_slice %230 {offsets = [0, 0], sizes = [1, 32], strides = [1, 1]} : vector<2x32xf32> to vector<1x32xf32>
    %250 = vector.broadcast %249 : vector<1x32xf32> to vector<72x32xf32>
    %251 = arith.mulf %248, %250 : vector<72x32xf32>
    %252 = vector.extract_strided_slice %230 {offsets = [1, 0], sizes = [1, 32], strides = [1, 1]} : vector<2x32xf32> to vector<1x32xf32>
    %253 = vector.broadcast %252 : vector<1x32xf32> to vector<72x32xf32>
    %254 = arith.addf %251, %253 : vector<72x32xf32>
    %c584 = arith.constant 584 : index
    %c0_75 = arith.constant 0 : index
    %255 = vector.load %arg2[%c584, %c0_75] : memref<744x128xf32, #tpu.memory_space<vmem>>, vector<32x64xf32>
    %cst_76 = arith.constant dense<0.000000e+00> : vector<72x64xf32>
    %256 = tpu.matmul %254, %255, %cst_76 {dimension_numbers = #tpu.dot_dimension_numbers<[1], [0], [0], [1], [0, 0, 1, 1], [], []>} : vector<72x32xf32>, vector<32x64xf32>, vector<72x64xf32> -> vector<72x64xf32>
    %c616 = arith.constant 616 : index
    %c0_77 = arith.constant 0 : index
    %257 = vector.load %arg2[%c616, %c0_77] : memref<744x128xf32, #tpu.memory_space<vmem>>, vector<1x64xf32>
    %258 = vector.broadcast %257 : vector<1x64xf32> to vector<72x64xf32>
    %259 = arith.addf %256, %258 : vector<72x64xf32>
    %cst_78 = arith.constant 5.000000e-01 : f32
    %260 = vector.broadcast %cst_78 : f32 to vector<72x64xf32>
    %261 = arith.mulf %260, %259 : vector<72x64xf32>
    %cst_79 = arith.constant 0.707106769 : f32
    %262 = vector.broadcast %cst_79 : f32 to vector<72x64xf32>
    %263 = arith.mulf %259, %262 : vector<72x64xf32>
    %264 = math.erf %263 : vector<72x64xf32>
    %cst_80 = arith.constant 1.000000e+00 : f32
    %265 = vector.broadcast %cst_80 : f32 to vector<72x64xf32>
    %266 = arith.addf %265, %264 : vector<72x64xf32>
    %267 = arith.mulf %261, %266 : vector<72x64xf32>
    %c624 = arith.constant 624 : index
    %c0_81 = arith.constant 0 : index
    %268 = vector.load %arg2[%c624, %c0_81] : memref<744x128xf32, #tpu.memory_space<vmem>>, vector<64x32xf32>
    %cst_82 = arith.constant dense<0.000000e+00> : vector<72x32xf32>
    %269 = tpu.matmul %267, %268, %cst_82 {dimension_numbers = #tpu.dot_dimension_numbers<[1], [0], [0], [1], [0, 0, 1, 1], [], []>} : vector<72x64xf32>, vector<64x32xf32>, vector<72x32xf32> -> vector<72x32xf32>
    %270 = arith.addf %229, %269 : vector<72x32xf32>
    %c688 = arith.constant 688 : index
    %c0_83 = arith.constant 0 : index
    %271 = vector.load %arg2[%c688, %c0_83] : memref<744x128xf32, #tpu.memory_space<vmem>>, vector<1x32xf32>
    %272 = vector.broadcast %271 : vector<1x32xf32> to vector<72x32xf32>
    %273 = arith.addf %270, %272 : vector<72x32xf32>
    %c272 = arith.constant 272 : index
    %c0_84 = arith.constant 0 : index
    %274 = vector.load %arg2[%c272, %c0_84] : memref<744x128xf32, #tpu.memory_space<vmem>>, vector<8x72xf32>
    %cst_85 = arith.constant dense<0.000000e+00> : vector<8x32xf32>
    %275 = tpu.matmul %274, %273, %cst_85 {dimension_numbers = #tpu.dot_dimension_numbers<[1], [0], [0], [1], [0, 0, 1, 1], [], []>} : vector<8x72xf32>, vector<72x32xf32>, vector<8x32xf32> -> vector<8x32xf32>
    %c696 = arith.constant 696 : index
    %c0_86 = arith.constant 0 : index
    %276 = vector.load %arg2[%c696, %c0_86] : memref<744x128xf32, #tpu.memory_space<vmem>>, vector<2x32xf32>
    %cst_87 = arith.constant dense<0.000000e+00> : vector<8xf32>
    %277 = vector.multi_reduction <add>, %275, %cst_87 [1] : vector<8x32xf32> to vector<8xf32>
    %278 = vector.shape_cast %277 : vector<8xf32> to vector<8x1xf32>
    %cst_88 = arith.constant 3.200000e+01 : f32
    %279 = vector.broadcast %cst_88 : f32 to vector<8x1xf32>
    %280 = arith.divf %278, %279 : vector<8x1xf32>
    %281 = vector.broadcast %280 : vector<8x1xf32> to vector<8x32xf32>
    %282 = arith.subf %275, %281 : vector<8x32xf32>
    %283 = arith.mulf %282, %282 : vector<8x32xf32>
    %cst_89 = arith.constant dense<0.000000e+00> : vector<8xf32>
    %284 = vector.multi_reduction <add>, %283, %cst_89 [1] : vector<8x32xf32> to vector<8xf32>
    %285 = vector.shape_cast %284 : vector<8xf32> to vector<8x1xf32>
    %cst_90 = arith.constant 3.200000e+01 : f32
    %286 = vector.broadcast %cst_90 : f32 to vector<8x1xf32>
    %287 = arith.divf %285, %286 : vector<8x1xf32>
    %288 = vector.broadcast %280 : vector<8x1xf32> to vector<8x32xf32>
    %289 = arith.subf %275, %288 : vector<8x32xf32>
    %cst_91 = arith.constant 9.99999974E-6 : f32
    %290 = vector.broadcast %cst_91 : f32 to vector<8x1xf32>
    %291 = arith.addf %287, %290 : vector<8x1xf32>
    %292 = math.rsqrt %291 : vector<8x1xf32>
    %293 = vector.broadcast %292 : vector<8x1xf32> to vector<8x32xf32>
    %294 = arith.mulf %289, %293 : vector<8x32xf32>
    %295 = vector.extract_strided_slice %276 {offsets = [0, 0], sizes = [1, 32], strides = [1, 1]} : vector<2x32xf32> to vector<1x32xf32>
    %296 = vector.broadcast %295 : vector<1x32xf32> to vector<8x32xf32>
    %297 = arith.mulf %294, %296 : vector<8x32xf32>
    %298 = vector.extract_strided_slice %276 {offsets = [1, 0], sizes = [1, 32], strides = [1, 1]} : vector<2x32xf32> to vector<1x32xf32>
    %299 = vector.broadcast %298 : vector<1x32xf32> to vector<8x32xf32>
    %300 = arith.addf %297, %299 : vector<8x32xf32>
    %c704 = arith.constant 704 : index
    %c0_92 = arith.constant 0 : index
    %301 = vector.load %arg2[%c704, %c0_92] : memref<744x128xf32, #tpu.memory_space<vmem>>, vector<32x128xf32>
    %cst_93 = arith.constant dense<0.000000e+00> : vector<8x128xf32>
    %302 = tpu.matmul %300, %301, %cst_93 {dimension_numbers = #tpu.dot_dimension_numbers<[1], [0], [0], [1], [0, 0, 1, 1], [], []>} : vector<8x32xf32>, vector<32x128xf32>, vector<8x128xf32> -> vector<8x128xf32>
    %c736 = arith.constant 736 : index
    %c0_94 = arith.constant 0 : index
    %303 = vector.load %arg2[%c736, %c0_94] : memref<744x128xf32, #tpu.memory_space<vmem>>, vector<1x128xf32>
    %304 = vector.broadcast %303 : vector<1x128xf32> to vector<8x128xf32>
    %305 = arith.addf %302, %304 : vector<8x128xf32>
    %c0_95 = arith.constant 0 : index
    %c0_96 = arith.constant 0 : index
    %306 = vector.load %arg3[%c0_95, %c0_96] : memref<8x128xf32, #tpu.memory_space<vmem>>, vector<8x128xf32>
    tpu.vector_store %arg3[%c0_95, %c0_96], %305 {strides = array<i32>} : memref<8x128xf32, #tpu.memory_space<vmem>>, vector<8x128xf32>,
    return
  }
  func.func @transform_0(%arg0: i32) -> (i32, i32) {
    %c0_i32 = arith.constant 0 : i32
    %c0_i32_0 = arith.constant 0 : i32
    return %arg0, %c0_i32 : i32, i32
  }
  func.func @transform_1(%arg0: i32) -> (i32, i32) {
    %c0_i32 = arith.constant 0 : i32
    %c0_i32_0 = arith.constant 0 : i32
    %c0_i32_1 = arith.constant 0 : i32
    return %c0_i32, %c0_i32_0 : i32, i32
  }
  func.func @transform_2(%arg0: i32) -> (i32, i32) {
    %c0_i32 = arith.constant 0 : i32
    %c0_i32_0 = arith.constant 0 : i32
    return %arg0, %c0_i32 : i32, i32
  }
}

</mosaic_0001>

<bundles_post_ra>
// kernel: vision_transformer_forward.1
= control target key start
LH: loop header
LB: loop body
LE: loop exit
PB: predicated region body
PF: predicated region fallthrough
CT: control target
= control target key end

     0   :  { %7 = vsyncpa [#allocation3], 0  ;;  %s8195_s9 = smov [#allocation2]   ;;  %s11165_s0 = inlined_call_operand.vmem [shape: f32[32,16], index: 0, kind: input, shape index: {}]   ;;  %s11166_s1 = inlined_call_operand.hbm [shape: f32[744,128], index: 1, kind: input, shape index: {}]   ;;  %s11167_s2 = inlined_call_operand.vmem [shape: f32[8,128], index: 2, kind: output, shape index: {}]  }
   0x1   :  { %s15_s10 = sshll.u32 %s8195_s9, 4  ;;  %s8171_s13 = scalar_lea.hbm %s11166_s1, 11904  ;;  %s16_s10 = int_to_ptr.vmem [resolvable:$true] %s15_s10 }
   0x2   :  { %p8172_p0 = scmp.ne.s32.totalorder %s11166_s1, %s8171_s13  ;;  %p8175_p1 = scmp.lt.u32.totalorder %s8171_s13, %s11166_s1 }
   0x4   :  { %p8177_p2 = pnand %p8175_p1, %p8172_p0 }
   0x6   :  { %8180 = shalt.err (!%p8177_p2)
}
   0x7   :  { %s8181_s18 = scalar_lea.vmem %s16_s10, 11904  ;;  %p8186_p4 = scmp.lt.s32.totalorder %s16_s10, %s16_s10 }
   0x8   :  { %p8182_p3 = scmp.ne.s32.totalorder %s16_s10, %s8181_s18  ;;  %p8187_p5 = scmp.lt.s32.totalorder %s8181_s18, %s8181_s18 }
   0xa   :  { %p8188_p6 = por %p8187_p5, %p8186_p4 }
   0xc   :  { %p8189_p7 = pnand %p8188_p6, %p8182_p3 }
   0xe   :  { %8192 = shalt.err (!%p8189_p7)
}
   0xf   :  { %s8196_s19 = smov 128   ;;  %s8197_s20 = smov 8  }
  0x10   :  { %21 = dma.hbm_to_vmem [thread:$0]  %s11166_s1, 11904, %s16_s10, [#allocation3], %s8196_s19, %s8196_s19, %s8197_s20  }
  0x11   :  { %8193 = dma.done.wait [#allocation3], 11904  }
  0x12   :  { %8194 = vsyncadd [#allocation3], 4294955392  ;;  %vm31_vm0 = vcmask 130048   ;;  %v29_v0 = vld [vmem:[#allocation2] sm:$0xff]  ;;  %v30_v1 = vld [vmem:[#allocation2 + $0x8] sm:$0xff]  ;;  %vm8199_vm1 = vmmov 0  }
  0x13   :  { %v25_v2 = vld [vmem:[%s11165_s0] sm:$0xff]  ;;  %v7159_v3 = vpack.c.bf16 %v30_v1, %v29_v0  ;;  %v129_v4 = vld [vmem:[#allocation2 + $0x10] sm:$0xff]  ;;  %v130_v5 = vld [vmem:[#allocation2 + $0x18] sm:$0xff]  ;;  %vm462_vm2 = vcmask 523264   ;;  %vm750_vm3 = vcmask 261120   ;;  %s8202_s30 = smov 96  }
  0x14   :  { %6546 = vmatprep.mubr.msk.f32.mxu0 %vm31_vm0, %v25_v2  ;;  %6556 = vmatprep.mubr.msk.f32.mxu1 %vm31_vm0, %v25_v2  ;;  %v7163_v6 = vpack.c.bf16 %v130_v5, %v129_v4  ;;  %v26_v7 = vld [vmem:[%s11165_s0 + $0x8] sm:$0xff]  ;;  %v27_v8 = vld [vmem:[%s11165_s0 + $0x10] sm:$0xff]  ;;  %v28_v9 = vld [vmem:[%s11165_s0 + $0x18] sm:$0xff]  ;;  %s8201_s0 = smov 32   ;;  %s8203_s3 = smov 16   ;;  %vm720_vm5 = vcmask 588800  }
  0x15   :  { %7160 = vmatprep.subr.bf16.mxu0 %v7159_v3  ;;  %v313_v2 = vld [vmem:[#allocation2 + $0x20] sm:$0xff]  ;;  %s8204_s4 = smov 64   ;;  %s8205_s5 = smov 88   ;;  %vm8719_vm4 = vmpackc.low %vm750_vm3, %vm750_vm3  ;;  %vm739_vm6 = vcmask 719872   ;;  %vm1609_vm7 = vcmask 1048128   ;;  %vm1673_vm8 = vcmask 720000  }
  0x16   :  { %7162 = vmatpush3.bf16.msra.mxu0 %v7159_v3  ;;  %7164 = vmatprep.subr.bf16.mxu1 %v7163_v6  ;;  %v314_v3 = vld [vmem:[#allocation2 + $0x28] sm:$0xff]  ;;  %s8206_s6 = smov 72   ;;  %vm1710_vm9 = vcmask 1048256  }
  0x17   :  { %7166 = vmatpush3.bf16.msra.mxu1 %v7163_v6  ;;  %v7167_v4 = vpack.c.bf16 %v314_v3, %v313_v2 }
  0x19   :  { %6547 = vmatmul.mubr.msk.f32.vlgmr.msra.gmra.mrb[0].mxu0 %vm31_vm0, %v26_v7  ;;  %7168 = vmatprep.subr.bf16.mxu0 %v7167_v4 }
  0x1a   :  { %6549 = vmatprep.mubr.msk.f32.mxu0 %vm31_vm0, %v27_v8  ;;  %6557 = vmatmul.mubr.msk.f32.vlgmr.msra.gmra.mrb[0].mxu1 %vm31_vm0, %v26_v7 }
  0x1b   :  { %6559 = vmatprep.mubr.msk.f32.mxu1 %vm31_vm0, %v27_v8  ;;  %7170 = vmatpush3.bf16.msra.mxu0 %v7167_v4 }
  0x1d   :  { %6550 = vmatmul.mubr.msk.f32.gmra.mrb[2].mxu0 %vm31_vm0, %v28_v9 }
  0x1e   :  { %6560 = vmatmul.mubr.msk.f32.gmra.mrb[2].mxu1 %vm31_vm0, %v28_v9 }
  0xec   :  { %v6548_v10 = vpop.f32.mrb[0].mxu0 }
  0xed   :  { %v110_v11 = vpop.f32.mrb[1].mxu0  ;;  %v6558_v13 = vpop.f32.mrb[0].mxu1  ;;  %v219_v17 = vsel %vm31_vm0, %v6548_v10, 0.0 }
  0xee   :  { %v216_v12 = vsel %vm31_vm0, %v110_v11, 0.0  ;;  %v197_v14 = vpop.f32.mrb[1].mxu1  ;;  %v231_v24 = vsel %vm31_vm0, %v6558_v13, 0.0 }
  0xef   :  { %217 = vadd.xlane.f32.xlu0 %v216_v12  ;;  %v228_v21 = vsel %vm31_vm0, %v197_v14, 0.0 }
  0xf0   :  { %v6551_v15 = vpop.f32.mrb[2].mxu0 }
  0xf1   :  { %v120_v16 = vpop.f32.mrb[3].mxu0  ;;  %v6561_v19 = vpop.f32.mrb[2].mxu1  ;;  %v225_v22 = vsel %vm31_vm0, %v6551_v15, 0.0 }
  0xf2   :  { %v222_v18 = vsel %vm31_vm0, %v120_v16, 0.0  ;;  %v207_v20 = vpop.f32.mrb[3].mxu1  ;;  %v237_v25 = vsel %vm31_vm0, %v6561_v19, 0.0 }
  0xf3   :  { %220 = vadd.xlane.f32.xlu0 %v219_v17  ;;  %223 = vadd.xlane.f32.xlu1 %v222_v18  ;;  %v234_v23 = vsel %vm31_vm0, %v207_v20, 0.0 }
  0xf7   :  { %229 = vadd.xlane.f32.xlu0 %v228_v21  ;;  %226 = vadd.xlane.f32.xlu1 %v225_v22 }
  0xfb   :  { %235 = vadd.xlane.f32.xlu0 %v234_v23  ;;  %232 = vadd.xlane.f32.xlu1 %v231_v24 }
  0xff   :  { %238 = vadd.xlane.f32.xlu1 %v237_v25 }
 0x17c   :  { %v218_v26 = vpop.xlane.xlu0 %217 }
 0x17d   :  { %v241_v27 = vmul.f32 0.0625, %v218_v26 }
 0x17f   :  { %v8262_v28 = vsub.f32 %v110_v11, %v241_v27 }
 0x180   :  { %v221_v29 = vpop.xlane.xlu0 %220  ;;  %v224_v30 = vpop.xlane.xlu1 %223 }
 0x181   :  { %v242_v31 = vmul.f32 0.0625, %v221_v29  ;;  %v243_v32 = vmul.f32 0.0625, %v224_v30  ;;  %v257_v33 = vmul.f32 %v8262_v28, %v8262_v28 }
 0x183   :  { %v8266_v34 = vsub.f32 %v6548_v10, %v242_v31  ;;  %v8268_v35 = vsub.f32 %v120_v16, %v243_v32  ;;  %v265_v36 = vsel %vm31_vm0, %v257_v33, 0.0 }
 0x184   :  { %266 = vadd.xlane.f32.xlu0 %v265_v36  ;;  %v230_v37 = vpop.xlane.xlu0 %229  ;;  %v227_v38 = vpop.xlane.xlu1 %226 }
 0x185   :  { %v245_v39 = vmul.f32 0.0625, %v230_v37  ;;  %v244_v40 = vmul.f32 0.0625, %v227_v38  ;;  %v258_v41 = vmul.f32 %v8266_v34, %v8266_v34  ;;  %v259_v42 = vmul.f32 %v8268_v35, %v8268_v35 }
 0x186   :  { %v11168_v37 = vmov 0.0|0.0   ;;  %v11170_v38 = vmov 0.0  }
 0x187   :  { %v8275_v43 = vsub.f32 %v197_v14, %v245_v39  ;;  %v8277_v44 = vsub.f32 %v6551_v15, %v244_v40  ;;  %v268_v45 = vsel %vm31_vm0, %v258_v41, 0.0  ;;  %v271_v46 = vsel %vm31_vm0, %v259_v42, 0.0  ;;  %7171 = vmatprep.subr.bf16.mxu1 %v11168_v37  ;;  %7183 = vmatprep.subr.bf16.mxu0 %v11168_v37 }
 0x188   :  { %v236_v47 = vpop.xlane.xlu0 %235  ;;  %269 = vadd.xlane.f32.xlu1 %v268_v45  ;;  %272 = vadd.xlane.f32.xlu0 %v271_v46  ;;  %v233_v48 = vpop.xlane.xlu1 %232 }
 0x189   :  { %v247_v49 = vmul.f32 0.0625, %v236_v47  ;;  %v246_v50 = vmul.f32 0.0625, %v233_v48  ;;  %v261_v51 = vmul.f32 %v8275_v43, %v8275_v43  ;;  %v260_v52 = vmul.f32 %v8277_v44, %v8277_v44  ;;  %6594 = vmatprep.mubr.msk.f32.mxu1 %vm8199_vm1, %v11170_v38 }
 0x18b   :  { %v8285_v53 = vsub.f32 %v207_v20, %v247_v49  ;;  %v8287_v54 = vsub.f32 %v6558_v13, %v246_v50  ;;  %v277_v55 = vsel %vm31_vm0, %v261_v51, 0.0  ;;  %v274_v56 = vsel %vm31_vm0, %v260_v52, 0.0  ;;  %v444_v51 = vld [vmem:[#allocation2 + $0x30] sm:$0xff]  ;;  %v445_v52 = vld [vmem:[#allocation2 + $0x38] sm:$0xff] }
 0x18c   :  { %278 = vadd.xlane.f32.xlu0 %v277_v55  ;;  %275 = vadd.xlane.f32.xlu1 %v274_v56  ;;  %v239_v57 = vpop.xlane.xlu1 %238  ;;  %v448_v55 = vld [vmem:[#allocation2 + $0x50] sm:$0xff]  ;;  %v449_v56 = vld [vmem:[#allocation2 + $0x58] sm:$0xff] }
 0x18d   :  { %v248_v58 = vmul.f32 0.0625, %v239_v57  ;;  %v263_v59 = vmul.f32 %v8285_v53, %v8285_v53  ;;  %v262_v60 = vmul.f32 %v8287_v54, %v8287_v54  ;;  %v450_v57 = vld [vmem:[#allocation2 + $0x60] sm:$0xff] }
 0x18f   :  { %v256_v61 = vsub.f32 %v6561_v19, %v248_v58  ;;  %v283_v62 = vsel %vm31_vm0, %v263_v59, 0.0  ;;  %v280_v63 = vsel %vm31_vm0, %v262_v60, 0.0  ;;  %v451_v58 = vld [vmem:[#allocation2 + $0x68] sm:$0xff]  ;;  %v452_v59 = vld [vmem:[#allocation2 + $0x70] sm:$0xff]  ;;  %v453_v60 = vld [vmem:[#allocation2 + $0x78] sm:$0xff] }
 0x190   :  { %284 = vadd.xlane.f32.xlu0 %v283_v62  ;;  %281 = vadd.xlane.f32.xlu1 %v280_v63 }
 0x191   :  { %v264_v0 = vmul.f32 %v256_v61, %v256_v61 }
 0x193   :  { %v286_v1 = vsel %vm31_vm0, %v264_v0, 0.0  ;;  %v454_v0 = vld [vmem:[#allocation2 + $0x80] sm:$0xff] }
 0x194   :  { %287 = vadd.xlane.f32.xlu1 %v286_v1 }
 0x211   :  { %v267_v5 = vpop.xlane.xlu0 %266 }
 0x212   :  { %v289_v6 = vmul.f32 0.06666667, %v267_v5  ;;  %v455_v5 = vld [vmem:[#allocation2 + $0x88] sm:$0xff] }
 0x214   :  { %7901 = vrsqrt.f32 %v289_v6 }
 0x215   :  { %v273_v7 = vpop.xlane.xlu0 %272  ;;  %v270_v8 = vpop.xlane.xlu1 %269 }
 0x216   :  { %v291_v9 = vmul.f32 0.06666667, %v273_v7  ;;  %v290_v10 = vmul.f32 0.06666667, %v270_v8 }
 0x218   :  { %7903 = vrsqrt.f32 %v291_v9 }
 0x219   :  { %7905 = vrsqrt.f32 %v290_v10  ;;  %v279_v11 = vpop.xlane.xlu0 %278  ;;  %v276_v12 = vpop.xlane.xlu1 %275  ;;  %v456_v10 = vld [vmem:[#allocation2 + $0x90] sm:$0xff] }
 0x21a   :  { %v293_v13 = vmul.f32 0.06666667, %v279_v11  ;;  %v292_v14 = vmul.f32 0.06666667, %v276_v12 }
 0x21c   :  { %7907 = vrsqrt.f32 %v293_v13 }
 0x21d   :  { %7909 = vrsqrt.f32 %v292_v14  ;;  %v285_v15 = vpop.xlane.xlu0 %284  ;;  %v282_v16 = vpop.xlane.xlu1 %281 }
 0x21e   :  { %v7902_v17 = vpop.eup %7901  ;;  %v295_v18 = vmul.f32 0.06666667, %v285_v15  ;;  %v294_v19 = vmul.f32 0.06666667, %v282_v16  ;;  %v457_v15 = vld [vmem:[#allocation2 + $0x98] sm:$0xff] }
 0x21f   :  { %v305_v20 = vmul.f32 %v7902_v17, %v8262_v28 }
 0x220   :  { %7911 = vrsqrt.f32 %v295_v18 }
 0x221   :  { %7913 = vrsqrt.f32 %v294_v19  ;;  %6566 = vmatprep.mubr.msk.f32.mxu0 %vm31_vm0, %v305_v20  ;;  %v288_v21 = vpop.xlane.xlu1 %287  ;;  %v458_v20 = vld [vmem:[#allocation2 + $0xa0] sm:$0xff] }
 0x222   :  { %v7904_v22 = vpop.eup %7903  ;;  %v296_v23 = vmul.f32 0.06666667, %v288_v21 }
 0x223   :  { %v7906_v24 = vpop.eup %7905  ;;  %v307_v25 = vmul.f32 %v7904_v22, %v8268_v35 }
 0x224   :  { %v306_v26 = vmul.f32 %v7906_v24, %v8266_v34  ;;  %7915 = vrsqrt.f32 %v296_v23 }
 0x226   :  { %v7908_v27 = vpop.eup %7907  ;;  %6567 = vmatmul.mubr.msk.f32.vlgmr.msra.gmra.mrb[4].mxu0 %vm31_vm0, %v306_v26 }
 0x227   :  { %v7910_v29 = vpop.eup %7909  ;;  %6569 = vmatprep.mubr.msk.f32.mxu0 %vm31_vm0, %v307_v25  ;;  %v309_v28 = vmul.f32 %v7908_v27, %v8275_v43  ;;  %v459_v25 = vld [vmem:[#allocation2 + $0xa8] sm:$0xff] }
 0x228   :  { %v308_v30 = vmul.f32 %v7910_v29, %v8277_v44 }
 0x22a   :  { %v7912_v31 = vpop.eup %7911  ;;  %6570 = vmatmul.mubr.msk.f32.gmra.mrb[6].mxu0 %vm31_vm0, %v308_v30  ;;  %v460_v30 = vld [vmem:[#allocation2 + $0xb0] sm:$0xff] }
 0x22b   :  { %v7914_v32 = vpop.eup %7913  ;;  %6572 = vmatprep.mubr.msk.f32.mxu0 %vm31_vm0, %v309_v28  ;;  %v311_v33 = vmul.f32 %v7912_v31, %v8285_v53  ;;  %v446_v53 = vld [vmem:[#allocation2 + $0x40] sm:$0xff] }
 0x22c   :  { %v310_v34 = vmul.f32 %v7914_v32, %v8287_v54  ;;  %v447_v54 = vld [vmem:[#allocation2 + $0x48] sm:$0xff] }
 0x22e   :  { %v7916_v35 = vpop.eup %7915  ;;  %6573 = vmatmul.mubr.msk.f32.gmra.mrb[8].mxu0 %vm31_vm0, %v310_v34 }
 0x22f   :  { %6575 = vmatprep.mubr.msk.f32.mxu0 %vm31_vm0, %v311_v33  ;;  %v312_v36 = vmul.f32 %v7916_v35, %v256_v61  ;;  %v461_v35 = vld [vmem:[#allocation2 + $0xb8] sm:$0xff] }
 0x232   :  { %6576 = vmatmul.mubr.msk.f32.gmra.mrb[10].mxu0 %vm31_vm0, %v312_v36 }
 0x233   :  { %6629 = vmatprep.mubr.msk.f32.mxu0 %vm8199_vm1, %v11170_v38 }
 0x2f9   :  { %v6568_v39 = vpop.f32.mrb[4].mxu0 }
 0x2fa   :  { %v405_v40 = vpop.f32.mrb[5].mxu0 }
 0x2fb   :  { %v7172_v41 = vpack.c.bf16 %v6568_v39, %v405_v40 }
 0x2fd   :  { %v6571_v42 = vpop.f32.mrb[6].mxu0  ;;  %7173 = vmatpush3.bf16.msra.mxu1 %v7172_v41 }
 0x2fe   :  { %v415_v43 = vpop.f32.mrb[7].mxu0  ;;  %7174 = vmatprep.subr.bf16.mxu1 %v11168_v37 }
 0x2ff   :  { %v7175_v44 = vpack.c.bf16 %v6571_v42, %v415_v43 }
 0x301   :  { %v6574_v45 = vpop.f32.mrb[8].mxu0  ;;  %7176 = vmatpush3.bf16.msra.mxu1 %v7175_v44 }
 0x302   :  { %v425_v46 = vpop.f32.mrb[9].mxu0  ;;  %7177 = vmatprep.subr.bf16.mxu1 %v11168_v37 }
 0x303   :  { %v7178_v47 = vpack.c.bf16 %v6574_v45, %v425_v46 }
 0x305   :  { %v6577_v48 = vpop.f32.mrb[10].mxu0  ;;  %7179 = vmatpush3.bf16.msra.mxu1 %v7178_v47 }
 0x306   :  { %v435_v49 = vpop.f32.mrb[11].mxu0  ;;  %7180 = vmatprep.subr.bf16.mxu1 %v11168_v37 }
 0x307   :  { %v7181_v50 = vpack.c.bf16 %v6577_v48, %v435_v49 }
 0x309   :  { %7182 = vmatpush3.bf16.msra.mxu1 %v7181_v50 }
 0x30c   :  { %6595 = vmatmul.mubr.msk.f32.vlgmr.msra.gmra.mrb[4].mxu1 %vm462_vm2, %v444_v51 }
 0x30d   :  { %6597 = vmatprep.mubr.msk.f32.mxu1 %vm8199_vm1, %v11170_v38 }
 0x310   :  { %6598 = vmatmul.mubr.msk.f32.gmra.mrb[6].mxu1 %vm462_vm2, %v445_v52 }
 0x311   :  { %6600 = vmatprep.mubr.msk.f32.mxu1 %vm8199_vm1, %v11170_v38 }
 0x314   :  { %6601 = vmatmul.mubr.msk.f32.gmra.mrb[8].mxu1 %vm462_vm2, %v446_v53 }
 0x315   :  { %6603 = vmatprep.mubr.msk.f32.mxu1 %vm8199_vm1, %v11170_v38 }
 0x318   :  { %6604 = vmatmul.mubr.msk.f32.gmra.mrb[10].mxu1 %vm462_vm2, %v447_v54 }
 0x319   :  { %6606 = vmatprep.mubr.msk.f32.mxu1 %vm8199_vm1, %v11170_v38 }
 0x31c   :  { %6607 = vmatmul.mubr.msk.f32.gmra.mrb[12].mxu1 %vm462_vm2, %v448_v55 }
 0x31d   :  { %6609 = vmatprep.mubr.msk.f32.mxu1 %vm8199_vm1, %v11170_v38 }
 0x320   :  { %6610 = vmatmul.mubr.msk.f32.gmra.mrb[14].mxu1 %vm462_vm2, %v449_v56 }
 0x321   :  { %6612 = vmatprep.mubr.msk.f32.mxu1 %vm8199_vm1, %v11170_v38 }
 0x324   :  { %6613 = vmatmul.mubr.msk.f32.gmra.mrb[16].mxu1 %vm462_vm2, %v450_v57 }
 0x325   :  { %6615 = vmatprep.mubr.msk.f32.mxu1 %vm8199_vm1, %v11170_v38 }
 0x328   :  { %6616 = vmatmul.mubr.msk.f32.gmra.mrb[18].mxu1 %vm462_vm2, %v451_v58 }
 0x329   :  { %6618 = vmatprep.mubr.msk.f32.mxu1 %vm8199_vm1, %v11170_v38 }
 0x32c   :  { %6619 = vmatmul.mubr.msk.f32.gmra.mrb[20].mxu1 %vm462_vm2, %v452_v59 }
 0x3df   :  { %v556_v61 = vpop.f32.mrb[4].mxu1 }
 0x3e0   :  { %v8347_v62 = vadd.f32 %v556_v61, %v453_v60  ;;  %v6596_v63 = vpop.f32.mrb[5].mxu1 }
 0x3e2   :  { %11236 = vst [vmem:[#allocation5_spill] sm:$0xff] %v8347_v62  ;;  %v751_v1 = vsel %vm750_vm3, %v8347_v62, 0.0 }
 0x3e3   :  { %752 = vadd.xlane.f32.xlu0 %v751_v1  ;;  %v561_v2 = vpop.f32.mrb[6].mxu1 }
 0x3e4   :  { %v8351_v3 = vadd.f32 %v561_v2, %v454_v0  ;;  %v6599_v4 = vpop.f32.mrb[7].mxu1 }
 0x3e6   :  { %11237 = vst [vmem:[#allocation6_spill] sm:$0xff] %v8351_v3  ;;  %v754_v6 = vsel %vm750_vm3, %v8351_v3, 0.0 }
 0x3e7   :  { %755 = vadd.xlane.f32.xlu1 %v754_v6  ;;  %v566_v7 = vpop.f32.mrb[8].mxu1 }
 0x3e8   :  { %v8355_v8 = vadd.f32 %v566_v7, %v455_v5  ;;  %v6602_v9 = vpop.f32.mrb[9].mxu1 }
 0x3ea   :  { %11238 = vst [vmem:[#allocation7_spill] sm:$0xff] %v8355_v8  ;;  %v757_v11 = vsel %vm750_vm3, %v8355_v8, 0.0 }
 0x3eb   :  { %758 = vadd.xlane.f32.xlu0 %v757_v11  ;;  %v571_v12 = vpop.f32.mrb[10].mxu1 }
 0x3ec   :  { %v8359_v13 = vadd.f32 %v571_v12, %v456_v10  ;;  %v6605_v14 = vpop.f32.mrb[11].mxu1 }
 0x3ee   :  { %11239 = vst [vmem:[#allocation8_spill] sm:$0xff] %v8359_v13  ;;  %v760_v16 = vsel %vm750_vm3, %v8359_v13, 0.0 }
 0x3ef   :  { %761 = vadd.xlane.f32.xlu1 %v760_v16  ;;  %v576_v17 = vpop.f32.mrb[12].mxu1 }
 0x3f0   :  { %v8363_v18 = vadd.f32 %v576_v17, %v457_v15  ;;  %v6608_v19 = vpop.f32.mrb[13].mxu1 }
 0x3f2   :  { %11240 = vst [vmem:[#allocation9_spill] sm:$0xff] %v8363_v18  ;;  %v763_v21 = vsel %vm750_vm3, %v8363_v18, 0.0 }
 0x3f3   :  { %764 = vadd.xlane.f32.xlu0 %v763_v21  ;;  %v581_v22 = vpop.f32.mrb[14].mxu1 }
 0x3f4   :  { %v8367_v23 = vadd.f32 %v581_v22, %v458_v20  ;;  %v6611_v24 = vpop.f32.mrb[15].mxu1 }
 0x3f6   :  { %11241 = vst [vmem:[#allocation10_spill] sm:$0xff] %v8367_v23  ;;  %v766_v26 = vsel %vm750_vm3, %v8367_v23, 0.0 }
 0x3f7   :  { %767 = vadd.xlane.f32.xlu1 %v766_v26  ;;  %v586_v27 = vpop.f32.mrb[16].mxu1  ;;  %v895_v26 = vld [vmem:[#allocation2 + $0x120] sm:$0xff] }
 0x3f8   :  { %v8371_v29 = vadd.f32 %v586_v27, %v459_v25  ;;  %v6614_v28 = vpop.f32.mrb[17].mxu1  ;;  %v896_v27 = vld [vmem:[#allocation2 + $0x128] sm:$0xff] }
 0x3f9   :  { %v7184_v28 = vpack.c.bf16 %v896_v27, %v895_v26 }
 0x3fa   :  { %11242 = vst [vmem:[#allocation11_spill] sm:$0xff] %v8371_v29  ;;  %v769_v31 = vsel %vm750_vm3, %v8371_v29, 0.0 }
 0x3fb   :  { %770 = vadd.xlane.f32.xlu0 %v769_v31  ;;  %v591_v32 = vpop.f32.mrb[18].mxu1  ;;  %7185 = vmatpush3.bf16.msra.mxu0 %v7184_v28 }
 0x3fc   :  { %v8375_v33 = vadd.f32 %v591_v32, %v460_v30  ;;  %v6617_v34 = vpop.f32.mrb[19].mxu1  ;;  %7186 = vmatprep.subr.bf16.mxu0 %v11168_v37 }
 0x3fd   :  { %v897_v34 = vld [vmem:[#allocation2 + $0x130] sm:$0xff] }
 0x3fe   :  { %11243 = vst [vmem:[#allocation12_spill] sm:$0xff] %v8375_v33  ;;  %v772_v36 = vsel %vm750_vm3, %v8375_v33, 0.0 }
 0x3ff   :  { %773 = vadd.xlane.f32.xlu1 %v772_v36  ;;  %v596_v39 = vpop.f32.mrb[20].mxu1 }
 0x400   :  { %v8379_v40 = vadd.f32 %v596_v39, %v461_v35  ;;  %v6620_v41 = vpop.f32.mrb[21].mxu1  ;;  %v898_v35 = vld [vmem:[#allocation2 + $0x138] sm:$0xff] }
 0x401   :  { %v7187_v36 = vpack.c.bf16 %v898_v35, %v897_v34  ;;  %v601_v41 = vlaneseq }
 0x402   :  { %11244 = vst [vmem:[#allocation13_spill] sm:$0xff] %v8379_v40  ;;  %v775_v42 = vsel %vm750_vm3, %v8379_v40, 0.0 }
 0x403   :  { %776 = vadd.xlane.f32.xlu0 %v775_v42  ;;  %7188 = vmatpush3.bf16.msra.mxu0 %v7187_v36  ;;  %v602_v42 = vshrl.u32 %v601_v41, 7 }
 0x404   :  { %7237 = vmatprep.subr.bf16.mxu0 %v11168_v37 }
 0x470   :  { %v753_v43 = vpop.xlane.xlu0 %752 }
 0x471   :  { %v779_v44 = vmul.f32 0.03125, %v753_v43  ;;  %v8439_v43 = vsub.s32 0, %v602_v42 }
 0x473   :  { %v8384_v45 = vsub.f32 %v8347_v62, %v779_v44  ;;  %11245 = vst [vmem:[#allocation14_spill] sm:$0xff] %v8439_v43  ;;  %v8441_v44 = vsub.s32 1, %v602_v42 }
 0x474   :  { %v756_v46 = vpop.xlane.xlu1 %755 }
 0x475   :  { %v780_v47 = vmul.f32 0.03125, %v756_v46  ;;  %v797_v48 = vmul.f32 %v8384_v45, %v8384_v45  ;;  %11246 = vst [vmem:[#allocation15_spill] sm:$0xff] %v8441_v44  ;;  %v600_v46 = vld [vmem:[#allocation2 + $0x108] sm:$0xf] }
 0x477   :  { %v8389_v49 = vsub.f32 %v8351_v3, %v780_v47  ;;  %v806_v50 = vsel %vm750_vm3, %v797_v48, 0.0  ;;  %v611_v47 = vsub.s32 2, %v602_v42  ;;  %v8444_v48 = vrot.slane %v600_v46, %v8439_v43 }
 0x478   :  { %v759_v51 = vpop.xlane.xlu0 %758  ;;  %807 = vadd.xlane.f32.xlu1 %v806_v50  ;;  %v8447_v50 = vrot.slane %v600_v46, %v8441_v44 }
 0x479   :  { %v781_v52 = vmul.f32 0.03125, %v759_v51  ;;  %v798_v53 = vmul.f32 %v8389_v49, %v8389_v49  ;;  %11247 = vst [vmem:[#allocation16_spill] sm:$0xff] %v8444_v48  ;;  %v8450_v51 = vrot.slane %v600_v46, %v611_v47 }
 0x47b   :  { %v8395_v54 = vsub.f32 %v8355_v8, %v781_v52  ;;  %v809_v55 = vsel %vm750_vm3, %v798_v53, 0.0  ;;  %11248 = vst [vmem:[#allocation17_spill] sm:$0xff] %v8450_v51  ;;  %v615_v52 = vsub.s32 3, %v602_v42 }
 0x47c   :  { %v762_v56 = vpop.xlane.xlu1 %761  ;;  %810 = vadd.xlane.f32.xlu0 %v809_v55 }
 0x47d   :  { %v782_v57 = vmul.f32 0.03125, %v762_v56  ;;  %v799_v58 = vmul.f32 %v8395_v54, %v8395_v54  ;;  %v8454_v53 = vrot.slane %v600_v46, %v615_v52 }
 0x47f   :  { %v8401_v59 = vsub.f32 %v8359_v13, %v782_v57  ;;  %v812_v60 = vsel %vm750_vm3, %v799_v58, 0.0  ;;  %11249 = vst [vmem:[#allocation18_spill] sm:$0xff] %v8454_v53 }
 0x480   :  { %v765_v61 = vpop.xlane.xlu0 %764  ;;  %813 = vadd.xlane.f32.xlu1 %v812_v60 }
 0x481   :  { %v783_v63 = vmul.f32 0.03125, %v765_v61  ;;  %v800_v0 = vmul.f32 %v8401_v59, %v8401_v59 }
 0x483   :  { %v8407_v1 = vsub.f32 %v8363_v18, %v783_v63  ;;  %v815_v2 = vsel %vm750_vm3, %v800_v0, 0.0 }
 0x484   :  { %v768_v4 = vpop.xlane.xlu1 %767  ;;  %816 = vadd.xlane.f32.xlu0 %v815_v2  ;;  %v749_v2 = vld [vmem:[#allocation2 + $0x118] sm:$0x3] }
 0x485   :  { %v784_v5 = vmul.f32 0.03125, %v768_v4  ;;  %v801_v6 = vmul.f32 %v8407_v1, %v8407_v1 }
 0x487   :  { %v8413_v7 = vsub.f32 %v8367_v23, %v784_v5  ;;  %v818_v9 = vsel %vm750_vm3, %v801_v6, 0.0 }
 0x488   :  { %v771_v10 = vpop.xlane.xlu0 %770  ;;  %819 = vadd.xlane.f32.xlu1 %v818_v9  ;;  %v8458_v9 = vrot.slane %v749_v2, %v8439_v43 }
 0x489   :  { %v785_v11 = vmul.f32 0.03125, %v771_v10  ;;  %v802_v12 = vmul.f32 %v8413_v7, %v8413_v7 }
 0x48b   :  { %v8419_v14 = vsub.f32 %v8371_v29, %v785_v11  ;;  %v821_v15 = vsel %vm750_vm3, %v802_v12, 0.0 }
 0x48c   :  { %v774_v16 = vpop.xlane.xlu1 %773  ;;  %822 = vadd.xlane.f32.xlu0 %v821_v15 }
 0x48d   :  { %v786_v17 = vmul.f32 0.03125, %v774_v16  ;;  %v803_v19 = vmul.f32 %v8419_v14, %v8419_v14  ;;  %v8462_v16 = vrot.slane %v749_v2, %v8441_v44 }
 0x48f   :  { %v8425_v20 = vsub.f32 %v8375_v33, %v786_v17  ;;  %v824_v21 = vsel %vm750_vm3, %v803_v19, 0.0 }
 0x490   :  { %825 = vadd.xlane.f32.xlu1 %v824_v21  ;;  %v777_v22 = vpop.xlane.xlu0 %776 }
 0x491   :  { %v787_v24 = vmul.f32 0.03125, %v777_v22  ;;  %v804_v25 = vmul.f32 %v8425_v20, %v8425_v20 }
 0x493   :  { %v8431_v30 = vsub.f32 %v8379_v40, %v787_v24  ;;  %v827_v31 = vsel %vm750_vm3, %v804_v25, 0.0 }
 0x494   :  { %828 = vadd.xlane.f32.xlu0 %v827_v31 }
 0x495   :  { %v805_v32 = vmul.f32 %v8431_v30, %v8431_v30 }
 0x497   :  { %v830_v39 = vsel %vm750_vm3, %v805_v32, 0.0 }
 0x498   :  { %831 = vadd.xlane.f32.xlu1 %v830_v39 }
 0x4a9   :  { %1041 = vrot.lane.b32.xlu1 %v8444_v48, %s8201_s0 }
 0x4aa   :  { %1043 = vrot.lane.b32.xlu0 %v8447_v50, %s8201_s0 }
 0x4ad   :  { %1045 = vrot.lane.b32.xlu1 %v8450_v51, %s8201_s0 }
 0x4b1   :  { %1047 = vrot.lane.b32.xlu1 %v8454_v53, %s8201_s0 }
 0x505   :  { %v808_v55 = vpop.xlane.xlu1 %807 }
 0x506   :  { %v833_v56 = vmul.f32 0.03125, %v808_v55 }
 0x508   :  { %v842_v57 = vadd.f32 1e-05, %v833_v56 }
 0x509   :  { %v811_v58 = vpop.xlane.xlu0 %810 }
 0x50a   :  { %7917 = vrsqrt.f32 %v842_v57  ;;  %v834_v60 = vmul.f32 0.03125, %v811_v58 }
 0x50c   :  { %v843_v61 = vadd.f32 1e-05, %v834_v60 }
 0x50d   :  { %v814_v63 = vpop.xlane.xlu1 %813 }
 0x50e   :  { %7919 = vrsqrt.f32 %v843_v61  ;;  %v835_v0 = vmul.f32 0.03125, %v814_v63 }
 0x510   :  { %v844_v4 = vadd.f32 1e-05, %v835_v0 }
 0x511   :  { %v817_v5 = vpop.xlane.xlu0 %816 }
 0x512   :  { %7921 = vrsqrt.f32 %v844_v4  ;;  %v836_v6 = vmul.f32 0.03125, %v817_v5 }
 0x514   :  { %v7918_v10 = vpop.eup %7917  ;;  %v845_v11 = vadd.f32 1e-05, %v836_v6 }
 0x515   :  { %v860_v12 = vmul.f32 %v7918_v10, %v8384_v45  ;;  %v820_v15 = vpop.xlane.xlu1 %819 }
 0x516   :  { %7923 = vrsqrt.f32 %v845_v11  ;;  %v837_v17 = vmul.f32 0.03125, %v820_v15 }
 0x517   :  { %v873_v19 = vmul.f32 %v8458_v9, %v860_v12 }
 0x518   :  { %v7920_v21 = vpop.eup %7919  ;;  %v846_v22 = vadd.f32 1e-05, %v837_v17 }
 0x519   :  { %v823_v24 = vpop.xlane.xlu0 %822  ;;  %v886_v25 = vadd.f32 %v8462_v16, %v873_v19  ;;  %v861_v26 = vmul.f32 %v7920_v21, %v8389_v49 }
 0x51a   :  { %7925 = vrsqrt.f32 %v846_v22  ;;  %v838_v27 = vmul.f32 0.03125, %v823_v24  ;;  %v5735_v24 = vld [vmem:[#allocation2 + $0x140] ss:$0 sm:$0xff] }
 0x51b   :  { %6630 = vmatmul.mubr.msk.f32.vlgmr.msra.gmra.mrb[12].mxu0 %vm750_vm3, %v886_v25  ;;  %v874_v45 = vmul.f32 %v8458_v9, %v861_v26 }
 0x51c   :  { %v7922_v28 = vpop.eup %7921  ;;  %v847_v31 = vadd.f32 1e-05, %v838_v27  ;;  %6632 = vmatprep.mubr.msk.f32.mxu0 %vm8199_vm1, %v11170_v38 }
 0x51d   :  { %v826_v32 = vpop.xlane.xlu1 %825  ;;  %v887_v34 = vadd.f32 %v8462_v16, %v874_v45  ;;  %v862_v35 = vmul.f32 %v7922_v28, %v8395_v54 }
 0x51e   :  { %7927 = vrsqrt.f32 %v847_v31  ;;  %v839_v36 = vmul.f32 0.03125, %v826_v32 }
 0x51f   :  { %6633 = vmatmul.mubr.msk.f32.gmra.mrb[14].mxu0 %vm750_vm3, %v887_v34  ;;  %v875_v49 = vmul.f32 %v8458_v9, %v862_v35 }
 0x520   :  { %v7924_v39 = vpop.eup %7923  ;;  %v848_v41 = vadd.f32 1e-05, %v839_v36  ;;  %6635 = vmatprep.mubr.msk.f32.mxu0 %vm8199_vm1, %v11170_v38 }
 0x521   :  { %v829_v42 = vpop.xlane.xlu0 %828  ;;  %v888_v46 = vadd.f32 %v8462_v16, %v875_v49  ;;  %v863_v47 = vmul.f32 %v7924_v39, %v8401_v59 }
 0x522   :  { %7929 = vrsqrt.f32 %v848_v41  ;;  %v840_v52 = vmul.f32 0.03125, %v829_v42 }
 0x523   :  { %6636 = vmatmul.mubr.msk.f32.gmra.mrb[16].mxu0 %vm750_vm3, %v888_v46  ;;  %v876_v54 = vmul.f32 %v8458_v9, %v863_v47 }
 0x524   :  { %v7926_v55 = vpop.eup %7925  ;;  %v849_v56 = vadd.f32 1e-05, %v840_v52  ;;  %6638 = vmatprep.mubr.msk.f32.mxu0 %vm8199_vm1, %v11170_v38 }
 0x525   :  { %v832_v57 = vpop.xlane.xlu1 %831  ;;  %v889_v58 = vadd.f32 %v8462_v16, %v876_v54  ;;  %v864_v60 = vmul.f32 %v7926_v55, %v8407_v1 }
 0x526   :  { %7931 = vrsqrt.f32 %v849_v56  ;;  %v841_v61 = vmul.f32 0.03125, %v832_v57 }
 0x527   :  { %6639 = vmatmul.mubr.msk.f32.gmra.mrb[18].mxu0 %vm750_vm3, %v889_v58  ;;  %v877_v59 = vmul.f32 %v8458_v9, %v864_v60 }
 0x528   :  { %v7928_v63 = vpop.eup %7927  ;;  %v850_v0 = vadd.f32 1e-05, %v841_v61  ;;  %6641 = vmatprep.mubr.msk.f32.mxu0 %vm8199_vm1, %v11170_v38 }
 0x529   :  { %v890_v2 = vadd.f32 %v8462_v16, %v877_v59  ;;  %v865_v4 = vmul.f32 %v7928_v63, %v8413_v7  ;;  %v8523_v28 = vpop.permute.xlu1 %1041 }
 0x52a   :  { %7933 = vrsqrt.f32 %v850_v0  ;;  %11250 = vst [vmem:[#allocation19_spill] sm:$0xff] %v8523_v28 }
 0x52b   :  { %6642 = vmatmul.mubr.msk.f32.gmra.mrb[20].mxu0 %vm750_vm3, %v890_v2  ;;  %v878_v1 = vmul.f32 %v8458_v9, %v865_v4 }
 0x52c   :  { %v7930_v5 = vpop.eup %7929  ;;  %6644 = vmatprep.mubr.msk.f32.mxu0 %vm8199_vm1, %v11170_v38 }
 0x52d   :  { %v891_v6 = vadd.f32 %v8462_v16, %v878_v1  ;;  %v866_v10 = vmul.f32 %v7930_v5, %v8419_v14 }
 0x52f   :  { %6645 = vmatmul.mubr.msk.f32.gmra.mrb[22].mxu0 %vm750_vm3, %v891_v6  ;;  %v879_v11 = vmul.f32 %v8458_v9, %v866_v10 }
 0x530   :  { %v7932_v12 = vpop.eup %7931  ;;  %6647 = vmatprep.mubr.msk.f32.mxu0 %vm8199_vm1, %v11170_v38 }
 0x531   :  { %v892_v7 = vadd.f32 %v8462_v16, %v879_v11  ;;  %v867_v15 = vmul.f32 %v7932_v12, %v8425_v20  ;;  %v8556_v11 = vpop.permute.xlu0 %1043 }
 0x532   :  { %11254 = vst [vmem:[#allocation23_spill] sm:$0xff] %v8556_v11 }
 0x533   :  { %6648 = vmatmul.mubr.msk.f32.gmra.mrb[24].mxu0 %vm750_vm3, %v892_v7  ;;  %v880_v17 = vmul.f32 %v8458_v9, %v867_v15 }
 0x534   :  { %v7934_v19 = vpop.eup %7933  ;;  %6650 = vmatprep.mubr.msk.f32.mxu0 %vm8199_vm1, %v11170_v38 }
 0x535   :  { %v893_v14 = vadd.f32 %v8462_v16, %v880_v17  ;;  %v868_v21 = vmul.f32 %v7934_v19, %v8431_v30 }
 0x537   :  { %6651 = vmatmul.mubr.msk.f32.gmra.mrb[26].mxu0 %vm750_vm3, %v893_v14  ;;  %v881_v22 = vmul.f32 %v8458_v9, %v868_v21 }
 0x538   :  { %6653 = vmatprep.mubr.msk.f32.mxu0 %vm8199_vm1, %v11170_v38 }
 0x539   :  { %v894_v20 = vadd.f32 %v8462_v16, %v881_v22 }
 0x53b   :  { %6654 = vmatmul.mubr.msk.f32.gmra.mrb[28].mxu0 %vm750_vm3, %v894_v20  ;;  %v8569_v20 = vpop.permute.xlu1 %1045 }
 0x53c   :  { %6664 = vmatprep.mubr.msk.f32.mxu0 %vm8199_vm1, %v11170_v38  ;;  %11256 = vst [vmem:[#allocation25_spill] sm:$0xff] %v8569_v20 }
 0x5ee   :  { %v997_v25 = vpop.f32.mrb[12].mxu0 }
 0x5ef   :  { %v8517_v26 = vadd.f32 %v5735_v24, %v997_v25  ;;  %v6631_v27 = vpop.f32.mrb[13].mxu0 }
 0x5f1   :  { %6046 = vmatprep.mubr.msk.f32.mxu1 %vm750_vm3, %v8517_v26  ;;  %v1053_v16 = vmul.f32 %v8523_v28, %v8517_v26  ;;  %v1062_v22 = vmul.f32 %v8556_v11, %v8517_v26 }
 0x5f2   :  { %v1002_v30 = vpop.f32.mrb[14].mxu0 }
 0x5f3   :  { %v8521_v9 = vadd.f32 %v5735_v24, %v1002_v30  ;;  %v6634_v45 = vpop.f32.mrb[15].mxu0 }
 0x5f4   :  { %v1071_v45 = vmul.f32 %v8569_v20, %v8517_v26 }
 0x5f5   :  { %v1054_v31 = vmul.f32 %v8523_v28, %v8521_v9  ;;  %v1072_v27 = vmul.f32 %v8569_v20, %v8521_v9 }
 0x5f6   :  { %v1007_v32 = vpop.f32.mrb[16].mxu0 }
 0x5f7   :  { %v6637_v34 = vpop.f32.mrb[17].mxu0  ;;  %v7546_v35 = vpack.i.bf16 %v1054_v31, %v1053_v16  ;;  %v8529_v36 = vadd.f32 %v5735_v24, %v1007_v32  ;;  %v1063_v16 = vmul.f32 %v8556_v11, %v8521_v9  ;;  %v7551_v31 = vpack.i.bf16 %v1072_v27, %v1071_v45 }
 0x5f9   :  { %7547 = vrot.lane.b32.xlu1 %v7546_v35, %s8202_s30  ;;  %v1055_v42 = vmul.f32 %v8523_v28, %v8529_v36  ;;  %v1064_v30 = vmul.f32 %v8556_v11, %v8529_v36 }
 0x5fa   :  { %v1012_v49 = vpop.f32.mrb[18].mxu0 }
 0x5fb   :  { %v8532_v39 = vadd.f32 %v5735_v24, %v1012_v49  ;;  %v6640_v41 = vpop.f32.mrb[19].mxu0  ;;  %v7596_v32 = vpack.i.bf16 %v1064_v30, %v1063_v16  ;;  %v1073_v49 = vmul.f32 %v8569_v20, %v8529_v36 }
 0x5fd   :  { %v1056_v46 = vmul.f32 %v8523_v28, %v8532_v39  ;;  %v1074_v34 = vmul.f32 %v8569_v20, %v8532_v39  ;;  %v1065_v41 = vmul.f32 %v8556_v11, %v8532_v39 }
 0x5fe   :  { %v1017_v47 = vpop.f32.mrb[20].mxu0 }
 0x5ff   :  { %v6643_v52 = vpop.f32.mrb[21].mxu0  ;;  %v7556_v54 = vpack.i.bf16 %v1056_v46, %v1055_v42  ;;  %v8538_v55 = vadd.f32 %v5735_v24, %v1017_v47  ;;  %v8591_v42 = vpop.permute.xlu1 %1047  ;;  %v7561_v46 = vpack.i.bf16 %v1074_v34, %v1073_v49  ;;  %v8663_v34 = vld [vmem:[#allocation2 + $0xe0] sm:$0xff]  ;;  %v8683_v49 = vld [vmem:[#allocation2 + $0xf0] sm:$0xff] }
 0x600   :  { %11257 = vst [vmem:[#allocation26_spill] sm:$0xff] %v8591_v42 }
 0x601   :  { %7557 = vrot.lane.b32.xlu1 %v7556_v54, %s8202_s30  ;;  %v1057_v60 = vmul.f32 %v8523_v28, %v8538_v55  ;;  %v1066_v35 = vmul.f32 %v8556_v11, %v8538_v55  ;;  %v1084_v54 = vmul.f32 %v8591_v42, %v8538_v55 }
 0x602   :  { %v1022_v56 = vpop.f32.mrb[22].mxu0 }
 0x603   :  { %v8541_v57 = vadd.f32 %v5735_v24, %v1022_v56  ;;  %v6646_v58 = vpop.f32.mrb[23].mxu0  ;;  %v7606_v47 = vpack.i.bf16 %v1066_v35, %v1065_v41  ;;  %v1075_v56 = vmul.f32 %v8569_v20, %v8538_v55  ;;  %v8673_v35 = vld [vmem:[#allocation2 + $0xe8] sm:$0xff]  ;;  %v8689_v41 = vld [vmem:[#allocation2 + $0xf8] sm:$0xff] }
 0x604   :  { %v1083_v58 = vmul.f32 %v8591_v42, %v8532_v39 }
 0x605   :  { %11251 = vst [vmem:[#allocation20_spill] sm:$0xff] %v8541_v57  ;;  %v1058_v61 = vmul.f32 %v8523_v28, %v8541_v57  ;;  %v1076_v52 = vmul.f32 %v8569_v20, %v8541_v57  ;;  %v1067_v45 = vmul.f32 %v8556_v11, %v8541_v57 }
 0x606   :  { %v1027_v59 = vpop.f32.mrb[24].mxu0 }
 0x607   :  { %v6649_v63 = vpop.f32.mrb[25].mxu0  ;;  %v7566_v0 = vpack.i.bf16 %v1058_v61, %v1057_v60  ;;  %v8547_v2 = vadd.f32 %v5735_v24, %v1027_v59  ;;  %v7571_v60 = vpack.i.bf16 %v1076_v52, %v1075_v56  ;;  %v7616_v61 = vpack.i.bf16 %v1084_v54, %v1083_v58 }
 0x609   :  { %11252 = vst [vmem:[#allocation21_spill] sm:$0xff] %v8547_v2  ;;  %7567 = vrot.lane.b32.xlu1 %v7566_v0, %s8202_s30  ;;  %v1059_v6 = vmul.f32 %v8523_v28, %v8547_v2  ;;  %v1077_v0 = vmul.f32 %v8569_v20, %v8547_v2  ;;  %v1068_v30 = vmul.f32 %v8556_v11, %v8547_v2 }
 0x60a   :  { %v1032_v4 = vpop.f32.mrb[26].mxu0 }
 0x60b   :  { %v8550_v1 = vadd.f32 %v5735_v24, %v1032_v4  ;;  %v6652_v5 = vpop.f32.mrb[27].mxu0  ;;  %v7621_v16 = vpack.i.bf16 %v1068_v30, %v1067_v45 }
 0x60d   :  { %11253 = vst [vmem:[#allocation22_spill] sm:$0xff] %v8550_v1  ;;  %v1060_v10 = vmul.f32 %v8523_v28, %v8550_v1  ;;  %v1069_v19 = vmul.f32 %v8556_v11, %v8550_v1  ;;  %v1078_v59 = vmul.f32 %v8569_v20, %v8550_v1  ;;  %v1087_v4 = vmul.f32 %v8591_v42, %v8550_v1 }
 0x60e   :  { %v1037_v12 = vpop.f32.mrb[28].mxu0 }
 0x60f   :  { %v8558_v7 = vadd.f32 %v5735_v24, %v1037_v12  ;;  %v6655_v15 = vpop.f32.mrb[29].mxu0  ;;  %v7576_v17 = vpack.i.bf16 %v1060_v10, %v1059_v6  ;;  %v7581_v5 = vpack.i.bf16 %v1078_v59, %v1077_v0  ;;  %v1080_v12 = vmul.f32 %v8591_v42, %v8517_v26 }
 0x610   :  { %v8619_v15 = vld [vmem:[#allocation2 + $0xc0] sm:$0xff] }
 0x611   :  { %11255 = vst [vmem:[#allocation24_spill] sm:$0xff] %v8558_v7  ;;  %7577 = vrot.lane.b32.xlu1 %v7576_v17, %s8202_s30  ;;  %v1070_v14 = vmul.f32 %v8556_v11, %v8558_v7  ;;  %v1061_v21 = vmul.f32 %v8523_v28, %v8558_v7  ;;  %v1088_v63 = vmul.f32 %v8591_v42, %v8558_v7 }
 0x612   :  { %v1079_v10 = vmul.f32 %v8569_v20, %v8558_v7 }
 0x613   :  { %v7541_v24 = vpack.i.bf16 %v1070_v14, %v1069_v19  ;;  %v7586_v25 = vpack.i.bf16 %v1062_v22, %v1061_v21  ;;  %v7626_v6 = vpack.i.bf16 %v1088_v63, %v1087_v4  ;;  %v1082_v19 = vmul.f32 %v8591_v42, %v8529_v36 }
 0x614   :  { %v7591_v17 = vpack.i.bf16 %v1080_v12, %v1079_v10  ;;  %v1081_v14 = vmul.f32 %v8591_v42, %v8521_v9  ;;  %v1086_v22 = vmul.f32 %v8591_v42, %v8547_v2  ;;  %v11259_v4 = vmov 0 }
 0x615   :  { %7542 = vrot.lane.b32.xlu0 %v7541_v24, %s8202_s30  ;;  %7587 = vrot.lane.b32.xlu1 %v7586_v25, %s8202_s30  ;;  %v1085_v24 = vmul.f32 %v8591_v42, %v8541_v57  ;;  %v8635_v25 = vld [vmem:[#allocation2 + $0xc8] sm:$0xff]  ;;  %v11260_v4 = vsel %vm8719_vm4, 4294967295, %v11259_v4  ;;  %v11265_v42 = vmov 0.0  }
 0x616   :  { %v7601_v21 = vpack.i.bf16 %v1082_v19, %v1081_v14  ;;  %11261 = vst [vmem:[#allocation28_spill] sm:$0xff] %v11260_v4 }
 0x617   :  { %v7611_v27 = vpack.i.bf16 %v1086_v22, %v1085_v24 }
 0x619   :  { %7552 = vrot.lane.b32.xlu0 %v7551_v31, %s8202_s30  ;;  %7597 = vrot.lane.b32.xlu1 %v7596_v32, %s8202_s30  ;;  %v8647_v31 = vld [vmem:[#allocation2 + $0xd0] sm:$0xff]  ;;  %v8657_v32 = vld [vmem:[#allocation2 + $0xd8] sm:$0xff] }
 0x61d   :  { %7562 = vrot.lane.b32.xlu0 %v7561_v46, %s8202_s30  ;;  %7607 = vrot.lane.b32.xlu1 %v7606_v47, %s8202_s30  ;;  %v8699_v46 = vld [vmem:[#allocation2 + $0x100] sm:$0xff] }
 0x61e   :  { %11258 = vst [vmem:[#allocation27_spill] sm:$0xff] %v8699_v46 }
 0x621   :  { %7572 = vrot.lane.b32.xlu0 %v7571_v60, %s8202_s30  ;;  %7617 = vrot.lane.b32.xlu1 %v7616_v61, %s8202_s30 }
 0x625   :  { %7582 = vrot.lane.b32.xlu0 %v7581_v5, %s8202_s30  ;;  %7627 = vrot.lane.b32.xlu1 %v7626_v6, %s8202_s30 }
 0x629   :  { %7592 = vrot.lane.b32.xlu0 %v7591_v17, %s8202_s30  ;;  %666 = vrot.lane.b32.xlu1 %v8619_v15, %s8203_s3 }
 0x62d   :  { %7602 = vrot.lane.b32.xlu0 %v7601_v21, %s8202_s30  ;;  %1091 = vrot.lane.b32.xlu1 %v8447_v50, %s8204_s4 }
 0x631   :  { %7612 = vrot.lane.b32.xlu0 %v7611_v27, %s8202_s30  ;;  %668 = vrot.lane.b32.xlu1 %v8635_v25, %s8203_s3 }
 0x635   :  { %7622 = vrot.lane.b32.xlu0 %v7621_v16, %s8202_s30  ;;  %695 = vrot.lane.b32.xlu1 %v8635_v25, %s8205_s5 }
 0x639   :  { %639 = vrot.lane.b32.xlu0 %v8619_v15, %s8206_s6  ;;  %643 = vrot.lane.b32.xlu1 %v8647_v31, %s8206_s6 }
 0x63d   :  { %693 = vrot.lane.b32.xlu0 %v8619_v15, %s8205_s5  ;;  %697 = vrot.lane.b32.xlu1 %v8647_v31, %s8205_s5 }
 0x641   :  { %641 = vrot.lane.b32.xlu0 %v8635_v25, %s8206_s6  ;;  %672 = vrot.lane.b32.xlu1 %v8657_v32, %s8203_s3 }
 0x645   :  { %1089 = vrot.lane.b32.xlu0 %v8444_v48, %s8204_s4  ;;  %647 = vrot.lane.b32.xlu1 %v8663_v34, %s8206_s6 }
 0x649   :  { %1093 = vrot.lane.b32.xlu0 %v8450_v51, %s8204_s4  ;;  %701 = vrot.lane.b32.xlu1 %v8663_v34, %s8205_s5 }
 0x64d   :  { %676 = vrot.lane.b32.xlu1 %v8673_v35, %s8203_s3  ;;  %670 = vrot.lane.b32.xlu0 %v8647_v31, %s8203_s3 }
 0x651   :  { %1095 = vrot.lane.b32.xlu1 %v8454_v53, %s8204_s4  ;;  %645 = vrot.lane.b32.xlu0 %v8657_v32, %s8206_s6 }
 0x655   :  { %699 = vrot.lane.b32.xlu0 %v8657_v32, %s8205_s5  ;;  %678 = vrot.lane.b32.xlu1 %v8683_v49, %s8203_s3 }
 0x659   :  { %674 = vrot.lane.b32.xlu0 %v8663_v34, %s8203_s3  ;;  %653 = vrot.lane.b32.xlu1 %v8689_v41, %s8206_s6 }
 0x65d   :  { %649 = vrot.lane.b32.xlu0 %v8673_v35, %s8206_s6  ;;  %707 = vrot.lane.b32.xlu1 %v8689_v41, %s8205_s5 }
 0x661   :  { %703 = vrot.lane.b32.xlu0 %v8673_v35, %s8205_s5  ;;  %682 = vrot.lane.b32.xlu1 %v8699_v46, %s8203_s3 }
 0x665   :  { %651 = vrot.lane.b32.xlu0 %v8683_v49, %s8206_s6 }
 0x669   :  { %705 = vrot.lane.b32.xlu0 %v8683_v49, %s8205_s5 }
 0x66b   :  { %v7548_v47 = vpop.permute.xlu1 %7547 }
 0x66c   :  { %v7550_v58 = vunpack.i.h.bf16 %v7548_v47  ;;  %v7549_v60 = vunpack.i.l.bf16 %v7548_v47 }
 0x66d   :  { %680 = vrot.lane.b32.xlu0 %v8689_v41, %s8203_s3 }
 0x66e   :  { %v7192_v6 = vpack.c.bf16 %v7550_v58, %v7549_v60 }
 0x671   :  { %655 = vrot.lane.b32.xlu0 %v8699_v46, %s8206_s6 }
 0x673   :  { %v7558_v52 = vpop.permute.xlu1 %7557 }
 0x674   :  { %v7560_v21 = vunpack.i.h.bf16 %v7558_v52  ;;  %v7559_v22 = vunpack.i.l.bf16 %v7558_v52 }
 0x675   :  { %709 = vrot.lane.b32.xlu0 %v8699_v46, %s8205_s5 }
 0x676   :  { %v7198_v16 = vpack.c.bf16 %v7560_v21, %v7559_v22 }
 0x67b   :  { %v7568_v54 = vpop.permute.xlu1 %7567 }
 0x67c   :  { %v7570_v52 = vunpack.i.h.bf16 %v7568_v54 }
 0x683   :  { %v7578_v56 = vpop.permute.xlu1 %7577 }
 0x684   :  { %v7580_v21 = vunpack.i.h.bf16 %v7578_v56  ;;  %v7579_v22 = vunpack.i.l.bf16 %v7578_v56 }
 0x687   :  { %v7543_v61 = vpop.permute.xlu0 %7542  ;;  %v8715_v59 = vpop.permute.xlu1 %7587 }
 0x688   :  { %v7545_v63 = vunpack.i.h.bf16 %v7543_v61  ;;  %v7544_v0 = vunpack.i.l.bf16 %v7543_v61  ;;  %v7569_v61 = vunpack.i.l.bf16 %v7568_v54  ;;  %v7590_v56 = vunpack.i.h.bf16 %v8715_v59 }
 0x68a   :  { %v7189_v5 = vpack.c.bf16 %v7545_v63, %v7544_v0 }
 0x68b   :  { %v7553_v10 = vpop.permute.xlu0 %7552  ;;  %v8723_v12 = vpop.permute.xlu1 %7597 }
 0x68c   :  { %v7555_v17 = vunpack.i.h.bf16 %v7553_v10  ;;  %v7554_v19 = vunpack.i.l.bf16 %v7553_v10  ;;  %7191 = vmatprep.subr.msk.bf16.mxu1 %vm8719_vm4, %v7189_v5  ;;  %v7204_v10 = vpack.c.bf16 %v7570_v52, %v7569_v61 }
 0x68d   :  { %7194 = vmatpush3.bf16.xpose.msk.msra.mxu1 %vm8719_vm4, %v7192_v6 }
 0x68e   :  { %v7195_v14 = vpack.c.bf16 %v7555_v17, %v7554_v19 }
 0x68f   :  { %v7563_v24 = vpop.permute.xlu0 %7562  ;;  %v8729_v27 = vpop.permute.xlu1 %7607 }
 0x690   :  { %v7565_v30 = vunpack.i.h.bf16 %v7563_v24  ;;  %v7564_v45 = vunpack.i.l.bf16 %v7563_v24  ;;  %7197 = vmatprep.subr.msk.bf16.mxu1 %vm8719_vm4, %v7195_v14 }
 0x692   :  { %v7201_v60 = vpack.c.bf16 %v7565_v30, %v7564_v45 }
 0x693   :  { %v7573_v47 = vpop.permute.xlu0 %7572  ;;  %v8733_v58 = vpop.permute.xlu1 %7617 }
 0x694   :  { %v7575_v5 = vunpack.i.h.bf16 %v7573_v47  ;;  %v7574_v6 = vunpack.i.l.bf16 %v7573_v47 }
 0x695   :  { %7200 = vmatpush3.bf16.xpose.msk.msra.mxu1 %vm8719_vm4, %v7198_v16  ;;  %v7210_v16 = vpack.c.bf16 %v7580_v21, %v7579_v22 }
 0x696   :  { %7203 = vmatprep.subr.msk.bf16.mxu1 %vm8719_vm4, %v7201_v60  ;;  %v7207_v14 = vpack.c.bf16 %v7575_v5, %v7574_v6 }
 0x697   :  { %v7583_v63 = vpop.permute.xlu0 %7582  ;;  %v7628_v0 = vpop.permute.xlu1 %7627 }
 0x698   :  { %v7585_v54 = vunpack.i.h.bf16 %v7583_v63  ;;  %v7584_v45 = vunpack.i.l.bf16 %v7583_v63 }
 0x69a   :  { %v7213_v52 = vpack.c.bf16 %v7585_v54, %v7584_v45  ;;  %v7630_v54 = vunpack.i.h.bf16 %v7628_v0  ;;  %v7629_v45 = vunpack.i.l.bf16 %v7628_v0 }
 0x69b   :  { %v7593_v17 = vpop.permute.xlu0 %7592  ;;  %v8739_v19 = vpop.permute.xlu1 %666 }
 0x69c   :  { %v7595_v21 = vunpack.i.h.bf16 %v7593_v17  ;;  %v7594_v22 = vunpack.i.l.bf16 %v7593_v17  ;;  %v7600_v17 = vunpack.i.h.bf16 %v8723_v12 }
 0x69d   :  { %7206 = vmatpush3.bf16.xpose.msk.msra.mxu1 %vm8719_vm4, %v7204_v10  ;;  %v7589_v10 = vunpack.i.l.bf16 %v8715_v59  ;;  %v7242_v59 = vpack.c.bf16 %v7630_v54, %v7629_v45 }
 0x69e   :  { %7209 = vmatprep.subr.msk.bf16.mxu1 %vm8719_vm4, %v7207_v14 }
 0x69f   :  { %v7603_v24 = vpop.permute.xlu0 %7602  ;;  %v8745_v30 = vpop.permute.xlu1 %1091 }
 0x6a0   :  { %11262 = vst [vmem:[#allocation29_spill] sm:$0xff] %v8745_v30 }
 0x6a3   :  { %v7613_v47 = vpop.permute.xlu0 %7612  ;;  %v8747_v60 = vpop.permute.xlu1 %668 }
 0x6a4   :  { %v7615_v61 = vunpack.i.h.bf16 %v7613_v47  ;;  %v7614_v5 = vunpack.i.l.bf16 %v7613_v47 }
 0x6a5   :  { %7212 = vmatpush3.bf16.xpose.msk.msra.mxu1 %vm8719_vm4, %v7210_v16  ;;  %v7216_v16 = vpack.c.bf16 %v7590_v56, %v7589_v10  ;;  %v7605_v56 = vunpack.i.h.bf16 %v7603_v24  ;;  %v7604_v10 = vunpack.i.l.bf16 %v7603_v24 }
 0x6a6   :  { %v7238_v6 = vpack.c.bf16 %v7615_v61, %v7614_v5  ;;  %7215 = vmatprep.subr.msk.bf16.mxu1 %vm8719_vm4, %v7213_v52  ;;  %v7219_v61 = vpack.c.bf16 %v7595_v21, %v7594_v22  ;;  %v7599_v5 = vunpack.i.l.bf16 %v8723_v12  ;;  %v7610_v12 = vunpack.i.h.bf16 %v8729_v27 }
 0x6a7   :  { %v8755_v14 = vpop.permute.xlu0 %7622  ;;  %v8757_v63 = vpop.permute.xlu1 %695  ;;  %v7225_v45 = vpack.c.bf16 %v7605_v56, %v7604_v10 }
 0x6a8   :  { %7240 = vmatpush3.bf16.xpose.msk.msra.mxu0 %vm8719_vm4, %v7238_v6  ;;  %v7222_v21 = vpack.c.bf16 %v7600_v17, %v7599_v5  ;;  %v7619_v17 = vunpack.i.l.bf16 %v8733_v58  ;;  %v7625_v11 = vunpack.i.h.bf16 %v8755_v14 }
 0x6a9   :  { %7241 = vmatprep.subr.bf16.mxu0 %v11168_v37 }
 0x6ab   :  { %v8762_v47 = vpop.permute.xlu0 %639  ;;  %v8764_v52 = vpop.permute.xlu1 %643 }
 0x6ad   :  { %7218 = vmatpush3.bf16.xpose.msk.msra.mxu1 %vm8719_vm4, %v7216_v16  ;;  %v7609_v16 = vunpack.i.l.bf16 %v8729_v27 }
 0x6ae   :  { %7221 = vmatprep.subr.msk.bf16.mxu1 %vm8719_vm4, %v7219_v61 }
 0x6af   :  { %v8772_v6 = vpop.permute.xlu0 %693  ;;  %v8774_v0 = vpop.permute.xlu1 %697 }
 0x6b0   :  { %7244 = vmatpush3.bf16.xpose.msk.msra.mxu0 %vm8719_vm4, %v7242_v59  ;;  %v7620_v59 = vunpack.i.h.bf16 %v8733_v58 }
 0x6b3   :  { %v8778_v22 = vpop.permute.xlu0 %641  ;;  %v8780_v54 = vpop.permute.xlu1 %672 }
 0x6b5   :  { %7224 = vmatpush3.bf16.xpose.msk.msra.mxu1 %vm8719_vm4, %v7222_v21 }
 0x6b6   :  { %7227 = vmatprep.subr.msk.bf16.mxu1 %vm8719_vm4, %v7225_v45  ;;  %v7228_v45 = vpack.c.bf16 %v7610_v12, %v7609_v16 }
 0x6b7   :  { %v8788_v24 = vpop.permute.xlu0 %1089  ;;  %v8790_v61 = vpop.permute.xlu1 %647  ;;  %6665 = vmatmul.mubr.msk.f32.vlgmr.msra.gmra.mrb[30].mxu0 %vm750_vm3, %v8517_v26 }
 0x6b8   :  { %11263 = vst [vmem:[#allocation30_spill] sm:$0xff] %v8788_v24  ;;  %6667 = vmatprep.mubr.msk.f32.mxu0 %vm8199_vm1, %v11170_v38  ;;  %v1101_v5 = vmul.f32 %v8788_v24, %v8517_v26  ;;  %v1102_v27 = vmul.f32 %v8788_v24, %v8521_v9  ;;  %v1103_v10 = vmul.f32 %v8788_v24, %v8529_v36 }
 0x6b9   :  { %v1104_v21 = vmul.f32 %v8788_v24, %v8532_v39  ;;  %v7231_v38 = vpack.c.bf16 %v7620_v59, %v7619_v17  ;;  %v1105_v12 = vmul.f32 %v8788_v24, %v8538_v55  ;;  %v1106_v16 = vmul.f32 %v8788_v24, %v8541_v57 }
 0x6ba   :  { %v7631_v56 = vpack.i.bf16 %v1102_v27, %v1101_v5 }
 0x6bb   :  { %v8806_v37 = vpop.permute.xlu0 %1093  ;;  %v8808_v58 = vpop.permute.xlu1 %701  ;;  %6668 = vmatmul.mubr.msk.f32.gmra.mrb[32].mxu0 %vm750_vm3, %v8521_v9  ;;  %v7641_v59 = vpack.i.bf16 %v1104_v21, %v1103_v10  ;;  %v1107_v10 = vmul.f32 %v8788_v24, %v8547_v2  ;;  %v1108_v21 = vmul.f32 %v8788_v24, %v8550_v1 }
 0x6bc   :  { %11264 = vst [vmem:[#allocation31_spill] sm:$0xff] %v8806_v37  ;;  %7632 = vrot.lane.b32.xlu0 %v7631_v56, %s8204_s4  ;;  %6670 = vmatprep.mubr.msk.f32.mxu0 %vm8199_vm1, %v11265_v42  ;;  %v1119_v5 = vmul.f32 %v8806_v37, %v8517_v26  ;;  %v1120_v27 = vmul.f32 %v8806_v37, %v8521_v9 }
 0x6bd   :  { %7230 = vmatpush3.bf16.xpose.msk.msra.mxu1 %vm8719_vm4, %v7228_v45  ;;  %v1121_v56 = vmul.f32 %v8806_v37, %v8529_v36  ;;  %v1122_v20 = vmul.f32 %v8806_v37, %v8532_v39  ;;  %v7624_v45 = vunpack.i.l.bf16 %v8755_v14 }
 0x6be   :  { %7233 = vmatprep.subr.msk.bf16.mxu1 %vm8719_vm4, %v7231_v38  ;;  %v7636_v17 = vpack.i.bf16 %v1120_v27, %v1119_v5  ;;  %v7651_v5 = vpack.i.bf16 %v1106_v16, %v1105_v12  ;;  %v1123_v27 = vmul.f32 %v8806_v37, %v8538_v55  ;;  %v1112_v12 = vmul.f32 %v8745_v30, %v8529_v36 }
 0x6bf   :  { %6671 = vmatmul.mubr.msk.f32.gmra.mrb[34].mxu0 %vm750_vm3, %v8529_v36  ;;  %v8837_v38 = vpop.permute.xlu1 %676  ;;  %v7646_v14 = vpack.i.bf16 %v1122_v20, %v1121_v56  ;;  %v1111_v20 = vmul.f32 %v8745_v30, %v8521_v9  ;;  %v1125_v56 = vmul.f32 %v8806_v37, %v8547_v2 }
 0x6c0   :  { %7642 = vrot.lane.b32.xlu0 %v7641_v59, %s8204_s4  ;;  %7637 = vrot.lane.b32.xlu1 %v7636_v17, %s8204_s4  ;;  %v1124_v59 = vmul.f32 %v8806_v37, %v8541_v57  ;;  %v7234_v17 = vpack.c.bf16 %v7625_v11, %v7624_v45  ;;  %v7661_v11 = vpack.i.bf16 %v1108_v21, %v1107_v10 }
 0x6c1   :  { %6673 = vmatprep.mubr.msk.f32.mxu0 %vm8199_vm1, %v11265_v42  ;;  %v1126_v45 = vmul.f32 %v8806_v37, %v8550_v1  ;;  %v1113_v10 = vmul.f32 %v8745_v30, %v8532_v39  ;;  %v1114_v21 = vmul.f32 %v8745_v30, %v8538_v55 }
 0x6c2   :  { %v7656_v16 = vpack.i.bf16 %v1124_v59, %v1123_v27  ;;  %v7671_v59 = vpack.i.bf16 %v1112_v12, %v1111_v20  ;;  %v1115_v20 = vmul.f32 %v8745_v30, %v8541_v57  ;;  %v1116_v12 = vmul.f32 %v8745_v30, %v8547_v2 }
 0x6c3   :  { %6674 = vmatmul.mubr.msk.f32.gmra.mrb[36].mxu0 %vm750_vm3, %v8532_v39  ;;  %v7666_v27 = vpack.i.bf16 %v1126_v45, %v1125_v56 }
 0x6c4   :  { %7652 = vrot.lane.b32.xlu0 %v7651_v5, %s8204_s4  ;;  %7647 = vrot.lane.b32.xlu1 %v7646_v14, %s8204_s4  ;;  %v11266_v5 = vmov 0.0|0.0   ;;  %v8866_v14 = vpop.permute.xlu1 %1095 }
 0x6c5   :  { %7236 = vmatpush3.bf16.xpose.msk.msra.mxu1 %vm8719_vm4, %v7234_v17  ;;  %6676 = vmatprep.mubr.msk.f32.mxu0 %vm8199_vm1, %v11265_v42  ;;  %11267 = vst [vmem:[#allocation32_spill] sm:$0xff] %v8866_v14  ;;  %v1129_v17 = vmul.f32 %v8866_v14, %v8521_v9  ;;  %v1130_v4 = vmul.f32 %v8866_v14, %v8529_v36 }
 0x6c6   :  { %7277 = vmatprep.subr.bf16.mxu1 %v11266_v5  ;;  %v1131_v56 = vmul.f32 %v8866_v14, %v8532_v39  ;;  %v1132_v45 = vmul.f32 %v8866_v14, %v8538_v55 }
 0x6c7   :  { %6677 = vmatmul.mubr.msk.f32.gmra.mrb[38].mxu0 %vm750_vm3, %v8538_v55 }
 0x6c8   :  { %7662 = vrot.lane.b32.xlu0 %v7661_v11, %s8204_s4  ;;  %7657 = vrot.lane.b32.xlu1 %v7656_v16, %s8204_s4  ;;  %v7681_v11 = vpack.i.bf16 %v1114_v21, %v1113_v10  ;;  %v7676_v16 = vpack.i.bf16 %v1130_v4, %v1129_v17  ;;  %v1117_v4 = vmul.f32 %v8745_v30, %v8550_v1 }
 0x6c9   :  { %6679 = vmatprep.mubr.msk.f32.mxu0 %vm8199_vm1, %v11265_v42  ;;  %v7691_v10 = vpack.i.bf16 %v1116_v12, %v1115_v20  ;;  %v7686_v21 = vpack.i.bf16 %v1132_v45, %v1131_v56  ;;  %v1128_v12 = vmul.f32 %v8866_v14, %v8517_v26 }
 0x6cb   :  { %6680 = vmatmul.mubr.msk.f32.gmra.mrb[40].mxu0 %vm750_vm3, %v8541_v57 }
 0x6cc   :  { %7667 = vrot.lane.b32.xlu1 %v7666_v27, %s8204_s4  ;;  %7672 = vrot.lane.b32.xlu0 %v7671_v59, %s8204_s4  ;;  %v1109_v27 = vmul.f32 %v8788_v24, %v8558_v7  ;;  %v1118_v59 = vmul.f32 %v8745_v30, %v8558_v7 }
 0x6cd   :  { %6047 = vmatmul.mubr.msk.f32.vlgmr.msra.gmra.mrb[22].mxu1 %vm750_vm3, %v8517_v26  ;;  %6682 = vmatprep.mubr.msk.f32.mxu0 %vm8199_vm1, %v11265_v42 }
 0x6ce   :  { %6048 = vmatprep.mubr.msk.f32.mxu1 %vm750_vm3, %v8521_v9  ;;  %v7696_v20 = vpack.i.bf16 %v1118_v59, %v1117_v4 }
 0x6cf   :  { %6683 = vmatmul.mubr.msk.f32.gmra.mrb[42].mxu0 %vm750_vm3, %v8547_v2 }
 0x6d0   :  { %7682 = vrot.lane.b32.xlu0 %v7681_v11, %s8204_s4  ;;  %7677 = vrot.lane.b32.xlu1 %v7676_v16, %s8204_s4 }
 0x6d1   :  { %6049 = vmatmul.mubr.msk.f32.gmra.mrb[24].mxu1 %vm750_vm3, %v8521_v9  ;;  %6685 = vmatprep.mubr.msk.f32.mxu0 %vm8199_vm1, %v11265_v42  ;;  %v1110_v9 = vmul.f32 %v8745_v30, %v8517_v26  ;;  %v8957_v26 = vpop.permute.xlu0 %670 }
 0x6d2   :  { %6050 = vmatprep.mubr.msk.f32.mxu1 %vm750_vm3, %v8529_v36 }
 0x6d3   :  { %6686 = vmatmul.mubr.msk.f32.gmra.mrb[44].mxu0 %vm750_vm3, %v8550_v1  ;;  %v7701_v17 = vpack.i.bf16 %v1110_v9, %v1109_v27 }
 0x6d4   :  { %7692 = vrot.lane.b32.xlu0 %v7691_v10, %s8204_s4  ;;  %7687 = vrot.lane.b32.xlu1 %v7686_v21, %s8204_s4  ;;  %v8977_v21 = vpop.permute.xlu1 %678 }
 0x6d5   :  { %6051 = vmatmul.mubr.msk.f32.gmra.mrb[26].mxu1 %vm750_vm3, %v8529_v36  ;;  %6688 = vmatprep.mubr.msk.f32.mxu0 %vm8199_vm1, %v11265_v42  ;;  %v1127_v36 = vmul.f32 %v8806_v37, %v8558_v7 }
 0x6d6   :  { %6052 = vmatprep.mubr.msk.f32.mxu1 %vm750_vm3, %v8532_v39 }
 0x6d7   :  { %6689 = vmatmul.mubr.msk.f32.gmra.mrb[46].mxu0 %vm750_vm3, %v8558_v7  ;;  %v7706_v11 = vpack.i.bf16 %v1128_v12, %v1127_v36 }
 0x6d8   :  { %7702 = vrot.lane.b32.xlu0 %v7701_v17, %s8204_s4  ;;  %7697 = vrot.lane.b32.xlu1 %v7696_v20, %s8204_s4  ;;  %v8981_v59 = vpop.permute.xlu1 %653 }
 0x6d9   :  { %6053 = vmatmul.mubr.msk.f32.gmra.mrb[28].mxu1 %vm750_vm3, %v8532_v39  ;;  %v8963_v39 = vpop.permute.xlu0 %645 }
 0x6da   :  { %6054 = vmatprep.mubr.msk.f32.mxu1 %vm750_vm3, %v8538_v55 }
 0x6dc   :  { %7707 = vrot.lane.b32.xlu1 %v7706_v11, %s8204_s4  ;;  %v8985_v17 = vpop.permute.xlu1 %707 }
 0x6dd   :  { %6055 = vmatmul.mubr.msk.f32.gmra.mrb[30].mxu1 %vm750_vm3, %v8538_v55  ;;  %v8965_v55 = vpop.permute.xlu0 %699  ;;  %11271 = vst [vmem:[#allocation36_spill] sm:$0xff] %v8985_v17 }
 0x6de   :  { %6056 = vmatprep.mubr.msk.f32.mxu1 %vm750_vm3, %v8541_v57 }
 0x6e0   :  { %v8989_v12 = vpop.permute.xlu1 %682 }
 0x6e1   :  { %6057 = vmatmul.mubr.msk.f32.gmra.mrb[32].mxu1 %vm750_vm3, %v8541_v57  ;;  %v8967_v16 = vpop.permute.xlu0 %674  ;;  %11273 = vst [vmem:[#allocation38_spill] sm:$0xff] %v8989_v12 }
 0x6e2   :  { %6058 = vmatprep.mubr.msk.f32.mxu1 %vm750_vm3, %v8547_v2 }
 0x6e5   :  { %6059 = vmatmul.mubr.msk.f32.gmra.mrb[34].mxu1 %vm750_vm3, %v8547_v2  ;;  %v8969_v56 = vpop.permute.xlu0 %649 }
 0x6e6   :  { %6060 = vmatprep.mubr.msk.f32.mxu1 %vm750_vm3, %v8550_v1 }
 0x6e9   :  { %6061 = vmatmul.mubr.msk.f32.gmra.mrb[36].mxu1 %vm750_vm3, %v8550_v1  ;;  %v8971_v45 = vpop.permute.xlu0 %703 }
 0x6ea   :  { %6062 = vmatprep.mubr.msk.f32.mxu1 %vm750_vm3, %v8558_v7  ;;  %11268 = vst [vmem:[#allocation33_spill] sm:$0xff] %v8971_v45 }
 0x6ed   :  { %6063 = vmatmul.mubr.msk.f32.gmra.mrb[38].mxu1 %vm750_vm3, %v8558_v7  ;;  %v8973_v4 = vpop.permute.xlu0 %651 }
 0x6ee   :  { %6699 = vmatprep.mubr.msk.f32.mxu1 %vm8199_vm1, %v11265_v42 }
 0x6f1   :  { %v8975_v10 = vpop.permute.xlu0 %705 }
 0x6f2   :  { %11269 = vst [vmem:[#allocation34_spill] sm:$0xff] %v8975_v10 }
 0x6f5   :  { %v8979_v27 = vpop.permute.xlu0 %680 }
 0x6f9   :  { %v8983_v9 = vpop.permute.xlu0 %655 }
 0x6fa   :  { %11270 = vst [vmem:[#allocation35_spill] sm:$0xff] %v8983_v9 }
 0x6fd   :  { %v8987_v20 = vpop.permute.xlu0 %709 }
 0x6fe   :  { %11272 = vst [vmem:[#allocation37_spill] sm:$0xff] %v8987_v20 }
 0x72e   :  { %v7633_v36 = vpop.permute.xlu0 %7632 }
 0x72f   :  { %v7635_v23 = vunpack.i.h.bf16 %v7633_v36  ;;  %v7634_v18 = vunpack.i.l.bf16 %v7633_v36 }
 0x731   :  { %v7247_v51 = vpack.c.bf16 %v7635_v23, %v7634_v18 }
 0x732   :  { %v7638_v11 = vpop.permute.xlu1 %7637  ;;  %v7643_v37 = vpop.permute.xlu0 %7642 }
 0x733   :  { %v7640_v8 = vunpack.i.h.bf16 %v7638_v11  ;;  %v7639_v3 = vunpack.i.l.bf16 %v7638_v11  ;;  %v7645_v48 = vunpack.i.h.bf16 %v7643_v37  ;;  %v7644_v7 = vunpack.i.l.bf16 %v7643_v37 }
 0x735   :  { %v7249_v14 = vpack.c.bf16 %v7640_v8, %v7639_v3  ;;  %v7251_v20 = vpack.c.bf16 %v7645_v48, %v7644_v7 }
 0x736   :  { %v7648_v30 = vpop.permute.xlu1 %7647  ;;  %v7653_v24 = vpop.permute.xlu0 %7652 }
 0x737   :  { %v7650_v1 = vunpack.i.h.bf16 %v7648_v30  ;;  %v7649_v2 = vunpack.i.l.bf16 %v7648_v30  ;;  %v7655_v46 = vunpack.i.h.bf16 %v7653_v24  ;;  %v7654_v36 = vunpack.i.l.bf16 %v7653_v24 }
 0x739   :  { %v7253_v11 = vpack.c.bf16 %v7650_v1, %v7649_v2 }
 0x73a   :  { %v7658_v28 = vpop.permute.xlu1 %7657  ;;  %v7663_v43 = vpop.permute.xlu0 %7662 }
 0x73b   :  { %v7660_v9 = vunpack.i.h.bf16 %v7658_v28  ;;  %v7659_v12 = vunpack.i.l.bf16 %v7658_v28  ;;  %v7664_v18 = vunpack.i.l.bf16 %v7663_v43 }
 0x73d   :  { %v7257_v30 = vpack.c.bf16 %v7660_v9, %v7659_v12 }
 0x73e   :  { %v7668_v44 = vpop.permute.xlu1 %7667  ;;  %v7673_v33 = vpop.permute.xlu0 %7672 }
 0x73f   :  { %v7670_v23 = vunpack.i.h.bf16 %v7668_v44  ;;  %v7669_v37 = vunpack.i.l.bf16 %v7668_v44  ;;  %v7675_v28 = vunpack.i.h.bf16 %v7673_v33  ;;  %v7674_v2 = vunpack.i.l.bf16 %v7673_v33 }
 0x741   :  { %v7261_v24 = vpack.c.bf16 %v7670_v23, %v7669_v37  ;;  %v7267_v44 = vpack.c.bf16 %v7675_v28, %v7674_v2  ;;  %v9014_v28 = vsel %vm720_vm5, %v8619_v15, %v8762_v47 }
 0x742   :  { %v7678_v40 = vpop.permute.xlu1 %7677  ;;  %v7683_v62 = vpop.permute.xlu0 %7682 }
 0x743   :  { %v7685_v9 = vunpack.i.h.bf16 %v7683_v62 }
 0x746   :  { %v8991_v29 = vpop.permute.xlu1 %7687  ;;  %v7693_v57 = vpop.permute.xlu0 %7692 }
 0x747   :  { %v7690_v12 = vunpack.i.h.bf16 %v8991_v29 }
 0x74a   :  { %v7698_v13 = vpop.permute.xlu1 %7697 }
 0x74b   :  { %v7700_v42 = vunpack.i.h.bf16 %v7698_v13  ;;  %v7699_v5 = vunpack.i.l.bf16 %v7698_v13  ;;  %v7255_v13 = vpack.c.bf16 %v7655_v46, %v7654_v36  ;;  %v7680_v46 = vunpack.i.h.bf16 %v7678_v40 }
 0x74c   :  { %v7689_v36 = vunpack.i.l.bf16 %v8991_v29 }
 0x74d   :  { %v7245_v53 = vpack.c.bf16 %v7700_v42, %v7699_v5  ;;  %v7665_v42 = vunpack.i.h.bf16 %v7663_v43  ;;  %v7703_v5 = vpop.permute.xlu0 %7702  ;;  %v7679_v43 = vunpack.i.l.bf16 %v7678_v40  ;;  %v8997_v40 = vpack.c.bf16 %v8447_v50, %v8447_v50 }
 0x74e   :  { %v7705_v8 = vunpack.i.h.bf16 %v7703_v5  ;;  %v7704_v48 = vunpack.i.l.bf16 %v7703_v5  ;;  %v7273_v33 = vpack.c.bf16 %v7690_v12, %v7689_v36 }
 0x74f   :  { %7246 = vmatprep.subr.bf16.mxu0 %v7245_v53  ;;  %v7708_v53 = vpop.permute.xlu1 %7707  ;;  %v7259_v3 = vpack.c.bf16 %v7665_v42, %v7664_v18  ;;  %v7695_v42 = vunpack.i.h.bf16 %v7693_v57  ;;  %v7694_v18 = vunpack.i.l.bf16 %v7693_v57 }
 0x750   :  { %7248 = vmatpush3.bf16.msra.mxu0 %v7247_v51  ;;  %v7710_v51 = vunpack.i.h.bf16 %v7708_v53  ;;  %v7709_v7 = vunpack.i.l.bf16 %v7708_v53  ;;  %v7263_v1 = vpack.c.bf16 %v7705_v8, %v7704_v48 }
 0x751   :  { %7250 = vmatprep.subr.bf16.mxu0 %v7249_v14  ;;  %v7275_v23 = vpack.c.bf16 %v7695_v42, %v7694_v18 }
 0x752   :  { %v7265_v14 = vpack.c.bf16 %v7710_v51, %v7709_v7  ;;  %v730_v51 = vsel %vm31_vm0, %v8762_v47, %v8739_v19  ;;  %v731_v19 = vsel %vm31_vm0, %v8778_v22, %v8747_v60 }
 0x754   :  { %7252 = vmatpush3.bf16.msra.mxu0 %v7251_v20  ;;  %v7684_v20 = vunpack.i.l.bf16 %v7683_v62 }
 0x755   :  { %7254 = vmatprep.subr.bf16.mxu0 %v7253_v11  ;;  %v7269_v11 = vpack.c.bf16 %v7680_v46, %v7679_v43  ;;  %v9021_v46 = vsel %vm739_vm6, %v730_v51, %v8772_v6  ;;  %v9076_v51 = vsel %vm720_vm5, %v8647_v31, %v8764_v52 }
 0x758   :  { %7256 = vmatpush3.bf16.msra.mxu0 %v7255_v13  ;;  %v7271_v13 = vpack.c.bf16 %v7685_v9, %v7684_v20  ;;  %v9038_v20 = vsel %vm720_vm5, %v8635_v25, %v8778_v22  ;;  %v732_v22 = vsel %vm31_vm0, %v8764_v52, %v8957_v26 }
 0x759   :  { %7258 = vmatprep.subr.bf16.mxu0 %v7257_v30 }
 0x75c   :  { %7260 = vmatpush3.bf16.msra.mxu0 %v7259_v3 }
 0x75d   :  { %7262 = vmatprep.subr.bf16.mxu0 %v7261_v24 }
 0x760   :  { %7264 = vmatpush3.bf16.msra.mxu0 %v7263_v1 }
 0x761   :  { %7266 = vmatprep.subr.bf16.mxu0 %v7265_v14 }
 0x764   :  { %7268 = vmatpush3.bf16.msra.mxu0 %v7267_v44 }
 0x765   :  { %7270 = vmatprep.subr.bf16.mxu0 %v7269_v11 }
 0x768   :  { %7272 = vmatpush3.bf16.msra.mxu0 %v7271_v13  ;;  %v9050_v13 = vsel %vm739_vm6, %v731_v19, %v8757_v63 }
 0x769   :  { %7274 = vmatprep.subr.bf16.mxu0 %v7273_v33 }
 0x76c   :  { %7276 = vmatpush3.bf16.msra.mxu0 %v7275_v23 }
 0x76d   :  { %7284 = vmatprep.subr.bf16.mxu0 %v8997_v40 }
 0x78a   :  { %v1529_v62 = vpop.f32.mrb[30].mxu0 }
 0x78b   :  { %v6666_v37 = vpop.f32.mrb[31].mxu0  ;;  %v9043_v36 = vadd.f32 %v1529_v62, %v8772_v6 }
 0x78e   :  { %v1534_v29 = vpop.f32.mrb[32].mxu0 }
 0x78f   :  { %v6669_v5 = vpop.f32.mrb[33].mxu0 }
 0x792   :  { %v9000_v30 = vpop.f32.mrb[34].mxu0 }
 0x793   :  { %v6672_v53 = vpop.f32.mrb[35].mxu0 }
 0x794   :  { %v9067_v53 = vadd.f32 %v1534_v29, %v8757_v63 }
 0x796   :  { %v9002_v3 = vpop.f32.mrb[36].mxu0  ;;  %v1717_v52 = vsel %vm750_vm3, %v9067_v53, -inf }
 0x797   :  { %v6675_v57 = vpop.f32.mrb[37].mxu0 }
 0x79a   :  { %v9004_v8 = vpop.f32.mrb[38].mxu0 }
 0x79b   :  { %v6678_v48 = vpop.f32.mrb[39].mxu0 }
 0x79c   :  { %v1712_v48 = vsel %vm750_vm3, %v9043_v36, -inf }
 0x79e   :  { %v9009_v7 = vpop.f32.mrb[40].mxu0 }
 0x79f   :  { %v6681_v24 = vpop.f32.mrb[41].mxu0 }
 0x7a0   :  { %v1410_v2 = vpop.f32.mrb[22].mxu1  ;;  %v9080_v24 = vsel %vm739_vm6, %v732_v22, %v8774_v0 }
 0x7a1   :  { %v9017_v1 = vadd.f32 %v1410_v2, %v9014_v28  ;;  %v1412_v43 = vpop.f32.mrb[23].mxu1 }
 0x7a2   :  { %v9027_v14 = vadd.f32 %v1412_v43, %v9021_v46  ;;  %v9029_v44 = vpop.f32.mrb[42].mxu0 }
 0x7a3   :  { %v6684_v15 = vpop.f32.mrb[43].mxu0  ;;  %v1573_v47 = vsel %vm720_vm5, %v9017_v1, -inf  ;;  %v1610_v9 = vsel %vm1609_vm7, %v9017_v1, -inf }
 0x7a4   :  { %v1416_v12 = vpop.f32.mrb[24].mxu1  ;;  %1574 = vmax.xlane.f32.xlu0 %v1573_v47  ;;  %v1611_v60 = vsel %vm31_vm0, %v9027_v14, -inf  ;;  %v1674_v62 = vsel %vm1673_vm8, %v9027_v14, -inf  ;;  %v1711_v5 = vsel %vm1710_vm9, %v9027_v14, -inf }
 0x7a5   :  { %v9046_v11 = vadd.f32 %v1416_v12, %v9038_v20  ;;  %v1418_v42 = vpop.f32.mrb[25].mxu1  ;;  %v1612_v25 = vmax.f32 %v1610_v9, %v1611_v60  ;;  %v1713_v47 = vmax.f32 %v1711_v5, %v1712_v48  ;;  %v9110_v5 = vadd.f32 %v9000_v30, %v8774_v0 }
 0x7a6   :  { %v9056_v18 = vadd.f32 %v1418_v42, %v9050_v13  ;;  %v9058_v33 = vpop.f32.mrb[44].mxu0 }
 0x7a7   :  { %1613 = vmax.xlane.f32.xlu1 %v1612_v25  ;;  %v6687_v23 = vpop.f32.mrb[45].mxu0  ;;  %v1615_v37 = vsel %vm1609_vm7, %v9046_v11, -inf  ;;  %v733_v25 = vsel %vm31_vm0, %v8963_v39, %v8780_v54 }
 0x7a8   :  { %v1422_v26 = vpop.f32.mrb[26].mxu1  ;;  %1675 = vmax.xlane.f32.xlu0 %v1674_v62  ;;  %v1616_v57 = vsel %vm31_vm0, %v9056_v18, -inf  ;;  %v1716_v9 = vsel %vm1710_vm9, %v9056_v18, -inf  ;;  %v9104_v62 = vsel %vm720_vm5, %v8657_v32, %v8963_v39  ;;  %v1677_v30 = vsel %vm1673_vm8, %v9056_v18, -inf }
 0x7a9   :  { %v1424_v2 = vpop.f32.mrb[27].mxu1  ;;  %v1617_v29 = vmax.f32 %v1615_v37, %v1616_v57  ;;  %v9083_v43 = vadd.f32 %v1422_v26, %v9076_v51  ;;  %v1718_v42 = vmax.f32 %v1716_v9, %v1717_v52  ;;  %v1576_v37 = vsel %vm720_vm5, %v9046_v11, -inf }
 0x7aa   :  { %v9086_v19 = vadd.f32 %v1424_v2, %v9080_v24  ;;  %v9088_v15 = vpop.f32.mrb[46].mxu0  ;;  %v9114_v26 = vsel %vm739_vm6, %v733_v25, %v8965_v55  ;;  %v734_v52 = vsel %vm31_vm0, %v8790_v61, %v8967_v16  ;;  %v9139_v25 = vadd.f32 %v9002_v3, %v8965_v55 }
 0x7ab   :  { %1618 = vmax.xlane.f32.xlu1 %v1617_v29  ;;  %v6690_v31 = vpop.f32.mrb[47].mxu0  ;;  %v1620_v22 = vsel %vm1609_vm7, %v9083_v43, -inf  ;;  %v1722_v29 = vsel %vm750_vm3, %v9110_v5, -inf  ;;  %v9144_v16 = vsel %vm720_vm5, %v8663_v34, %v8790_v61 }
 0x7ac   :  { %v1428_v12 = vpop.f32.mrb[28].mxu1  ;;  %1714 = vmax.xlane.f32.xlu0 %v1713_v47  ;;  %v1621_v23 = vsel %vm31_vm0, %v9086_v19, -inf  ;;  %v1721_v39 = vsel %vm1710_vm9, %v9086_v19, -inf  ;;  %v1680_v34 = vsel %vm1673_vm8, %v9086_v19, -inf  ;;  %v1727_v61 = vsel %vm750_vm3, %v9139_v25, -inf }
 0x7ad   :  { %v1430_v60 = vpop.f32.mrb[29].mxu1  ;;  %v1622_v48 = vmax.f32 %v1620_v22, %v1621_v23  ;;  %v9117_v2 = vadd.f32 %v1428_v12, %v9104_v62  ;;  %v1723_v31 = vmax.f32 %v1721_v39, %v1722_v29  ;;  %v9148_v23 = vsel %vm739_vm6, %v734_v52, %v8808_v58 }
 0x7ae   :  { %v9120_v32 = vadd.f32 %v1430_v60, %v9114_v26  ;;  %11274 = vst [vmem:[#allocation39_spill] sm:$0xff] %v9148_v23 }
 0x7af   :  { %1719 = vmax.xlane.f32.xlu1 %v1718_v42  ;;  %v1625_v12 = vsel %vm1609_vm7, %v9117_v2, -inf  ;;  %v1579_v42 = vsel %vm720_vm5, %v9083_v43, -inf }
 0x7b0   :  { %v1434_v54 = vpop.f32.mrb[30].mxu1  ;;  %1577 = vmax.xlane.f32.xlu0 %v1576_v37  ;;  %v1626_v60 = vsel %vm31_vm0, %v9120_v32, -inf  ;;  %v1726_v3 = vsel %vm1710_vm9, %v9120_v32, -inf }
 0x7b1   :  { %v1436_v57 = vpop.f32.mrb[31].mxu1  ;;  %v9151_v39 = vadd.f32 %v1434_v54, %v9144_v16  ;;  %v1728_v52 = vmax.f32 %v1726_v3, %v1727_v61  ;;  %v735_v54 = vsel %vm31_vm0, %v8969_v56, %v8837_v38 }
 0x7b2   :  { %v9182_v3 = vsel %vm739_vm6, %v735_v54, %v8971_v45 }
 0x7b3   :  { %1623 = vmax.xlane.f32.xlu1 %v1622_v48  ;;  %v1627_v48 = vmax.f32 %v1625_v12, %v1626_v60  ;;  %v9172_v60 = vsel %vm720_vm5, %v8673_v35, %v8969_v56  ;;  %11276 = vst [vmem:[#allocation41_spill] sm:$0xff] %v9182_v3 }
 0x7b4   :  { %v1440_v47 = vpop.f32.mrb[32].mxu1  ;;  %1678 = vmax.xlane.f32.xlu0 %v1677_v30  ;;  %v9154_v30 = vadd.f32 %v1436_v57, %v9148_v23  ;;  %v1630_v57 = vsel %vm1609_vm7, %v9151_v39, -inf  ;;  %11275 = vst [vmem:[#allocation40_spill] sm:$0xff] %v9172_v60 }
 0x7b5   :  { %v1442_v9 = vpop.f32.mrb[33].mxu1  ;;  %v9185_v23 = vadd.f32 %v1440_v47, %v9172_v60 }
 0x7b6   :  { %v1631_v12 = vsel %vm31_vm0, %v9154_v30, -inf  ;;  %v9188_v35 = vadd.f32 %v1442_v9, %v9182_v3  ;;  %v1731_v56 = vsel %vm1710_vm9, %v9154_v30, -inf }
 0x7b7   :  { %1724 = vmax.xlane.f32.xlu1 %v1723_v31  ;;  %v1632_v61 = vmax.f32 %v1630_v57, %v1631_v12  ;;  %v1635_v9 = vsel %vm1609_vm7, %v9185_v23, -inf  ;;  %v9206_v12 = vsel %vm720_vm5, %v8683_v49, %v8973_v4 }
 0x7b8   :  { %v1446_v22 = vpop.f32.mrb[34].mxu1  ;;  %1580 = vmax.xlane.f32.xlu0 %v1579_v42  ;;  %v1582_v42 = vsel %vm720_vm5, %v9117_v2, -inf  ;;  %v1636_v57 = vsel %vm31_vm0, %v9188_v35, -inf  ;;  %11277 = vst [vmem:[#allocation42_spill] sm:$0xff] %v9206_v12 }
 0x7b9   :  { %v1448_v37 = vpop.f32.mrb[35].mxu1 }
 0x7bb   :  { %1628 = vmax.xlane.f32.xlu1 %v1627_v48  ;;  %v9178_v48 = vadd.f32 %v9004_v8, %v8808_v58  ;;  %v1683_v8 = vsel %vm1673_vm8, %v9120_v32, -inf }
 0x7bc   :  { %v1452_v29 = vpop.f32.mrb[36].mxu1  ;;  %1681 = vmax.xlane.f32.xlu0 %v1680_v34 }
 0x7bd   :  { %v1454_v31 = vpop.f32.mrb[37].mxu1  ;;  %v1732_v54 = vsel %vm750_vm3, %v9178_v48, -inf }
 0x7be   :  { %v1733_v47 = vmax.f32 %v1731_v56, %v1732_v54  ;;  %v1637_v56 = vmax.f32 %v1635_v9, %v1636_v57  ;;  %v9240_v9 = vsel %vm720_vm5, %v8689_v41, %v8981_v59 }
 0x7bf   :  { %1729 = vmax.xlane.f32.xlu1 %v1728_v52  ;;  %v736_v52 = vsel %vm31_vm0, %v8973_v4, %v8977_v21  ;;  %v1585_v21 = vsel %vm720_vm5, %v9151_v39, -inf  ;;  %v1736_v4 = vsel %vm1710_vm9, %v9188_v35, -inf  ;;  %11279 = vst [vmem:[#allocation44_spill] sm:$0xff] %v9240_v9 }
 0x7c0   :  { %v1458_v38 = vpop.f32.mrb[38].mxu1  ;;  %1583 = vmax.xlane.f32.xlu0 %v1582_v42  ;;  %v9210_v42 = vsel %vm739_vm6, %v736_v52, %v8975_v10  ;;  %v1686_v52 = vsel %vm1673_vm8, %v9154_v30, -inf }
 0x7c1   :  { %v1460_v34 = vpop.f32.mrb[39].mxu1  ;;  %11278 = vst [vmem:[#allocation43_spill] sm:$0xff] %v9210_v42  ;;  %v9222_v49 = vadd.f32 %v1448_v37, %v9210_v42 }
 0x7c3   :  { %1633 = vmax.xlane.f32.xlu1 %v1632_v61  ;;  %v9216_v61 = vadd.f32 %v9009_v7, %v8971_v45  ;;  %v737_v7 = vsel %vm31_vm0, %v8981_v59, %v8979_v27  ;;  %v1588_v27 = vsel %vm720_vm5, %v9185_v23, -inf  ;;  %v1741_v59 = vsel %vm1710_vm9, %v9222_v49, -inf }
 0x7c4   :  { %1684 = vmax.xlane.f32.xlu0 %v1683_v8  ;;  %v9219_v8 = vadd.f32 %v1446_v22, %v9206_v12  ;;  %v9244_v57 = vsel %vm739_vm6, %v737_v7, %v8985_v17  ;;  %v11281_v7 = vld [vmem:[#allocation38_spill] sm:$0xff] }
 0x7c5   :  { %v1737_v54 = vsel %vm750_vm3, %v9216_v61, -inf  ;;  %11280 = vst [vmem:[#allocation45_spill] sm:$0xff] %v9244_v57  ;;  %v9256_v41 = vadd.f32 %v1454_v31, %v9244_v57 }
 0x7c6   :  { %v1738_v22 = vmax.f32 %v1736_v4, %v1737_v54  ;;  %v1640_v37 = vsel %vm1609_vm7, %v9219_v8, -inf  ;;  %v9253_v4 = vadd.f32 %v1452_v29, %v9240_v9  ;;  %v11282_v54 = vld [vmem:[#allocation35_spill] sm:$0xff] }
 0x7c7   :  { %1734 = vmax.xlane.f32.xlu1 %v1733_v47  ;;  %v1641_v47 = vsel %vm31_vm0, %v9222_v49, -inf }
 0x7c8   :  { %1586 = vmax.xlane.f32.xlu0 %v1585_v21  ;;  %v9250_v21 = vadd.f32 %v9029_v44, %v8975_v10  ;;  %v738_v44 = vsel %vm31_vm0, %v11282_v54, %v11281_v7  ;;  %v1645_v31 = vsel %vm1609_vm7, %v9253_v4, -inf }
 0x7cb   :  { %1638 = vmax.xlane.f32.xlu1 %v1637_v56  ;;  %v1642_v56 = vmax.f32 %v1640_v37, %v1641_v47  ;;  %v1646_v37 = vsel %vm31_vm0, %v9256_v41, -inf  ;;  %v11283_v47 = vld [vmem:[#allocation27_spill] sm:$0xff] }
 0x7cc   :  { %1687 = vmax.xlane.f32.xlu0 %v1686_v52  ;;  %v1689_v52 = vsel %vm1673_vm8, %v9188_v35, -inf  ;;  %v1647_v7 = vmax.f32 %v1645_v31, %v1646_v37 }
 0x7cf   :  { %1739 = vmax.xlane.f32.xlu1 %v1738_v22  ;;  %v1742_v22 = vsel %vm750_vm3, %v9250_v21, -inf }
 0x7d0   :  { %1589 = vmax.xlane.f32.xlu0 %v1588_v27  ;;  %v1743_v29 = vmax.f32 %v1741_v59, %v1742_v22  ;;  %v9274_v27 = vsel %vm720_vm5, %v11283_v47, %v11282_v54  ;;  %v9284_v59 = vadd.f32 %v9058_v33, %v8985_v17 }
 0x7d1   :  { %11284 = vst [vmem:[#allocation38_spill] sm:$0xff] %v9274_v27  ;;  %v9287_v22 = vadd.f32 %v1458_v38, %v9274_v27 }
 0x7d2   :  { %v1747_v47 = vsel %vm750_vm3, %v9284_v59, -inf }
 0x7d3   :  { %1643 = vmax.xlane.f32.xlu1 %v1642_v56  ;;  %v11285_v56 = vld [vmem:[#allocation37_spill] sm:$0xff]  ;;  %v1650_v31 = vsel %vm1609_vm7, %v9287_v22, -inf }
 0x7d4   :  { %1690 = vmax.xlane.f32.xlu0 %v1689_v52  ;;  %v9278_v57 = vsel %vm739_vm6, %v738_v44, %v11285_v56  ;;  %v1591_v52 = vsel %vm720_vm5, %v9219_v8, -inf  ;;  %v1746_v44 = vsel %vm1710_vm9, %v9256_v41, -inf  ;;  %v9306_v37 = vadd.f32 %v9088_v15, %v11285_v56 }
 0x7d5   :  { %11286 = vst [vmem:[#allocation35_spill] sm:$0xff] %v9278_v57  ;;  %v9290_v54 = vadd.f32 %v1460_v34, %v9278_v57  ;;  %v1748_v33 = vmax.f32 %v1746_v44, %v1747_v47  ;;  %v1594_v34 = vsel %vm720_vm5, %v9253_v4, -inf  ;;  %v1695_v44 = vsel %vm1673_vm8, %v9256_v41, -inf }
 0x7d6   :  { %v1597_v15 = vsel %vm720_vm5, %v9287_v22, -inf }
 0x7d7   :  { %1744 = vmax.xlane.f32.xlu1 %v1743_v29  ;;  %v1692_v29 = vsel %vm1673_vm8, %v9222_v49, -inf  ;;  %v1651_v38 = vsel %vm31_vm0, %v9290_v54, -inf }
 0x7d8   :  { %1592 = vmax.xlane.f32.xlu0 %v1591_v52  ;;  %v1652_v52 = vmax.f32 %v1650_v31, %v1651_v38  ;;  %v11287_v31 = vld [vmem:[#allocation20_spill] sm:$0xff] }
 0x7d9   :  { %v11288_v38 = vld [vmem:[#allocation32_spill] sm:$0xff] }
 0x7db   :  { %1648 = vmax.xlane.f32.xlu1 %v1647_v7  ;;  %v1751_v7 = vsel %vm1710_vm9, %v9290_v54, -inf }
 0x7dc   :  { %1693 = vmax.xlane.f32.xlu0 %v1692_v29  ;;  %v1752_v29 = vsel %vm750_vm3, %v9306_v37, -inf }
 0x7dd   :  { %v1753_v47 = vmax.f32 %v1751_v7, %v1752_v29  ;;  %v11291_v29 = vld [vmem:[#allocation24_spill] sm:$0xff] }
 0x7df   :  { %1749 = vmax.xlane.f32.xlu1 %v1748_v33  ;;  %v1698_v33 = vsel %vm1673_vm8, %v9290_v54, -inf }
 0x7e0   :  { %1595 = vmax.xlane.f32.xlu0 %v1594_v34  ;;  %v1133_v34 = vmul.f32 %v11288_v38, %v11287_v31 }
 0x7e3   :  { %1653 = vmax.xlane.f32.xlu1 %v1652_v52  ;;  %v11289_v52 = vld [vmem:[#allocation21_spill] sm:$0xff] }
 0x7e4   :  { %1696 = vmax.xlane.f32.xlu0 %v1695_v44  ;;  %v1134_v56 = vmul.f32 %v11288_v38, %v11289_v52  ;;  %v11290_v44 = vld [vmem:[#allocation22_spill] sm:$0xff] }
 0x7e5   :  { %v1135_v7 = vmul.f32 %v11288_v38, %v11290_v44 }
 0x7e6   :  { %v7711_v57 = vpack.i.bf16 %v1134_v56, %v1133_v34 }
 0x7e7   :  { %1754 = vmax.xlane.f32.xlu1 %v1753_v47  ;;  %v1136_v47 = vmul.f32 %v11288_v38, %v11291_v29 }
 0x7e8   :  { %1699 = vmax.xlane.f32.xlu0 %v1698_v33 }
 0x7e9   :  { %v7716_v33 = vpack.i.bf16 %v1136_v47, %v1135_v7 }
 0x7ec   :  { %1598 = vmax.xlane.f32.xlu0 %v1597_v15 }
 0x7f8   :  { %7712 = vrot.lane.b32.xlu1 %v7711_v57, %s8204_s4 }
 0x802   :  { %7717 = vrot.lane.b32.xlu0 %v7716_v33, %s8204_s4 }
 0x831   :  { %v1575_v27 = vpop.xlane.xlu0 %1574 }
 0x832   :  { %v1600_v9 = vsub.f32 %v9017_v1, %v1575_v27 }
 0x834   :  { %v1614_v15 = vpop.xlane.xlu1 %1613 }
 0x835   :  { %v1655_v17 = vsub.f32 %v9017_v1, %v1614_v15  ;;  %v1676_v31 = vpop.xlane.xlu0 %1675  ;;  %v1656_v56 = vsub.f32 %v9027_v14, %v1614_v15 }
 0x836   :  { %v1701_v57 = vsub.f32 %v9027_v14, %v1676_v31 }
 0x837   :  { %v1774_v52 = vsel %vm720_vm5, %v1600_v9, %v1655_v17 }
 0x838   :  { %v1619_v34 = vpop.xlane.xlu1 %1618  ;;  %v1783_v29 = vsel %vm31_vm0, %v1656_v56, %v1701_v57  ;;  %v1801_v47 = vmul.f32 1.442695, %v1774_v52 }
 0x839   :  { %v9333_v44 = vpop.xlane.xlu0 %1714  ;;  %v1657_v17 = vsub.f32 %v9046_v11, %v1619_v34  ;;  %v1658_v42 = vsub.f32 %v9056_v18, %v1619_v34 }
 0x83a   :  { %v1756_v7 = vsub.f32 %v9027_v14, %v9333_v44 }
 0x83c   :  { %v1792_v33 = vsel %vm739_vm6, %v1783_v29, %v1756_v7  ;;  %v9339_v10 = vpop.xlane.xlu1 %1719 }
 0x83d   :  { %v1803_v1 = vmul.f32 1.442695, %v1792_v33  ;;  %v1578_v27 = vpop.xlane.xlu0 %1577  ;;  %v1758_v57 = vsub.f32 %v9056_v18, %v9339_v10 }
 0x83e   :  { %v1601_v15 = vsub.f32 %v9046_v11, %v1578_v27  ;;  %v11292_v27 = vld [vmem:[#allocation16_spill] sm:$0xff] }
 0x83f   :  { %7935 = vpow2.f32 %v1803_v1  ;;  %v9355_v34 = vpack.c.bf16 %v11292_v27, %v11292_v27 }
 0x840   :  { %7937 = vpow2.f32 %v1801_v47  ;;  %v1624_v9 = vpop.xlane.xlu1 %1623  ;;  %v1775_v14 = vsel %vm720_vm5, %v1601_v15, %v1657_v17 }
 0x841   :  { %v1679_v31 = vpop.xlane.xlu0 %1678  ;;  %v1807_v29 = vmul.f32 1.442695, %v1775_v14  ;;  %11293 = vst [vmem:[#allocation27_spill] sm:$0xff] %v9355_v34  ;;  %v1659_v15 = vsub.f32 %v9083_v43, %v1624_v9 }
 0x842   :  { %v1702_v56 = vsub.f32 %v9056_v18, %v1679_v31 }
 0x844   :  { %v1784_v52 = vsel %vm31_vm0, %v1658_v42, %v1702_v56  ;;  %v9349_v7 = vpop.xlane.xlu1 %1724  ;;  %v11294_v42 = vld [vmem:[#allocation17_spill] sm:$0xff] }
 0x845   :  { %v1793_v47 = vsel %vm739_vm6, %v1784_v52, %v1758_v57  ;;  %v1581_v33 = vpop.xlane.xlu0 %1580  ;;  %v9362_v31 = vpack.c.bf16 %v11294_v42, %v11294_v42  ;;  %v1660_v57 = vsub.f32 %v9086_v19, %v1624_v9 }
 0x846   :  { %v1809_v11 = vmul.f32 1.442695, %v1793_v47  ;;  %v1602_v1 = vsub.f32 %v9083_v43, %v1581_v33  ;;  %v1760_v43 = vsub.f32 %v9086_v19, %v9349_v7 }
 0x847   :  { %11295 = vst [vmem:[#allocation20_spill] sm:$0xff] %v9362_v31 }
 0x848   :  { %7939 = vpow2.f32 %v1809_v11  ;;  %v1629_v17 = vpop.xlane.xlu1 %1628  ;;  %v1776_v52 = vsel %vm720_vm5, %v1602_v1, %v1659_v15 }
 0x849   :  { %v9358_v18 = vpop.eup %7935  ;;  %7941 = vpow2.f32 %v1807_v29  ;;  %v1682_v14 = vpop.xlane.xlu0 %1681  ;;  %v1813_v29 = vmul.f32 1.442695, %v1776_v52  ;;  %v1662_v52 = vsub.f32 %v9120_v32, %v1629_v17 }
 0x84a   :  { %v9364_v56 = vpop.eup %7937  ;;  %v1703_v47 = vsub.f32 %v9086_v19, %v1682_v14  ;;  %2090 = vmatprep.mubr.f32.mxu0 %v9358_v18  ;;  %v1661_v14 = vsub.f32 %v9117_v2, %v1629_v17 }
 0x84b   :  { %2091 = vmatmul.mubr.f32.vlgmr.msra.gmra.mrb[48].mxu0 %v9364_v56 }
 0x84c   :  { %v1785_v33 = vsel %vm31_vm0, %v1660_v57, %v1703_v47  ;;  %v9374_v11 = vpop.xlane.xlu1 %1729  ;;  %7286 = vmatpush3.bf16.msra.mxu0 %v9355_v34 }
 0x84d   :  { %v1794_v9 = vsel %vm739_vm6, %v1785_v33, %v1760_v43  ;;  %v1584_v12 = vpop.xlane.xlu0 %1583  ;;  %7288 = vmatprep.subr.bf16.mxu0 %v9362_v31 }
 0x84e   :  { %v1815_v1 = vmul.f32 1.442695, %v1794_v9  ;;  %v1603_v15 = vsub.f32 %v9117_v2, %v1584_v12  ;;  %v1762_v2 = vsub.f32 %v9120_v32, %v9374_v11 }
 0x850   :  { %7943 = vpow2.f32 %v1815_v1  ;;  %v1634_v19 = vpop.xlane.xlu1 %1633  ;;  %7290 = vmatpush3.bf16.msra.mxu0 %v9355_v34  ;;  %v1777_v43 = vsel %vm720_vm5, %v1603_v15, %v1661_v14 }
 0x851   :  { %7945 = vpow2.f32 %v1813_v29  ;;  %v1685_v57 = vpop.xlane.xlu0 %1684  ;;  %7292 = vmatprep.subr.bf16.mxu0 %v9362_v31  ;;  %v1819_v1 = vmul.f32 1.442695, %v1777_v43  ;;  %v9405_v43 = vpack.c.bf16 %v8447_v50, %v11292_v27 }
 0x852   :  { %v9383_v47 = vpop.eup %7939  ;;  %v1704_v33 = vsub.f32 %v9120_v32, %v1685_v57  ;;  %v1663_v32 = vsub.f32 %v9151_v39, %v1634_v19 }
 0x853   :  { %v9388_v9 = vpop.eup %7941  ;;  %2095 = vmatprep.mubr.f32.mxu0 %v9383_v47  ;;  %11296 = vst [vmem:[#allocation32_spill] sm:$0xff] %v9405_v43 }
 0x854   :  { %v1786_v12 = vsel %vm31_vm0, %v1662_v52, %v1704_v33  ;;  %v9394_v29 = vpop.xlane.xlu1 %1734  ;;  %2096 = vmatmul.mubr.f32.gmra.mrb[50].mxu0 %v9388_v9 }
 0x855   :  { %v1795_v17 = vsel %vm739_vm6, %v1786_v12, %v1762_v2  ;;  %v1587_v45 = vpop.xlane.xlu0 %1586  ;;  %7294 = vmatpush3.bf16.msra.mxu0 %v9355_v34  ;;  %v1664_v2 = vsub.f32 %v9154_v30, %v1634_v19  ;;  %v1764_v50 = vsub.f32 %v9154_v30, %v9394_v29 }
 0x856   :  { %v1821_v15 = vmul.f32 1.442695, %v1795_v17  ;;  %v1604_v14 = vsub.f32 %v9151_v39, %v1587_v45  ;;  %7296 = vmatprep.subr.bf16.mxu0 %v9362_v31  ;;  %v11297_v39 = vld [vmem:[#allocation18_spill] sm:$0xff] }
 0x858   :  { %7947 = vpow2.f32 %v1821_v15  ;;  %v1639_v57 = vpop.xlane.xlu1 %1638  ;;  %v1778_v45 = vsel %vm720_vm5, %v1604_v14, %v1663_v32 }
 0x859   :  { %7949 = vpow2.f32 %v1819_v1  ;;  %v1688_v52 = vpop.xlane.xlu0 %1687  ;;  %7298 = vmatpush3.bf16.msra.mxu0 %v9355_v34  ;;  %v9415_v1 = vpack.c.bf16 %v11297_v39, %v11294_v42  ;;  %v1825_v15 = vmul.f32 1.442695, %v1778_v45  ;;  %v9430_v42 = vpack.c.bf16 %v11297_v39, %v11297_v39 }
 0x85a   :  { %v9407_v33 = vpop.eup %7943  ;;  %v1705_v12 = vsub.f32 %v9154_v30, %v1688_v52  ;;  %7300 = vmatprep.subr.bf16.mxu0 %v9362_v31  ;;  %v1757_v34 = vsub.f32 %v9043_v36, %v9333_v44 }
 0x85b   :  { %11298 = vst [vmem:[#allocation21_spill] sm:$0xff] %v9415_v1  ;;  %v9417_v17 = vpop.eup %7945  ;;  %2100 = vmatprep.mubr.f32.mxu0 %v9407_v33 }
 0x85c   :  { %v1787_v27 = vsel %vm31_vm0, %v1664_v2, %v1705_v12  ;;  %v9423_v19 = vpop.xlane.xlu1 %1739  ;;  %2101 = vmatmul.mubr.f32.gmra.mrb[52].mxu0 %v9417_v17  ;;  %v1665_v2 = vsub.f32 %v9185_v23, %v1639_v57 }
 0x85d   :  { %v1796_v14 = vsel %vm739_vm6, %v1787_v27, %v1764_v50  ;;  %v1590_v32 = vpop.xlane.xlu0 %1589  ;;  %7302 = vmatpush3.bf16.msra.mxu0 %v9405_v43  ;;  %v1666_v27 = vsub.f32 %v9188_v35, %v1639_v57 }
 0x85e   :  { %v1827_v52 = vmul.f32 1.442695, %v1796_v14  ;;  %v1605_v30 = vsub.f32 %v9185_v23, %v1590_v32  ;;  %7304 = vmatprep.subr.bf16.mxu0 %v9415_v1  ;;  %v1766_v23 = vsub.f32 %v9188_v35, %v9423_v19 }
 0x860   :  { %7951 = vpow2.f32 %v1827_v52  ;;  %v1644_v12 = vpop.xlane.xlu1 %1643  ;;  %v1779_v39 = vsel %vm720_vm5, %v1605_v30, %v1665_v2 }
 0x861   :  { %7953 = vpow2.f32 %v1825_v15  ;;  %v1691_v45 = vpop.xlane.xlu0 %1690  ;;  %7306 = vmatpush3.bf16.msra.mxu0 %v8997_v40  ;;  %v1831_v57 = vmul.f32 1.442695, %v1779_v39  ;;  %v1668_v39 = vsub.f32 %v9222_v49, %v1644_v12 }
 0x862   :  { %v9436_v50 = vpop.eup %7947  ;;  %v1706_v14 = vsub.f32 %v9188_v35, %v1691_v45  ;;  %7308 = vmatprep.subr.bf16.mxu0 %v9430_v42  ;;  %v1667_v35 = vsub.f32 %v9219_v8, %v1644_v12 }
 0x863   :  { %v9442_v32 = vpop.eup %7949  ;;  %2105 = vmatprep.mubr.f32.mxu0 %v9436_v50 }
 0x864   :  { %v1788_v15 = vsel %vm31_vm0, %v1666_v27, %v1706_v14  ;;  %v9448_v52 = vpop.xlane.xlu1 %1744  ;;  %2106 = vmatmul.mubr.f32.gmra.mrb[54].mxu0 %v9442_v32 }
 0x865   :  { %v1797_v30 = vsel %vm739_vm6, %v1788_v15, %v1766_v23  ;;  %v1593_v2 = vpop.xlane.xlu0 %1592  ;;  %7310 = vmatpush3.bf16.msra.mxu0 %v8997_v40 }
 0x866   :  { %v1833_v45 = vmul.f32 1.442695, %v1797_v30  ;;  %v1606_v1 = vsub.f32 %v9219_v8, %v1593_v2  ;;  %7312 = vmatprep.subr.bf16.mxu0 %v9430_v42  ;;  %v11299_v30 = vmov 0.0|0.0   ;;  %v1768_v8 = vsub.f32 %v9222_v49, %v9448_v52 }
 0x868   :  { %7955 = vpow2.f32 %v1833_v45  ;;  %v1649_v43 = vpop.xlane.xlu1 %1648  ;;  %v1780_v23 = vsel %vm720_vm5, %v1606_v1, %v1667_v35 }
 0x869   :  { %7957 = vpow2.f32 %v1831_v57  ;;  %v1694_v27 = vpop.xlane.xlu0 %1693  ;;  %7314 = vmatpush3.bf16.msra.mxu0 %v8997_v40  ;;  %v1837_v12 = vmul.f32 1.442695, %v1780_v23  ;;  %v1670_v60 = vsub.f32 %v9256_v41, %v1649_v43 }
 0x86a   :  { %v9457_v14 = vpop.eup %7951  ;;  %v1707_v15 = vsub.f32 %v9222_v49, %v1694_v27  ;;  %7315 = vmatprep.subr.bf16.mxu0 %v11299_v30  ;;  %v1669_v49 = vsub.f32 %v9253_v4, %v1649_v43 }
 0x86b   :  { %v9463_v2 = vpop.eup %7953  ;;  %2110 = vmatprep.mubr.f32.mxu0 %v9457_v14 }
 0x86c   :  { %v1789_v57 = vsel %vm31_vm0, %v1668_v39, %v1707_v15  ;;  %v9469_v45 = vpop.xlane.xlu1 %1749  ;;  %2111 = vmatmul.mubr.f32.gmra.mrb[56].mxu0 %v9463_v2 }
 0x86d   :  { %v1798_v1 = vsel %vm739_vm6, %v1789_v57, %v1768_v8  ;;  %v1596_v35 = vpop.xlane.xlu0 %1595  ;;  %v1770_v36 = vsub.f32 %v9256_v41, %v9469_v45 }
 0x86e   :  { %v1839_v27 = vmul.f32 1.442695, %v1798_v1  ;;  %v1607_v31 = vsub.f32 %v9253_v4, %v1596_v35  ;;  %v1805_v1 = vmul.f32 1.442695, %v1757_v34  ;;  %v1759_v4 = vsub.f32 %v9067_v53, %v9339_v10 }
 0x870   :  { %7959 = vpow2.f32 %v1839_v27  ;;  %v1654_v3 = vpop.xlane.xlu1 %1653  ;;  %v1781_v23 = vsel %vm720_vm5, %v1607_v31, %v1669_v49  ;;  %v1811_v10 = vmul.f32 1.442695, %v1759_v4 }
 0x871   :  { %7961 = vpow2.f32 %v1837_v12  ;;  %v1697_v39 = vpop.xlane.xlu0 %1696  ;;  %v1843_v31 = vmul.f32 1.442695, %v1781_v23  ;;  %v1672_v34 = vsub.f32 %v9290_v54, %v1654_v3 }
 0x872   :  { %v9477_v15 = vpop.eup %7955  ;;  %v1708_v8 = vsub.f32 %v9256_v41, %v1697_v39  ;;  %7963 = vpow2.f32 %v1805_v1  ;;  %v1671_v1 = vsub.f32 %v9287_v22, %v1654_v3  ;;  %v1763_v3 = vsub.f32 %v9139_v25, %v9374_v11 }
 0x873   :  { %v9482_v57 = vpop.eup %7957  ;;  %2115 = vmatprep.mubr.f32.mxu0 %v9477_v15 }
 0x874   :  { %v1790_v44 = vsel %vm31_vm0, %v1670_v60, %v1708_v8  ;;  %v9490_v12 = vpop.xlane.xlu1 %1754  ;;  %2116 = vmatmul.mubr.f32.gmra.mrb[58].mxu0 %v9482_v57 }
 0x875   :  { %v1799_v43 = vsel %vm739_vm6, %v1790_v44, %v1770_v36  ;;  %v1700_v35 = vpop.xlane.xlu0 %1699  ;;  %v1772_v49 = vsub.f32 %v9290_v54, %v9490_v12 }
 0x876   :  { %v1845_v27 = vmul.f32 1.442695, %v1799_v43  ;;  %v1709_v41 = vsub.f32 %v9290_v54, %v1700_v35  ;;  %v1761_v43 = vsub.f32 %v9110_v5, %v9349_v7 }
 0x878   :  { %7965 = vpow2.f32 %v1845_v27  ;;  %v1791_v53 = vsel %vm31_vm0, %v1672_v34, %v1709_v41  ;;  %v7713_v60 = vpop.permute.xlu1 %7712  ;;  %v1817_v5 = vmul.f32 1.442695, %v1761_v43 }
 0x879   :  { %7967 = vpow2.f32 %v1843_v31  ;;  %v1800_v39 = vsel %vm739_vm6, %v1791_v53, %v1772_v49  ;;  %v7715_v23 = vunpack.i.h.bf16 %v7713_v60  ;;  %v7714_v8 = vunpack.i.l.bf16 %v7713_v60  ;;  %v1599_v36 = vpop.xlane.xlu0 %1598 }
 0x87a   :  { %v9500_v44 = vpop.eup %7959  ;;  %v1851_v35 = vmul.f32 1.442695, %v1800_v39  ;;  %v1608_v54 = vsub.f32 %v9287_v22, %v1599_v36  ;;  %v1823_v39 = vmul.f32 1.442695, %v1763_v3 }
 0x87b   :  { %v9506_v4 = vpop.eup %7961  ;;  %v7278_v34 = vpack.c.bf16 %v7715_v23, %v7714_v8  ;;  %2120 = vmatprep.mubr.f32.mxu0 %v9500_v44  ;;  %v1767_v8 = vsub.f32 %v9216_v61, %v9423_v19  ;;  %v1769_v61 = vsub.f32 %v9250_v21, %v9448_v52  ;;  %v1773_v52 = vsub.f32 %v9306_v37, %v9490_v12 }
 0x87c   :  { %7969 = vpow2.f32 %v1851_v35  ;;  %v1782_v31 = vsel %vm720_vm5, %v1608_v54, %v1671_v1  ;;  %2121 = vmatmul.mubr.f32.gmra.mrb[60].mxu0 %v9506_v4  ;;  %v9514_v53 = vpop.eup %7963  ;;  %v1771_v35 = vsub.f32 %v9284_v59, %v9469_v45 }
 0x87d   :  { %7971 = vpow2.f32 %v1811_v10  ;;  %v1849_v27 = vmul.f32 1.442695, %v1782_v31  ;;  %7279 = vmatpush3.bf16.msra.mxu1 %v7278_v34  ;;  %v7718_v41 = vpop.permute.xlu0 %7717  ;;  %v1765_v10 = vsub.f32 %v9178_v48, %v9394_v29  ;;  %v11300_v48 = vmov 0.0  }
 0x87e   :  { %v7720_v7 = vunpack.i.h.bf16 %v7718_v41  ;;  %v7719_v22 = vunpack.i.l.bf16 %v7718_v41  ;;  %7280 = vmatprep.subr.bf16.mxu1 %v11299_v30  ;;  %v1835_v43 = vmul.f32 1.442695, %v1767_v8  ;;  %v1841_v1 = vmul.f32 1.442695, %v1769_v61 }
 0x87f   :  { %7973 = vpow2.f32 %v1849_v27  ;;  %v1829_v11 = vmul.f32 1.442695, %v1765_v10 }
 0x880   :  { %v7281_v49 = vpack.c.bf16 %v7720_v7, %v7719_v22  ;;  %7975 = vpow2.f32 %v1817_v5 }
 0x881   :  { %7977 = vpow2.f32 %v1823_v39 }
 0x882   :  { %v9516_v60 = vpop.eup %7965  ;;  %7282 = vmatpush3.bf16.msra.mxu1 %v7281_v49  ;;  %7979 = vpow2.f32 %v1829_v11 }
 0x883   :  { %v9520_v23 = vpop.eup %7967  ;;  %2125 = vmatprep.mubr.f32.mxu0 %v9516_v60  ;;  %7525 = vmatprep.subr.bf16.mxu1 %v11299_v30  ;;  %7981 = vpow2.f32 %v1835_v43 }
 0x884   :  { %2126 = vmatmul.mubr.f32.gmra.mrb[62].mxu0 %v9520_v23  ;;  %7983 = vpow2.f32 %v1841_v1 }
 0x885   :  { %6700 = vmatmul.mubr.msk.f32.vlgmr.msra.gmra.mrb[40].mxu1 %vm750_vm3, %v9514_v53 }
 0x886   :  { %v9527_v25 = vpop.eup %7969  ;;  %6702 = vmatprep.mubr.msk.f32.mxu1 %vm8199_vm1, %v11300_v48  ;;  %7527 = vmatpush3.bf16.msra.mxu1 %v9430_v42 }
 0x887   :  { %v9534_v29 = vpop.eup %7971  ;;  %2130 = vmatprep.mubr.f32.mxu0 %v9527_v25  ;;  %7526 = vmatprep.subr.bf16.mxu1 %v11299_v30 }
 0x889   :  { %v9538_v36 = vpop.eup %7973  ;;  %6703 = vmatmul.mubr.msk.f32.gmra.mrb[42].mxu1 %vm750_vm3, %v9534_v29 }
 0x88a   :  { %2131 = vmatmul.mubr.f32.gmra.mrb[64].mxu0 %v9538_v36  ;;  %6705 = vmatprep.mubr.msk.f32.mxu1 %vm8199_vm1, %v11300_v48  ;;  %v7976_v19 = vpop.eup %7975 }
 0x88b   :  { %2310 = vmatprep.mubr.f32.mxu0 %v9358_v18  ;;  %7528 = vmatpush3.bf16.msra.mxu1 %v9430_v42  ;;  %v7978_v21 = vpop.eup %7977  ;;  %v1847_v18 = vmul.f32 1.442695, %v1771_v35 }
 0x88c   :  { %7327 = vmatprep.subr.bf16.mxu1 %v11299_v30  ;;  %v7980_v59 = vpop.eup %7979 }
 0x88d   :  { %6706 = vmatmul.mubr.msk.f32.gmra.mrb[44].mxu1 %vm750_vm3, %v7976_v19  ;;  %7985 = vpow2.f32 %v1847_v18  ;;  %v7982_v37 = vpop.eup %7981 }
 0x88e   :  { %2311 = vmatmul.mubr.f32.vlgmr.msra.gmra.mrb[66].mxu0 %v9364_v56  ;;  %6708 = vmatprep.mubr.msk.f32.mxu1 %vm8199_vm1, %v11300_v48  ;;  %v1853_v56 = vmul.f32 1.442695, %v1773_v52 }
 0x88f   :  { %2315 = vmatprep.mubr.f32.mxu0 %v9383_v47  ;;  %7317 = vmatpush3.bf16.msra.mxu0 %v9430_v42  ;;  %v7984_v47 = vpop.eup %7983 }
 0x890   :  { %7318 = vmatprep.subr.bf16.mxu0 %v11299_v30  ;;  %7987 = vpow2.f32 %v1853_v56 }
 0x891   :  { %6709 = vmatmul.mubr.msk.f32.gmra.mrb[46].mxu1 %vm750_vm3, %v7978_v21 }
 0x892   :  { %2316 = vmatmul.mubr.f32.gmra.mrb[68].mxu0 %v9388_v9  ;;  %6711 = vmatprep.mubr.msk.f32.mxu1 %vm8199_vm1, %v11300_v48 }
 0x893   :  { %2320 = vmatprep.mubr.f32.mxu0 %v9407_v33  ;;  %7320 = vmatpush3.bf16.msra.mxu0 %v9430_v42 }
 0x894   :  { %7321 = vmatprep.subr.bf16.mxu0 %v11299_v30 }
 0x895   :  { %6712 = vmatmul.mubr.msk.f32.gmra.mrb[48].mxu1 %vm750_vm3, %v7980_v59 }
 0x896   :  { %2321 = vmatmul.mubr.f32.gmra.mrb[70].mxu0 %v9417_v17  ;;  %6714 = vmatprep.mubr.msk.f32.mxu1 %vm8199_vm1, %v11300_v48  ;;  %v2484_v17 = vld [vmem:[#allocation2 + $0x148] sm:$0xff] }
 0x897   :  { %2325 = vmatprep.mubr.f32.mxu0 %v9436_v50  ;;  %v7986_v9 = vpop.eup %7985  ;;  %v2485_v50 = vld [vmem:[#allocation2 + $0x150] sm:$0xff] }
 0x899   :  { %6715 = vmatmul.mubr.msk.f32.gmra.mrb[50].mxu1 %vm750_vm3, %v7982_v37 }
 0x89a   :  { %2326 = vmatmul.mubr.f32.gmra.mrb[72].mxu0 %v9442_v32  ;;  %6717 = vmatprep.mubr.msk.f32.mxu1 %vm8199_vm1, %v11300_v48  ;;  %v7988_v33 = vpop.eup %7987  ;;  %v7322_v32 = vpack.c.bf16 %v2485_v50, %v2484_v17 }
 0x89b   :  { %2330 = vmatprep.mubr.f32.mxu0 %v9457_v14  ;;  %v2486_v14 = vld [vmem:[#allocation2 + $0x158] sm:$0xff] }
 0x89d   :  { %6718 = vmatmul.mubr.msk.f32.gmra.mrb[52].mxu1 %vm750_vm3, %v7984_v47 }
 0x89e   :  { %2331 = vmatmul.mubr.f32.gmra.mrb[74].mxu0 %v9463_v2  ;;  %6720 = vmatprep.mubr.msk.f32.mxu1 %vm8199_vm1, %v11300_v48  ;;  %v2487_v2 = vld [vmem:[#allocation2 + $0x160] sm:$0xff] }
 0x89f   :  { %2335 = vmatprep.mubr.f32.mxu0 %v9477_v15  ;;  %v7325_v45 = vpack.c.bf16 %v2487_v2, %v2486_v14 }
 0x8a1   :  { %6721 = vmatmul.mubr.msk.f32.gmra.mrb[54].mxu1 %vm750_vm3, %v7986_v9 }
 0x8a2   :  { %2336 = vmatmul.mubr.f32.gmra.mrb[76].mxu0 %v9482_v57  ;;  %6723 = vmatprep.mubr.msk.f32.mxu1 %vm8199_vm1, %v11300_v48 }
 0x8a3   :  { %2340 = vmatprep.mubr.f32.mxu0 %v9500_v44 }
 0x8a5   :  { %6724 = vmatmul.mubr.msk.f32.gmra.mrb[56].mxu1 %vm750_vm3, %v7988_v33 }
 0x8a6   :  { %2341 = vmatmul.mubr.f32.gmra.mrb[78].mxu0 %v9506_v4  ;;  %6740 = vmatprep.mubr.msk.f32.mxu1 %vm8199_vm1, %v11300_v48 }
 0x8a7   :  { %2345 = vmatprep.mubr.f32.mxu0 %v9516_v60 }
 0x8a9   :  { %6741 = vmatmul.mubr.msk.f32.vlgmr.msra.gmra.mrb[58].mxu1 %vm750_vm3, %v7976_v19 }
 0x8aa   :  { %2346 = vmatmul.mubr.f32.gmra.mrb[80].mxu0 %v9520_v23  ;;  %6743 = vmatprep.mubr.msk.f32.mxu1 %vm8199_vm1, %v11300_v48 }
 0x8ab   :  { %2350 = vmatprep.mubr.f32.mxu0 %v9527_v25 }
 0x8ad   :  { %6744 = vmatmul.mubr.msk.f32.gmra.mrb[60].mxu1 %vm750_vm3, %v7978_v21 }
 0x8ae   :  { %2351 = vmatmul.mubr.f32.gmra.mrb[82].mxu0 %v9538_v36  ;;  %6746 = vmatprep.mubr.msk.f32.mxu1 %vm8199_vm1, %v11300_v48 }
 0x8af   :  { %6734 = vmatprep.mubr.msk.f32.mxu0 %vm8199_vm1, %v11300_v48 }
 0x8b1   :  { %6747 = vmatmul.mubr.msk.f32.gmra.mrb[62].mxu1 %vm750_vm3, %v7980_v59 }
 0x8b2   :  { %6735 = vmatmul.mubr.msk.f32.vlgmr.msra.gmra.mrb[84].mxu0 %vm750_vm3, %v9514_v53  ;;  %6749 = vmatprep.mubr.msk.f32.mxu1 %vm8199_vm1, %v11300_v48 }
 0x8b3   :  { %6737 = vmatprep.mubr.msk.f32.mxu0 %vm8199_vm1, %v11300_v48  ;;  %7323 = vmatpush3.bf16.msra.mxu0 %v7322_v32 }
 0x8b4   :  { %7324 = vmatprep.subr.bf16.mxu0 %v11299_v30 }
 0x8b5   :  { %6750 = vmatmul.mubr.msk.f32.gmra.mrb[64].mxu1 %vm750_vm3, %v7982_v37 }
 0x8b6   :  { %6738 = vmatmul.mubr.msk.f32.gmra.mrb[86].mxu0 %vm750_vm3, %v9534_v29  ;;  %6752 = vmatprep.mubr.msk.f32.mxu1 %vm8199_vm1, %v11300_v48 }
 0x8b7   :  { %6769 = vmatprep.mubr.msk.f32.mxu0 %vm8199_vm1, %v11300_v48  ;;  %7326 = vmatpush3.bf16.msra.mxu0 %v7325_v45 }
 0x8b8   :  { %7333 = vmatprep.subr.bf16.mxu0 %v11299_v30 }
 0x8b9   :  { %6753 = vmatmul.mubr.msk.f32.gmra.mrb[66].mxu1 %vm750_vm3, %v7984_v47 }
 0x8ba   :  { %6755 = vmatprep.mubr.msk.f32.mxu1 %vm8199_vm1, %v11300_v48 }
 0x8bd   :  { %6756 = vmatmul.mubr.msk.f32.gmra.mrb[68].mxu1 %vm750_vm3, %v7986_v9 }
 0x8be   :  { %6758 = vmatprep.mubr.msk.f32.mxu1 %vm8199_vm1, %v11300_v48 }
 0x8c1   :  { %6759 = vmatmul.mubr.msk.f32.gmra.mrb[70].mxu1 %vm750_vm3, %v7988_v33 }
 0x8c2   :  { %6804 = vmatprep.mubr.msk.f32.mxu1 %vm8199_vm1, %v11300_v48 }
 0x91e   :  { %v6109_v15 = vpop.f32.mrb[48].mxu0 }
 0x91f   :  { %v6110_v57 = vpop.f32.mrb[49].mxu0 }
 0x920   :  { %v6111_v12 = vadd.f32 %v6110_v57, %v6109_v15 }
 0x927   :  { %v6112_v44 = vpop.f32.mrb[50].mxu0 }
 0x928   :  { %v6113_v54 = vpop.f32.mrb[51].mxu0 }
 0x929   :  { %v6114_v4 = vadd.f32 %v6113_v54, %v6112_v44 }
 0x92f   :  { %v6115_v34 = vpop.f32.mrb[52].mxu0 }
 0x930   :  { %v6116_v31 = vpop.f32.mrb[53].mxu0 }
 0x931   :  { %v6117_v27 = vadd.f32 %v6116_v31, %v6115_v34 }
 0x937   :  { %v6118_v41 = vpop.f32.mrb[54].mxu0 }
 0x938   :  { %v6119_v5 = vpop.f32.mrb[55].mxu0 }
 0x939   :  { %v6120_v3 = vadd.f32 %v6119_v5, %v6118_v41 }
 0x93f   :  { %v6121_v7 = vpop.f32.mrb[56].mxu0 }
 0x940   :  { %v6122_v22 = vpop.f32.mrb[57].mxu0 }
 0x941   :  { %v6123_v49 = vadd.f32 %v6122_v22, %v6121_v7 }
 0x947   :  { %v6124_v53 = vpop.f32.mrb[58].mxu0 }
 0x948   :  { %v6125_v60 = vpop.f32.mrb[59].mxu0 }
 0x949   :  { %v6126_v39 = vadd.f32 %v6125_v60, %v6124_v53 }
 0x94f   :  { %v6127_v10 = vpop.f32.mrb[60].mxu0 }
 0x950   :  { %v6128_v23 = vpop.f32.mrb[61].mxu0 }
 0x951   :  { %v6129_v25 = vadd.f32 %v6128_v23, %v6127_v10 }
 0x957   :  { %v6130_v11 = vpop.f32.mrb[62].mxu0 }
 0x958   :  { %v6131_v8 = vpop.f32.mrb[63].mxu0  ;;  %v2202_v29 = vpop.f32.mrb[40].mxu1 }
 0x959   :  { %v6132_v36 = vadd.f32 %v6131_v8, %v6130_v11  ;;  %v9629_v43 = vadd.f32 %v6111_v12, %v2202_v29  ;;  %v6701_v61 = vpop.f32.mrb[41].mxu1 }
 0x95c   :  { %v2207_v19 = vpop.f32.mrb[42].mxu1 }
 0x95d   :  { %v9631_v1 = vadd.f32 %v6114_v4, %v2207_v19  ;;  %v6133_v35 = vpop.f32.mrb[64].mxu0  ;;  %v6704_v21 = vpop.f32.mrb[43].mxu1 }
 0x95e   :  { %v6134_v18 = vpop.f32.mrb[65].mxu0 }
 0x95f   :  { %v6135_v52 = vadd.f32 %v6134_v18, %v6133_v35 }
 0x960   :  { %v2212_v59 = vpop.f32.mrb[44].mxu1 }
 0x961   :  { %v9633_v56 = vadd.f32 %v6117_v27, %v2212_v59  ;;  %v6707_v37 = vpop.f32.mrb[45].mxu1  ;;  %v6181_v47 = vpop.f32.mrb[66].mxu0 }
 0x962   :  { %v6182_v9 = vpop.f32.mrb[67].mxu0 }
 0x963   :  { %v6183_v33 = vadd.f32 %v6182_v9, %v6181_v47 }
 0x964   :  { %v2217_v17 = vpop.f32.mrb[46].mxu1 }
 0x965   :  { %v9635_v50 = vadd.f32 %v6120_v3, %v2217_v17  ;;  %v6710_v32 = vpop.f32.mrb[47].mxu1  ;;  %v6184_v14 = vpop.f32.mrb[68].mxu0 }
 0x966   :  { %v6185_v2 = vpop.f32.mrb[69].mxu0 }
 0x967   :  { %v6186_v45 = vadd.f32 %v6185_v2, %v6184_v14 }
 0x968   :  { %v2222_v15 = vpop.f32.mrb[48].mxu1 }
 0x969   :  { %v9637_v57 = vadd.f32 %v6123_v49, %v2222_v15  ;;  %v6713_v12 = vpop.f32.mrb[49].mxu1  ;;  %v6187_v44 = vpop.f32.mrb[70].mxu0 }
 0x96a   :  { %v6188_v54 = vpop.f32.mrb[71].mxu0 }
 0x96b   :  { %v6189_v4 = vadd.f32 %v6188_v54, %v6187_v44 }
 0x96c   :  { %v2227_v34 = vpop.f32.mrb[50].mxu1 }
 0x96d   :  { %v9639_v31 = vadd.f32 %v6126_v39, %v2227_v34  ;;  %v6716_v27 = vpop.f32.mrb[51].mxu1  ;;  %v6190_v41 = vpop.f32.mrb[72].mxu0 }
 0x96e   :  { %v6191_v5 = vpop.f32.mrb[73].mxu0 }
 0x96f   :  { %v6192_v7 = vadd.f32 %v6191_v5, %v6190_v41 }
 0x970   :  { %v2232_v3 = vpop.f32.mrb[52].mxu1 }
 0x971   :  { %v9641_v22 = vadd.f32 %v6129_v25, %v2232_v3  ;;  %v6719_v53 = vpop.f32.mrb[53].mxu1  ;;  %v6193_v60 = vpop.f32.mrb[74].mxu0 }
 0x972   :  { %v6194_v10 = vpop.f32.mrb[75].mxu0 }
 0x973   :  { %v6195_v23 = vadd.f32 %v6194_v10, %v6193_v60 }
 0x974   :  { %v2237_v49 = vpop.f32.mrb[54].mxu1 }
 0x975   :  { %v9643_v11 = vadd.f32 %v6132_v36, %v2237_v49  ;;  %v6722_v8 = vpop.f32.mrb[55].mxu1  ;;  %v6196_v29 = vpop.f32.mrb[76].mxu0 }
 0x976   :  { %v6197_v61 = vpop.f32.mrb[77].mxu0 }
 0x977   :  { %v6198_v19 = vadd.f32 %v6197_v61, %v6196_v29 }
 0x978   :  { %v2242_v39 = vpop.f32.mrb[56].mxu1 }
 0x979   :  { %v9645_v35 = vadd.f32 %v6135_v52, %v2242_v39  ;;  %v6725_v21 = vpop.f32.mrb[57].mxu1  ;;  %v6199_v18 = vpop.f32.mrb[78].mxu0 }
 0x97a   :  { %v6200_v59 = vpop.f32.mrb[79].mxu0 }
 0x97b   :  { %v6201_v37 = vadd.f32 %v6200_v59, %v6199_v18 }
 0x97c   :  { %v2432_v25 = vpop.f32.mrb[58].mxu1 }
 0x97d   :  { %v2433_v47 = vadd.f32 %v6189_v4, %v2432_v25  ;;  %v6202_v9 = vpop.f32.mrb[80].mxu0  ;;  %v6742_v17 = vpop.f32.mrb[59].mxu1 }
 0x97e   :  { %v6203_v32 = vpop.f32.mrb[81].mxu0 }
 0x97f   :  { %7989 = vrcp.f32 %v2433_v47  ;;  %v6204_v14 = vadd.f32 %v6203_v32, %v6202_v9 }
 0x980   :  { %v2437_v36 = vpop.f32.mrb[60].mxu1 }
 0x981   :  { %v2438_v2 = vadd.f32 %v6192_v7, %v2437_v36  ;;  %v6205_v15 = vpop.f32.mrb[82].mxu0  ;;  %v6745_v12 = vpop.f32.mrb[61].mxu1 }
 0x982   :  { %v6206_v44 = vpop.f32.mrb[83].mxu0 }
 0x983   :  { %7991 = vrcp.f32 %v2438_v2  ;;  %v6207_v54 = vadd.f32 %v6206_v44, %v6205_v15 }
 0x984   :  { %v2442_v52 = vpop.f32.mrb[62].mxu1 }
 0x985   :  { %v2443_v34 = vadd.f32 %v6195_v23, %v2442_v52  ;;  %v2422_v27 = vpop.f32.mrb[84].mxu0  ;;  %v6748_v41 = vpop.f32.mrb[63].mxu1 }
 0x986   :  { %v2423_v5 = vadd.f32 %v6183_v33, %v2422_v27  ;;  %v6736_v3 = vpop.f32.mrb[85].mxu0 }
 0x987   :  { %7993 = vrcp.f32 %v2443_v34  ;;  %v11302_v34 = vld [vmem:[#allocation6_spill] sm:$0xff] }
 0x988   :  { %7995 = vrcp.f32 %v2423_v5  ;;  %v2447_v4 = vpop.f32.mrb[64].mxu1 }
 0x989   :  { %v7990_v53 = vpop.eup %7989  ;;  %v2448_v60 = vadd.f32 %v6198_v19, %v2447_v4  ;;  %v2427_v10 = vpop.f32.mrb[86].mxu0 }
 0x98a   :  { %v6751_v49 = vpop.f32.mrb[65].mxu1  ;;  %v2428_v8 = vadd.f32 %v6186_v45, %v2427_v10  ;;  %v6739_v7 = vpop.f32.mrb[87].mxu0  ;;  %v2477_v29 = vmul.f32 %v7990_v53, %v9633_v56  ;;  %v11303_v53 = vld [vmem:[#allocation7_spill] sm:$0xff] }
 0x98b   :  { %7997 = vrcp.f32 %v2448_v60 }
 0x98c   :  { %7999 = vrcp.f32 %v2428_v8  ;;  %v2452_v61 = vpop.f32.mrb[66].mxu1 }
 0x98d   :  { %v7992_v39 = vpop.eup %7991  ;;  %v2453_v23 = vadd.f32 %v6201_v37, %v2452_v61  ;;  %v6754_v21 = vpop.f32.mrb[67].mxu1 }
 0x98e   :  { %v2478_v33 = vmul.f32 %v7992_v39, %v9635_v50 }
 0x98f   :  { %8001 = vrcp.f32 %v2453_v23 }
 0x990   :  { %v2457_v18 = vpop.f32.mrb[68].mxu1 }
 0x991   :  { %v7994_v59 = vpop.eup %7993  ;;  %v2458_v25 = vadd.f32 %v6204_v14, %v2457_v18  ;;  %v6757_v47 = vpop.f32.mrb[69].mxu1  ;;  %v11305_v18 = vld [vmem:[#allocation9_spill] sm:$0xff] }
 0x992   :  { %v7996_v19 = vpop.eup %7995  ;;  %v2479_v9 = vmul.f32 %v7994_v59, %v9637_v57 }
 0x993   :  { %v2475_v45 = vmul.f32 %v7996_v19, %v9629_v43  ;;  %8003 = vrcp.f32 %v2458_v25 }
 0x994   :  { %v2462_v56 = vpop.f32.mrb[70].mxu1 }
 0x995   :  { %v7998_v17 = vpop.eup %7997  ;;  %v2463_v32 = vadd.f32 %v6207_v54, %v2462_v56  ;;  %v6760_v36 = vpop.f32.mrb[71].mxu1  ;;  %6770 = vmatmul.mubr.msk.f32.vlgmr.msra.gmra.mrb[88].mxu0 %vm750_vm3, %v2475_v45  ;;  %v11306_v45 = vld [vmem:[#allocation10_spill] sm:$0xff] }
 0x996   :  { %v8000_v37 = vpop.eup %7999  ;;  %6772 = vmatprep.mubr.msk.f32.mxu0 %vm8199_vm1, %v11300_v48  ;;  %v2480_v50 = vmul.f32 %v7998_v17, %v9639_v31 }
 0x997   :  { %8005 = vrcp.f32 %v2463_v32  ;;  %v2476_v14 = vmul.f32 %v8000_v37, %v9631_v1 }
 0x999   :  { %v8002_v2 = vpop.eup %8001  ;;  %6773 = vmatmul.mubr.msk.f32.gmra.mrb[90].mxu0 %vm750_vm3, %v2476_v14 }
 0x99a   :  { %6775 = vmatprep.mubr.msk.f32.mxu0 %vm8199_vm1, %v11300_v48  ;;  %v2481_v43 = vmul.f32 %v8002_v2, %v9641_v22 }
 0x99d   :  { %v8004_v57 = vpop.eup %8003  ;;  %6776 = vmatmul.mubr.msk.f32.gmra.mrb[92].mxu0 %vm750_vm3, %v2477_v29  ;;  %v11304_v29 = vld [vmem:[#allocation8_spill] sm:$0xff] }
 0x99e   :  { %6778 = vmatprep.mubr.msk.f32.mxu0 %vm8199_vm1, %v11300_v48  ;;  %v2482_v15 = vmul.f32 %v8004_v57, %v9643_v11  ;;  %v5826_v11 = vld [vmem:[#allocation2 + $0x168] ss:$0 sm:$0xff] }
 0x9a1   :  { %v8006_v31 = vpop.eup %8005  ;;  %6779 = vmatmul.mubr.msk.f32.gmra.mrb[94].mxu0 %vm750_vm3, %v2478_v33 }
 0x9a2   :  { %6781 = vmatprep.mubr.msk.f32.mxu0 %vm8199_vm1, %v11300_v48  ;;  %v2483_v1 = vmul.f32 %v8006_v31, %v9645_v35  ;;  %v11301_v35 = vld [vmem:[#allocation5_spill] sm:$0xff]  ;;  %v11308_v31 = vld [vmem:[#allocation12_spill] sm:$0xff] }
 0x9a5   :  { %6782 = vmatmul.mubr.msk.f32.gmra.mrb[96].mxu0 %vm750_vm3, %v2479_v9 }
 0x9a6   :  { %6784 = vmatprep.mubr.msk.f32.mxu0 %vm8199_vm1, %v11300_v48 }
 0x9a9   :  { %6785 = vmatmul.mubr.msk.f32.gmra.mrb[98].mxu0 %vm750_vm3, %v2480_v50  ;;  %v11307_v50 = vld [vmem:[#allocation11_spill] sm:$0xff] }
 0x9aa   :  { %6787 = vmatprep.mubr.msk.f32.mxu0 %vm8199_vm1, %v11300_v48 }
 0x9ad   :  { %6788 = vmatmul.mubr.msk.f32.gmra.mrb[100].mxu0 %vm750_vm3, %v2481_v43 }
 0x9ae   :  { %6790 = vmatprep.mubr.msk.f32.mxu0 %vm8199_vm1, %v11300_v48 }
 0x9b1   :  { %6791 = vmatmul.mubr.msk.f32.gmra.mrb[102].mxu0 %vm750_vm3, %v2482_v15 }
 0x9b2   :  { %6793 = vmatprep.mubr.msk.f32.mxu0 %vm8199_vm1, %v11300_v48 }
 0x9b5   :  { %6794 = vmatmul.mubr.msk.f32.gmra.mrb[104].mxu0 %vm750_vm3, %v2483_v1 }
 0x9b6   :  { %6847 = vmatprep.mubr.msk.f32.mxu0 %vm8199_vm1, %v11300_v48 }
 0xa68   :  { %v2581_v22 = vpop.f32.mrb[88].mxu0 }
 0xa69   :  { %v2625_v12 = vadd.f32 %v2581_v22, %v11301_v35  ;;  %v6771_v44 = vpop.f32.mrb[89].mxu0 }
 0xa6b   :  { %v9684_v54 = vadd.f32 %v5826_v11, %v2625_v12 }
 0xa6c   :  { %v2586_v52 = vpop.f32.mrb[90].mxu0 }
 0xa6d   :  { %v2626_v27 = vadd.f32 %v2586_v52, %v11302_v34  ;;  %v6774_v41 = vpop.f32.mrb[91].mxu0  ;;  %v2649_v5 = vsel %vm750_vm3, %v9684_v54, 0.0  ;;  %v11309_v52 = vld [vmem:[#allocation13_spill] sm:$0xff] }
 0xa6e   :  { %2650 = vadd.xlane.f32.xlu1 %v2649_v5 }
 0xa6f   :  { %v9689_v3 = vadd.f32 %v5826_v11, %v2626_v27 }
 0xa70   :  { %v2591_v4 = vpop.f32.mrb[92].mxu0 }
 0xa71   :  { %v2627_v60 = vadd.f32 %v2591_v4, %v11303_v53  ;;  %v6777_v10 = vpop.f32.mrb[93].mxu0  ;;  %v2652_v49 = vsel %vm750_vm3, %v9689_v3, 0.0 }
 0xa72   :  { %2653 = vadd.xlane.f32.xlu0 %v2652_v49 }
 0xa73   :  { %v9694_v8 = vadd.f32 %v5826_v11, %v2627_v60 }
 0xa74   :  { %v2596_v7 = vpop.f32.mrb[94].mxu0 }
 0xa75   :  { %v2628_v61 = vadd.f32 %v2596_v7, %v11304_v29  ;;  %v6780_v39 = vpop.f32.mrb[95].mxu0  ;;  %v2655_v23 = vsel %vm750_vm3, %v9694_v8, 0.0 }
 0xa76   :  { %2656 = vadd.xlane.f32.xlu1 %v2655_v23 }
 0xa77   :  { %v9699_v21 = vadd.f32 %v5826_v11, %v2628_v61 }
 0xa78   :  { %v2601_v33 = vpop.f32.mrb[96].mxu0 }
 0xa79   :  { %v2629_v59 = vadd.f32 %v2601_v33, %v11305_v18  ;;  %v6783_v25 = vpop.f32.mrb[97].mxu0  ;;  %v2658_v47 = vsel %vm750_vm3, %v9699_v21, 0.0 }
 0xa7a   :  { %2659 = vadd.xlane.f32.xlu0 %v2658_v47 }
 0xa7b   :  { %v9704_v19 = vadd.f32 %v5826_v11, %v2629_v59 }
 0xa7c   :  { %v2606_v9 = vpop.f32.mrb[98].mxu0 }
 0xa7d   :  { %v2630_v56 = vadd.f32 %v2606_v9, %v11306_v45  ;;  %v6786_v17 = vpop.f32.mrb[99].mxu0  ;;  %v2661_v32 = vsel %vm750_vm3, %v9704_v19, 0.0 }
 0xa7e   :  { %2662 = vadd.xlane.f32.xlu1 %v2661_v32 }
 0xa7f   :  { %v9709_v36 = vadd.f32 %v5826_v11, %v2630_v56 }
 0xa80   :  { %v2611_v37 = vpop.f32.mrb[100].mxu0 }
 0xa81   :  { %v2631_v14 = vadd.f32 %v2611_v37, %v11307_v50  ;;  %v6789_v2 = vpop.f32.mrb[101].mxu0  ;;  %v2664_v43 = vsel %vm750_vm3, %v9709_v36, 0.0 }
 0xa82   :  { %2665 = vadd.xlane.f32.xlu0 %v2664_v43 }
 0xa83   :  { %v9714_v57 = vadd.f32 %v5826_v11, %v2631_v14 }
 0xa84   :  { %v2616_v15 = vpop.f32.mrb[102].mxu0 }
 0xa85   :  { %v2632_v1 = vadd.f32 %v2616_v15, %v11308_v31  ;;  %v6792_v22 = vpop.f32.mrb[103].mxu0  ;;  %v2667_v35 = vsel %vm750_vm3, %v9714_v57, 0.0 }
 0xa86   :  { %2668 = vadd.xlane.f32.xlu1 %v2667_v35 }
 0xa87   :  { %v9719_v12 = vadd.f32 %v5826_v11, %v2632_v1 }
 0xa88   :  { %v2621_v44 = vpop.f32.mrb[104].mxu0 }
 0xa89   :  { %v2633_v34 = vadd.f32 %v2621_v44, %v11309_v52  ;;  %v6795_v27 = vpop.f32.mrb[105].mxu0  ;;  %v2670_v41 = vsel %vm750_vm3, %v9719_v12, 0.0 }
 0xa8a   :  { %2671 = vadd.xlane.f32.xlu0 %v2670_v41 }
 0xa8b   :  { %v9724_v5 = vadd.f32 %v5826_v11, %v2633_v34 }
 0xa8d   :  { %v2673_v4 = vsel %vm750_vm3, %v9724_v5, 0.0 }
 0xa8e   :  { %2674 = vadd.xlane.f32.xlu1 %v2673_v4 }
 0xafb   :  { %v2651_v53 = vpop.xlane.xlu1 %2650 }
 0xafc   :  { %v2676_v60 = vmul.f32 0.03125, %v2651_v53 }
 0xafe   :  { %v9729_v10 = vsub.f32 %v9684_v54, %v2676_v60 }
 0xaff   :  { %v2654_v49 = vpop.xlane.xlu0 %2653 }
 0xb00   :  { %v2677_v7 = vmul.f32 0.03125, %v2654_v49  ;;  %v2694_v29 = vmul.f32 %v9729_v10, %v9729_v10 }
 0xb02   :  { %v9734_v61 = vsub.f32 %v9689_v3, %v2677_v7  ;;  %v2703_v11 = vsel %vm750_vm3, %v2694_v29, 0.0 }
 0xb03   :  { %v2657_v39 = vpop.xlane.xlu1 %2656  ;;  %2704 = vadd.xlane.f32.xlu0 %v2703_v11 }
 0xb04   :  { %v2678_v23 = vmul.f32 0.03125, %v2657_v39  ;;  %v2695_v33 = vmul.f32 %v9734_v61, %v9734_v61 }
 0xb06   :  { %v9740_v18 = vsub.f32 %v9694_v8, %v2678_v23  ;;  %v2706_v59 = vsel %vm750_vm3, %v2695_v33, 0.0  ;;  %v2792_v23 = vld [vmem:[#allocation2 + $0x178] sm:$0xff]  ;;  %v2793_v33 = vld [vmem:[#allocation2 + $0x180] sm:$0xff] }
 0xb07   :  { %v2660_v25 = vpop.xlane.xlu0 %2659  ;;  %2707 = vadd.xlane.f32.xlu1 %v2706_v59 }
 0xb08   :  { %v2679_v47 = vmul.f32 0.03125, %v2660_v25  ;;  %v2696_v9 = vmul.f32 %v9740_v18, %v9740_v18  ;;  %v7328_v25 = vpack.c.bf16 %v2793_v33, %v2792_v23 }
 0xb0a   :  { %v9746_v45 = vsub.f32 %v9699_v21, %v2679_v47  ;;  %v2709_v56 = vsel %vm750_vm3, %v2696_v9, 0.0  ;;  %7329 = vmatpush3.bf16.msra.mxu1 %v7328_v25  ;;  %v2794_v9 = vld [vmem:[#allocation2 + $0x188] sm:$0xff] }
 0xb0b   :  { %v2663_v17 = vpop.xlane.xlu1 %2662  ;;  %2710 = vadd.xlane.f32.xlu0 %v2709_v56  ;;  %7330 = vmatprep.subr.bf16.mxu1 %v11299_v30  ;;  %v2795_v56 = vld [vmem:[#allocation2 + $0x190] sm:$0xff] }
 0xb0c   :  { %v2680_v32 = vmul.f32 0.03125, %v2663_v17  ;;  %v2697_v37 = vmul.f32 %v9746_v45, %v9746_v45  ;;  %v7331_v17 = vpack.c.bf16 %v2795_v56, %v2794_v9 }
 0xb0e   :  { %v9752_v50 = vsub.f32 %v9704_v19, %v2680_v32  ;;  %v2712_v14 = vsel %vm750_vm3, %v2697_v37, 0.0  ;;  %7332 = vmatpush3.bf16.msra.mxu1 %v7331_v17  ;;  %v2983_v32 = vld [vmem:[#allocation2 + $0x1a0] sm:$0xff]  ;;  %v2984_v37 = vld [vmem:[#allocation2 + $0x1a8] sm:$0xff] }
 0xb0f   :  { %v2666_v2 = vpop.xlane.xlu0 %2665  ;;  %2713 = vadd.xlane.f32.xlu1 %v2712_v14  ;;  %7345 = vmatprep.subr.bf16.mxu1 %v11299_v30  ;;  %v7334_v14 = vpack.c.bf16 %v2984_v37, %v2983_v32 }
 0xb10   :  { %v2681_v43 = vmul.f32 0.03125, %v2666_v2  ;;  %v2698_v15 = vmul.f32 %v9752_v50, %v9752_v50 }
 0xb11   :  { %7335 = vmatpush3.bf16.msra.mxu0 %v7334_v14 }
 0xb12   :  { %v9758_v31 = vsub.f32 %v9709_v36, %v2681_v43  ;;  %v2715_v1 = vsel %vm750_vm3, %v2698_v15, 0.0  ;;  %7336 = vmatprep.subr.bf16.mxu0 %v11299_v30 }
 0xb13   :  { %v2669_v22 = vpop.xlane.xlu1 %2668  ;;  %2716 = vadd.xlane.f32.xlu0 %v2715_v1 }
 0xb14   :  { %v2682_v35 = vmul.f32 0.03125, %v2669_v22  ;;  %v2699_v44 = vmul.f32 %v9758_v31, %v9758_v31 }
 0xb16   :  { %v9764_v52 = vsub.f32 %v9714_v57, %v2682_v35  ;;  %v2718_v34 = vsel %vm750_vm3, %v2699_v44, 0.0 }
 0xb17   :  { %v2672_v27 = vpop.xlane.xlu0 %2671  ;;  %2719 = vadd.xlane.f32.xlu1 %v2718_v34 }
 0xb18   :  { %v2683_v41 = vmul.f32 0.03125, %v2672_v27  ;;  %v2700_v4 = vmul.f32 %v9764_v52, %v9764_v52  ;;  %v2648_v27 = vld [vmem:[#allocation2 + $0x170] sm:$0x3] }
 0xb1a   :  { %v9770_v53 = vsub.f32 %v9719_v12, %v2683_v41  ;;  %v2721_v60 = vsel %vm750_vm3, %v2700_v4, 0.0 }
 0xb1b   :  { %2722 = vadd.xlane.f32.xlu0 %v2721_v60  ;;  %v2675_v49 = vpop.xlane.xlu1 %2674 }
 0xb1c   :  { %v2684_v7 = vmul.f32 0.03125, %v2675_v49  ;;  %v2701_v29 = vmul.f32 %v9770_v53, %v9770_v53  ;;  %v11310_v49 = vld [vmem:[#allocation14_spill] sm:$0xff] }
 0xb1e   :  { %v9776_v11 = vsub.f32 %v9724_v5, %v2684_v7  ;;  %v2724_v39 = vsel %vm750_vm3, %v2701_v29, 0.0  ;;  %v9786_v7 = vrot.slane %v2648_v27, %v11310_v49 }
 0xb1f   :  { %2725 = vadd.xlane.f32.xlu1 %v2724_v39 }
 0xb20   :  { %v2702_v59 = vmul.f32 %v9776_v11, %v9776_v11 }
 0xb22   :  { %v2727_v47 = vsel %vm750_vm3, %v2702_v59, 0.0  ;;  %v11311_v59 = vld [vmem:[#allocation15_spill] sm:$0xff] }
 0xb23   :  { %2728 = vadd.xlane.f32.xlu0 %v2727_v47  ;;  %v9790_v25 = vrot.slane %v2648_v27, %v11311_v59 }
 0xb90   :  { %v2705_v2 = vpop.xlane.xlu0 %2704 }
 0xb91   :  { %v2730_v43 = vmul.f32 0.03125, %v2705_v2 }
 0xb93   :  { %v2739_v15 = vadd.f32 1e-05, %v2730_v43 }
 0xb94   :  { %v2708_v1 = vpop.xlane.xlu1 %2707 }
 0xb95   :  { %8007 = vrsqrt.f32 %v2739_v15  ;;  %v2731_v22 = vmul.f32 0.03125, %v2708_v1 }
 0xb97   :  { %v2740_v35 = vadd.f32 1e-05, %v2731_v22 }
 0xb98   :  { %v2711_v44 = vpop.xlane.xlu0 %2710 }
 0xb99   :  { %8009 = vrsqrt.f32 %v2740_v35  ;;  %v2732_v34 = vmul.f32 0.03125, %v2711_v44 }
 0xb9b   :  { %v2741_v41 = vadd.f32 1e-05, %v2732_v34 }
 0xb9c   :  { %v2714_v4 = vpop.xlane.xlu1 %2713 }
 0xb9d   :  { %8011 = vrsqrt.f32 %v2741_v41  ;;  %v2733_v60 = vmul.f32 0.03125, %v2714_v4 }
 0xb9f   :  { %v8008_v29 = vpop.eup %8007  ;;  %v2742_v39 = vadd.f32 1e-05, %v2733_v60 }
 0xba0   :  { %v2757_v23 = vmul.f32 %v8008_v29, %v9729_v10  ;;  %v2717_v33 = vpop.xlane.xlu0 %2716 }
 0xba1   :  { %8013 = vrsqrt.f32 %v2742_v39  ;;  %v2734_v47 = vmul.f32 0.03125, %v2717_v33 }
 0xba2   :  { %v2770_v9 = vmul.f32 %v9786_v7, %v2757_v23 }
 0xba3   :  { %v8010_v56 = vpop.eup %8009  ;;  %v2743_v17 = vadd.f32 1e-05, %v2734_v47 }
 0xba4   :  { %v2720_v32 = vpop.xlane.xlu1 %2719  ;;  %v2783_v37 = vadd.f32 %v9790_v25, %v2770_v9  ;;  %v2758_v14 = vmul.f32 %v8010_v56, %v9734_v61 }
 0xba5   :  { %8015 = vrsqrt.f32 %v2743_v17  ;;  %v2735_v2 = vmul.f32 0.03125, %v2720_v32 }
 0xba6   :  { %6805 = vmatmul.mubr.msk.f32.vlgmr.msra.gmra.mrb[72].mxu1 %vm750_vm3, %v2783_v37  ;;  %v2771_v10 = vmul.f32 %v9786_v7, %v2758_v14 }
 0xba7   :  { %v8012_v43 = vpop.eup %8011  ;;  %v2744_v15 = vadd.f32 1e-05, %v2735_v2  ;;  %6807 = vmatprep.mubr.msk.f32.mxu1 %vm8199_vm1, %v11300_v48 }
 0xba8   :  { %v2723_v1 = vpop.xlane.xlu0 %2722  ;;  %v2784_v22 = vadd.f32 %v9790_v25, %v2771_v10  ;;  %v2759_v35 = vmul.f32 %v8012_v43, %v9740_v18 }
 0xba9   :  { %8017 = vrsqrt.f32 %v2744_v15  ;;  %v2736_v44 = vmul.f32 0.03125, %v2723_v1 }
 0xbaa   :  { %6808 = vmatmul.mubr.msk.f32.gmra.mrb[74].mxu1 %vm750_vm3, %v2784_v22  ;;  %v2772_v61 = vmul.f32 %v9786_v7, %v2759_v35 }
 0xbab   :  { %v8014_v34 = vpop.eup %8013  ;;  %v2745_v27 = vadd.f32 1e-05, %v2736_v44  ;;  %6810 = vmatprep.mubr.msk.f32.mxu1 %vm8199_vm1, %v11300_v48 }
 0xbac   :  { %v2726_v41 = vpop.xlane.xlu1 %2725  ;;  %v2785_v4 = vadd.f32 %v9790_v25, %v2772_v61  ;;  %v2760_v60 = vmul.f32 %v8014_v34, %v9746_v45 }
 0xbad   :  { %8019 = vrsqrt.f32 %v2745_v27  ;;  %v2737_v29 = vmul.f32 0.03125, %v2726_v41  ;;  %v2985_v27 = vld [vmem:[#allocation2 + $0x1b0] sm:$0xff]  ;;  %v2986_v41 = vld [vmem:[#allocation2 + $0x1b8] sm:$0xff] }
 0xbae   :  { %6811 = vmatmul.mubr.msk.f32.gmra.mrb[76].mxu1 %vm750_vm3, %v2785_v4  ;;  %v2773_v18 = vmul.f32 %v9786_v7, %v2760_v60  ;;  %v7337_v4 = vpack.c.bf16 %v2986_v41, %v2985_v27  ;;  %v2988_v60 = vld [vmem:[#allocation2 + $0x1c8] sm:$0xff] }
 0xbaf   :  { %v8016_v39 = vpop.eup %8015  ;;  %v2746_v23 = vadd.f32 1e-05, %v2737_v29  ;;  %6813 = vmatprep.mubr.msk.f32.mxu1 %vm8199_vm1, %v11300_v48 }
 0xbb0   :  { %v2729_v33 = vpop.xlane.xlu0 %2728  ;;  %v2786_v47 = vadd.f32 %v9790_v25, %v2773_v18  ;;  %v2761_v9 = vmul.f32 %v8016_v39, %v9752_v50  ;;  %7338 = vmatpush3.bf16.msra.mxu0 %v7337_v4  ;;  %v2990_v18 = vld [vmem:[#allocation2 + $0x1d8] sm:$0xff] }
 0xbb1   :  { %8021 = vrsqrt.f32 %v2746_v23  ;;  %v2738_v56 = vmul.f32 0.03125, %v2729_v33  ;;  %7339 = vmatprep.subr.bf16.mxu0 %v11299_v30  ;;  %v9847_v39 = vld [vmem:[#allocation2 + $0x198] ss:$0 sm:$0xff] }
 0xbb2   :  { %6814 = vmatmul.mubr.msk.f32.gmra.mrb[78].mxu1 %vm750_vm3, %v2786_v47  ;;  %v2774_v45 = vmul.f32 %v9786_v7, %v2761_v9 }
 0xbb3   :  { %v8018_v17 = vpop.eup %8017  ;;  %v2747_v32 = vadd.f32 1e-05, %v2738_v56  ;;  %6816 = vmatprep.mubr.msk.f32.mxu1 %vm8199_vm1, %v11300_v48 }
 0xbb4   :  { %v2787_v37 = vadd.f32 %v9790_v25, %v2774_v45  ;;  %v2762_v14 = vmul.f32 %v8018_v17, %v9758_v31 }
 0xbb5   :  { %8023 = vrsqrt.f32 %v2747_v32 }
 0xbb6   :  { %6817 = vmatmul.mubr.msk.f32.gmra.mrb[80].mxu1 %vm750_vm3, %v2787_v37  ;;  %v2775_v50 = vmul.f32 %v9786_v7, %v2762_v14 }
 0xbb7   :  { %v8020_v2 = vpop.eup %8019  ;;  %6819 = vmatprep.mubr.msk.f32.mxu1 %vm8199_vm1, %v11300_v48 }
 0xbb8   :  { %v2788_v10 = vadd.f32 %v9790_v25, %v2775_v50  ;;  %v2763_v43 = vmul.f32 %v8020_v2, %v9764_v52 }
 0xbba   :  { %6820 = vmatmul.mubr.msk.f32.gmra.mrb[82].mxu1 %vm750_vm3, %v2788_v10  ;;  %v2776_v15 = vmul.f32 %v9786_v7, %v2763_v43 }
 0xbbb   :  { %v8022_v1 = vpop.eup %8021  ;;  %6822 = vmatprep.mubr.msk.f32.mxu1 %vm8199_vm1, %v11300_v48 }
 0xbbc   :  { %v2789_v31 = vadd.f32 %v9790_v25, %v2776_v15  ;;  %v2764_v22 = vmul.f32 %v8022_v1, %v9770_v53 }
 0xbbe   :  { %6823 = vmatmul.mubr.msk.f32.gmra.mrb[84].mxu1 %vm750_vm3, %v2789_v31  ;;  %v2777_v35 = vmul.f32 %v9786_v7, %v2764_v22 }
 0xbbf   :  { %v8024_v44 = vpop.eup %8023  ;;  %6825 = vmatprep.mubr.msk.f32.mxu1 %vm8199_vm1, %v11300_v48 }
 0xbc0   :  { %v2790_v52 = vadd.f32 %v9790_v25, %v2777_v35  ;;  %v2765_v61 = vmul.f32 %v8024_v44, %v9776_v11  ;;  %v2987_v11 = vld [vmem:[#allocation2 + $0x1c0] sm:$0xff] }
 0xbc1   :  { %v7340_v29 = vpack.c.bf16 %v2988_v60, %v2987_v11 }
 0xbc2   :  { %6826 = vmatmul.mubr.msk.f32.gmra.mrb[86].mxu1 %vm750_vm3, %v2790_v52  ;;  %v2778_v34 = vmul.f32 %v9786_v7, %v2765_v61  ;;  %v2989_v7 = vld [vmem:[#allocation2 + $0x1d0] sm:$0xff] }
 0xbc3   :  { %6828 = vmatprep.mubr.msk.f32.mxu1 %vm8199_vm1, %v11300_v48  ;;  %7341 = vmatpush3.bf16.msra.mxu0 %v7340_v29 }
 0xbc4   :  { %v2791_v53 = vadd.f32 %v9790_v25, %v2778_v34  ;;  %7342 = vmatprep.subr.bf16.mxu0 %v11299_v30  ;;  %v7343_v25 = vpack.c.bf16 %v2990_v18, %v2989_v7 }
 0xbc6   :  { %6829 = vmatmul.mubr.msk.f32.gmra.mrb[88].mxu1 %vm750_vm3, %v2791_v53 }
 0xbc7   :  { %6882 = vmatprep.mubr.msk.f32.mxu1 %vm8199_vm1, %v11300_v48  ;;  %7344 = vmatpush3.bf16.msra.mxu0 %v7343_v25 }
 0xc79   :  { %v2894_v23 = vpop.f32.mrb[72].mxu1 }
 0xc7a   :  { %v2895_v33 = vadd.f32 %v9847_v39, %v2894_v23  ;;  %v6806_v47 = vpop.f32.mrb[73].mxu1 }
 0xc7c   :  { %v2947_v9 = vmul.f32 0.70710677, %v2895_v33  ;;  %v2938_v22 = vmul.f32 0.5, %v2895_v33 }
 0xc7d   :  { %v2899_v56 = vpop.f32.mrb[74].mxu1 }
 0xc7e   :  { %8025 = verf.f32 %v2947_v9  ;;  %v2900_v45 = vadd.f32 %v9847_v39, %v2899_v56  ;;  %v6809_v17 = vpop.f32.mrb[75].mxu1 }
 0xc80   :  { %v2948_v32 = vmul.f32 0.70710677, %v2900_v45  ;;  %v2939_v41 = vmul.f32 0.5, %v2900_v45 }
 0xc81   :  { %v2904_v37 = vpop.f32.mrb[76].mxu1 }
 0xc82   :  { %8027 = verf.f32 %v2948_v32  ;;  %v2905_v14 = vadd.f32 %v9847_v39, %v2904_v37  ;;  %v6812_v50 = vpop.f32.mrb[77].mxu1 }
 0xc84   :  { %v2949_v2 = vmul.f32 0.70710677, %v2905_v14  ;;  %v2940_v23 = vmul.f32 0.5, %v2905_v14 }
 0xc85   :  { %v2909_v10 = vpop.f32.mrb[78].mxu1 }
 0xc86   :  { %8029 = verf.f32 %v2949_v2  ;;  %v2910_v43 = vadd.f32 %v9847_v39, %v2909_v10  ;;  %v6815_v15 = vpop.f32.mrb[79].mxu1 }
 0xc88   :  { %v8026_v1 = vpop.eup %8025  ;;  %v2950_v31 = vmul.f32 0.70710677, %v2910_v43  ;;  %v2941_v37 = vmul.f32 0.5, %v2910_v43 }
 0xc89   :  { %v2965_v35 = vadd.f32 1.0, %v8026_v1  ;;  %v2914_v44 = vpop.f32.mrb[80].mxu1 }
 0xc8a   :  { %8031 = verf.f32 %v2950_v31  ;;  %v2915_v52 = vadd.f32 %v9847_v39, %v2914_v44  ;;  %v6818_v61 = vpop.f32.mrb[81].mxu1 }
 0xc8b   :  { %v2974_v34 = vmul.f32 %v2965_v35, %v2938_v22 }
 0xc8c   :  { %v8028_v53 = vpop.eup %8027  ;;  %v2951_v27 = vmul.f32 0.70710677, %v2915_v52  ;;  %v2942_v22 = vmul.f32 0.5, %v2915_v52 }
 0xc8d   :  { %v2966_v4 = vadd.f32 1.0, %v8028_v53  ;;  %v2919_v11 = vpop.f32.mrb[82].mxu1  ;;  %6848 = vmatmul.mubr.msk.f32.vlgmr.msra.gmra.mrb[106].mxu0 %vm462_vm2, %v2974_v34 }
 0xc8e   :  { %8033 = verf.f32 %v2951_v27  ;;  %v2920_v60 = vadd.f32 %v9847_v39, %v2919_v11  ;;  %v6821_v29 = vpop.f32.mrb[83].mxu1  ;;  %6850 = vmatprep.mubr.msk.f32.mxu0 %vm8199_vm1, %v11300_v48 }
 0xc8f   :  { %v2975_v7 = vmul.f32 %v2966_v4, %v2939_v41 }
 0xc90   :  { %v8030_v18 = vpop.eup %8029  ;;  %v2952_v25 = vmul.f32 0.70710677, %v2920_v60  ;;  %v2943_v41 = vmul.f32 0.5, %v2920_v60 }
 0xc91   :  { %v2967_v33 = vadd.f32 1.0, %v8030_v18  ;;  %v2924_v47 = vpop.f32.mrb[84].mxu1  ;;  %6851 = vmatmul.mubr.msk.f32.gmra.mrb[108].mxu0 %vm462_vm2, %v2975_v7 }
 0xc92   :  { %8035 = verf.f32 %v2952_v25  ;;  %v2925_v9 = vadd.f32 %v9847_v39, %v2924_v47  ;;  %v6824_v56 = vpop.f32.mrb[85].mxu1  ;;  %6853 = vmatprep.mubr.msk.f32.mxu0 %vm8199_vm1, %v11300_v48 }
 0xc93   :  { %v2976_v45 = vmul.f32 %v2967_v33, %v2940_v23 }
 0xc94   :  { %v8032_v17 = vpop.eup %8031  ;;  %v2953_v32 = vmul.f32 0.70710677, %v2925_v9  ;;  %v2944_v29 = vmul.f32 0.5, %v2925_v9 }
 0xc95   :  { %v2968_v50 = vadd.f32 1.0, %v8032_v17  ;;  %v2929_v2 = vpop.f32.mrb[86].mxu1  ;;  %6854 = vmatmul.mubr.msk.f32.gmra.mrb[110].mxu0 %vm462_vm2, %v2976_v45  ;;  %v5846_v17 = vld [vmem:[#allocation2 + $0x1e0] ss:$0 sm:$0xff] }
 0xc96   :  { %8037 = verf.f32 %v2953_v32  ;;  %v2930_v14 = vadd.f32 %v9847_v39, %v2929_v2  ;;  %v6827_v10 = vpop.f32.mrb[87].mxu1  ;;  %6856 = vmatprep.mubr.msk.f32.mxu0 %vm8199_vm1, %v11300_v48 }
 0xc97   :  { %v2977_v15 = vmul.f32 %v2968_v50, %v2941_v37 }
 0xc98   :  { %v8034_v1 = vpop.eup %8033  ;;  %v2954_v31 = vmul.f32 0.70710677, %v2930_v14  ;;  %v2945_v25 = vmul.f32 0.5, %v2930_v14 }
 0xc99   :  { %v2969_v35 = vadd.f32 1.0, %v8034_v1  ;;  %v2934_v44 = vpop.f32.mrb[88].mxu1  ;;  %6857 = vmatmul.mubr.msk.f32.gmra.mrb[112].mxu0 %vm462_vm2, %v2977_v15 }
 0xc9a   :  { %8039 = verf.f32 %v2954_v31  ;;  %v2935_v43 = vadd.f32 %v9847_v39, %v2934_v44  ;;  %v6830_v61 = vpop.f32.mrb[89].mxu1  ;;  %6859 = vmatprep.mubr.msk.f32.mxu0 %vm8199_vm1, %v11300_v48 }
 0xc9b   :  { %v2978_v34 = vmul.f32 %v2969_v35, %v2942_v22 }
 0xc9c   :  { %v8036_v53 = vpop.eup %8035  ;;  %v2955_v27 = vmul.f32 0.70710677, %v2935_v43  ;;  %v2946_v47 = vmul.f32 0.5, %v2935_v43 }
 0xc9d   :  { %v2970_v4 = vadd.f32 1.0, %v8036_v53  ;;  %6860 = vmatmul.mubr.msk.f32.gmra.mrb[114].mxu0 %vm462_vm2, %v2978_v34 }
 0xc9e   :  { %8041 = verf.f32 %v2955_v27  ;;  %6862 = vmatprep.mubr.msk.f32.mxu0 %vm8199_vm1, %v11300_v48 }
 0xc9f   :  { %v2979_v52 = vmul.f32 %v2970_v4, %v2943_v41 }
 0xca0   :  { %v8038_v11 = vpop.eup %8037 }
 0xca1   :  { %v2971_v7 = vadd.f32 1.0, %v8038_v11  ;;  %6863 = vmatmul.mubr.msk.f32.gmra.mrb[116].mxu0 %vm462_vm2, %v2979_v52 }
 0xca2   :  { %6865 = vmatprep.mubr.msk.f32.mxu0 %vm8199_vm1, %v11300_v48 }
 0xca3   :  { %v2980_v39 = vmul.f32 %v2971_v7, %v2944_v29 }
 0xca4   :  { %v8040_v18 = vpop.eup %8039 }
 0xca5   :  { %v2972_v60 = vadd.f32 1.0, %v8040_v18  ;;  %6866 = vmatmul.mubr.msk.f32.gmra.mrb[118].mxu0 %vm462_vm2, %v2980_v39 }
 0xca6   :  { %6868 = vmatprep.mubr.msk.f32.mxu0 %vm8199_vm1, %v11300_v48 }
 0xca7   :  { %v2981_v23 = vmul.f32 %v2972_v60, %v2945_v25 }
 0xca8   :  { %v8042_v33 = vpop.eup %8041 }
 0xca9   :  { %v2973_v56 = vadd.f32 1.0, %v8042_v33  ;;  %6869 = vmatmul.mubr.msk.f32.gmra.mrb[120].mxu0 %vm462_vm2, %v2981_v23 }
 0xcaa   :  { %6871 = vmatprep.mubr.msk.f32.mxu0 %vm8199_vm1, %v11300_v48 }
 0xcab   :  { %v2982_v9 = vmul.f32 %v2973_v56, %v2946_v47 }
 0xcad   :  { %6872 = vmatmul.mubr.msk.f32.gmra.mrb[122].mxu0 %vm462_vm2, %v2982_v9 }
 0xd60   :  { %v3084_v45 = vpop.f32.mrb[106].mxu0 }
 0xd61   :  { %v3128_v32 = vadd.f32 %v3084_v45, %v9684_v54  ;;  %v6849_v37 = vpop.f32.mrb[107].mxu0 }
 0xd63   :  { %v9884_v50 = vadd.f32 %v5846_v17, %v3128_v32 }
 0xd64   :  { %v3089_v2 = vpop.f32.mrb[108].mxu0 }
 0xd65   :  { %v3129_v14 = vadd.f32 %v3089_v2, %v9689_v3  ;;  %v6852_v10 = vpop.f32.mrb[109].mxu0  ;;  %v3152_v15 = vsel %vm750_vm3, %v9884_v50, 0.0 }
 0xd66   :  { %3153 = vadd.xlane.f32.xlu1 %v3152_v15 }
 0xd67   :  { %v9889_v1 = vadd.f32 %v5846_v17, %v3129_v14 }
 0xd68   :  { %v3094_v31 = vpop.f32.mrb[110].mxu0 }
 0xd69   :  { %v3130_v22 = vadd.f32 %v3094_v31, %v9694_v8  ;;  %v6855_v35 = vpop.f32.mrb[111].mxu0  ;;  %v3155_v54 = vsel %vm750_vm3, %v9889_v1, 0.0 }
 0xd6a   :  { %3156 = vadd.xlane.f32.xlu0 %v3155_v54 }
 0xd6b   :  { %v9894_v44 = vadd.f32 %v5846_v17, %v3130_v22 }
 0xd6c   :  { %v3099_v43 = vpop.f32.mrb[112].mxu0 }
 0xd6d   :  { %v3131_v3 = vadd.f32 %v3099_v43, %v9699_v21  ;;  %v6858_v61 = vpop.f32.mrb[113].mxu0  ;;  %v3158_v34 = vsel %vm750_vm3, %v9894_v44, 0.0 }
 0xd6e   :  { %3159 = vadd.xlane.f32.xlu1 %v3158_v34 }
 0xd6f   :  { %v9899_v53 = vadd.f32 %v5846_v17, %v3131_v3 }
 0xd70   :  { %v3104_v27 = vpop.f32.mrb[114].mxu0 }
 0xd71   :  { %v3132_v8 = vadd.f32 %v3104_v27, %v9704_v19  ;;  %v6861_v41 = vpop.f32.mrb[115].mxu0  ;;  %v3161_v4 = vsel %vm750_vm3, %v9899_v53, 0.0 }
 0xd72   :  { %3162 = vadd.xlane.f32.xlu0 %v3161_v4 }
 0xd73   :  { %v9904_v52 = vadd.f32 %v5846_v17, %v3132_v8 }
 0xd74   :  { %v3109_v11 = vpop.f32.mrb[116].mxu0 }
 0xd75   :  { %v3133_v21 = vadd.f32 %v3109_v11, %v9709_v36  ;;  %v6864_v29 = vpop.f32.mrb[117].mxu0  ;;  %v3164_v7 = vsel %vm750_vm3, %v9904_v52, 0.0 }
 0xd76   :  { %3165 = vadd.xlane.f32.xlu1 %v3164_v7 }
 0xd77   :  { %v9909_v39 = vadd.f32 %v5846_v17, %v3133_v21 }
 0xd78   :  { %v3114_v18 = vpop.f32.mrb[118].mxu0 }
 0xd79   :  { %v3134_v19 = vadd.f32 %v3114_v18, %v9714_v57  ;;  %v6867_v25 = vpop.f32.mrb[119].mxu0  ;;  %v3167_v60 = vsel %vm750_vm3, %v9909_v39, 0.0 }
 0xd7a   :  { %3168 = vadd.xlane.f32.xlu0 %v3167_v60 }
 0xd7b   :  { %v9914_v23 = vadd.f32 %v5846_v17, %v3134_v19 }
 0xd7c   :  { %v3119_v33 = vpop.f32.mrb[120].mxu0 }
 0xd7d   :  { %v3135_v36 = vadd.f32 %v3119_v33, %v9719_v12  ;;  %v6870_v47 = vpop.f32.mrb[121].mxu0  ;;  %v3170_v56 = vsel %vm750_vm3, %v9914_v23, 0.0 }
 0xd7e   :  { %3171 = vadd.xlane.f32.xlu1 %v3170_v56 }
 0xd7f   :  { %v9919_v9 = vadd.f32 %v5846_v17, %v3135_v36 }
 0xd80   :  { %v3124_v45 = vpop.f32.mrb[122].mxu0 }
 0xd81   :  { %v3136_v57 = vadd.f32 %v3124_v45, %v9724_v5  ;;  %v6873_v32 = vpop.f32.mrb[123].mxu0  ;;  %v3173_v37 = vsel %vm750_vm3, %v9919_v9, 0.0 }
 0xd82   :  { %3174 = vadd.xlane.f32.xlu0 %v3173_v37 }
 0xd83   :  { %v9924_v2 = vadd.f32 %v5846_v17, %v3136_v57 }
 0xd85   :  { %v3176_v12 = vsel %vm750_vm3, %v9924_v2, 0.0 }
 0xd86   :  { %3177 = vadd.xlane.f32.xlu1 %v3176_v12 }
 0xdf3   :  { %v3154_v14 = vpop.xlane.xlu1 %3153 }
 0xdf4   :  { %v3179_v10 = vmul.f32 0.03125, %v3154_v14 }
 0xdf6   :  { %v9929_v15 = vsub.f32 %v9884_v50, %v3179_v10 }
 0xdf7   :  { %v3157_v31 = vpop.xlane.xlu0 %3156 }
 0xdf8   :  { %v3180_v22 = vmul.f32 0.03125, %v3157_v31  ;;  %v3197_v5 = vmul.f32 %v9929_v15, %v9929_v15 }
 0xdfa   :  { %v9934_v35 = vsub.f32 %v9889_v1, %v3180_v22  ;;  %v3206_v17 = vsel %vm750_vm3, %v3197_v5, 0.0 }
 0xdfb   :  { %v3160_v54 = vpop.xlane.xlu1 %3159  ;;  %3207 = vadd.xlane.f32.xlu0 %v3206_v17 }
 0xdfc   :  { %v3181_v43 = vmul.f32 0.03125, %v3160_v54  ;;  %v3198_v3 = vmul.f32 %v9934_v35, %v9934_v35 }
 0xdfe   :  { %v9940_v61 = vsub.f32 %v9894_v44, %v3181_v43  ;;  %v3209_v34 = vsel %vm750_vm3, %v3198_v3, 0.0 }
 0xdff   :  { %v3163_v27 = vpop.xlane.xlu0 %3162  ;;  %3210 = vadd.xlane.f32.xlu1 %v3209_v34  ;;  %v3295_v34 = vld [vmem:[#allocation2 + $0x1f0] sm:$0xff] }
 0xe00   :  { %v3182_v8 = vmul.f32 0.03125, %v3163_v27  ;;  %v3199_v41 = vmul.f32 %v9940_v61, %v9940_v61  ;;  %v3296_v27 = vld [vmem:[#allocation2 + $0x1f8] sm:$0xff] }
 0xe02   :  { %v9946_v4 = vsub.f32 %v9899_v53, %v3182_v8  ;;  %v3212_v11 = vsel %vm750_vm3, %v3199_v41, 0.0  ;;  %v7346_v41 = vpack.c.bf16 %v3296_v27, %v3295_v34 }
 0xe03   :  { %v3166_v21 = vpop.xlane.xlu1 %3165  ;;  %3213 = vadd.xlane.f32.xlu0 %v3212_v11 }
 0xe04   :  { %v3183_v29 = vmul.f32 0.03125, %v3166_v21  ;;  %v3200_v7 = vmul.f32 %v9946_v4, %v9946_v4  ;;  %7347 = vmatpush3.bf16.msra.mxu1 %v7346_v41  ;;  %v3297_v21 = vld [vmem:[#allocation2 + $0x200] sm:$0xff] }
 0xe05   :  { %7348 = vmatprep.subr.bf16.mxu1 %v11299_v30 }
 0xe06   :  { %v9952_v18 = vsub.f32 %v9904_v52, %v3183_v29  ;;  %v3215_v19 = vsel %vm750_vm3, %v3200_v7, 0.0  ;;  %v3298_v29 = vld [vmem:[#allocation2 + $0x208] sm:$0xff] }
 0xe07   :  { %v3169_v25 = vpop.xlane.xlu0 %3168  ;;  %3216 = vadd.xlane.f32.xlu1 %v3215_v19  ;;  %v7349_v7 = vpack.c.bf16 %v3298_v29, %v3297_v21 }
 0xe08   :  { %v3184_v60 = vmul.f32 0.03125, %v3169_v25  ;;  %v3201_v33 = vmul.f32 %v9952_v18, %v9952_v18 }
 0xe09   :  { %7350 = vmatpush3.bf16.msra.mxu1 %v7349_v7 }
 0xe0a   :  { %v9958_v36 = vsub.f32 %v9909_v39, %v3184_v60  ;;  %v3218_v47 = vsel %vm750_vm3, %v3201_v33, 0.0  ;;  %7399 = vmatprep.subr.bf16.mxu1 %v11299_v30 }
 0xe0b   :  { %v3172_v56 = vpop.xlane.xlu1 %3171  ;;  %3219 = vadd.xlane.f32.xlu0 %v3218_v47 }
 0xe0c   :  { %v3185_v45 = vmul.f32 0.03125, %v3172_v56  ;;  %v3202_v57 = vmul.f32 %v9958_v36, %v9958_v36 }
 0xe0e   :  { %v9964_v32 = vsub.f32 %v9914_v23, %v3185_v45  ;;  %v3221_v37 = vsel %vm750_vm3, %v3202_v57, 0.0 }
 0xe0f   :  { %v3175_v12 = vpop.xlane.xlu0 %3174  ;;  %3222 = vadd.xlane.f32.xlu1 %v3221_v37  ;;  %v3151_v37 = vld [vmem:[#allocation2 + $0x1e8] sm:$0x3] }
 0xe10   :  { %v3186_v14 = vmul.f32 0.03125, %v3175_v12  ;;  %v3203_v10 = vmul.f32 %v9964_v32, %v9964_v32 }
 0xe12   :  { %v9970_v31 = vsub.f32 %v9919_v9, %v3186_v14  ;;  %v3224_v22 = vsel %vm750_vm3, %v3203_v10, 0.0 }
 0xe13   :  { %3225 = vadd.xlane.f32.xlu0 %v3224_v22  ;;  %v3178_v5 = vpop.xlane.xlu1 %3177  ;;  %v9985_v22 = vrot.slane %v3151_v37, %v11310_v49 }
 0xe14   :  { %v3187_v17 = vmul.f32 0.03125, %v3178_v5  ;;  %v3204_v54 = vmul.f32 %v9970_v31, %v9970_v31 }
 0xe16   :  { %v9976_v43 = vsub.f32 %v9924_v2, %v3187_v17  ;;  %v3227_v3 = vsel %vm750_vm3, %v3204_v54, 0.0  ;;  %v9988_v54 = vrot.slane %v3151_v37, %v11311_v59 }
 0xe17   :  { %3228 = vadd.xlane.f32.xlu1 %v3227_v3 }
 0xe18   :  { %v3205_v8 = vmul.f32 %v9976_v43, %v9976_v43 }
 0xe1a   :  { %v3230_v11 = vsel %vm750_vm3, %v3205_v8, 0.0 }
 0xe1b   :  { %3231 = vadd.xlane.f32.xlu0 %v3230_v11 }
 0xe88   :  { %v3208_v19 = vpop.xlane.xlu0 %3207 }
 0xe89   :  { %v3233_v25 = vmul.f32 0.03125, %v3208_v19 }
 0xe8b   :  { %v3242_v60 = vadd.f32 1e-05, %v3233_v25 }
 0xe8c   :  { %v3211_v33 = vpop.xlane.xlu1 %3210 }
 0xe8d   :  { %8043 = vrsqrt.f32 %v3242_v60  ;;  %v3234_v47 = vmul.f32 0.03125, %v3211_v33 }
 0xe8f   :  { %v3243_v56 = vadd.f32 1e-05, %v3234_v47 }
 0xe90   :  { %v3214_v45 = vpop.xlane.xlu0 %3213 }
 0xe91   :  { %8045 = vrsqrt.f32 %v3243_v56  ;;  %v3235_v57 = vmul.f32 0.03125, %v3214_v45 }
 0xe93   :  { %v3244_v12 = vadd.f32 1e-05, %v3235_v57 }
 0xe94   :  { %v3217_v14 = vpop.xlane.xlu1 %3216 }
 0xe95   :  { %8047 = vrsqrt.f32 %v3244_v12  ;;  %v3236_v10 = vmul.f32 0.03125, %v3217_v14 }
 0xe97   :  { %v8044_v5 = vpop.eup %8043  ;;  %v3245_v17 = vadd.f32 1e-05, %v3236_v10 }
 0xe98   :  { %v3260_v3 = vmul.f32 %v8044_v5, %v9929_v15  ;;  %v3220_v34 = vpop.xlane.xlu0 %3219 }
 0xe99   :  { %8049 = vrsqrt.f32 %v3245_v17  ;;  %v3237_v27 = vmul.f32 0.03125, %v3220_v34 }
 0xe9a   :  { %v3273_v8 = vmul.f32 %v9985_v22, %v3260_v3 }
 0xe9b   :  { %v8046_v41 = vpop.eup %8045  ;;  %v3246_v11 = vadd.f32 1e-05, %v3237_v27 }
 0xe9c   :  { %v3286_v21 = vadd.f32 %v9988_v54, %v3273_v8  ;;  %v3223_v29 = vpop.xlane.xlu1 %3222  ;;  %v3261_v7 = vmul.f32 %v8046_v41, %v9934_v35 }
 0xe9d   :  { %8051 = vrsqrt.f32 %v3246_v11  ;;  %v3238_v19 = vmul.f32 0.03125, %v3223_v29 }
 0xe9e   :  { %6883 = vmatmul.mubr.msk.f32.vlgmr.msra.gmra.mrb[90].mxu1 %vm750_vm3, %v3286_v21  ;;  %v3274_v25 = vmul.f32 %v9985_v22, %v3261_v7 }
 0xe9f   :  { %v8048_v60 = vpop.eup %8047  ;;  %v3247_v15 = vadd.f32 1e-05, %v3238_v19  ;;  %6885 = vmatprep.mubr.msk.f32.mxu1 %vm8199_vm1, %v11300_v48 }
 0xea0   :  { %v3226_v33 = vpop.xlane.xlu0 %3225  ;;  %v3287_v47 = vadd.f32 %v9988_v54, %v3274_v25  ;;  %v3262_v56 = vmul.f32 %v8048_v60, %v9940_v61 }
 0xea1   :  { %8053 = vrsqrt.f32 %v3247_v15  ;;  %v3239_v45 = vmul.f32 0.03125, %v3226_v33 }
 0xea2   :  { %6886 = vmatmul.mubr.msk.f32.gmra.mrb[92].mxu1 %vm750_vm3, %v3287_v47  ;;  %v3275_v35 = vmul.f32 %v9985_v22, %v3262_v56 }
 0xea3   :  { %v8050_v57 = vpop.eup %8049  ;;  %v3248_v37 = vadd.f32 1e-05, %v3239_v45  ;;  %6888 = vmatprep.mubr.msk.f32.mxu1 %vm8199_vm1, %v11300_v48 }
 0xea4   :  { %v3229_v12 = vpop.xlane.xlu1 %3228  ;;  %v3288_v14 = vadd.f32 %v9988_v54, %v3275_v35  ;;  %v3263_v10 = vmul.f32 %v8050_v57, %v9946_v4 }
 0xea5   :  { %8055 = vrsqrt.f32 %v3248_v37  ;;  %v3240_v5 = vmul.f32 0.03125, %v3229_v12  ;;  %v5847_v37 = vld [vmem:[#allocation2 + $0x210] ss:$0 sm:$0xff] }
 0xea6   :  { %6889 = vmatmul.mubr.msk.f32.gmra.mrb[94].mxu1 %vm750_vm3, %v3288_v14  ;;  %v3276_v61 = vmul.f32 %v9985_v22, %v3263_v10 }
 0xea7   :  { %v8052_v17 = vpop.eup %8051  ;;  %v3249_v3 = vadd.f32 1e-05, %v3240_v5  ;;  %6891 = vmatprep.mubr.msk.f32.mxu1 %vm8199_vm1, %v11300_v48 }
 0xea8   :  { %v3232_v34 = vpop.xlane.xlu0 %3231  ;;  %v3289_v27 = vadd.f32 %v9988_v54, %v3276_v61  ;;  %v3264_v8 = vmul.f32 %v8052_v17, %v9952_v18  ;;  %v11312_v61 = vld [vmem:[#allocation19_spill] sm:$0xff] }
 0xea9   :  { %8057 = vrsqrt.f32 %v3249_v3  ;;  %v3241_v41 = vmul.f32 0.03125, %v3232_v34 }
 0xeaa   :  { %6892 = vmatmul.mubr.msk.f32.gmra.mrb[96].mxu1 %vm750_vm3, %v3289_v27  ;;  %v3277_v4 = vmul.f32 %v9985_v22, %v3264_v8 }
 0xeab   :  { %v8054_v11 = vpop.eup %8053  ;;  %v3250_v21 = vadd.f32 1e-05, %v3241_v41  ;;  %6894 = vmatprep.mubr.msk.f32.mxu1 %vm8199_vm1, %v11300_v48 }
 0xeac   :  { %v3290_v29 = vadd.f32 %v9988_v54, %v3277_v4  ;;  %v3265_v7 = vmul.f32 %v8054_v11, %v9958_v36 }
 0xead   :  { %8059 = vrsqrt.f32 %v3250_v21 }
 0xeae   :  { %6895 = vmatmul.mubr.msk.f32.gmra.mrb[98].mxu1 %vm750_vm3, %v3290_v29  ;;  %v3278_v18 = vmul.f32 %v9985_v22, %v3265_v7 }
 0xeaf   :  { %v8056_v19 = vpop.eup %8055  ;;  %6897 = vmatprep.mubr.msk.f32.mxu1 %vm8199_vm1, %v11300_v48 }
 0xeb0   :  { %v3291_v25 = vadd.f32 %v9988_v54, %v3278_v18  ;;  %v3266_v60 = vmul.f32 %v8056_v19, %v9964_v32 }
 0xeb2   :  { %6898 = vmatmul.mubr.msk.f32.gmra.mrb[100].mxu1 %vm750_vm3, %v3291_v25  ;;  %v3279_v15 = vmul.f32 %v9985_v22, %v3266_v60 }
 0xeb3   :  { %v8058_v33 = vpop.eup %8057  ;;  %6900 = vmatprep.mubr.msk.f32.mxu1 %vm8199_vm1, %v11300_v48 }
 0xeb4   :  { %v3292_v36 = vadd.f32 %v9988_v54, %v3279_v15  ;;  %v3267_v47 = vmul.f32 %v8058_v33, %v9970_v31 }
 0xeb6   :  { %6901 = vmatmul.mubr.msk.f32.gmra.mrb[102].mxu1 %vm750_vm3, %v3292_v36  ;;  %v3280_v56 = vmul.f32 %v9985_v22, %v3267_v47 }
 0xeb7   :  { %v8060_v45 = vpop.eup %8059  ;;  %6903 = vmatprep.mubr.msk.f32.mxu1 %vm8199_vm1, %v11300_v48 }
 0xeb8   :  { %v3293_v32 = vadd.f32 %v9988_v54, %v3280_v56  ;;  %v3268_v35 = vmul.f32 %v8060_v45, %v9976_v43 }
 0xeba   :  { %6904 = vmatmul.mubr.msk.f32.gmra.mrb[104].mxu1 %vm750_vm3, %v3293_v32  ;;  %v3281_v57 = vmul.f32 %v9985_v22, %v3268_v35 }
 0xebb   :  { %6906 = vmatprep.mubr.msk.f32.mxu1 %vm8199_vm1, %v11300_v48 }
 0xebc   :  { %v3294_v31 = vadd.f32 %v9988_v54, %v3281_v57 }
 0xebe   :  { %6907 = vmatmul.mubr.msk.f32.gmra.mrb[106].mxu1 %vm750_vm3, %v3294_v31 }
 0xebf   :  { %6917 = vmatprep.mubr.msk.f32.mxu1 %vm8199_vm1, %v11300_v48 }
 0xf71   :  { %v3397_v12 = vpop.f32.mrb[90].mxu1 }
 0xf72   :  { %v10044_v14 = vadd.f32 %v5847_v37, %v3397_v12  ;;  %v6884_v10 = vpop.f32.mrb[91].mxu1 }
 0xf74   :  { %6309 = vmatprep.mubr.msk.f32.mxu0 %vm750_vm3, %v10044_v14  ;;  %v3441_v54 = vmul.f32 %v10044_v14, %v11312_v61 }
 0xf75   :  { %v3402_v43 = vpop.f32.mrb[92].mxu1 }
 0xf76   :  { %v10048_v22 = vadd.f32 %v5847_v37, %v3402_v43  ;;  %v6887_v5 = vpop.f32.mrb[93].mxu1 }
 0xf77   :  { %v11313_v5 = vld [vmem:[#allocation23_spill] sm:$0xff] }
 0xf78   :  { %v3442_v17 = vmul.f32 %v10048_v22, %v11312_v61 }
 0xf79   :  { %v3407_v3 = vpop.f32.mrb[94].mxu1 }
 0xf7a   :  { %v6890_v34 = vpop.f32.mrb[95].mxu1  ;;  %v7726_v27 = vpack.i.bf16 %v3442_v17, %v3441_v54  ;;  %v10072_v31 = vadd.f32 %v5847_v37, %v3407_v3  ;;  %v11314_v3 = vld [vmem:[#allocation25_spill] sm:$0xff] }
 0xf7c   :  { %7727 = vrot.lane.b32.xlu0 %v7726_v27, %s8202_s30  ;;  %v3450_v27 = vmul.f32 %v10044_v14, %v11313_v5 }
 0xf7d   :  { %v3412_v8 = vpop.f32.mrb[96].mxu1 }
 0xf7e   :  { %v6893_v41 = vpop.f32.mrb[97].mxu1 }
 0xf7f   :  { %v3460_v41 = vmul.f32 %v10048_v22, %v11314_v3 }
 0xf81   :  { %v3417_v4 = vpop.f32.mrb[98].mxu1 }
 0xf82   :  { %v6896_v11 = vpop.f32.mrb[99].mxu1  ;;  %v10055_v21 = vadd.f32 %v5847_v37, %v3417_v4  ;;  %v10087_v4 = vadd.f32 %v5847_v37, %v3412_v8 }
 0xf84   :  { %v3445_v19 = vmul.f32 %v10055_v21, %v11312_v61  ;;  %v3454_v8 = vmul.f32 %v10055_v21, %v11313_v5 }
 0xf85   :  { %v3422_v29 = vpop.f32.mrb[100].mxu1 }
 0xf86   :  { %v10057_v7 = vadd.f32 %v5847_v37, %v3422_v29  ;;  %v6899_v18 = vpop.f32.mrb[101].mxu1 }
 0xf87   :  { %v3452_v18 = vmul.f32 %v10072_v31, %v11313_v5 }
 0xf88   :  { %v3446_v25 = vmul.f32 %v10057_v7, %v11312_v61 }
 0xf89   :  { %v3427_v60 = vpop.f32.mrb[102].mxu1 }
 0xf8a   :  { %v6902_v15 = vpop.f32.mrb[103].mxu1  ;;  %v7746_v33 = vpack.i.bf16 %v3446_v25, %v3445_v19  ;;  %v10063_v36 = vadd.f32 %v5847_v37, %v3427_v60  ;;  %v3459_v19 = vmul.f32 %v10044_v14, %v11314_v3  ;;  %v3451_v25 = vmul.f32 %v10048_v22, %v11313_v5 }
 0xf8c   :  { %7747 = vrot.lane.b32.xlu0 %v7746_v33, %s8202_s30  ;;  %v3447_v32 = vmul.f32 %v10063_v36, %v11312_v61  ;;  %v7731_v60 = vpack.i.bf16 %v3460_v41, %v3459_v19  ;;  %v7776_v15 = vpack.i.bf16 %v3452_v18, %v3451_v25  ;;  %v3443_v33 = vmul.f32 %v10072_v31, %v11312_v61  ;;  %v11316_v25 = vld [vmem:[#allocation30_spill] sm:$0xff] }
 0xf8d   :  { %v3432_v47 = vpop.f32.mrb[104].mxu1  ;;  %v3463_v41 = vmul.f32 %v10055_v21, %v11314_v3 }
 0xf8e   :  { %v10066_v56 = vadd.f32 %v5847_v37, %v3432_v47  ;;  %v6905_v45 = vpop.f32.mrb[105].mxu1  ;;  %v3453_v47 = vmul.f32 %v10087_v4, %v11313_v5 }
 0xf90   :  { %v3448_v35 = vmul.f32 %v10066_v56, %v11312_v61  ;;  %v3457_v54 = vmul.f32 %v10066_v56, %v11313_v5  ;;  %v3466_v19 = vmul.f32 %v10066_v56, %v11314_v3 }
 0xf91   :  { %v3437_v57 = vpop.f32.mrb[106].mxu1 }
 0xf92   :  { %v10074_v12 = vadd.f32 %v5847_v37, %v3437_v57  ;;  %v6908_v10 = vpop.f32.mrb[107].mxu1  ;;  %v7756_v43 = vpack.i.bf16 %v3448_v35, %v3447_v32  ;;  %v3444_v37 = vmul.f32 %v10087_v4, %v11312_v61  ;;  %v7786_v32 = vpack.i.bf16 %v3454_v8, %v3453_v47  ;;  %v11315_v57 = vld [vmem:[#allocation26_spill] sm:$0xff] }
 0xf93   :  { %v3462_v35 = vmul.f32 %v10087_v4, %v11314_v3  ;;  %v3472_v10 = vmul.f32 %v10055_v21, %v11315_v57 }
 0xf94   :  { %7757 = vrot.lane.b32.xlu0 %v7756_v43, %s8202_s30  ;;  %v3458_v17 = vmul.f32 %v10074_v12, %v11313_v5  ;;  %v3449_v34 = vmul.f32 %v10074_v12, %v11312_v61  ;;  %v7736_v45 = vpack.i.bf16 %v3444_v37, %v3443_v33  ;;  %v3461_v43 = vmul.f32 %v10072_v31, %v11314_v3 }
 0xf95   :  { %v3471_v61 = vmul.f32 %v10087_v4, %v11315_v57  ;;  %v3477_v37 = vmul.f32 %v10044_v14, %v11316_v25  ;;  %v3467_v47 = vmul.f32 %v10074_v12, %v11314_v3 }
 0xf96   :  { %v7721_v11 = vpack.i.bf16 %v3458_v17, %v3457_v54  ;;  %v7766_v29 = vpack.i.bf16 %v3450_v27, %v3449_v34  ;;  %v7741_v54 = vpack.i.bf16 %v3462_v35, %v3461_v43  ;;  %v3464_v34 = vmul.f32 %v10057_v7, %v11314_v3 }
 0xf97   :  { %v7796_v17 = vpack.i.bf16 %v3472_v10, %v3471_v61  ;;  %v3476_v27 = vmul.f32 %v10074_v12, %v11315_v57  ;;  %v3479_v35 = vmul.f32 %v10072_v31, %v11316_v25  ;;  %v3470_v61 = vmul.f32 %v10072_v31, %v11315_v57 }
 0xf98   :  { %7722 = vrot.lane.b32.xlu1 %v7721_v11, %s8202_s30  ;;  %7767 = vrot.lane.b32.xlu0 %v7766_v29, %s8202_s30  ;;  %v3475_v11 = vmul.f32 %v10066_v56, %v11315_v57  ;;  %v7751_v29 = vpack.i.bf16 %v3464_v34, %v3463_v41  ;;  %v3474_v41 = vmul.f32 %v10063_v36, %v11315_v57 }
 0xf9a   :  { %v7806_v18 = vpack.i.bf16 %v3476_v27, %v3475_v11  ;;  %v3484_v11 = vmul.f32 %v10066_v56, %v11316_v25 }
 0xf9c   :  { %7732 = vrot.lane.b32.xlu1 %v7731_v60, %s8202_s30  ;;  %7777 = vrot.lane.b32.xlu0 %v7776_v15, %s8202_s30  ;;  %v3478_v60 = vmul.f32 %v10048_v22, %v11316_v25  ;;  %v3465_v15 = vmul.f32 %v10063_v36, %v11314_v3  ;;  %v3482_v3 = vmul.f32 %v10057_v7, %v11316_v25 }
 0xf9e   :  { %v7761_v8 = vpack.i.bf16 %v3466_v19, %v3465_v15  ;;  %v7811_v33 = vpack.i.bf16 %v3478_v60, %v3477_v37  ;;  %v3456_v15 = vmul.f32 %v10063_v36, %v11313_v5  ;;  %v11317_v37 = vld [vmem:[#allocation29_spill] sm:$0xff] }
 0xfa0   :  { %7737 = vrot.lane.b32.xlu1 %v7736_v45, %s8202_s30  ;;  %7787 = vrot.lane.b32.xlu0 %v7786_v32, %s8202_s30  ;;  %v3480_v45 = vmul.f32 %v10087_v4, %v11316_v25  ;;  %v3468_v32 = vmul.f32 %v10044_v14, %v11315_v57 }
 0xfa2   :  { %v7771_v10 = vpack.i.bf16 %v3468_v32, %v3467_v47  ;;  %v7821_v43 = vpack.i.bf16 %v3480_v45, %v3479_v35  ;;  %v11318_v32 = vld [vmem:[#allocation31_spill] sm:$0xff] }
 0xfa3   :  { %v3496_v35 = vmul.f32 %v10048_v22, %v11318_v32 }
 0xfa4   :  { %7742 = vrot.lane.b32.xlu1 %v7741_v54, %s8202_s30  ;;  %7797 = vrot.lane.b32.xlu0 %v7796_v17, %s8202_s30  ;;  %v3469_v54 = vmul.f32 %v10048_v22, %v11315_v57  ;;  %v3481_v17 = vmul.f32 %v10055_v21, %v11316_v25 }
 0xfa6   :  { %v7781_v34 = vpack.i.bf16 %v3470_v61, %v3469_v54  ;;  %v7831_v27 = vpack.i.bf16 %v3482_v3, %v3481_v17  ;;  %v3498_v54 = vmul.f32 %v10087_v4, %v11318_v32  ;;  %v3510_v17 = vmul.f32 %v10063_v36, %v11288_v38 }
 0xfa8   :  { %7752 = vrot.lane.b32.xlu1 %v7751_v29, %s8202_s30  ;;  %7807 = vrot.lane.b32.xlu0 %v7806_v18, %s8202_s30  ;;  %v3473_v29 = vmul.f32 %v10057_v7, %v11315_v57  ;;  %v3483_v18 = vmul.f32 %v10063_v36, %v11316_v25  ;;  %v3487_v57 = vmul.f32 %v10048_v22, %v11317_v37 }
 0xfaa   :  { %v7791_v19 = vpack.i.bf16 %v3474_v41, %v3473_v29  ;;  %v7841_v60 = vpack.i.bf16 %v3484_v11, %v3483_v18  ;;  %v3500_v29 = vmul.f32 %v10057_v7, %v11318_v32  ;;  %v3485_v18 = vmul.f32 %v10074_v12, %v11316_v25 }
 0xfab   :  { %v3501_v25 = vmul.f32 %v10063_v36, %v11318_v32 }
 0xfac   :  { %7762 = vrot.lane.b32.xlu1 %v7761_v8, %s8202_s30  ;;  %7812 = vrot.lane.b32.xlu0 %v7811_v33, %s8204_s4  ;;  %v3488_v8 = vmul.f32 %v10072_v31, %v11317_v37  ;;  %v3455_v33 = vmul.f32 %v10057_v7, %v11313_v5  ;;  %v3489_v5 = vmul.f32 %v10087_v4, %v11317_v37 }
 0xfae   :  { %v7801_v47 = vpack.i.bf16 %v3456_v15, %v3455_v33  ;;  %v7851_v45 = vpack.i.bf16 %v3488_v8, %v3487_v57  ;;  %v3502_v33 = vmul.f32 %v10066_v56, %v11318_v32 }
 0xfb0   :  { %7772 = vrot.lane.b32.xlu1 %v7771_v10, %s8202_s30  ;;  %7822 = vrot.lane.b32.xlu0 %v7821_v43, %s8204_s4  ;;  %v3490_v10 = vmul.f32 %v10055_v21, %v11317_v37  ;;  %v3495_v43 = vmul.f32 %v10044_v14, %v11318_v32  ;;  %v7846_v57 = vpack.i.bf16 %v3502_v33, %v3501_v25 }
 0xfb2   :  { %v7816_v61 = vpack.i.bf16 %v3496_v35, %v3495_v43  ;;  %v7861_v3 = vpack.i.bf16 %v3490_v10, %v3489_v5  ;;  %v3508_v10 = vmul.f32 %v10055_v21, %v11288_v38  ;;  %v3507_v43 = vmul.f32 %v10087_v4, %v11288_v38 }
 0xfb4   :  { %7782 = vrot.lane.b32.xlu1 %v7781_v34, %s8202_s30  ;;  %7832 = vrot.lane.b32.xlu0 %v7831_v27, %s8204_s4  ;;  %v3497_v34 = vmul.f32 %v10072_v31, %v11318_v32  ;;  %v3509_v27 = vmul.f32 %v10057_v7, %v11288_v38  ;;  %v7866_v5 = vpack.i.bf16 %v3508_v10, %v3507_v43 }
 0xfb6   :  { %v7826_v41 = vpack.i.bf16 %v3498_v54, %v3497_v34  ;;  %v7871_v11 = vpack.i.bf16 %v3510_v17, %v3509_v27  ;;  %v3494_v17 = vmul.f32 %v10074_v12, %v11317_v37  ;;  %v3493_v34 = vmul.f32 %v10066_v56, %v11317_v37 }
 0xfb8   :  { %7792 = vrot.lane.b32.xlu1 %v7791_v19, %s8202_s30  ;;  %7842 = vrot.lane.b32.xlu0 %v7841_v60, %s8204_s4  ;;  %v3499_v19 = vmul.f32 %v10055_v21, %v11318_v32  ;;  %v3486_v60 = vmul.f32 %v10044_v14, %v11317_v37  ;;  %v7881_v27 = vpack.i.bf16 %v3494_v17, %v3493_v34 }
 0xfba   :  { %v7836_v15 = vpack.i.bf16 %v3500_v29, %v3499_v19  ;;  %v7886_v8 = vpack.i.bf16 %v3486_v60, %v3485_v18 }
 0xfbc   :  { %7802 = vrot.lane.b32.xlu1 %v7801_v47, %s8202_s30  ;;  %7852 = vrot.lane.b32.xlu0 %v7851_v45, %s8204_s4  ;;  %v3506_v47 = vmul.f32 %v10072_v31, %v11288_v38  ;;  %v3505_v45 = vmul.f32 %v10048_v22, %v11288_v38 }
 0xfbe   :  { %v7856_v35 = vpack.i.bf16 %v3506_v47, %v3505_v45 }
 0xfc0   :  { %7817 = vrot.lane.b32.xlu1 %v7816_v61, %s8204_s4  ;;  %7862 = vrot.lane.b32.xlu0 %v7861_v3, %s8204_s4  ;;  %v3492_v61 = vmul.f32 %v10063_v36, %v11317_v37  ;;  %v3491_v3 = vmul.f32 %v10057_v7, %v11317_v37 }
 0xfc2   :  { %v7876_v54 = vpack.i.bf16 %v3492_v61, %v3491_v3 }
 0xfc4   :  { %7827 = vrot.lane.b32.xlu1 %v7826_v41, %s8204_s4  ;;  %7872 = vrot.lane.b32.xlu0 %v7871_v11, %s8204_s4  ;;  %v3503_v41 = vmul.f32 %v10074_v12, %v11318_v32  ;;  %v3504_v11 = vmul.f32 %v10044_v14, %v11288_v38 }
 0xfc6   :  { %v7891_v29 = vpack.i.bf16 %v3504_v11, %v3503_v41 }
 0xfc8   :  { %7837 = vrot.lane.b32.xlu1 %v7836_v15, %s8204_s4  ;;  %7887 = vrot.lane.b32.xlu0 %v7886_v8, %s8204_s4 }
 0xfcc   :  { %7847 = vrot.lane.b32.xlu1 %v7846_v57, %s8204_s4 }
 0xfd0   :  { %7857 = vrot.lane.b32.xlu1 %v7856_v35, %s8204_s4 }
 0xfd4   :  { %7867 = vrot.lane.b32.xlu1 %v7866_v5, %s8204_s4 }
 0xfd8   :  { %7877 = vrot.lane.b32.xlu1 %v7876_v54, %s8204_s4 }
 0xfdc   :  { %7882 = vrot.lane.b32.xlu1 %v7881_v27, %s8204_s4 }
 0xfe0   :  { %7892 = vrot.lane.b32.xlu1 %v7891_v29, %s8204_s4 }
 0xfee   :  { %v7728_v18 = vpop.permute.xlu0 %7727 }
 0xfef   :  { %v7730_v15 = vunpack.i.h.bf16 %v7728_v18  ;;  %v7729_v8 = vunpack.i.l.bf16 %v7728_v18 }
 0xff1   :  { %v7354_v45 = vpack.c.bf16 %v7730_v15, %v7729_v8 }
 0xffe   :  { %v7748_v19 = vpop.permute.xlu0 %7747 }
 0xfff   :  { %v7750_v8 = vunpack.i.h.bf16 %v7748_v19 }
0x1006   :  { %v7758_v60 = vpop.permute.xlu0 %7757 }
0x100a   :  { %v7723_v33 = vpop.permute.xlu1 %7722  ;;  %v7768_v25 = vpop.permute.xlu0 %7767 }
0x100b   :  { %v7725_v37 = vunpack.i.h.bf16 %v7723_v33  ;;  %v7724_v57 = vunpack.i.l.bf16 %v7723_v33  ;;  %v7749_v33 = vunpack.i.l.bf16 %v7748_v19 }
0x100d   :  { %v7351_v47 = vpack.c.bf16 %v7725_v37, %v7724_v57 }
0x100e   :  { %v7733_v32 = vpop.permute.xlu1 %7732  ;;  %v10239_v35 = vpop.permute.xlu0 %7777 }
0x100f   :  { %v7735_v10 = vunpack.i.h.bf16 %v7733_v32  ;;  %v7734_v43 = vunpack.i.l.bf16 %v7733_v32  ;;  %7353 = vmatprep.subr.msk.bf16.mxu0 %vm8719_vm4, %v7351_v47  ;;  %v7366_v32 = vpack.c.bf16 %v7750_v8, %v7749_v33  ;;  %v7770_v8 = vunpack.i.h.bf16 %v7768_v25 }
0x1010   :  { %7356 = vmatpush3.bf16.xpose.msk.msra.mxu0 %vm8719_vm4, %v7354_v45  ;;  %v7769_v33 = vunpack.i.l.bf16 %v7768_v25 }
0x1011   :  { %v7357_v61 = vpack.c.bf16 %v7735_v10, %v7734_v43 }
0x1012   :  { %v7738_v3 = vpop.permute.xlu1 %7737  ;;  %v10245_v54 = vpop.permute.xlu0 %7787 }
0x1013   :  { %v7740_v17 = vunpack.i.h.bf16 %v7738_v3  ;;  %v7739_v34 = vunpack.i.l.bf16 %v7738_v3  ;;  %7359 = vmatprep.subr.msk.bf16.mxu0 %vm8719_vm4, %v7357_v61  ;;  %v7760_v61 = vunpack.i.h.bf16 %v7758_v60  ;;  %v7759_v3 = vunpack.i.l.bf16 %v7758_v60 }
0x1015   :  { %v7360_v27 = vpack.c.bf16 %v7740_v17, %v7739_v34 }
0x1016   :  { %v7743_v41 = vpop.permute.xlu1 %7742  ;;  %v10249_v18 = vpop.permute.xlu0 %7797 }
0x1017   :  { %v7745_v11 = vunpack.i.h.bf16 %v7743_v41  ;;  %v7744_v29 = vunpack.i.l.bf16 %v7743_v41  ;;  %v7372_v41 = vpack.c.bf16 %v7760_v61, %v7759_v3 }
0x1018   :  { %7362 = vmatpush3.bf16.xpose.msk.msra.mxu0 %vm8719_vm4, %v7360_v27 }
0x1019   :  { %v7363_v15 = vpack.c.bf16 %v7745_v11, %v7744_v29 }
0x101a   :  { %v7753_v37 = vpop.permute.xlu1 %7752  ;;  %v7808_v45 = vpop.permute.xlu0 %7807 }
0x101b   :  { %v7755_v57 = vunpack.i.h.bf16 %v7753_v37  ;;  %v7754_v47 = vunpack.i.l.bf16 %v7753_v37  ;;  %7365 = vmatprep.subr.msk.bf16.mxu0 %vm8719_vm4, %v7363_v15  ;;  %v7810_v25 = vunpack.i.h.bf16 %v7808_v45 }
0x101d   :  { %v7369_v43 = vpack.c.bf16 %v7755_v57, %v7754_v47 }
0x101e   :  { %v7763_v10 = vpop.permute.xlu1 %7762  ;;  %v10259_v27 = vpop.permute.xlu0 %7812 }
0x101f   :  { %v7765_v19 = vunpack.i.h.bf16 %v7763_v10  ;;  %v7764_v34 = vunpack.i.l.bf16 %v7763_v10 }
0x1020   :  { %7368 = vmatpush3.bf16.xpose.msk.msra.mxu0 %vm8719_vm4, %v7366_v32 }
0x1021   :  { %7371 = vmatprep.subr.msk.bf16.mxu0 %vm8719_vm4, %v7369_v43  ;;  %v7375_v29 = vpack.c.bf16 %v7765_v19, %v7764_v34  ;;  %v7378_v43 = vpack.c.bf16 %v7770_v8, %v7769_v33  ;;  %v7809_v34 = vunpack.i.l.bf16 %v7808_v45  ;;  %v7789_v45 = vunpack.i.l.bf16 %v10245_v54 }
0x1022   :  { %v7773_v17 = vpop.permute.xlu1 %7772  ;;  %v10263_v15 = vpop.permute.xlu0 %7822 }
0x1023   :  { %v7775_v60 = vunpack.i.h.bf16 %v7773_v17  ;;  %v7774_v57 = vunpack.i.l.bf16 %v7773_v17  ;;  %v7780_v17 = vunpack.i.h.bf16 %v10239_v35 }
0x1025   :  { %v7381_v3 = vpack.c.bf16 %v7775_v60, %v7774_v57 }
0x1026   :  { %v7783_v11 = vpop.permute.xlu1 %7782  ;;  %v10267_v19 = vpop.permute.xlu0 %7832 }
0x1027   :  { %v7785_v8 = vunpack.i.h.bf16 %v7783_v11  ;;  %v7784_v33 = vunpack.i.l.bf16 %v7783_v11 }
0x1028   :  { %7374 = vmatpush3.bf16.xpose.msk.msra.mxu0 %vm8719_vm4, %v7372_v41  ;;  %v7779_v41 = vunpack.i.l.bf16 %v10239_v35  ;;  %v7790_v35 = vunpack.i.h.bf16 %v10245_v54 }
0x1029   :  { %7377 = vmatprep.subr.msk.bf16.mxu0 %vm8719_vm4, %v7375_v29 }
0x102a   :  { %v7793_v37 = vpop.permute.xlu1 %7792  ;;  %v10278_v60 = vpop.permute.xlu0 %7842  ;;  %v7384_v57 = vpack.c.bf16 %v7780_v17, %v7779_v41 }
0x102b   :  { %v7795_v47 = vunpack.i.h.bf16 %v7793_v37  ;;  %v7794_v32 = vunpack.i.l.bf16 %v7793_v37  ;;  %v7404_v37 = vpack.c.bf16 %v7810_v25, %v7809_v34  ;;  %v7390_v25 = vpack.c.bf16 %v7790_v35, %v7789_v45 }
0x102c   :  { %v7815_v45 = vunpack.i.h.bf16 %v10259_v27 }
0x102d   :  { %v7400_v10 = vpack.c.bf16 %v7795_v47, %v7794_v32  ;;  %v7387_v32 = vpack.c.bf16 %v7785_v8, %v7784_v33 }
0x102e   :  { %v7803_v61 = vpop.permute.xlu1 %7802 }
0x102f   :  { %7402 = vmatpush3.bf16.xpose.msk.msra.mxu1 %vm8719_vm4, %v7400_v10  ;;  %v7800_v10 = vunpack.i.h.bf16 %v10249_v18  ;;  %v7804_v41 = vunpack.i.l.bf16 %v7803_v61 }
0x1030   :  { %7380 = vmatpush3.bf16.xpose.msk.msra.mxu0 %vm8719_vm4, %v7378_v43  ;;  %7403 = vmatprep.subr.bf16.mxu1 %v11299_v30  ;;  %v7799_v43 = vunpack.i.l.bf16 %v10249_v18  ;;  %v7805_v18 = vunpack.i.h.bf16 %v7803_v61 }
0x1031   :  { %7383 = vmatprep.subr.msk.bf16.mxu0 %vm8719_vm4, %v7381_v3  ;;  %v10294_v3 = vpop.permute.xlu0 %7852 }
0x1032   :  { %v7818_v29 = vpop.permute.xlu1 %7817  ;;  %v7393_v17 = vpack.c.bf16 %v7800_v10, %v7799_v43  ;;  %v7396_v33 = vpack.c.bf16 %v7805_v18, %v7804_v41  ;;  %v7814_v10 = vunpack.i.l.bf16 %v10259_v27 }
0x1033   :  { %v7820_v5 = vunpack.i.h.bf16 %v7818_v29 }
0x1035   :  { %v10304_v54 = vpop.permute.xlu0 %7862 }
0x1036   :  { %v10280_v47 = vpop.permute.xlu1 %7827 }
0x1037   :  { %7406 = vmatpush3.bf16.xpose.msk.msra.mxu1 %vm8719_vm4, %v7404_v37 }
0x1038   :  { %7386 = vmatpush3.bf16.xpose.msk.msra.mxu0 %vm8719_vm4, %v7384_v57 }
0x1039   :  { %7389 = vmatprep.subr.msk.bf16.mxu0 %vm8719_vm4, %v7387_v32  ;;  %v7873_v57 = vpop.permute.xlu0 %7872 }
0x103a   :  { %v10290_v11 = vpop.permute.xlu1 %7837  ;;  %v7875_v61 = vunpack.i.h.bf16 %v7873_v57  ;;  %v7874_v32 = vunpack.i.l.bf16 %v7873_v57  ;;  %v7825_v57 = vunpack.i.h.bf16 %v10263_v15 }
0x103c   :  { %v7440_v43 = vpack.c.bf16 %v7875_v61, %v7874_v32  ;;  %v7829_v32 = vunpack.i.l.bf16 %v10280_v47 }
0x103e   :  { %v10296_v34 = vpop.permute.xlu1 %7847  ;;  %6918 = vmatmul.mubr.msk.f32.vlgmr.msra.gmra.mrb[108].mxu1 %vm750_vm3, %v10044_v14 }
0x103f   :  { %6920 = vmatprep.mubr.msk.f32.mxu1 %vm8199_vm1, %v11300_v48 }
0x1040   :  { %7392 = vmatpush3.bf16.xpose.msk.msra.mxu0 %vm8719_vm4, %v7390_v25 }
0x1041   :  { %7395 = vmatprep.subr.msk.bf16.mxu0 %vm8719_vm4, %v7393_v17  ;;  %v7819_v17 = vunpack.i.l.bf16 %v7818_v29  ;;  %v7824_v29 = vunpack.i.l.bf16 %v10263_v15 }
0x1042   :  { %v10308_v8 = vpop.permute.xlu1 %7857  ;;  %6921 = vmatmul.mubr.msk.f32.gmra.mrb[110].mxu1 %vm750_vm3, %v10048_v22 }
0x1043   :  { %6923 = vmatprep.mubr.msk.f32.mxu1 %vm8199_vm1, %v11300_v48  ;;  %v7411_v61 = vpack.c.bf16 %v7820_v5, %v7819_v17  ;;  %v7413_v15 = vpack.c.bf16 %v7825_v57, %v7824_v29  ;;  %v7844_v5 = vunpack.i.l.bf16 %v10278_v60  ;;  %v7888_v17 = vpop.permute.xlu0 %7887 }
0x1046   :  { %v10314_v37 = vpop.permute.xlu1 %7867  ;;  %6924 = vmatmul.mubr.msk.f32.gmra.mrb[112].mxu1 %vm750_vm3, %v10072_v31 }
0x1047   :  { %6926 = vmatprep.mubr.msk.f32.mxu1 %vm8199_vm1, %v11300_v48 }
0x1048   :  { %7398 = vmatpush3.bf16.xpose.msk.msra.mxu0 %vm8719_vm4, %v7396_v33  ;;  %v7409_v33 = vpack.c.bf16 %v7815_v45, %v7814_v10  ;;  %v7835_v45 = vunpack.i.h.bf16 %v10267_v19  ;;  %v7834_v10 = vunpack.i.l.bf16 %v10267_v19 }
0x1049   :  { %7439 = vmatprep.subr.bf16.mxu0 %v11299_v30 }
0x104a   :  { %v10323_v35 = vpop.permute.xlu1 %7877  ;;  %6927 = vmatmul.mubr.msk.f32.gmra.mrb[114].mxu1 %vm750_vm3, %v10087_v4  ;;  %v7417_v19 = vpack.c.bf16 %v7835_v45, %v7834_v10  ;;  %v7865_v10 = vunpack.i.h.bf16 %v10304_v54 }
0x104b   :  { %6929 = vmatprep.mubr.msk.f32.mxu1 %vm8199_vm1, %v11300_v48 }
0x104e   :  { %v7883_v25 = vpop.permute.xlu1 %7882  ;;  %6930 = vmatmul.mubr.msk.f32.gmra.mrb[116].mxu1 %vm750_vm3, %v10055_v21 }
0x104f   :  { %v7885_v18 = vunpack.i.h.bf16 %v7883_v25  ;;  %v7884_v41 = vunpack.i.l.bf16 %v7883_v25  ;;  %6310 = vmatmul.mubr.msk.f32.vlgmr.msra.gmra.mrb[124].mxu0 %vm750_vm3, %v10044_v14  ;;  %6932 = vmatprep.mubr.msk.f32.mxu1 %vm8199_vm1, %v11300_v48  ;;  %v7830_v14 = vunpack.i.h.bf16 %v10280_v47  ;;  %v7845_v25 = vunpack.i.h.bf16 %v10278_v60 }
0x1050   :  { %6311 = vmatprep.mubr.msk.f32.mxu0 %vm750_vm3, %v10048_v22  ;;  %7441 = vmatpush3.bf16.msra.mxu0 %v7440_v43  ;;  %v7839_v43 = vunpack.i.l.bf16 %v10290_v11 }
0x1051   :  { %v7407_v27 = vpack.c.bf16 %v7885_v18, %v7884_v41  ;;  %7442 = vmatprep.subr.bf16.mxu0 %v11299_v30  ;;  %v7415_v47 = vpack.c.bf16 %v7830_v14, %v7829_v32  ;;  %v7849_v18 = vunpack.i.l.bf16 %v10296_v34  ;;  %v7421_v60 = vpack.c.bf16 %v7845_v25, %v7844_v5 }
0x1052   :  { %6933 = vmatmul.mubr.msk.f32.gmra.mrb[118].mxu1 %vm750_vm3, %v10057_v7  ;;  %v7893_v41 = vpop.permute.xlu1 %7892  ;;  %v7860_v32 = vunpack.i.h.bf16 %v10308_v8 }
0x1053   :  { %6312 = vmatmul.mubr.msk.f32.gmra.mrb[126].mxu0 %vm750_vm3, %v10048_v22  ;;  %7408 = vmatprep.subr.bf16.mxu1 %v7407_v27  ;;  %v7840_v22 = vunpack.i.h.bf16 %v10290_v11  ;;  %v7890_v27 = vunpack.i.h.bf16 %v7888_v17  ;;  %v7894_v29 = vunpack.i.l.bf16 %v7893_v41 }
0x1054   :  { %6313 = vmatprep.mubr.msk.f32.mxu0 %vm750_vm3, %v10072_v31  ;;  %7410 = vmatpush3.bf16.msra.mxu1 %v7409_v33  ;;  %v7889_v33 = vunpack.i.l.bf16 %v7888_v17 }
0x1055   :  { %6935 = vmatprep.mubr.msk.f32.mxu1 %vm8199_vm1, %v11300_v48  ;;  %7412 = vmatprep.subr.bf16.mxu1 %v7411_v61  ;;  %v7419_v11 = vpack.c.bf16 %v7840_v22, %v7839_v43  ;;  %v7854_v61 = vunpack.i.l.bf16 %v10294_v3  ;;  %v7870_v22 = vunpack.i.h.bf16 %v10314_v37  ;;  %v7869_v43 = vunpack.i.l.bf16 %v10314_v37 }
0x1056   :  { %6936 = vmatmul.mubr.msk.f32.gmra.mrb[120].mxu1 %vm750_vm3, %v10063_v36  ;;  %v7425_v14 = vpack.c.bf16 %v7890_v27, %v7889_v33 }
0x1057   :  { %6314 = vmatmul.mubr.msk.f32.gmra.mrb[128].mxu0 %vm750_vm3, %v10072_v31  ;;  %6938 = vmatprep.mubr.msk.f32.mxu1 %vm8199_vm1, %v11300_v48  ;;  %v7850_v31 = vunpack.i.h.bf16 %v10296_v34  ;;  %v7895_v34 = vunpack.i.h.bf16 %v7893_v41  ;;  %v7435_v25 = vpack.c.bf16 %v7870_v22, %v7869_v43 }
0x1058   :  { %6315 = vmatprep.mubr.msk.f32.mxu0 %vm750_vm3, %v10087_v4  ;;  %7414 = vmatpush3.bf16.msra.mxu1 %v7413_v15  ;;  %v7859_v15 = vunpack.i.l.bf16 %v10308_v8  ;;  %v7880_v8 = vunpack.i.h.bf16 %v10323_v35 }
0x1059   :  { %7416 = vmatprep.subr.bf16.mxu1 %v7415_v47  ;;  %v7423_v57 = vpack.c.bf16 %v7850_v31, %v7849_v18  ;;  %v7427_v45 = vpack.c.bf16 %v7895_v34, %v7894_v29  ;;  %v7864_v47 = vunpack.i.l.bf16 %v10304_v54 }
0x105a   :  { %6939 = vmatmul.mubr.msk.f32.gmra.mrb[122].mxu1 %vm750_vm3, %v10066_v56 }
0x105b   :  { %6316 = vmatmul.mubr.msk.f32.gmra.mrb[130].mxu0 %vm750_vm3, %v10087_v4  ;;  %6941 = vmatprep.mubr.msk.f32.mxu1 %vm8199_vm1, %v11300_v48  ;;  %v7855_v4 = vunpack.i.h.bf16 %v10294_v3  ;;  %v7431_v3 = vpack.c.bf16 %v7860_v32, %v7859_v15 }
0x105c   :  { %6317 = vmatprep.mubr.msk.f32.mxu0 %vm750_vm3, %v10055_v21  ;;  %7418 = vmatpush3.bf16.msra.mxu1 %v7417_v19  ;;  %v7879_v19 = vunpack.i.l.bf16 %v10323_v35 }
0x105d   :  { %7420 = vmatprep.subr.bf16.mxu1 %v7419_v11 }
0x105e   :  { %6942 = vmatmul.mubr.msk.f32.gmra.mrb[124].mxu1 %vm750_vm3, %v10074_v12 }
0x105f   :  { %6318 = vmatmul.mubr.msk.f32.gmra.mrb[132].mxu0 %vm750_vm3, %v10055_v21  ;;  %v7429_v21 = vpack.c.bf16 %v7855_v4, %v7854_v61 }
0x1060   :  { %6319 = vmatprep.mubr.msk.f32.mxu0 %vm750_vm3, %v10057_v7  ;;  %7422 = vmatpush3.bf16.msra.mxu1 %v7421_v60 }
0x1061   :  { %7424 = vmatprep.subr.bf16.mxu1 %v7423_v57 }
0x1063   :  { %6320 = vmatmul.mubr.msk.f32.gmra.mrb[134].mxu0 %vm750_vm3, %v10057_v7  ;;  %v7433_v7 = vpack.c.bf16 %v7865_v10, %v7864_v47 }
0x1064   :  { %6321 = vmatprep.mubr.msk.f32.mxu0 %vm750_vm3, %v10063_v36  ;;  %7426 = vmatpush3.bf16.msra.mxu1 %v7425_v14 }
0x1065   :  { %7428 = vmatprep.subr.bf16.mxu1 %v7427_v45 }
0x1067   :  { %6322 = vmatmul.mubr.msk.f32.gmra.mrb[136].mxu0 %vm750_vm3, %v10063_v36  ;;  %v7437_v36 = vpack.c.bf16 %v7880_v8, %v7879_v19 }
0x1068   :  { %6323 = vmatprep.mubr.msk.f32.mxu0 %vm750_vm3, %v10066_v56  ;;  %7430 = vmatpush3.bf16.msra.mxu1 %v7429_v21 }
0x1069   :  { %7432 = vmatprep.subr.bf16.mxu1 %v7431_v3 }
0x106b   :  { %6324 = vmatmul.mubr.msk.f32.gmra.mrb[138].mxu0 %vm750_vm3, %v10066_v56 }
0x106c   :  { %6325 = vmatprep.mubr.msk.f32.mxu0 %vm750_vm3, %v10074_v12  ;;  %7434 = vmatpush3.bf16.msra.mxu1 %v7433_v7 }
0x106d   :  { %7436 = vmatprep.subr.bf16.mxu1 %v7435_v25 }
0x106f   :  { %6326 = vmatmul.mubr.msk.f32.gmra.mrb[140].mxu0 %vm750_vm3, %v10074_v12 }
0x1070   :  { %7438 = vmatpush3.bf16.msra.mxu1 %v7437_v36  ;;  %6952 = vmatprep.mubr.msk.f32.mxu0 %vm8199_vm1, %v11300_v48 }
0x1071   :  { %7446 = vmatprep.subr.bf16.mxu1 %v8997_v40 }
0x1111   :  { %v3905_v54 = vpop.f32.mrb[108].mxu1 }
0x1112   :  { %v6919_v37 = vpop.f32.mrb[109].mxu1 }
0x1115   :  { %v3910_v35 = vpop.f32.mrb[110].mxu1 }
0x1116   :  { %v6922_v5 = vpop.f32.mrb[111].mxu1 }
0x1119   :  { %v3915_v11 = vpop.f32.mrb[112].mxu1 }
0x111a   :  { %v6925_v17 = vpop.f32.mrb[113].mxu1 }
0x111d   :  { %v10409_v31 = vpop.f32.mrb[114].mxu1 }
0x111e   :  { %v6928_v18 = vpop.f32.mrb[115].mxu1 }
0x1121   :  { %v10411_v41 = vpop.f32.mrb[116].mxu1 }
0x1122   :  { %v3786_v60 = vpop.f32.mrb[124].mxu0  ;;  %v6931_v27 = vpop.f32.mrb[117].mxu1 }
0x1123   :  { %v10414_v33 = vadd.f32 %v3786_v60, %v9014_v28  ;;  %v3788_v57 = vpop.f32.mrb[125].mxu0  ;;  %v10428_v28 = vadd.f32 %v3905_v54, %v8772_v6 }
0x1124   :  { %v10417_v34 = vadd.f32 %v3788_v57, %v9021_v46 }
0x1125   :  { %v10419_v29 = vpop.f32.mrb[118].mxu1  ;;  %v3949_v4 = vsel %vm720_vm5, %v10414_v33, -inf  ;;  %v3985_v61 = vsel %vm1609_vm7, %v10414_v33, -inf  ;;  %v4085_v8 = vsel %vm750_vm3, %v10428_v28, -inf }
0x1126   :  { %v3792_v14 = vpop.f32.mrb[126].mxu0  ;;  %3950 = vmax.xlane.f32.xlu0 %v3949_v4  ;;  %v6934_v32 = vpop.f32.mrb[119].mxu1  ;;  %v3986_v15 = vsel %vm31_vm0, %v10417_v34, -inf  ;;  %v4048_v3 = vsel %vm1673_vm8, %v10417_v34, -inf  ;;  %v4084_v6 = vsel %vm1710_vm9, %v10417_v34, -inf }
0x1127   :  { %v10431_v46 = vadd.f32 %v3792_v14, %v9038_v20  ;;  %v3794_v45 = vpop.f32.mrb[127].mxu0  ;;  %v3987_v21 = vmax.f32 %v3985_v61, %v3986_v15  ;;  %v10445_v20 = vadd.f32 %v3910_v35, %v8757_v63  ;;  %v4086_v37 = vmax.f32 %v4084_v6, %v4085_v8 }
0x1128   :  { %v10434_v10 = vadd.f32 %v3794_v45, %v9050_v13  ;;  %v10472_v61 = vadd.f32 %v3915_v11, %v8774_v0  ;;  %v10494_v8 = vadd.f32 %v10409_v31, %v8965_v55 }
0x1129   :  { %3988 = vmax.xlane.f32.xlu1 %v3987_v21  ;;  %v10436_v47 = vpop.f32.mrb[120].mxu1  ;;  %v3990_v22 = vsel %vm1609_vm7, %v10431_v46, -inf  ;;  %v4090_v5 = vsel %vm750_vm3, %v10445_v20, -inf  ;;  %v3952_v4 = vsel %vm720_vm5, %v10431_v46, -inf }
0x112a   :  { %v3798_v43 = vpop.f32.mrb[128].mxu0  ;;  %4049 = vmax.xlane.f32.xlu0 %v4048_v3  ;;  %v6937_v7 = vpop.f32.mrb[121].mxu1  ;;  %v3991_v13 = vsel %vm31_vm0, %v10434_v10, -inf  ;;  %v4089_v63 = vsel %vm1710_vm9, %v10434_v10, -inf  ;;  %v4051_v6 = vsel %vm1673_vm8, %v10434_v10, -inf  ;;  %v4095_v0 = vsel %vm750_vm3, %v10472_v61, -inf }
0x112b   :  { %v3800_v19 = vpop.f32.mrb[129].mxu0  ;;  %v3992_v25 = vmax.f32 %v3990_v22, %v3991_v13  ;;  %v10452_v36 = vadd.f32 %v3798_v43, %v9076_v51  ;;  %v4091_v27 = vmax.f32 %v4089_v63, %v4090_v5  ;;  %v11320_v5 = vld [vmem:[#allocation39_spill] sm:$0xff]  ;;  %v4100_v55 = vsel %vm750_vm3, %v10494_v8, -inf }
0x112c   :  { %v10455_v54 = vadd.f32 %v3800_v19, %v9080_v24 }
0x112d   :  { %3993 = vmax.xlane.f32.xlu1 %v3992_v25  ;;  %v10459_v35 = vpop.f32.mrb[122].mxu1  ;;  %v3995_v51 = vsel %vm1609_vm7, %v10452_v36, -inf  ;;  %v3955_v13 = vsel %vm720_vm5, %v10452_v36, -inf }
0x112e   :  { %v3804_v17 = vpop.f32.mrb[130].mxu0  ;;  %4087 = vmax.xlane.f32.xlu0 %v4086_v37  ;;  %v6940_v18 = vpop.f32.mrb[123].mxu1  ;;  %v3996_v24 = vsel %vm31_vm0, %v10455_v54, -inf  ;;  %v4094_v22 = vsel %vm1710_vm9, %v10455_v54, -inf }
0x112f   :  { %v3806_v60 = vpop.f32.mrb[131].mxu0  ;;  %v3997_v45 = vmax.f32 %v3995_v51, %v3996_v24  ;;  %v10475_v21 = vadd.f32 %v3804_v17, %v9104_v62  ;;  %v4096_v7 = vmax.f32 %v4094_v22, %v4095_v0  ;;  %v11321_v22 = vld [vmem:[#allocation40_spill] sm:$0xff]  ;;  %v11322_v0 = vld [vmem:[#allocation41_spill] sm:$0xff] }
0x1130   :  { %v10478_v3 = vadd.f32 %v3806_v60, %v9114_v26  ;;  %v4054_v60 = vsel %vm1673_vm8, %v10455_v54, -inf }
0x1131   :  { %4092 = vmax.xlane.f32.xlu1 %v4091_v27  ;;  %v10467_v57 = vpop.f32.mrb[124].mxu1  ;;  %v4000_v62 = vsel %vm1609_vm7, %v10475_v21, -inf }
0x1132   :  { %v3810_v14 = vpop.f32.mrb[132].mxu0  ;;  %3953 = vmax.xlane.f32.xlu0 %v3952_v4  ;;  %v6943_v32 = vpop.f32.mrb[125].mxu1  ;;  %v4001_v26 = vsel %vm31_vm0, %v10478_v3, -inf  ;;  %v4099_v18 = vsel %vm1710_vm9, %v10478_v3, -inf  ;;  %v3958_v4 = vsel %vm720_vm5, %v10475_v21, -inf }
0x1133   :  { %v3812_v15 = vpop.f32.mrb[133].mxu0  ;;  %v4002_v37 = vmax.f32 %v4000_v62, %v4001_v26  ;;  %v10497_v63 = vadd.f32 %v3810_v14, %v9144_v16  ;;  %v4101_v51 = vmax.f32 %v4099_v18, %v4100_v55  ;;  %v10516_v14 = vadd.f32 %v10411_v41, %v8808_v58 }
0x1134   :  { %v10500_v17 = vadd.f32 %v3812_v15, %v11320_v5  ;;  %v4057_v26 = vsel %vm1673_vm8, %v10478_v3, -inf }
0x1135   :  { %3998 = vmax.xlane.f32.xlu1 %v3997_v45  ;;  %v4005_v16 = vsel %vm1609_vm7, %v10497_v63, -inf  ;;  %v4105_v58 = vsel %vm750_vm3, %v10516_v14, -inf }
0x1136   :  { %v3816_v11 = vpop.f32.mrb[134].mxu0  ;;  %4052 = vmax.xlane.f32.xlu0 %v4051_v6  ;;  %v4006_v24 = vsel %vm31_vm0, %v10500_v17, -inf  ;;  %v4104_v62 = vsel %vm1710_vm9, %v10500_v17, -inf }
0x1137   :  { %v3818_v43 = vpop.f32.mrb[135].mxu0  ;;  %v4007_v45 = vmax.f32 %v4005_v16, %v4006_v24  ;;  %v10519_v6 = vadd.f32 %v3816_v11, %v11321_v22  ;;  %v4106_v41 = vmax.f32 %v4104_v62, %v4105_v58 }
0x1139   :  { %4097 = vmax.xlane.f32.xlu1 %v4096_v7  ;;  %v10522_v7 = vadd.f32 %v3818_v43, %v11322_v0  ;;  %v3961_v43 = vsel %vm720_vm5, %v10497_v63, -inf  ;;  %v11326_v0 = vld [vmem:[#allocation34_spill] sm:$0xff] }
0x113a   :  { %v3822_v19 = vpop.f32.mrb[136].mxu0  ;;  %3956 = vmax.xlane.f32.xlu0 %v3955_v13  ;;  %v4010_v13 = vsel %vm1609_vm7, %v10519_v6, -inf  ;;  %v10560_v62 = vadd.f32 %v10436_v47, %v11326_v0 }
0x113b   :  { %v3824_v25 = vpop.f32.mrb[137].mxu0  ;;  %v4011_v11 = vsel %vm31_vm0, %v10522_v7, -inf  ;;  %v4109_v24 = vsel %vm1710_vm9, %v10522_v7, -inf }
0x113c   :  { %v4012_v18 = vmax.f32 %v4010_v13, %v4011_v11  ;;  %v4115_v13 = vsel %vm750_vm3, %v10560_v62, -inf }
0x113d   :  { %4003 = vmax.xlane.f32.xlu1 %v4002_v37  ;;  %v11323_v37 = vld [vmem:[#allocation33_spill] sm:$0xff] }
0x113e   :  { %v3828_v31 = vpop.f32.mrb[138].mxu0  ;;  %4055 = vmax.xlane.f32.xlu0 %v4054_v60  ;;  %v10538_v5 = vadd.f32 %v10419_v29, %v11323_v37  ;;  %v11324_v60 = vld [vmem:[#allocation42_spill] sm:$0xff] }
0x113f   :  { %v3830_v27 = vpop.f32.mrb[139].mxu0  ;;  %v10541_v55 = vadd.f32 %v3822_v19, %v11324_v60 }
0x1141   :  { %4102 = vmax.xlane.f32.xlu1 %v4101_v51  ;;  %v11325_v51 = vld [vmem:[#allocation43_spill] sm:$0xff]  ;;  %v4015_v22 = vsel %vm1609_vm7, %v10541_v55, -inf  ;;  %v3967_v60 = vsel %vm720_vm5, %v10541_v55, -inf }
0x1142   :  { %v3834_v32 = vpop.f32.mrb[140].mxu0  ;;  %3959 = vmax.xlane.f32.xlu0 %v3958_v4  ;;  %v10544_v16 = vadd.f32 %v3824_v25, %v11325_v51  ;;  %v4060_v4 = vsel %vm1673_vm8, %v10500_v17, -inf  ;;  %v3964_v25 = vsel %vm720_vm5, %v10519_v6, -inf }
0x1143   :  { %v3836_v15 = vpop.f32.mrb[141].mxu0 }
0x1144   :  { %v4016_v19 = vsel %vm31_vm0, %v10544_v16, -inf  ;;  %v4114_v58 = vsel %vm1710_vm9, %v10544_v16, -inf }
0x1145   :  { %4008 = vmax.xlane.f32.xlu1 %v4007_v45  ;;  %v4110_v45 = vsel %vm750_vm3, %v10538_v5, -inf  ;;  %v4116_v11 = vmax.f32 %v4114_v58, %v4115_v13 }
0x1146   :  { %4058 = vmax.xlane.f32.xlu0 %v4057_v26  ;;  %v4111_v29 = vmax.f32 %v4109_v24, %v4110_v45  ;;  %v4017_v26 = vmax.f32 %v4015_v22, %v4016_v19  ;;  %v11330_v22 = vld [vmem:[#allocation38_spill] sm:$0xff] }
0x1147   :  { %v10589_v19 = vadd.f32 %v3834_v32, %v11330_v22 }
0x1149   :  { %4107 = vmax.xlane.f32.xlu1 %v4106_v41  ;;  %v4063_v41 = vsel %vm1673_vm8, %v10522_v7, -inf  ;;  %v4025_v32 = vsel %vm1609_vm7, %v10589_v19, -inf }
0x114a   :  { %3962 = vmax.xlane.f32.xlu0 %v3961_v43  ;;  %v11327_v43 = vld [vmem:[#allocation44_spill] sm:$0xff] }
0x114b   :  { %v10569_v37 = vadd.f32 %v3828_v31, %v11327_v43  ;;  %v4066_v31 = vsel %vm1673_vm8, %v10544_v16, -inf }
0x114d   :  { %4013 = vmax.xlane.f32.xlu1 %v4012_v18  ;;  %v11328_v18 = vld [vmem:[#allocation45_spill] sm:$0xff]  ;;  %v3970_v51 = vsel %vm720_vm5, %v10569_v37, -inf  ;;  %v4020_v24 = vsel %vm1609_vm7, %v10569_v37, -inf }
0x114e   :  { %4061 = vmax.xlane.f32.xlu0 %v4060_v4  ;;  %v10572_v47 = vadd.f32 %v3830_v27, %v11328_v18  ;;  %v11329_v27 = vld [vmem:[#allocation36_spill] sm:$0xff] }
0x114f   :  { %v10586_v45 = vadd.f32 %v10459_v35, %v11329_v27 }
0x1150   :  { %v4021_v4 = vsel %vm31_vm0, %v10572_v47, -inf  ;;  %v4119_v58 = vsel %vm1710_vm9, %v10572_v47, -inf }
0x1151   :  { %4112 = vmax.xlane.f32.xlu1 %v4111_v29  ;;  %v4022_v29 = vmax.f32 %v4020_v24, %v4021_v4  ;;  %v3973_v4 = vsel %vm720_vm5, %v10589_v19, -inf }
0x1152   :  { %3965 = vmax.xlane.f32.xlu0 %v3964_v25  ;;  %v11331_v25 = vld [vmem:[#allocation35_spill] sm:$0xff] }
0x1153   :  { %v10592_v0 = vadd.f32 %v3836_v15, %v11331_v25 }
0x1155   :  { %4018 = vmax.xlane.f32.xlu1 %v4017_v26  ;;  %v4069_v26 = vsel %vm1673_vm8, %v10572_v47, -inf  ;;  %v4072_v35 = vsel %vm1673_vm8, %v10592_v0, -inf  ;;  %v4026_v15 = vsel %vm31_vm0, %v10592_v0, -inf }
0x1156   :  { %4064 = vmax.xlane.f32.xlu0 %v4063_v41  ;;  %v4120_v41 = vsel %vm750_vm3, %v10586_v45, -inf  ;;  %v4027_v18 = vmax.f32 %v4025_v32, %v4026_v15 }
0x1157   :  { %v4121_v13 = vmax.f32 %v4119_v58, %v4120_v41 }
0x1159   :  { %4117 = vmax.xlane.f32.xlu1 %v4116_v11  ;;  %v11332_v11 = vld [vmem:[#allocation37_spill] sm:$0xff] }
0x115a   :  { %3968 = vmax.xlane.f32.xlu0 %v3967_v60  ;;  %v10608_v43 = vadd.f32 %v10467_v57, %v11332_v11  ;;  %v4124_v60 = vsel %vm1710_vm9, %v10592_v0, -inf  ;;  %v3511_v57 = vmul.f32 %v10066_v56, %v11288_v38 }
0x115d   :  { %3971 = vmax.xlane.f32.xlu1 %v3970_v51  ;;  %v4125_v51 = vsel %vm750_vm3, %v10608_v43, -inf }
0x115e   :  { %4067 = vmax.xlane.f32.xlu0 %v4066_v31  ;;  %v4126_v24 = vmax.f32 %v4124_v60, %v4125_v51  ;;  %v3512_v31 = vmul.f32 %v10074_v12, %v11288_v38 }
0x1160   :  { %v7896_v27 = vpack.i.bf16 %v3512_v31, %v3511_v57 }
0x1161   :  { %4023 = vmax.xlane.f32.xlu1 %v4022_v29 }
0x1162   :  { %4070 = vmax.xlane.f32.xlu0 %v4069_v26 }
0x1165   :  { %4073 = vmax.xlane.f32.xlu1 %v4072_v35 }
0x1166   :  { %4122 = vmax.xlane.f32.xlu0 %v4121_v13 }
0x1169   :  { %4028 = vmax.xlane.f32.xlu1 %v4027_v18 }
0x116d   :  { %4127 = vmax.xlane.f32.xlu1 %v4126_v24 }
0x1171   :  { %3974 = vmax.xlane.f32.xlu1 %v3973_v4 }
0x117c   :  { %7897 = vrot.lane.b32.xlu0 %v7896_v27, %s8204_s4 }
0x11b3   :  { %v3951_v29 = vpop.xlane.xlu0 %3950 }
0x11b4   :  { %v3976_v58 = vsub.f32 %v10414_v33, %v3951_v29 }
0x11b6   :  { %v3989_v22 = vpop.xlane.xlu1 %3988 }
0x11b7   :  { %v4030_v25 = vsub.f32 %v10414_v33, %v3989_v22  ;;  %v4050_v26 = vpop.xlane.xlu0 %4049  ;;  %v4031_v41 = vsub.f32 %v10417_v34, %v3989_v22 }
0x11b8   :  { %v4075_v35 = vsub.f32 %v10417_v34, %v4050_v26 }
0x11b9   :  { %v4147_v12 = vsel %vm720_vm5, %v3976_v58, %v4030_v25 }
0x11ba   :  { %v3994_v13 = vpop.xlane.xlu1 %3993  ;;  %v4156_v56 = vsel %vm31_vm0, %v4031_v41, %v4075_v35  ;;  %v4174_v15 = vmul.f32 1.442695, %v4147_v12 }
0x11bb   :  { %v10626_v32 = vpop.xlane.xlu0 %4087  ;;  %v4032_v24 = vsub.f32 %v10431_v46, %v3994_v13  ;;  %v4033_v57 = vsub.f32 %v10434_v10, %v3994_v13 }
0x11bc   :  { %v4129_v38 = vsub.f32 %v10417_v34, %v10626_v32 }
0x11be   :  { %v4165_v11 = vsel %vm739_vm6, %v4156_v56, %v4129_v38  ;;  %v10632_v18 = vpop.xlane.xlu1 %4092 }
0x11bf   :  { %v4176_v33 = vmul.f32 1.442695, %v4165_v11  ;;  %v3954_v60 = vpop.xlane.xlu0 %3953  ;;  %v4131_v29 = vsub.f32 %v10434_v10, %v10632_v18 }
0x11c0   :  { %v3977_v51 = vsub.f32 %v10431_v46, %v3954_v60 }
0x11c1   :  { %8061 = vpow2.f32 %v4176_v33 }
0x11c2   :  { %8063 = vpow2.f32 %v4174_v15  ;;  %v3999_v4 = vpop.xlane.xlu1 %3998  ;;  %v4148_v34 = vsel %vm720_vm5, %v3977_v51, %v4032_v24  ;;  %v11333_v24 = vld [vmem:[#allocation27_spill] sm:$0xff] }
0x11c3   :  { %v4053_v31 = vpop.xlane.xlu0 %4052  ;;  %v4180_v26 = vmul.f32 1.442695, %v4148_v34  ;;  %v4034_v13 = vsub.f32 %v10452_v36, %v3999_v4  ;;  %v4035_v15 = vsub.f32 %v10455_v54, %v3999_v4  ;;  %v11334_v34 = vld [vmem:[#allocation20_spill] sm:$0xff] }
0x11c4   :  { %v4076_v27 = vsub.f32 %v10434_v10, %v4053_v31 }
0x11c6   :  { %v4157_v22 = vsel %vm31_vm0, %v4033_v57, %v4076_v27  ;;  %v10642_v25 = vpop.xlane.xlu1 %4097 }
0x11c7   :  { %v4166_v58 = vsel %vm739_vm6, %v4157_v22, %v4131_v29  ;;  %v3957_v41 = vpop.xlane.xlu0 %3956  ;;  %v4133_v60 = vsub.f32 %v10455_v54, %v10642_v25 }
0x11c8   :  { %v4182_v46 = vmul.f32 1.442695, %v4166_v58  ;;  %v3978_v35 = vsub.f32 %v10452_v36, %v3957_v41 }
0x11ca   :  { %8065 = vpow2.f32 %v4182_v46  ;;  %v4004_v12 = vpop.xlane.xlu1 %4003  ;;  %v4149_v11 = vsel %vm720_vm5, %v3978_v35, %v4034_v13 }
0x11cb   :  { %v10647_v38 = vpop.eup %8061  ;;  %8067 = vpow2.f32 %v4180_v26  ;;  %v4056_v56 = vpop.xlane.xlu0 %4055  ;;  %v4186_v31 = vmul.f32 1.442695, %v4149_v11  ;;  %v4036_v22 = vsub.f32 %v10475_v21, %v4004_v12  ;;  %v4037_v41 = vsub.f32 %v10478_v3, %v4004_v12 }
0x11cc   :  { %v10649_v10 = vpop.eup %8063  ;;  %v4077_v33 = vsub.f32 %v10455_v54, %v4056_v56  ;;  %4463 = vmatprep.mubr.f32.mxu1 %v10647_v38 }
0x11cd   :  { %4464 = vmatmul.mubr.f32.vlgmr.msra.gmra.mrb[126].mxu1 %v10649_v10 }
0x11ce   :  { %v4158_v36 = vsel %vm31_vm0, %v4035_v15, %v4077_v33  ;;  %v10659_v51 = vpop.xlane.xlu1 %4102  ;;  %7448 = vmatpush3.bf16.msra.mxu1 %v11333_v24 }
0x11cf   :  { %v4167_v4 = vsel %vm739_vm6, %v4158_v36, %v4133_v60  ;;  %v3960_v57 = vpop.xlane.xlu0 %3959  ;;  %7450 = vmatprep.subr.bf16.mxu1 %v11334_v34 }
0x11d0   :  { %v4188_v27 = vmul.f32 1.442695, %v4167_v4  ;;  %v3979_v29 = vsub.f32 %v10475_v21, %v3960_v57  ;;  %v4135_v21 = vsub.f32 %v10478_v3, %v10659_v51 }
0x11d2   :  { %8069 = vpow2.f32 %v4188_v27  ;;  %v4009_v54 = vpop.xlane.xlu1 %4008  ;;  %7452 = vmatpush3.bf16.msra.mxu1 %v11333_v24  ;;  %v4150_v46 = vsel %vm720_vm5, %v3979_v29, %v4036_v22 }
0x11d3   :  { %8071 = vpow2.f32 %v4186_v31  ;;  %v4059_v26 = vpop.xlane.xlu0 %4058  ;;  %7454 = vmatprep.subr.bf16.mxu1 %v11334_v34  ;;  %v4192_v11 = vmul.f32 1.442695, %v4150_v46  ;;  %v4039_v27 = vsub.f32 %v10500_v17, %v4009_v54 }
0x11d4   :  { %v10668_v58 = vpop.eup %8065  ;;  %v4078_v35 = vsub.f32 %v10478_v3, %v4059_v26  ;;  %v4038_v3 = vsub.f32 %v10497_v63, %v4009_v54 }
0x11d5   :  { %v10673_v13 = vpop.eup %8067  ;;  %4468 = vmatprep.mubr.f32.mxu1 %v10668_v58 }
0x11d6   :  { %v4159_v56 = vsel %vm31_vm0, %v4037_v41, %v4078_v35  ;;  %4469 = vmatmul.mubr.f32.gmra.mrb[128].mxu1 %v10673_v13  ;;  %v10680_v15 = vpop.xlane.xlu1 %4107 }
0x11d7   :  { %v4168_v12 = vsel %vm739_vm6, %v4159_v56, %v4135_v21  ;;  %v3963_v33 = vpop.xlane.xlu0 %3962  ;;  %7456 = vmatpush3.bf16.msra.mxu1 %v11333_v24  ;;  %v11335_v21 = vld [vmem:[#allocation32_spill] sm:$0xff] }
0x11d8   :  { %v4194_v60 = vmul.f32 1.442695, %v4168_v12  ;;  %v3980_v36 = vsub.f32 %v10497_v63, %v3963_v33  ;;  %7458 = vmatprep.subr.bf16.mxu1 %v11334_v34  ;;  %v4137_v63 = vsub.f32 %v10500_v17, %v10680_v15 }
0x11da   :  { %8073 = vpow2.f32 %v4194_v60  ;;  %v4014_v31 = vpop.xlane.xlu1 %4013  ;;  %v4151_v29 = vsel %vm720_vm5, %v3980_v36, %v4038_v3 }
0x11db   :  { %8075 = vpow2.f32 %v4192_v11  ;;  %v4062_v4 = vpop.xlane.xlu0 %4061  ;;  %7460 = vmatpush3.bf16.msra.mxu1 %v11333_v24  ;;  %v4198_v54 = vmul.f32 1.442695, %v4151_v29  ;;  %v11336_v11 = vld [vmem:[#allocation21_spill] sm:$0xff]  ;;  %v4041_v36 = vsub.f32 %v10522_v7, %v4014_v31 }
0x11dc   :  { %v10688_v57 = vpop.eup %8069  ;;  %v4079_v22 = vsub.f32 %v10500_v17, %v4062_v4  ;;  %7462 = vmatprep.subr.bf16.mxu1 %v11334_v34  ;;  %v4040_v17 = vsub.f32 %v10519_v6, %v4014_v31 }
0x11dd   :  { %v10694_v26 = vpop.eup %8071  ;;  %4473 = vmatprep.mubr.f32.mxu1 %v10688_v57 }
0x11de   :  { %v4160_v41 = vsel %vm31_vm0, %v4039_v27, %v4079_v22  ;;  %4474 = vmatmul.mubr.f32.gmra.mrb[130].mxu1 %v10694_v26  ;;  %v10701_v24 = vpop.xlane.xlu1 %4112 }
0x11df   :  { %v4169_v46 = vsel %vm739_vm6, %v4160_v41, %v4137_v63  ;;  %v3966_v35 = vpop.xlane.xlu0 %3965  ;;  %7464 = vmatpush3.bf16.msra.mxu1 %v11335_v21 }
0x11e0   :  { %v4200_v34 = vmul.f32 1.442695, %v4169_v46  ;;  %v3981_v56 = vsub.f32 %v10519_v6, %v3966_v35  ;;  %7466 = vmatprep.subr.bf16.mxu1 %v11336_v11  ;;  %v4139_v6 = vsub.f32 %v10522_v7, %v10701_v24 }
0x11e2   :  { %8077 = vpow2.f32 %v4200_v34  ;;  %v4019_v12 = vpop.xlane.xlu1 %4018  ;;  %v4152_v3 = vsel %vm720_vm5, %v3981_v56, %v4040_v17  ;;  %v4130_v56 = vsub.f32 %v10428_v28, %v10626_v32  ;;  %v4132_v32 = vsub.f32 %v10445_v20, %v10632_v18 }
0x11e3   :  { %8079 = vpow2.f32 %v4198_v54  ;;  %v4065_v33 = vpop.xlane.xlu0 %4064  ;;  %7468 = vmatpush3.bf16.msra.mxu1 %v8997_v40  ;;  %v4204_v31 = vmul.f32 1.442695, %v4152_v3  ;;  %v4043_v11 = vsub.f32 %v10544_v16, %v4019_v12 }
0x11e4   :  { %v10709_v60 = vpop.eup %8073  ;;  %v4080_v4 = vsub.f32 %v10522_v7, %v4065_v33  ;;  %7470 = vmatprep.subr.bf16.mxu1 %v9430_v42  ;;  %v4042_v7 = vsub.f32 %v10541_v55, %v4019_v12 }
0x11e5   :  { %v10715_v27 = vpop.eup %8075  ;;  %4478 = vmatprep.mubr.f32.mxu1 %v10709_v60 }
0x11e6   :  { %v4161_v29 = vsel %vm31_vm0, %v4041_v36, %v4080_v4  ;;  %4479 = vmatmul.mubr.f32.gmra.mrb[132].mxu1 %v10715_v27  ;;  %v10722_v22 = vpop.xlane.xlu1 %4117 }
0x11e7   :  { %v4170_v63 = vsel %vm739_vm6, %v4161_v29, %v4139_v6  ;;  %v3969_v41 = vpop.xlane.xlu0 %3968  ;;  %7472 = vmatpush3.bf16.msra.mxu1 %v8997_v40  ;;  %v4141_v36 = vsub.f32 %v10544_v16, %v10722_v22  ;;  %v4178_v29 = vmul.f32 1.442695, %v4130_v56 }
0x11e8   :  { %v4206_v54 = vmul.f32 1.442695, %v4170_v63  ;;  %v3982_v46 = vsub.f32 %v10541_v55, %v3969_v41  ;;  %7474 = vmatprep.subr.bf16.mxu1 %v9430_v42 }
0x11ea   :  { %8081 = vpow2.f32 %v4206_v54  ;;  %v3972_v35 = vpop.xlane.xlu1 %3971  ;;  %v4153_v17 = vsel %vm720_vm5, %v3982_v46, %v4042_v7  ;;  %v4184_v46 = vmul.f32 1.442695, %v4132_v32 }
0x11eb   :  { %8083 = vpow2.f32 %v4204_v31  ;;  %v4068_v21 = vpop.xlane.xlu0 %4067  ;;  %7476 = vmatpush3.bf16.msra.mxu1 %v8997_v40  ;;  %v4210_v12 = vmul.f32 1.442695, %v4153_v17 }
0x11ec   :  { %v10730_v34 = vpop.eup %8077  ;;  %v4081_v33 = vsub.f32 %v10544_v16, %v4068_v21  ;;  %7483 = vmatprep.subr.bf16.mxu1 %v11299_v30  ;;  %v3983_v16 = vsub.f32 %v10569_v37, %v3972_v35  ;;  %v4134_v21 = vsub.f32 %v10472_v61, %v10642_v25 }
0x11ed   :  { %v10738_v55 = vpop.eup %8079  ;;  %4483 = vmatprep.mubr.f32.mxu1 %v10730_v34 }
0x11ee   :  { %v4162_v40 = vsel %vm31_vm0, %v4043_v11, %v4081_v33  ;;  %4484 = vmatmul.mubr.f32.gmra.mrb[134].mxu1 %v10738_v55  ;;  %v4024_v28 = vpop.xlane.xlu1 %4023 }
0x11ef   :  { %v4171_v3 = vsel %vm739_vm6, %v4162_v40, %v4141_v36  ;;  %v4044_v4 = vsub.f32 %v10569_v37, %v4024_v28  ;;  %v4071_v6 = vpop.xlane.xlu0 %4070  ;;  %v4045_v63 = vsub.f32 %v10572_v47, %v4024_v28  ;;  %v4136_v36 = vsub.f32 %v10494_v8, %v10659_v51 }
0x11f0   :  { %v4212_v31 = vmul.f32 1.442695, %v4171_v3  ;;  %v4082_v41 = vsub.f32 %v10572_v47, %v4071_v6  ;;  %v4190_v40 = vmul.f32 1.442695, %v4134_v21 }
0x11f1   :  { %v4154_v20 = vsel %vm720_vm5, %v3983_v16, %v4044_v4  ;;  %v4196_v6 = vmul.f32 1.442695, %v4136_v36 }
0x11f2   :  { %8085 = vpow2.f32 %v4212_v31  ;;  %v4074_v54 = vpop.xlane.xlu1 %4073  ;;  %v4163_v56 = vsel %vm31_vm0, %v4045_v63, %v4082_v41  ;;  %v4216_v11 = vmul.f32 1.442695, %v4154_v20  ;;  %v4140_v20 = vsub.f32 %v10538_v5, %v10701_v24 }
0x11f3   :  { %8087 = vpow2.f32 %v4210_v12  ;;  %v10753_v18 = vpop.xlane.xlu0 %4122  ;;  %v4083_v12 = vsub.f32 %v10592_v0, %v4074_v54 }
0x11f4   :  { %v10755_v7 = vpop.eup %8081  ;;  %8089 = vpow2.f32 %v4178_v29  ;;  %v4143_v37 = vsub.f32 %v10572_v47, %v10753_v18  ;;  %v4138_v29 = vsub.f32 %v10516_v14, %v10680_v15  ;;  %v4208_v24 = vmul.f32 1.442695, %v4140_v20 }
0x11f5   :  { %v10761_v35 = vpop.eup %8083  ;;  %4488 = vmatprep.mubr.f32.mxu1 %v10755_v7  ;;  %8091 = vpow2.f32 %v4184_v46 }
0x11f6   :  { %v4172_v17 = vsel %vm739_vm6, %v4163_v56, %v4143_v37  ;;  %4489 = vmatmul.mubr.f32.gmra.mrb[136].mxu1 %v10761_v35  ;;  %v4029_v33 = vpop.xlane.xlu1 %4028 }
0x11f7   :  { %v4218_v61 = vmul.f32 1.442695, %v4172_v17  ;;  %v7898_v25 = vpop.permute.xlu0 %7897  ;;  %v4047_v47 = vsub.f32 %v10592_v0, %v4029_v33  ;;  %v4046_v15 = vsub.f32 %v10589_v19, %v4029_v33 }
0x11f8   :  { %v7900_v28 = vunpack.i.h.bf16 %v7898_v25  ;;  %v7899_v32 = vunpack.i.l.bf16 %v7898_v25 }
0x11f9   :  { %8093 = vpow2.f32 %v4218_v61  ;;  %v4164_v51 = vsel %vm31_vm0, %v4047_v47, %v4083_v12 }
0x11fa   :  { %8095 = vpow2.f32 %v4216_v11  ;;  %v7443_v3 = vpack.c.bf16 %v7900_v28, %v7899_v32  ;;  %v4128_v4 = vpop.xlane.xlu1 %4127  ;;  %v4142_v11 = vsub.f32 %v10560_v62, %v10722_v22  ;;  %v4144_v62 = vsub.f32 %v10586_v45, %v10753_v18 }
0x11fb   :  { %v4145_v31 = vsub.f32 %v10592_v0, %v4128_v4  ;;  %8097 = vpow2.f32 %v4190_v40  ;;  %v4202_v0 = vmul.f32 1.442695, %v4138_v29  ;;  %v4146_v61 = vsub.f32 %v10608_v43, %v4128_v4 }
0x11fc   :  { %v10774_v8 = vpop.eup %8085  ;;  %7444 = vmatpush3.bf16.msra.mxu0 %v7443_v3  ;;  %8099 = vpow2.f32 %v4196_v6  ;;  %v4214_v33 = vmul.f32 1.442695, %v4142_v11 }
0x11fd   :  { %v10777_v16 = vpop.eup %8087  ;;  %v4173_v63 = vsel %vm739_vm6, %v4164_v51, %v4145_v31  ;;  %4493 = vmatprep.mubr.f32.mxu1 %v10774_v8  ;;  %7477 = vmatprep.subr.bf16.mxu0 %v11299_v30  ;;  %v4226_v45 = vmul.f32 1.442695, %v4146_v61 }
0x11fe   :  { %v10782_v41 = vpop.eup %8089  ;;  %v4224_v54 = vmul.f32 1.442695, %v4173_v63  ;;  %4494 = vmatmul.mubr.f32.gmra.mrb[138].mxu1 %v10777_v16  ;;  %v3975_v14 = vpop.xlane.xlu1 %3974 }
0x11ff   :  { %v3984_v46 = vsub.f32 %v10589_v19, %v3975_v14  ;;  %6953 = vmatmul.mubr.msk.f32.vlgmr.msra.gmra.mrb[142].mxu0 %vm750_vm3, %v10782_v41  ;;  %v10794_v21 = vpop.eup %8091 }
0x1200   :  { %8101 = vpow2.f32 %v4224_v54  ;;  %6955 = vmatprep.mubr.msk.f32.mxu0 %vm8199_vm1, %v11300_v48  ;;  %7479 = vmatpush3.bf16.msra.mxu0 %v9430_v42 }
0x1201   :  { %v4155_v37 = vsel %vm720_vm5, %v3984_v46, %v4046_v15  ;;  %7480 = vmatprep.subr.bf16.mxu0 %v11299_v30  ;;  %8103 = vpow2.f32 %v4202_v0 }
0x1202   :  { %v4222_v56 = vmul.f32 1.442695, %v4155_v37 }
0x1203   :  { %v10798_v19 = vpop.eup %8093  ;;  %6956 = vmatmul.mubr.msk.f32.gmra.mrb[144].mxu0 %vm750_vm3, %v10794_v21 }
0x1204   :  { %v10802_v5 = vpop.eup %8095  ;;  %8105 = vpow2.f32 %v4222_v56  ;;  %4498 = vmatprep.mubr.f32.mxu1 %v10798_v19  ;;  %6958 = vmatprep.mubr.msk.f32.mxu0 %vm8199_vm1, %v11300_v48 }
0x1205   :  { %4499 = vmatmul.mubr.f32.gmra.mrb[140].mxu1 %v10802_v5  ;;  %7482 = vmatpush3.bf16.msra.mxu0 %v9430_v42  ;;  %v8098_v17 = vpop.eup %8097  ;;  %8107 = vpow2.f32 %v4208_v24  ;;  %v4220_v42 = vmul.f32 1.442695, %v4144_v62 }
0x1206   :  { %7489 = vmatprep.subr.bf16.mxu0 %v11299_v30  ;;  %v8100_v22 = vpop.eup %8099  ;;  %8109 = vpow2.f32 %v4214_v33 }
0x1207   :  { %6959 = vmatmul.mubr.msk.f32.gmra.mrb[146].mxu0 %vm750_vm3, %v8098_v17  ;;  %8111 = vpow2.f32 %v4220_v42 }
0x1208   :  { %6961 = vmatprep.mubr.msk.f32.mxu0 %vm8199_vm1, %v11300_v48  ;;  %8113 = vpow2.f32 %v4226_v45 }
0x120a   :  { %v8102_v36 = vpop.eup %8101 }
0x120b   :  { %4503 = vmatprep.mubr.f32.mxu1 %v8102_v36  ;;  %6962 = vmatmul.mubr.msk.f32.gmra.mrb[148].mxu0 %vm750_vm3, %v8100_v22  ;;  %v8104_v25 = vpop.eup %8103 }
0x120c   :  { %6964 = vmatprep.mubr.msk.f32.mxu0 %vm8199_vm1, %v11300_v48 }
0x120e   :  { %v8106_v40 = vpop.eup %8105 }
0x120f   :  { %4504 = vmatmul.mubr.f32.gmra.mrb[142].mxu1 %v8106_v40  ;;  %6965 = vmatmul.mubr.msk.f32.gmra.mrb[150].mxu0 %vm750_vm3, %v8104_v25  ;;  %v8108_v18 = vpop.eup %8107 }
0x1210   :  { %4683 = vmatprep.mubr.f32.mxu1 %v10647_v38  ;;  %6967 = vmatprep.mubr.msk.f32.mxu0 %vm8199_vm1, %v11300_v48  ;;  %v8110_v43 = vpop.eup %8109 }
0x1211   :  { %v8112_v38 = vpop.eup %8111 }
0x1213   :  { %6968 = vmatmul.mubr.msk.f32.gmra.mrb[152].mxu0 %vm750_vm3, %v8108_v18  ;;  %4684 = vmatmul.mubr.f32.vlgmr.msra.gmra.mrb[144].mxu1 %v10649_v10  ;;  %v8114_v10 = vpop.eup %8113 }
0x1214   :  { %4688 = vmatprep.mubr.f32.mxu1 %v10668_v58  ;;  %6970 = vmatprep.mubr.msk.f32.mxu0 %vm8199_vm1, %v11300_v48  ;;  %v4857_v58 = vld [vmem:[#allocation2 + $0x218] sm:$0xff] }
0x1217   :  { %6971 = vmatmul.mubr.msk.f32.gmra.mrb[154].mxu0 %vm750_vm3, %v8110_v43  ;;  %4689 = vmatmul.mubr.f32.gmra.mrb[146].mxu1 %v10673_v13  ;;  %v4858_v13 = vld [vmem:[#allocation2 + $0x220] sm:$0xff] }
0x1218   :  { %4693 = vmatprep.mubr.f32.mxu1 %v10688_v57  ;;  %6973 = vmatprep.mubr.msk.f32.mxu0 %vm8199_vm1, %v11300_v48  ;;  %v7484_v57 = vpack.c.bf16 %v4858_v13, %v4857_v58 }
0x121a   :  { %7485 = vmatpush3.bf16.msra.mxu1 %v7484_v57 }
0x121b   :  { %6974 = vmatmul.mubr.msk.f32.gmra.mrb[156].mxu0 %vm750_vm3, %v8112_v38  ;;  %4694 = vmatmul.mubr.f32.gmra.mrb[148].mxu1 %v10694_v26  ;;  %v4859_v26 = vld [vmem:[#allocation2 + $0x228] sm:$0xff] }
0x121c   :  { %4698 = vmatprep.mubr.f32.mxu1 %v10709_v60  ;;  %6976 = vmatprep.mubr.msk.f32.mxu0 %vm8199_vm1, %v11300_v48  ;;  %v4860_v60 = vld [vmem:[#allocation2 + $0x230] sm:$0xff] }
0x121d   :  { %7486 = vmatprep.subr.bf16.mxu1 %v11299_v30 }
0x121f   :  { %6977 = vmatmul.mubr.msk.f32.gmra.mrb[158].mxu0 %vm750_vm3, %v8114_v10  ;;  %4699 = vmatmul.mubr.f32.gmra.mrb[150].mxu1 %v10715_v27  ;;  %v7487_v27 = vpack.c.bf16 %v4860_v60, %v4859_v26 }
0x1220   :  { %4703 = vmatprep.mubr.f32.mxu1 %v10730_v34  ;;  %6987 = vmatprep.mubr.msk.f32.mxu0 %vm8199_vm1, %v11300_v48 }
0x1221   :  { %7488 = vmatpush3.bf16.msra.mxu1 %v7487_v27 }
0x1222   :  { %7495 = vmatprep.subr.bf16.mxu1 %v11299_v30 }
0x1223   :  { %4704 = vmatmul.mubr.f32.gmra.mrb[152].mxu1 %v10738_v55  ;;  %6988 = vmatmul.mubr.msk.f32.vlgmr.msra.gmra.mrb[160].mxu0 %vm750_vm3, %v10782_v41 }
0x1224   :  { %4708 = vmatprep.mubr.f32.mxu1 %v10755_v7  ;;  %6990 = vmatprep.mubr.msk.f32.mxu0 %vm8199_vm1, %v11300_v48 }
0x1227   :  { %4709 = vmatmul.mubr.f32.gmra.mrb[154].mxu1 %v10761_v35  ;;  %6991 = vmatmul.mubr.msk.f32.gmra.mrb[162].mxu0 %vm750_vm3, %v10794_v21 }
0x1228   :  { %4713 = vmatprep.mubr.f32.mxu1 %v10774_v8  ;;  %6993 = vmatprep.mubr.msk.f32.mxu0 %vm8199_vm1, %v11300_v48 }
0x122b   :  { %4714 = vmatmul.mubr.f32.gmra.mrb[156].mxu1 %v10777_v16  ;;  %6994 = vmatmul.mubr.msk.f32.gmra.mrb[164].mxu0 %vm750_vm3, %v8098_v17 }
0x122c   :  { %4718 = vmatprep.mubr.f32.mxu1 %v10798_v19  ;;  %6996 = vmatprep.mubr.msk.f32.mxu0 %vm8199_vm1, %v11300_v48 }
0x122f   :  { %4719 = vmatmul.mubr.f32.gmra.mrb[158].mxu1 %v10802_v5  ;;  %6997 = vmatmul.mubr.msk.f32.gmra.mrb[166].mxu0 %vm750_vm3, %v8100_v22 }
0x1230   :  { %4723 = vmatprep.mubr.f32.mxu1 %v8102_v36  ;;  %6999 = vmatprep.mubr.msk.f32.mxu0 %vm8199_vm1, %v11300_v48 }
0x1233   :  { %4724 = vmatmul.mubr.f32.gmra.mrb[160].mxu1 %v8106_v40  ;;  %7000 = vmatmul.mubr.msk.f32.gmra.mrb[168].mxu0 %vm750_vm3, %v8104_v25 }
0x1234   :  { %7002 = vmatprep.mubr.msk.f32.mxu0 %vm8199_vm1, %v11300_v48  ;;  %7022 = vmatprep.mubr.msk.f32.mxu1 %vm8199_vm1, %v11300_v48 }
0x1237   :  { %7003 = vmatmul.mubr.msk.f32.gmra.mrb[170].mxu0 %vm750_vm3, %v8108_v18 }
0x1238   :  { %7005 = vmatprep.mubr.msk.f32.mxu0 %vm8199_vm1, %v11300_v48 }
0x123b   :  { %7006 = vmatmul.mubr.msk.f32.gmra.mrb[172].mxu0 %vm750_vm3, %v8110_v43 }
0x123c   :  { %7008 = vmatprep.mubr.msk.f32.mxu0 %vm8199_vm1, %v11300_v48 }
0x123f   :  { %7009 = vmatmul.mubr.msk.f32.gmra.mrb[174].mxu0 %vm750_vm3, %v8112_v38 }
0x1240   :  { %7011 = vmatprep.mubr.msk.f32.mxu0 %vm8199_vm1, %v11300_v48 }
0x1243   :  { %7012 = vmatmul.mubr.msk.f32.gmra.mrb[176].mxu0 %vm750_vm3, %v8114_v10 }
0x1244   :  { %7057 = vmatprep.mubr.msk.f32.mxu0 %vm8199_vm1, %v11300_v48 }
0x12a0   :  { %v6372_v34 = vpop.f32.mrb[126].mxu1 }
0x12a1   :  { %v6373_v55 = vpop.f32.mrb[127].mxu1 }
0x12a2   :  { %v6374_v7 = vadd.f32 %v6373_v55, %v6372_v34 }
0x12a9   :  { %v6375_v35 = vpop.f32.mrb[128].mxu1 }
0x12aa   :  { %v6376_v47 = vpop.f32.mrb[129].mxu1 }
0x12ab   :  { %v6377_v28 = vadd.f32 %v6376_v47, %v6375_v35 }
0x12b1   :  { %v6378_v32 = vpop.f32.mrb[130].mxu1 }
0x12b2   :  { %v6379_v12 = vpop.f32.mrb[131].mxu1 }
0x12b3   :  { %v6380_v3 = vadd.f32 %v6379_v12, %v6378_v32 }
0x12b9   :  { %v6381_v4 = vpop.f32.mrb[132].mxu1 }
0x12ba   :  { %v6382_v6 = vpop.f32.mrb[133].mxu1 }
0x12bb   :  { %v6383_v29 = vadd.f32 %v6382_v6, %v6381_v4 }
0x12c1   :  { %v6384_v31 = vpop.f32.mrb[134].mxu1 }
0x12c2   :  { %v6385_v8 = vpop.f32.mrb[135].mxu1 }
0x12c3   :  { %v6386_v51 = vadd.f32 %v6385_v8, %v6384_v31 }
0x12c9   :  { %v6387_v16 = vpop.f32.mrb[136].mxu1 }
0x12ca   :  { %v6388_v63 = vpop.f32.mrb[137].mxu1 }
0x12cb   :  { %v6389_v41 = vadd.f32 %v6388_v63, %v6387_v16 }
0x12d1   :  { %v6390_v54 = vpop.f32.mrb[138].mxu1 }
0x12d2   :  { %v6391_v14 = vpop.f32.mrb[139].mxu1  ;;  %v4575_v0 = vpop.f32.mrb[142].mxu0 }
0x12d3   :  { %v6392_v15 = vadd.f32 %v6391_v14, %v6390_v54  ;;  %v10885_v46 = vadd.f32 %v6374_v7, %v4575_v0  ;;  %v6954_v20 = vpop.f32.mrb[143].mxu0 }
0x12d6   :  { %v4580_v21 = vpop.f32.mrb[144].mxu0 }
0x12d7   :  { %v10887_v37 = vadd.f32 %v6377_v28, %v4580_v21  ;;  %v6957_v56 = vpop.f32.mrb[145].mxu0 }
0x12d8   :  { %v6393_v19 = vpop.f32.mrb[140].mxu1 }
0x12d9   :  { %v6394_v5 = vpop.f32.mrb[141].mxu1 }
0x12da   :  { %v6395_v24 = vadd.f32 %v6394_v5, %v6393_v19  ;;  %v4585_v11 = vpop.f32.mrb[146].mxu0 }
0x12db   :  { %v10889_v17 = vadd.f32 %v6380_v3, %v4585_v11  ;;  %v6960_v33 = vpop.f32.mrb[147].mxu0 }
0x12de   :  { %v4590_v62 = vpop.f32.mrb[148].mxu0 }
0x12df   :  { %v10891_v22 = vadd.f32 %v6383_v29, %v4590_v62  ;;  %v6963_v36 = vpop.f32.mrb[149].mxu0 }
0x12e2   :  { %v6396_v42 = vpop.f32.mrb[142].mxu1  ;;  %v4595_v61 = vpop.f32.mrb[150].mxu0 }
0x12e3   :  { %v10893_v25 = vadd.f32 %v6386_v51, %v4595_v61  ;;  %v6397_v40 = vpop.f32.mrb[143].mxu1  ;;  %v6966_v45 = vpop.f32.mrb[151].mxu0 }
0x12e4   :  { %v6398_v18 = vadd.f32 %v6397_v40, %v6396_v42 }
0x12e6   :  { %v4600_v43 = vpop.f32.mrb[152].mxu0  ;;  %v6444_v38 = vpop.f32.mrb[144].mxu1 }
0x12e7   :  { %v10895_v10 = vadd.f32 %v6389_v41, %v4600_v43  ;;  %v6969_v58 = vpop.f32.mrb[153].mxu0  ;;  %v6445_v13 = vpop.f32.mrb[145].mxu1 }
0x12e8   :  { %v6446_v57 = vadd.f32 %v6445_v13, %v6444_v38 }
0x12ea   :  { %v4605_v26 = vpop.f32.mrb[154].mxu0  ;;  %v6447_v60 = vpop.f32.mrb[146].mxu1 }
0x12eb   :  { %v10897_v27 = vadd.f32 %v6392_v15, %v4605_v26  ;;  %v6972_v34 = vpop.f32.mrb[155].mxu0  ;;  %v6448_v55 = vpop.f32.mrb[147].mxu1 }
0x12ec   :  { %v6449_v7 = vadd.f32 %v6448_v55, %v6447_v60 }
0x12ee   :  { %v4610_v35 = vpop.f32.mrb[156].mxu0  ;;  %v6450_v47 = vpop.f32.mrb[148].mxu1 }
0x12ef   :  { %v10899_v28 = vadd.f32 %v6395_v24, %v4610_v35  ;;  %v6975_v32 = vpop.f32.mrb[157].mxu0  ;;  %v6451_v12 = vpop.f32.mrb[149].mxu1 }
0x12f0   :  { %v6452_v3 = vadd.f32 %v6451_v12, %v6450_v47 }
0x12f2   :  { %v4615_v4 = vpop.f32.mrb[158].mxu0  ;;  %v6453_v6 = vpop.f32.mrb[150].mxu1 }
0x12f3   :  { %v10901_v29 = vadd.f32 %v6398_v18, %v4615_v4  ;;  %v6978_v31 = vpop.f32.mrb[159].mxu0  ;;  %v6454_v8 = vpop.f32.mrb[151].mxu1 }
0x12f4   :  { %v6455_v51 = vadd.f32 %v6454_v8, %v6453_v6 }
0x12f6   :  { %v6456_v16 = vpop.f32.mrb[152].mxu1  ;;  %v4795_v63 = vpop.f32.mrb[160].mxu0 }
0x12f7   :  { %v4796_v41 = vadd.f32 %v6446_v57, %v4795_v63  ;;  %v6457_v54 = vpop.f32.mrb[153].mxu1  ;;  %v6989_v14 = vpop.f32.mrb[161].mxu0 }
0x12f8   :  { %v6458_v0 = vadd.f32 %v6457_v54, %v6456_v16 }
0x12f9   :  { %8115 = vrcp.f32 %v4796_v41 }
0x12fa   :  { %v6459_v15 = vpop.f32.mrb[154].mxu1  ;;  %v4800_v20 = vpop.f32.mrb[162].mxu0 }
0x12fb   :  { %v4801_v21 = vadd.f32 %v6449_v7, %v4800_v20  ;;  %v6460_v56 = vpop.f32.mrb[155].mxu1  ;;  %v6992_v19 = vpop.f32.mrb[163].mxu0 }
0x12fc   :  { %v6461_v5 = vadd.f32 %v6460_v56, %v6459_v15 }
0x12fd   :  { %8117 = vrcp.f32 %v4801_v21 }
0x12fe   :  { %v6462_v24 = vpop.f32.mrb[156].mxu1  ;;  %v4805_v11 = vpop.f32.mrb[164].mxu0 }
0x12ff   :  { %v4806_v33 = vadd.f32 %v6452_v3, %v4805_v11  ;;  %v6463_v62 = vpop.f32.mrb[157].mxu1  ;;  %v6995_v36 = vpop.f32.mrb[165].mxu0 }
0x1300   :  { %v6464_v42 = vadd.f32 %v6463_v62, %v6462_v24  ;;  %v5938_v24 = vld [vmem:[#allocation2 + $0x238] ss:$0 sm:$0xff] }
0x1301   :  { %8119 = vrcp.f32 %v4806_v33 }
0x1302   :  { %v6465_v61 = vpop.f32.mrb[158].mxu1  ;;  %v4810_v40 = vpop.f32.mrb[166].mxu0 }
0x1303   :  { %v8116_v45 = vpop.eup %8115  ;;  %v4811_v18 = vadd.f32 %v6455_v51, %v4810_v40  ;;  %v6466_v43 = vpop.f32.mrb[159].mxu1 }
0x1304   :  { %v6998_v38 = vpop.f32.mrb[167].mxu0  ;;  %v4848_v58 = vmul.f32 %v8116_v45, %v10885_v46  ;;  %v6467_v13 = vadd.f32 %v6466_v43, %v6465_v61 }
0x1305   :  { %8121 = vrcp.f32 %v4811_v18 }
0x1306   :  { %v6468_v57 = vpop.f32.mrb[160].mxu1  ;;  %v4815_v26 = vpop.f32.mrb[168].mxu0  ;;  %7023 = vmatmul.mubr.msk.f32.vlgmr.msra.gmra.mrb[162].mxu1 %vm750_vm3, %v4848_v58 }
0x1307   :  { %v8118_v60 = vpop.eup %8117  ;;  %v4816_v34 = vadd.f32 %v6458_v0, %v4815_v26  ;;  %v6469_v55 = vpop.f32.mrb[161].mxu1  ;;  %7025 = vmatprep.mubr.msk.f32.mxu1 %vm8199_vm1, %v11300_v48 }
0x1308   :  { %v7001_v7 = vpop.f32.mrb[169].mxu0  ;;  %v6470_v35 = vadd.f32 %v6469_v55, %v6468_v57  ;;  %v4849_v47 = vmul.f32 %v8118_v60, %v10887_v37 }
0x1309   :  { %8123 = vrcp.f32 %v4816_v34 }
0x130a   :  { %v4820_v32 = vpop.f32.mrb[170].mxu0  ;;  %7026 = vmatmul.mubr.msk.f32.gmra.mrb[164].mxu1 %vm750_vm3, %v4849_v47 }
0x130b   :  { %v8120_v46 = vpop.eup %8119  ;;  %v4821_v12 = vadd.f32 %v6461_v5, %v4820_v32  ;;  %v7004_v3 = vpop.f32.mrb[171].mxu0  ;;  %7028 = vmatprep.mubr.msk.f32.mxu1 %vm8199_vm1, %v11300_v48 }
0x130c   :  { %v4850_v4 = vmul.f32 %v8120_v46, %v10889_v17 }
0x130d   :  { %8125 = vrcp.f32 %v4821_v12 }
0x130e   :  { %v4825_v6 = vpop.f32.mrb[172].mxu0  ;;  %7029 = vmatmul.mubr.msk.f32.gmra.mrb[166].mxu1 %vm750_vm3, %v4850_v4 }
0x130f   :  { %v8122_v31 = vpop.eup %8121  ;;  %v4826_v8 = vadd.f32 %v6464_v42, %v4825_v6  ;;  %v7007_v51 = vpop.f32.mrb[173].mxu0  ;;  %7031 = vmatprep.mubr.msk.f32.mxu1 %vm8199_vm1, %v11300_v48 }
0x1310   :  { %v4851_v37 = vmul.f32 %v8122_v31, %v10891_v22 }
0x1311   :  { %8127 = vrcp.f32 %v4826_v8 }
0x1312   :  { %v4830_v16 = vpop.f32.mrb[174].mxu0  ;;  %7032 = vmatmul.mubr.msk.f32.gmra.mrb[168].mxu1 %vm750_vm3, %v4851_v37 }
0x1313   :  { %v8124_v63 = vpop.eup %8123  ;;  %v4831_v41 = vadd.f32 %v6467_v13, %v4830_v16  ;;  %v7010_v54 = vpop.f32.mrb[175].mxu0  ;;  %7034 = vmatprep.mubr.msk.f32.mxu1 %vm8199_vm1, %v11300_v48 }
0x1314   :  { %v4852_v17 = vmul.f32 %v8124_v63, %v10893_v25 }
0x1315   :  { %8129 = vrcp.f32 %v4831_v41 }
0x1316   :  { %v4835_v14 = vpop.f32.mrb[176].mxu0  ;;  %7035 = vmatmul.mubr.msk.f32.gmra.mrb[170].mxu1 %vm750_vm3, %v4852_v17 }
0x1317   :  { %v8126_v0 = vpop.eup %8125  ;;  %v4836_v15 = vadd.f32 %v6470_v35, %v4835_v14  ;;  %v7013_v20 = vpop.f32.mrb[177].mxu0  ;;  %7037 = vmatprep.mubr.msk.f32.mxu1 %vm8199_vm1, %v11300_v48 }
0x1318   :  { %v4853_v22 = vmul.f32 %v8126_v0, %v10895_v10 }
0x1319   :  { %8131 = vrcp.f32 %v4836_v15 }
0x131a   :  { %7038 = vmatmul.mubr.msk.f32.gmra.mrb[172].mxu1 %vm750_vm3, %v4853_v22 }
0x131b   :  { %v8128_v21 = vpop.eup %8127  ;;  %7040 = vmatprep.mubr.msk.f32.mxu1 %vm8199_vm1, %v11300_v48 }
0x131c   :  { %v4854_v25 = vmul.f32 %v8128_v21, %v10897_v27 }
0x131e   :  { %7041 = vmatmul.mubr.msk.f32.gmra.mrb[174].mxu1 %vm750_vm3, %v4854_v25 }
0x131f   :  { %v8130_v56 = vpop.eup %8129  ;;  %7043 = vmatprep.mubr.msk.f32.mxu1 %vm8199_vm1, %v11300_v48 }
0x1320   :  { %v4855_v19 = vmul.f32 %v8130_v56, %v10899_v28 }
0x1322   :  { %7044 = vmatmul.mubr.msk.f32.gmra.mrb[176].mxu1 %vm750_vm3, %v4855_v19 }
0x1323   :  { %v8132_v10 = vpop.eup %8131  ;;  %7046 = vmatprep.mubr.msk.f32.mxu1 %vm8199_vm1, %v11300_v48 }
0x1324   :  { %v4856_v5 = vmul.f32 %v8132_v10, %v10901_v29 }
0x1326   :  { %7047 = vmatmul.mubr.msk.f32.gmra.mrb[178].mxu1 %vm750_vm3, %v4856_v5 }
0x1327   :  { %7100 = vmatprep.mubr.msk.f32.mxu1 %vm8199_vm1, %v11300_v48 }
0x13d9   :  { %v4954_v27 = vpop.f32.mrb[162].mxu1 }
0x13da   :  { %v4998_v11 = vadd.f32 %v4954_v27, %v9884_v50  ;;  %v7024_v33 = vpop.f32.mrb[163].mxu1 }
0x13dc   :  { %v10940_v62 = vadd.f32 %v5938_v24, %v4998_v11 }
0x13dd   :  { %v4959_v28 = vpop.f32.mrb[164].mxu1 }
0x13de   :  { %v4999_v36 = vadd.f32 %v4959_v28, %v9889_v1  ;;  %v7027_v42 = vpop.f32.mrb[165].mxu1  ;;  %v5022_v61 = vsel %vm750_vm3, %v10940_v62, 0.0 }
0x13df   :  { %5023 = vadd.xlane.f32.xlu1 %v5022_v61 }
0x13e0   :  { %v10945_v29 = vadd.f32 %v5938_v24, %v4999_v36 }
0x13e1   :  { %v4964_v40 = vpop.f32.mrb[166].mxu1 }
0x13e2   :  { %v5000_v45 = vadd.f32 %v4964_v40, %v9894_v44  ;;  %v7030_v18 = vpop.f32.mrb[167].mxu1  ;;  %v5025_v50 = vsel %vm750_vm3, %v10945_v29, 0.0 }
0x13e3   :  { %5026 = vadd.xlane.f32.xlu1 %v5025_v50 }
0x13e4   :  { %v10950_v43 = vadd.f32 %v5938_v24, %v5000_v45 }
0x13e5   :  { %v4969_v38 = vpop.f32.mrb[168].mxu1 }
0x13e6   :  { %v5001_v1 = vadd.f32 %v4969_v38, %v9899_v53  ;;  %v7033_v58 = vpop.f32.mrb[169].mxu1  ;;  %v5028_v13 = vsel %vm750_vm3, %v10950_v43, 0.0 }
0x13e7   :  { %5029 = vadd.xlane.f32.xlu0 %v5028_v13 }
0x13e8   :  { %v10955_v57 = vadd.f32 %v5938_v24, %v5001_v1 }
0x13e9   :  { %v4974_v26 = vpop.f32.mrb[170].mxu1 }
0x13ea   :  { %v5002_v44 = vadd.f32 %v4974_v26, %v9904_v52  ;;  %v7036_v60 = vpop.f32.mrb[171].mxu1  ;;  %v5031_v34 = vsel %vm750_vm3, %v10955_v57, 0.0 }
0x13eb   :  { %5032 = vadd.xlane.f32.xlu1 %v5031_v34 }
0x13ec   :  { %v10960_v55 = vadd.f32 %v5938_v24, %v5002_v44 }
0x13ed   :  { %v4979_v7 = vpop.f32.mrb[172].mxu1 }
0x13ee   :  { %v5003_v53 = vadd.f32 %v4979_v7, %v9909_v39  ;;  %v7039_v35 = vpop.f32.mrb[173].mxu1  ;;  %v5034_v47 = vsel %vm750_vm3, %v10960_v55, 0.0 }
0x13ef   :  { %5035 = vadd.xlane.f32.xlu1 %v5034_v47 }
0x13f0   :  { %v10965_v32 = vadd.f32 %v5938_v24, %v5003_v53 }
0x13f1   :  { %v4984_v46 = vpop.f32.mrb[174].mxu1 }
0x13f2   :  { %v5004_v52 = vadd.f32 %v4984_v46, %v9914_v23  ;;  %v7042_v12 = vpop.f32.mrb[175].mxu1  ;;  %v5037_v3 = vsel %vm750_vm3, %v10965_v32, 0.0 }
0x13f3   :  { %5038 = vadd.xlane.f32.xlu1 %v5037_v3 }
0x13f4   :  { %v10970_v4 = vadd.f32 %v5938_v24, %v5004_v52 }
0x13f5   :  { %v4989_v6 = vpop.f32.mrb[176].mxu1 }
0x13f6   :  { %v5005_v39 = vadd.f32 %v4989_v6, %v9919_v9  ;;  %v7045_v31 = vpop.f32.mrb[177].mxu1  ;;  %v5040_v8 = vsel %vm750_vm3, %v10970_v4, 0.0 }
0x13f7   :  { %5041 = vadd.xlane.f32.xlu1 %v5040_v8  ;;  %v5166_v31 = vld [vmem:[#allocation2 + $0x250] sm:$0xff] }
0x13f8   :  { %v10975_v51 = vadd.f32 %v5938_v24, %v5005_v39  ;;  %v5165_v39 = vld [vmem:[#allocation2 + $0x248] sm:$0xff] }
0x13f9   :  { %v4994_v37 = vpop.f32.mrb[178].mxu1 }
0x13fa   :  { %v5006_v23 = vadd.f32 %v4994_v37, %v9924_v2  ;;  %v7048_v16 = vpop.f32.mrb[179].mxu1  ;;  %v5043_v63 = vsel %vm750_vm3, %v10975_v51, 0.0  ;;  %v7490_v37 = vpack.c.bf16 %v5166_v31, %v5165_v39 }
0x13fb   :  { %5044 = vadd.xlane.f32.xlu1 %v5043_v63  ;;  %v5167_v16 = vld [vmem:[#allocation2 + $0x258] sm:$0xff]  ;;  %v5168_v63 = vld [vmem:[#allocation2 + $0x260] sm:$0xff] }
0x13fc   :  { %v10980_v41 = vadd.f32 %v5938_v24, %v5006_v23  ;;  %7491 = vmatpush3.bf16.msra.mxu0 %v7490_v37 }
0x13fd   :  { %7492 = vmatprep.subr.bf16.mxu0 %v11299_v30 }
0x13fe   :  { %v5046_v9 = vsel %vm750_vm3, %v10980_v41, 0.0 }
0x13ff   :  { %5047 = vadd.xlane.f32.xlu1 %v5046_v9  ;;  %v7493_v9 = vpack.c.bf16 %v5168_v63, %v5167_v16 }
0x1401   :  { %7494 = vmatpush3.bf16.msra.mxu0 %v7493_v9 }
0x1402   :  { %7507 = vmatprep.subr.bf16.mxu0 %v11299_v30 }
0x146c   :  { %v5024_v54 = vpop.xlane.xlu1 %5023 }
0x146d   :  { %v5049_v17 = vmul.f32 0.03125, %v5024_v54  ;;  %v5356_v54 = vld [vmem:[#allocation2 + $0x270] sm:$0xff] }
0x146f   :  { %v10985_v14 = vsub.f32 %v10940_v62, %v5049_v17  ;;  %v5357_v17 = vld [vmem:[#allocation2 + $0x278] sm:$0xff] }
0x1470   :  { %v5027_v0 = vpop.xlane.xlu1 %5026 }
0x1471   :  { %v5050_v15 = vmul.f32 0.03125, %v5027_v0  ;;  %v5067_v2 = vmul.f32 %v10985_v14, %v10985_v14  ;;  %v7496_v0 = vpack.c.bf16 %v5357_v17, %v5356_v54 }
0x1473   :  { %v10990_v20 = vsub.f32 %v10945_v29, %v5050_v15  ;;  %v5076_v22 = vsel %vm750_vm3, %v5067_v2, 0.0  ;;  %7497 = vmatpush3.bf16.msra.mxu1 %v7496_v0 }
0x1474   :  { %v5030_v21 = vpop.xlane.xlu0 %5029  ;;  %5077 = vadd.xlane.f32.xlu1 %v5076_v22  ;;  %7498 = vmatprep.subr.bf16.mxu1 %v11299_v30 }
0x1475   :  { %v5051_v25 = vmul.f32 0.03125, %v5030_v21  ;;  %v5068_v56 = vmul.f32 %v10990_v20, %v10990_v20 }
0x1477   :  { %v10996_v19 = vsub.f32 %v10950_v43, %v5051_v25  ;;  %v5079_v10 = vsel %vm750_vm3, %v5068_v56, 0.0 }
0x1478   :  { %v5033_v5 = vpop.xlane.xlu1 %5032  ;;  %5080 = vadd.xlane.f32.xlu1 %v5079_v10 }
0x1479   :  { %v5052_v27 = vmul.f32 0.03125, %v5033_v5  ;;  %v5069_v24 = vmul.f32 %v10996_v19, %v10996_v19 }
0x147b   :  { %v11002_v11 = vsub.f32 %v10955_v57, %v5052_v27  ;;  %v5082_v33 = vsel %vm750_vm3, %v5069_v24, 0.0  ;;  %v5021_v27 = vld [vmem:[#allocation2 + $0x240] sm:$0x3] }
0x147c   :  { %5083 = vadd.xlane.f32.xlu0 %v5082_v33  ;;  %v5036_v28 = vpop.xlane.xlu1 %5035 }
0x147d   :  { %v5053_v36 = vmul.f32 0.03125, %v5036_v28  ;;  %v5070_v42 = vmul.f32 %v11002_v11, %v11002_v11 }
0x147f   :  { %v11008_v61 = vsub.f32 %v10960_v55, %v5053_v36  ;;  %v5085_v40 = vsel %vm750_vm3, %v5070_v42, 0.0  ;;  %v11042_v36 = vrot.slane %v5021_v27, %v11310_v49 }
0x1480   :  { %v5039_v45 = vpop.xlane.xlu1 %5038  ;;  %5086 = vadd.xlane.f32.xlu1 %v5085_v40 }
0x1481   :  { %v5054_v18 = vmul.f32 0.03125, %v5039_v45  ;;  %v5071_v50 = vmul.f32 %v11008_v61, %v11008_v61  ;;  %v11045_v45 = vrot.slane %v5021_v27, %v11311_v59 }
0x1483   :  { %v11014_v38 = vsub.f32 %v10965_v32, %v5054_v18  ;;  %v5088_v1 = vsel %vm750_vm3, %v5071_v50, 0.0 }
0x1484   :  { %5089 = vadd.xlane.f32.xlu0 %v5088_v1  ;;  %v5042_v58 = vpop.xlane.xlu1 %5041 }
0x1485   :  { %v5055_v13 = vmul.f32 0.03125, %v5042_v58  ;;  %v5072_v26 = vmul.f32 %v11014_v38, %v11014_v38 }
0x1487   :  { %v11020_v44 = vsub.f32 %v10970_v4, %v5055_v13  ;;  %v5091_v60 = vsel %vm750_vm3, %v5072_v26, 0.0 }
0x1488   :  { %v5045_v34 = vpop.xlane.xlu1 %5044  ;;  %5092 = vadd.xlane.f32.xlu1 %v5091_v60 }
0x1489   :  { %v5056_v7 = vmul.f32 0.03125, %v5045_v34  ;;  %v5073_v53 = vmul.f32 %v11020_v44, %v11020_v44 }
0x148b   :  { %v11026_v35 = vsub.f32 %v10975_v51, %v5056_v7  ;;  %v5094_v47 = vsel %vm750_vm3, %v5073_v53, 0.0 }
0x148c   :  { %5095 = vadd.xlane.f32.xlu0 %v5094_v47  ;;  %v5048_v46 = vpop.xlane.xlu1 %5047 }
0x148d   :  { %v5057_v52 = vmul.f32 0.03125, %v5048_v46  ;;  %v5074_v12 = vmul.f32 %v11026_v35, %v11026_v35 }
0x148f   :  { %v11032_v3 = vsub.f32 %v10980_v41, %v5057_v52  ;;  %v5097_v6 = vsel %vm750_vm3, %v5074_v12, 0.0 }
0x1490   :  { %5098 = vadd.xlane.f32.xlu1 %v5097_v6 }
0x1491   :  { %v5075_v8 = vmul.f32 %v11032_v3, %v11032_v3 }
0x1493   :  { %v5100_v23 = vsel %vm750_vm3, %v5075_v8, 0.0 }
0x1494   :  { %5101 = vadd.xlane.f32.xlu0 %v5100_v23 }
0x1501   :  { %v5078_v15 = vpop.xlane.xlu1 %5077 }
0x1502   :  { %v5103_v2 = vmul.f32 0.03125, %v5078_v15 }
0x1504   :  { %v5112_v22 = vadd.f32 1e-05, %v5103_v2 }
0x1505   :  { %v5081_v21 = vpop.xlane.xlu1 %5080 }
0x1506   :  { %8133 = vrsqrt.f32 %v5112_v22  ;;  %v5104_v25 = vmul.f32 0.03125, %v5081_v21 }
0x1508   :  { %v5113_v56 = vadd.f32 1e-05, %v5104_v25 }
0x1509   :  { %v5084_v10 = vpop.xlane.xlu0 %5083 }
0x150a   :  { %8135 = vrsqrt.f32 %v5113_v56  ;;  %v5105_v5 = vmul.f32 0.03125, %v5084_v10 }
0x150c   :  { %v5114_v24 = vadd.f32 1e-05, %v5105_v5 }
0x150d   :  { %v5087_v33 = vpop.xlane.xlu1 %5086 }
0x150e   :  { %8137 = vrsqrt.f32 %v5114_v24  ;;  %v5106_v28 = vmul.f32 0.03125, %v5087_v33 }
0x1510   :  { %v8134_v42 = vpop.eup %8133  ;;  %v5115_v40 = vadd.f32 1e-05, %v5106_v28 }
0x1511   :  { %v5130_v18 = vmul.f32 %v8134_v42, %v10985_v14  ;;  %v5090_v50 = vpop.xlane.xlu0 %5089 }
0x1512   :  { %8139 = vrsqrt.f32 %v5115_v40  ;;  %v5107_v1 = vmul.f32 0.03125, %v5090_v50 }
0x1513   :  { %v5143_v58 = vmul.f32 %v11042_v36, %v5130_v18 }
0x1514   :  { %v8136_v13 = vpop.eup %8135  ;;  %v5116_v26 = vadd.f32 1e-05, %v5107_v1  ;;  %v5358_v1 = vld [vmem:[#allocation2 + $0x280] sm:$0xff] }
0x1515   :  { %v5156_v60 = vadd.f32 %v11045_v45, %v5143_v58  ;;  %v5093_v34 = vpop.xlane.xlu1 %5092  ;;  %v5131_v7 = vmul.f32 %v8136_v13, %v10990_v20  ;;  %v5359_v58 = vld [vmem:[#allocation2 + $0x288] sm:$0xff] }
0x1516   :  { %8141 = vrsqrt.f32 %v5116_v26  ;;  %v5108_v53 = vmul.f32 0.03125, %v5093_v34  ;;  %v7499_v13 = vpack.c.bf16 %v5359_v58, %v5358_v1  ;;  %v5361_v26 = vld [vmem:[#allocation2 + $0x298] sm:$0xff]  ;;  %v5363_v34 = vld [vmem:[#allocation2 + $0x2a8] sm:$0xff] }
0x1517   :  { %7058 = vmatmul.mubr.msk.f32.vlgmr.msra.gmra.mrb[178].mxu0 %vm750_vm3, %v5156_v60  ;;  %v5144_v47 = vmul.f32 %v11042_v36, %v5131_v7  ;;  %v11103_v7 = vld [vmem:[#allocation2 + $0x268] ss:$0 sm:$0xff] }
0x1518   :  { %v8138_v46 = vpop.eup %8137  ;;  %v5117_v14 = vadd.f32 1e-05, %v5108_v53  ;;  %7060 = vmatprep.mubr.msk.f32.mxu0 %vm8199_vm1, %v11300_v48  ;;  %7500 = vmatpush3.bf16.msra.mxu1 %v7499_v13 }
0x1519   :  { %v5096_v52 = vpop.xlane.xlu0 %5095  ;;  %v5157_v12 = vadd.f32 %v11045_v45, %v5144_v47  ;;  %v5132_v6 = vmul.f32 %v8138_v46, %v10996_v19  ;;  %7501 = vmatprep.subr.bf16.mxu1 %v11299_v30 }
0x151a   :  { %8143 = vrsqrt.f32 %v5117_v14  ;;  %v5109_v39 = vmul.f32 0.03125, %v5096_v52 }
0x151b   :  { %7061 = vmatmul.mubr.msk.f32.gmra.mrb[180].mxu0 %vm750_vm3, %v5157_v12  ;;  %v5145_v20 = vmul.f32 %v11042_v36, %v5132_v6 }
0x151c   :  { %v8140_v31 = vpop.eup %8139  ;;  %v5118_v8 = vadd.f32 1e-05, %v5109_v39  ;;  %7063 = vmatprep.mubr.msk.f32.mxu0 %vm8199_vm1, %v11300_v48 }
0x151d   :  { %v5099_v37 = vpop.xlane.xlu1 %5098  ;;  %v5158_v23 = vadd.f32 %v11045_v45, %v5145_v20  ;;  %v5133_v16 = vmul.f32 %v8140_v31, %v11002_v11 }
0x151e   :  { %8145 = vrsqrt.f32 %v5118_v8  ;;  %v5110_v63 = vmul.f32 0.03125, %v5099_v37 }
0x151f   :  { %7064 = vmatmul.mubr.msk.f32.gmra.mrb[182].mxu0 %vm750_vm3, %v5158_v23  ;;  %v5146_v19 = vmul.f32 %v11042_v36, %v5133_v16 }
0x1520   :  { %v8142_v9 = vpop.eup %8141  ;;  %v5119_v54 = vadd.f32 1e-05, %v5110_v63  ;;  %7066 = vmatprep.mubr.msk.f32.mxu0 %vm8199_vm1, %v11300_v48 }
0x1521   :  { %v5102_v17 = vpop.xlane.xlu0 %5101  ;;  %v5159_v0 = vadd.f32 %v11045_v45, %v5146_v19  ;;  %v5134_v15 = vmul.f32 %v8142_v9, %v11008_v61 }
0x1522   :  { %8147 = vrsqrt.f32 %v5119_v54  ;;  %v5111_v2 = vmul.f32 0.03125, %v5102_v17 }
0x1523   :  { %7067 = vmatmul.mubr.msk.f32.gmra.mrb[184].mxu0 %vm750_vm3, %v5159_v0  ;;  %v5147_v11 = vmul.f32 %v11042_v36, %v5134_v15 }
0x1524   :  { %v8144_v22 = vpop.eup %8143  ;;  %v5120_v21 = vadd.f32 1e-05, %v5111_v2  ;;  %7069 = vmatprep.mubr.msk.f32.mxu0 %vm8199_vm1, %v11300_v48 }
0x1525   :  { %v5160_v25 = vadd.f32 %v11045_v45, %v5147_v11  ;;  %v5135_v56 = vmul.f32 %v8144_v22, %v11014_v38 }
0x1526   :  { %8149 = vrsqrt.f32 %v5120_v21 }
0x1527   :  { %7070 = vmatmul.mubr.msk.f32.gmra.mrb[186].mxu0 %vm750_vm3, %v5160_v25  ;;  %v5148_v61 = vmul.f32 %v11042_v36, %v5135_v56 }
0x1528   :  { %v8146_v10 = vpop.eup %8145  ;;  %7072 = vmatprep.mubr.msk.f32.mxu0 %vm8199_vm1, %v11300_v48 }
0x1529   :  { %v5161_v5 = vadd.f32 %v11045_v45, %v5148_v61  ;;  %v5136_v27 = vmul.f32 %v8146_v10, %v11020_v44 }
0x152b   :  { %7073 = vmatmul.mubr.msk.f32.gmra.mrb[188].mxu0 %vm750_vm3, %v5161_v5  ;;  %v5149_v24 = vmul.f32 %v11042_v36, %v5136_v27 }
0x152c   :  { %v8148_v33 = vpop.eup %8147  ;;  %7075 = vmatprep.mubr.msk.f32.mxu0 %vm8199_vm1, %v11300_v48 }
0x152d   :  { %v5162_v38 = vadd.f32 %v11045_v45, %v5149_v24  ;;  %v5137_v28 = vmul.f32 %v8148_v33, %v11026_v35 }
0x152f   :  { %7076 = vmatmul.mubr.msk.f32.gmra.mrb[190].mxu0 %vm750_vm3, %v5162_v38  ;;  %v5150_v42 = vmul.f32 %v11042_v36, %v5137_v28 }
0x1530   :  { %v8150_v40 = vpop.eup %8149  ;;  %7078 = vmatprep.mubr.msk.f32.mxu0 %vm8199_vm1, %v11300_v48 }
0x1531   :  { %v5163_v44 = vadd.f32 %v11045_v45, %v5150_v42  ;;  %v5138_v18 = vmul.f32 %v8150_v40, %v11032_v3  ;;  %v5360_v3 = vld [vmem:[#allocation2 + $0x290] sm:$0xff] }
0x1532   :  { %v7502_v60 = vpack.c.bf16 %v5361_v26, %v5360_v3 }
0x1533   :  { %7079 = vmatmul.mubr.msk.f32.gmra.mrb[192].mxu0 %vm750_vm3, %v5163_v44  ;;  %v5151_v50 = vmul.f32 %v11042_v36, %v5138_v18  ;;  %v5362_v36 = vld [vmem:[#allocation2 + $0x2a0] sm:$0xff] }
0x1534   :  { %7081 = vmatprep.mubr.msk.f32.mxu0 %vm8199_vm1, %v11300_v48  ;;  %7503 = vmatpush3.bf16.msra.mxu1 %v7502_v60 }
0x1535   :  { %v5164_v35 = vadd.f32 %v11045_v45, %v5151_v50  ;;  %7504 = vmatprep.subr.bf16.mxu1 %v11299_v30  ;;  %v7505_v45 = vpack.c.bf16 %v5363_v34, %v5362_v36 }
0x1537   :  { %7082 = vmatmul.mubr.msk.f32.gmra.mrb[194].mxu0 %vm750_vm3, %v5164_v35 }
0x1538   :  { %7145 = vmatprep.mubr.msk.f32.mxu0 %vm8199_vm1, %v11300_v48  ;;  %7506 = vmatpush3.bf16.msra.mxu1 %v7505_v45 }
0x15ea   :  { %v5267_v53 = vpop.f32.mrb[178].mxu0 }
0x15eb   :  { %v5268_v47 = vadd.f32 %v11103_v7, %v5267_v53  ;;  %v7059_v46 = vpop.f32.mrb[179].mxu0 }
0x15ed   :  { %v5320_v14 = vmul.f32 0.70710677, %v5268_v47  ;;  %v5311_v54 = vmul.f32 0.5, %v5268_v47 }
0x15ee   :  { %v5272_v52 = vpop.f32.mrb[180].mxu0 }
0x15ef   :  { %8151 = verf.f32 %v5320_v14  ;;  %v5273_v12 = vadd.f32 %v11103_v7, %v5272_v52  ;;  %v7062_v6 = vpop.f32.mrb[181].mxu0 }
0x15f1   :  { %v5321_v39 = vmul.f32 0.70710677, %v5273_v12  ;;  %v5312_v25 = vmul.f32 0.5, %v5273_v12 }
0x15f2   :  { %v5277_v20 = vpop.f32.mrb[182].mxu0 }
0x15f3   :  { %8153 = verf.f32 %v5321_v39  ;;  %v5278_v31 = vadd.f32 %v11103_v7, %v5277_v20  ;;  %v7065_v8 = vpop.f32.mrb[183].mxu0 }
0x15f5   :  { %v5322_v37 = vmul.f32 0.70710677, %v5278_v31  ;;  %v5313_v38 = vmul.f32 0.5, %v5278_v31 }
0x15f6   :  { %v5282_v23 = vpop.f32.mrb[184].mxu0 }
0x15f7   :  { %8155 = verf.f32 %v5322_v37  ;;  %v5283_v16 = vadd.f32 %v11103_v7, %v5282_v23  ;;  %v7068_v63 = vpop.f32.mrb[185].mxu0 }
0x15f9   :  { %v8152_v19 = vpop.eup %8151  ;;  %v5323_v9 = vmul.f32 0.70710677, %v5283_v16  ;;  %v5314_v1 = vmul.f32 0.5, %v5283_v16 }
0x15fa   :  { %v5338_v17 = vadd.f32 1.0, %v8152_v19  ;;  %v5287_v0 = vpop.f32.mrb[186].mxu0 }
0x15fb   :  { %8157 = verf.f32 %v5323_v9  ;;  %v5288_v15 = vadd.f32 %v11103_v7, %v5287_v0  ;;  %v7071_v2 = vpop.f32.mrb[187].mxu0 }
0x15fc   :  { %v5347_v11 = vmul.f32 %v5338_v17, %v5311_v54 }
0x15fd   :  { %v8154_v22 = vpop.eup %8153  ;;  %v5324_v21 = vmul.f32 0.70710677, %v5288_v15  ;;  %v5315_v45 = vmul.f32 0.5, %v5288_v15 }
0x15fe   :  { %v5339_v56 = vadd.f32 1.0, %v8154_v22  ;;  %v5292_v61 = vpop.f32.mrb[188].mxu0  ;;  %7101 = vmatmul.mubr.msk.f32.vlgmr.msra.gmra.mrb[180].mxu1 %vm462_vm2, %v5347_v11 }
0x15ff   :  { %8159 = verf.f32 %v5324_v21  ;;  %v5293_v10 = vadd.f32 %v11103_v7, %v5292_v61  ;;  %v7074_v5 = vpop.f32.mrb[189].mxu0  ;;  %7103 = vmatprep.mubr.msk.f32.mxu1 %vm8199_vm1, %v11300_v48  ;;  %v5958_v21 = vld [vmem:[#allocation2 + $0x2b0] ss:$0 sm:$0xff] }
0x1600   :  { %v5348_v27 = vmul.f32 %v5339_v56, %v5312_v25 }
0x1601   :  { %v8156_v24 = vpop.eup %8155  ;;  %v5325_v33 = vmul.f32 0.70710677, %v5293_v10  ;;  %v5316_v39 = vmul.f32 0.5, %v5293_v10 }
0x1602   :  { %v5340_v28 = vadd.f32 1.0, %v8156_v24  ;;  %v5297_v42 = vpop.f32.mrb[190].mxu0  ;;  %7104 = vmatmul.mubr.msk.f32.gmra.mrb[182].mxu1 %vm462_vm2, %v5348_v27 }
0x1603   :  { %8161 = verf.f32 %v5325_v33  ;;  %v5298_v40 = vadd.f32 %v11103_v7, %v5297_v42  ;;  %v7077_v44 = vpop.f32.mrb[191].mxu0  ;;  %7106 = vmatprep.mubr.msk.f32.mxu1 %vm8199_vm1, %v11300_v48 }
0x1604   :  { %v5349_v18 = vmul.f32 %v5340_v28, %v5313_v38 }
0x1605   :  { %v8158_v50 = vpop.eup %8157  ;;  %v5326_v35 = vmul.f32 0.70710677, %v5298_v40  ;;  %v5317_v37 = vmul.f32 0.5, %v5298_v40 }
0x1606   :  { %v5341_v58 = vadd.f32 1.0, %v8158_v50  ;;  %v5302_v13 = vpop.f32.mrb[192].mxu0  ;;  %7107 = vmatmul.mubr.msk.f32.gmra.mrb[184].mxu1 %vm462_vm2, %v5349_v18 }
0x1607   :  { %8163 = verf.f32 %v5326_v35  ;;  %v5303_v3 = vadd.f32 %v11103_v7, %v5302_v13  ;;  %v7080_v26 = vpop.f32.mrb[193].mxu0  ;;  %7109 = vmatprep.mubr.msk.f32.mxu1 %vm8199_vm1, %v11300_v48 }
0x1608   :  { %v5350_v60 = vmul.f32 %v5341_v58, %v5314_v1 }
0x1609   :  { %v8160_v36 = vpop.eup %8159  ;;  %v5327_v34 = vmul.f32 0.70710677, %v5303_v3  ;;  %v5318_v63 = vmul.f32 0.5, %v5303_v3 }
0x160a   :  { %v5342_v53 = vadd.f32 1.0, %v8160_v36  ;;  %v5307_v47 = vpop.f32.mrb[194].mxu0  ;;  %7110 = vmatmul.mubr.msk.f32.gmra.mrb[186].mxu1 %vm462_vm2, %v5350_v60 }
0x160b   :  { %8165 = verf.f32 %v5327_v34  ;;  %v5308_v46 = vadd.f32 %v11103_v7, %v5307_v47  ;;  %v7083_v14 = vpop.f32.mrb[195].mxu0  ;;  %7112 = vmatprep.mubr.msk.f32.mxu1 %vm8199_vm1, %v11300_v48 }
0x160c   :  { %v5351_v52 = vmul.f32 %v5342_v53, %v5315_v45 }
0x160d   :  { %v8162_v12 = vpop.eup %8161  ;;  %v5328_v6 = vmul.f32 0.70710677, %v5308_v46  ;;  %v5319_v17 = vmul.f32 0.5, %v5308_v46 }
0x160e   :  { %v5343_v20 = vadd.f32 1.0, %v8162_v12  ;;  %7113 = vmatmul.mubr.msk.f32.gmra.mrb[188].mxu1 %vm462_vm2, %v5351_v52 }
0x160f   :  { %8167 = verf.f32 %v5328_v6  ;;  %7115 = vmatprep.mubr.msk.f32.mxu1 %vm8199_vm1, %v11300_v48  ;;  %v5524_v6 = vld [vmem:[#allocation2 + $0x110] sm:$0xff] }
0x1610   :  { %v5352_v31 = vmul.f32 %v5343_v20, %v5316_v39 }
0x1611   :  { %v8164_v8 = vpop.eup %8163 }
0x1612   :  { %v5344_v23 = vadd.f32 1.0, %v8164_v8  ;;  %7116 = vmatmul.mubr.msk.f32.gmra.mrb[190].mxu1 %vm462_vm2, %v5352_v31 }
0x1613   :  { %7118 = vmatprep.mubr.msk.f32.mxu1 %vm8199_vm1, %v11300_v48 }
0x1614   :  { %v5353_v7 = vmul.f32 %v5344_v23, %v5317_v37  ;;  %v5622_v23 = vld [vmem:[#allocation2 + $0x2c0] sm:$0xff] }
0x1615   :  { %v8166_v16 = vpop.eup %8165 }
0x1616   :  { %v5345_v19 = vadd.f32 1.0, %v8166_v16  ;;  %7119 = vmatmul.mubr.msk.f32.gmra.mrb[192].mxu1 %vm462_vm2, %v5353_v7  ;;  %v5623_v7 = vld [vmem:[#allocation2 + $0x2c8] sm:$0xff] }
0x1617   :  { %7121 = vmatprep.mubr.msk.f32.mxu1 %vm8199_vm1, %v11300_v48  ;;  %v7520_v16 = vpack.c.bf16 %v5623_v7, %v5622_v23 }
0x1618   :  { %v5354_v9 = vmul.f32 %v5345_v19, %v5318_v63  ;;  %v5624_v63 = vld [vmem:[#allocation2 + $0x2d0] sm:$0xff]  ;;  %v5625_v19 = vld [vmem:[#allocation2 + $0x2d8] sm:$0xff] }
0x1619   :  { %v8168_v54 = vpop.eup %8167 }
0x161a   :  { %v5346_v0 = vadd.f32 1.0, %v8168_v54  ;;  %7122 = vmatmul.mubr.msk.f32.gmra.mrb[194].mxu1 %vm462_vm2, %v5354_v9 }
0x161b   :  { %7124 = vmatprep.mubr.msk.f32.mxu1 %vm8199_vm1, %v11300_v48 }
0x161c   :  { %v5355_v15 = vmul.f32 %v5346_v0, %v5319_v17  ;;  %v5598_v0 = vld [vmem:[#allocation2 + $0x2b8] sm:$0x3] }
0x161e   :  { %7125 = vmatmul.mubr.msk.f32.gmra.mrb[196].mxu1 %vm462_vm2, %v5355_v15  ;;  %v5615_v15 = vrot.slane %v5598_v0, %v11310_v49 }
0x16d1   :  { %v5457_v2 = vpop.f32.mrb[180].mxu1 }
0x16d2   :  { %v7102_v11 = vpop.f32.mrb[181].mxu1  ;;  %v5501_v22 = vadd.f32 %v5457_v2, %v10940_v62 }
0x16d4   :  { %v5515_v10 = vadd.f32 %v5958_v21, %v5501_v22  ;;  %v5620_v22 = vrot.slane %v5598_v0, %v11311_v59 }
0x16d5   :  { %v5462_v25 = vpop.f32.mrb[182].mxu1 }
0x16d6   :  { %v5502_v56 = vadd.f32 %v5462_v25, %v10945_v29  ;;  %v7105_v61 = vpop.f32.mrb[183].mxu1 }
0x16d8   :  { %v5516_v5 = vadd.f32 %v5958_v21, %v5502_v56  ;;  %v5960_v56 = vld [vmem:[#allocation2 + $0x2e0] ss:$0 sm:$0xff] }
0x16d9   :  { %v5467_v27 = vpop.f32.mrb[184].mxu1 }
0x16da   :  { %v7508_v24 = vpack.c.bf16 %v5516_v5, %v5515_v10  ;;  %v7108_v33 = vpop.f32.mrb[185].mxu1  ;;  %v5503_v38 = vadd.f32 %v5467_v27, %v10950_v43 }
0x16dc   :  { %7509 = vmatpush3.bf16.msra.mxu0 %v7508_v24  ;;  %v5517_v62 = vadd.f32 %v5958_v21, %v5503_v38 }
0x16dd   :  { %v5472_v28 = vpop.f32.mrb[186].mxu1  ;;  %7510 = vmatprep.subr.bf16.mxu0 %v11299_v30 }
0x16de   :  { %v5504_v42 = vadd.f32 %v5472_v28, %v10955_v57  ;;  %v7111_v40 = vpop.f32.mrb[187].mxu1 }
0x16e0   :  { %v5518_v44 = vadd.f32 %v5958_v21, %v5504_v42 }
0x16e1   :  { %v5477_v18 = vpop.f32.mrb[188].mxu1 }
0x16e2   :  { %v7511_v50 = vpack.c.bf16 %v5518_v44, %v5517_v62  ;;  %v7114_v29 = vpop.f32.mrb[189].mxu1  ;;  %v5505_v35 = vadd.f32 %v5477_v18, %v10960_v55 }
0x16e4   :  { %7512 = vmatpush3.bf16.msra.mxu0 %v7511_v50  ;;  %v5519_v13 = vadd.f32 %v5958_v21, %v5505_v35 }
0x16e5   :  { %v5482_v1 = vpop.f32.mrb[190].mxu1  ;;  %7513 = vmatprep.subr.bf16.mxu0 %v11299_v30 }
0x16e6   :  { %v5506_v43 = vadd.f32 %v5482_v1, %v10965_v32  ;;  %v7117_v58 = vpop.f32.mrb[191].mxu1 }
0x16e8   :  { %v5520_v3 = vadd.f32 %v5958_v21, %v5506_v43 }
0x16e9   :  { %v5487_v26 = vpop.f32.mrb[192].mxu1 }
0x16ea   :  { %v7514_v60 = vpack.c.bf16 %v5520_v3, %v5519_v13  ;;  %v7120_v57 = vpop.f32.mrb[193].mxu1  ;;  %v5507_v36 = vadd.f32 %v5487_v26, %v10970_v4 }
0x16ec   :  { %7515 = vmatpush3.bf16.msra.mxu0 %v7514_v60  ;;  %v5521_v53 = vadd.f32 %v5958_v21, %v5507_v36 }
0x16ed   :  { %v5492_v34 = vpop.f32.mrb[194].mxu1  ;;  %7516 = vmatprep.subr.bf16.mxu0 %v11299_v30 }
0x16ee   :  { %v5508_v55 = vadd.f32 %v5492_v34, %v10975_v51  ;;  %v7123_v45 = vpop.f32.mrb[195].mxu1 }
0x16f0   :  { %v5522_v47 = vadd.f32 %v5958_v21, %v5508_v55 }
0x16f1   :  { %v5497_v46 = vpop.f32.mrb[196].mxu1 }
0x16f2   :  { %v7517_v14 = vpack.c.bf16 %v5522_v47, %v5521_v53  ;;  %v5509_v32 = vadd.f32 %v5497_v46, %v10980_v41  ;;  %v7126_v52 = vpop.f32.mrb[197].mxu1 }
0x16f4   :  { %7518 = vmatpush3.bf16.msra.mxu0 %v7517_v14  ;;  %v5523_v12 = vadd.f32 %v5958_v21, %v5509_v32 }
0x16f5   :  { %7143 = vmatprep.subr.mxu0 %v11300_v48 }
0x16f8   :  { %7144 = vmatpush3.msra.mxu0 %v5523_v12 }
0x16f9   :  { %7146 = vmatmul.mubr.msk.f32.vlgmr.msra.gmra.mrb[196].mxu0 %vm720_vm5, %v5524_v6  ;;  %7519 = vmatprep.subr.bf16.mxu0 %v11299_v30 }
0x16fa   :  { %7156 = vmatprep.mubr.msk.f32.mxu0 %vm8199_vm1, %v11300_v48  ;;  %7521 = vmatpush3.bf16.msra.mxu0 %v7520_v16  ;;  %v7523_v48 = vpack.c.bf16 %v5625_v19, %v5624_v63 }
0x16fb   :  { %7522 = vmatprep.subr.bf16.mxu0 %v11299_v30 }
0x16fe   :  { %7524 = vmatpush3.bf16.msra.mxu0 %v7523_v48 }
0x17cc   :  { %v5594_v4 = vpop.f32.mrb[196].mxu0 }
0x17cd   :  { %v5599_v51 = vsel %vm750_vm3, %v5594_v4, 0.0  ;;  %v7147_v39 = vpop.f32.mrb[197].mxu0 }
0x17ce   :  { %5600 = vadd.xlane.f32.xlu1 %v5599_v51 }
0x185b   :  { %v5601_v41 = vpop.xlane.xlu1 %5600 }
0x185c   :  { %v5602_v20 = vmul.f32 0.03125, %v5601_v41 }
0x185e   :  { %v5603_v31 = vsub.f32 %v5594_v4, %v5602_v20 }
0x1860   :  { %v5604_v8 = vmul.f32 %v5603_v31, %v5603_v31 }
0x1862   :  { %v5605_v37 = vsel %vm750_vm3, %v5604_v8, 0.0 }
0x1863   :  { %5606 = vadd.xlane.f32.xlu0 %v5605_v37 }
0x18f0   :  { %v5607_v9 = vpop.xlane.xlu0 %5606 }
0x18f1   :  { %v5608_v54 = vmul.f32 0.03125, %v5607_v9 }
0x18f3   :  { %v5609_v17 = vadd.f32 1e-05, %v5608_v54 }
0x18f5   :  { %8169 = vrsqrt.f32 %v5609_v17 }
0x18ff   :  { %v8170_v2 = vpop.eup %8169 }
0x1900   :  { %v5611_v11 = vmul.f32 %v8170_v2, %v5603_v31 }
0x1902   :  { %v5616_v21 = vmul.f32 %v5615_v15, %v5611_v11 }
0x1904   :  { %v5621_v25 = vadd.f32 %v5620_v22, %v5616_v21 }
0x1906   :  { %7157 = vmatmul.mubr.msk.f32.vlgmr.msra.gmra.mrb[198].mxu0 %vm750_vm3, %v5621_v25 }
0x19d9   :  { %v5700_v61 = vpop.f32.mrb[198].mxu0 }
0x19da   :  { %v5701_v30 = vadd.f32 %v5960_v56, %v5700_v61  ;;  %v7158_v10 = vpop.f32.mrb[199].mxu0 }
0x19dc   :  { %5704 = vst [vmem:[%s11167_s2] sm:$0xff] %v5701_v30 }
0x19dd   :  { %5709 = vsyncpa [#allocation3], 1 }

</bundles_post_ra>
